<compile_context>
chip_gen: v5e
topology: v5e:2x2
jax: 0.10.0
libtpu: 0.0.40
codegen_flags: <defaults>
</compile_context>

<pallas_src>
import functools

import jax
import jax.numpy as jnp
from jax.experimental import pallas as pl
from jax.experimental.pallas import tpu as pltpu


# ----------------------------------------------------------------------------
# Pallas kernel: tap-fused 3-D convolution over one output depth plane.
# ----------------------------------------------------------------------------
def _conv_plane_kernel(x_ref, w_ref, b_ref, *rest, k, branches, n_hw, wp,
                       cout_b, mode, n_plane_extras):
    """One output depth plane of a (possibly multi-branch) 3-D convolution.

    x_ref : (Dp, Cin_p, Hp*Wp)   padded input volume (resident across depth)
    w_ref : (NB, k, Cout_b, k*k*Cin_p)
    b_ref : (NB*Cout_b, 1)
    rest  : [plane extras (Ce, Ho*Wp)] + [vector extras (C, 1)] + [o_ref]
    o_ref : (NB*Cout_b, Ho*Wp)   only the first n_hw lanes are valid.
    """
    o_ref = rest[-1]
    extras = rest[:-1]
    d = pl.program_id(1)

    outs = []
    for br, (dil, base) in enumerate(branches):
        acc = jnp.zeros((cout_b, n_hw), jnp.float32)
        for kd in range(k):
            plane = x_ref[d + base + kd * dil]            # (Cin_p, Hp*Wp)
            cols = []
            for kh in range(k):
                row_off = (base + kh * dil) * wp
                for kw in range(k):
                    off = row_off + base + kw * dil
                    cols.append(plane[:, off:off + n_hw])
            cols = jnp.concatenate(cols, axis=0)          # (k*k*Cin_p, n_hw)
            acc = acc + jnp.dot(w_ref[br, kd], cols,
                                preferred_element_type=jnp.float32)
        acc = acc + b_ref[br * cout_b:(br + 1) * cout_b, :]
        outs.append(acc)
    acc = outs[0] if len(outs) == 1 else jnp.concatenate(outs, axis=0)

    def _plane(i):
        return extras[i][:, :n_hw]

    if mode == "lrelu":
        res = jnp.where(acc >= 0, acc, 0.1 * acc)
    elif mode == "zr":                      # [sigmoid(conv_z) ; sigmoid(conv_r)*h]
        half = acc.shape[0] // 2
        zr = jax.nn.sigmoid(acc)
        res = jnp.concatenate([zr[:half], zr[half:] * _plane(0)], axis=0)
    elif mode == "gru":                     # DyT (alpha pre-folded) + GRU update
        z = _plane(0)
        h_prev = _plane(1)
        gamma = extras[n_plane_extras][...]
        beta = extras[n_plane_extras + 1][...]
        q = jnp.tanh(acc) * gamma + beta
        res = (1.0 - z) * h_prev + z * q
    elif mode == "add":                     # residual add (h_up)
        res = acc + _plane(0)
    else:
        res = acc
    o_ref[:, :n_hw] = res


# ----------------------------------------------------------------------------
# Pallas wrapper
# ----------------------------------------------------------------------------
def _conv3d(x_vol, w2d, bias, *, k, pad, branches, mode="none",
            plane_extras=(), vec_extras=()):
    """Tap-fused 3-D conv.  x_vol: (B, D, Cin, H, W) -> (B, Do, Cout, Ho, Wo).

    branches: tuple of (dilation, base_offset); all branches must produce the
    same output extent (base_offset = global_pad - per-branch conv pad).
    """
    b, d_in, cin, h_in, w_in = x_vol.shape
    nb, k_, cout_b, kkcin = w2d.shape
    assert k_ == k and nb == len(branches) and kkcin == k * k * cin
    cout = nb * cout_b

    dp, hp, wp = d_in + 2 * pad, h_in + 2 * pad, w_in + 2 * pad
    ext0 = (k - 1) * branches[0][0] + 2 * branches[0][1]
    for dil, base in branches:
        assert (k - 1) * dil + 2 * base == ext0, "branches disagree on out size"
    do, ho, wo = dp - ext0, hp - ext0, wp - ext0
    n_hw = (ho - 1) * wp + wo
    hwp = hp * wp

    # Channels padded to a sublane multiple -> aligned in-kernel im2col concat.
    cin_p = -(-cin // 8) * 8
    xp = jnp.pad(x_vol, ((0, 0), (pad, pad), (0, cin_p - cin),
                         (pad, pad), (pad, pad)))
    xp = xp.reshape(b, dp, cin_p, hwp)
    if cin_p != cin:
        w2d = w2d.reshape(nb, k, cout_b, k * k, cin)
        w2d = jnp.pad(w2d, ((0, 0), (0, 0), (0, 0), (0, 0), (0, cin_p - cin)))
        w2d = w2d.reshape(nb, k, cout_b, k * k * cin_p)
    bias2 = bias.reshape(cout, 1).astype(jnp.float32)

    in_arrays = [xp, w2d, bias2]
    in_specs = [
        pl.BlockSpec((None, dp, cin_p, hwp), lambda i, j: (i, 0, 0, 0)),
        pl.BlockSpec(w2d.shape, lambda i, j: (0, 0, 0, 0)),
        pl.BlockSpec((cout, 1), lambda i, j: (0, 0)),
    ]
    for e in plane_extras:                       # (B, Do, Ce, Ho, Wo)
        ce = e.shape[2]
        ep = jnp.pad(e, ((0, 0), (0, 0), (0, 0), (0, 0), (0, wp - wo)))
        in_arrays.append(ep.reshape(b, do, ce, ho * wp))
        in_specs.append(pl.BlockSpec((None, None, ce, ho * wp),
                                     lambda i, j: (i, j, 0, 0)))
    for v in vec_extras:                         # per-channel broadcast vectors
        in_arrays.append(v.reshape(-1, 1).astype(jnp.float32))
        in_specs.append(pl.BlockSpec((int(v.size), 1), lambda i, j: (0, 0)))

    # VMEM budget: resident input volume + double-buffered output/extra blocks.
    est = 4 * (dp * cin_p * hwp + int(w2d.size) + cout
               + 2 * cout * ho * wp
               + 2 * sum(int(e.shape[2]) * ho * wp for e in plane_extras)
               + sum(int(v.size) for v in vec_extras))
    vmem_limit = int(min(64 * 1024 * 1024,
                         max(32 * 1024 * 1024, 2 * est + (1 << 20))))

    kern = functools.partial(
        _conv_plane_kernel, k=k, branches=tuple(branches), n_hw=n_hw, wp=wp,
        cout_b=cout_b, mode=mode, n_plane_extras=len(plane_extras))

    y = pl.pallas_call(
        kern,
        out_shape=jax.ShapeDtypeStruct((b, do, cout, ho * wp), jnp.float32),
        grid_spec=pltpu.PrefetchScalarGridSpec(
            num_scalar_prefetch=0,
            grid=(b, do),
            in_specs=in_specs,
            out_specs=pl.BlockSpec((None, None, cout, ho * wp),
                                   lambda i, j: (i, j, 0, 0)),
        ),
        compiler_params=pltpu.CompilerParams(
            dimension_semantics=("parallel", "parallel"),
            vmem_limit_bytes=vmem_limit),
    )(*in_arrays)

    # Crop the padded-W ring (lanes beyond n_hw were never written).
    return y.reshape(b, do, cout, ho, wp)[..., :wo]


# ----------------------------------------------------------------------------
# Layout / data-movement glue (XLA).
# ----------------------------------------------------------------------------
def _to_w2d(w_oidhw):
    """(Cout, Cin, k, k, k) -> (k, Cout, k*k*Cin), row order (kh, kw, ci)."""
    co, ci, k = w_oidhw.shape[0], w_oidhw.shape[1], w_oidhw.shape[2]
    w = jnp.transpose(w_oidhw, (2, 0, 3, 4, 1))   # (kd, co, kh, kw, ci)
    return w.reshape(k, co, k * k * ci)


def _upsample2(x, axes):
    """Exact nn.Upsample(scale_factor=2, trilinear, align_corners=False)."""
    for ax in axes:
        n = x.shape[ax]
        prev = jnp.take(x, jnp.clip(jnp.arange(n) - 1, 0, n - 1), axis=ax)
        nxt = jnp.take(x, jnp.clip(jnp.arange(n) + 1, 0, n - 1), axis=ax)
        even = 0.25 * prev + 0.75 * x
        odd = 0.75 * x + 0.25 * nxt
        out = jnp.stack([even, odd], axis=ax + 1)
        shp = list(x.shape)
        shp[ax] = 2 * n
        x = out.reshape(shp)
    return x


def _zero_upsample2(x):
    """(B, D, C, H, W) -> (B, 2D-1, C, 2H-1, 2W-1) with zeros interleaved."""
    b, d, c, h, w = x.shape
    out = jnp.zeros((b, 2 * d - 1, c, 2 * h - 1, 2 * w - 1), x.dtype)
    return out.at[:, ::2, :, ::2, ::2].set(x)


def _shuffle(x, s):
    """3-D pixel shuffle in (B, D, C, H, W) layout (matches TriNet.Shuffle)."""
    b, d, c, h, w = x.shape
    co = c // (s ** 3)
    v = x.reshape(b, d, co, s, s, s, h, w)
    v = jnp.transpose(v, (0, 1, 3, 2, 6, 4, 7, 5))
    return v.reshape(b, d * s, co, h * s, w * s)


# ----------------------------------------------------------------------------
# Decoder forward (Pallas path)
# ----------------------------------------------------------------------------
def decoder_forward_pallas(h, x, p):
    """h: (B, hid, D, H, W), x: (B, Cx, D, H, W) -> (flow, h_merge) in NCDHW."""
    hid = h.shape[1]
    hv = jnp.transpose(h, (0, 2, 1, 3, 4))           # (B, D, C, H, W)
    xv = jnp.transpose(x, (0, 2, 1, 3, 4))
    hx = jnp.concatenate([hv, xv], axis=2)

    # ConvGRU z/r gates fused into one conv; epilogue emits [z ; r*h].
    w_zr = _to_w2d(jnp.concatenate([p["wz"], p["wr"]], axis=0))[None]
    b_zr = jnp.concatenate([p["bz"], p["br"]])
    zr = _conv3d(hx, w_zr, b_zr, k=3, pad=1, branches=((1, 0),),
                 mode="zr", plane_extras=(hv,))
    z, rh = zr[:, :, :hid], zr[:, :, hid:]

    # q conv with DyT (alpha folded into W, b) + GRU update in the epilogue.
    alpha = p["dyt_alpha"].reshape(())
    w_q = (_to_w2d(p["wq"]) * alpha)[None]
    b_q = p["bq"] * alpha
    qin = jnp.concatenate([rh, xv], axis=2)
    hn = _conv3d(qin, w_q, b_q, k=3, pad=1, branches=((1, 0),),
                 mode="gru", plane_extras=(z, hv),
                 vec_extras=(p["dyt_gamma"], p["dyt_beta"]))

    # ----- MRHU (skip=None path) ---------------------------------------------
    h_up = _upsample2(hn, axes=(1, 3, 4))            # (B, 2D, hid, 2H, 2W)

    # Four dilated convs in one pallas_call; channel order [x1, x3, x2, x4].
    w_m = jnp.stack([_to_w2d(p["w1"]), _to_w2d(p["w3"]),
                     _to_w2d(p["w2"]), _to_w2d(p["w4"])], axis=0)
    b_m = jnp.concatenate([p["b1"], p["b3"], p["b2"], p["b4"]])
    m = _conv3d(hn, w_m, b_m, k=3, pad=4,
                branches=((1, 3), (3, 1), (2, 2), (4, 0)), mode="lrelu")
    x13, x24 = m[:, :, :4 * hid], m[:, :, 4 * hid:]

    # ConvTranspose3d(k=4, s=2, p=1) == zero-upsample + pad 2 + flipped conv.
    wt_eq = jnp.transpose(jnp.flip(p["wt"], axis=(2, 3, 4)), (1, 0, 2, 3, 4))
    x1_ = _conv3d(_zero_upsample2(x13), _to_w2d(wt_eq)[None], p["bt"],
                  k=4, pad=2, branches=((1, 0),))
    x2_ = _shuffle(x24, 2)

    xc = jnp.concatenate([x1_, x2_], axis=2)
    w_f = _to_w2d(p["wf"])[None]
    y = _conv3d(xc, w_f, p["bf"], k=3, pad=1, branches=((1, 0),),
                mode="add", plane_extras=(h_up,))
    h_merge = _conv3d(y, w_f, p["bf"], k=3, pad=1, branches=((1, 0),))

    # ----- flow head ----------------------------------------------------------
    t = _conv3d(h_merge, _to_w2d(p["wc1"])[None], p["bc1"], k=3, pad=1,
                branches=((1, 0),), mode="lrelu")
    flow = _conv3d(t, _to_w2d(p["wc2"])[None], p["bc2"], k=3, pad=1,
                   branches=((1, 0),))

    flow = jnp.transpose(flow, (0, 2, 1, 3, 4))
    h_merge = jnp.transpose(h_merge, (0, 2, 1, 3, 4))
    return flow, h_merge


# ----------------------------------------------------------------------------
# Pure-JAX reference mirroring the PyTorch forward (for validation)
# ----------------------------------------------------------------------------
def _lrelu(v):
    return jnp.where(v >= 0, v, 0.1 * v)


def _conv3d_ref(x, w, bias, *, dil=1, pad=None, lhs_dil=1):
    if pad is None:
        pad = dil
    y = jax.lax.conv_general_dilated(
        x, w, window_strides=(1, 1, 1), padding=[(pad, pad)] * 3,
        lhs_dilation=(lhs_dil,) * 3, rhs_dilation=(dil,) * 3,
        dimension_numbers=("NCDHW", "OIDHW", "NCDHW"),
        precision=jax.lax.Precision.HIGHEST)
    return y + bias[None, :, None, None, None]


def _shuffle_ref(x, s):
    b, c, d, h, w = x.shape
    co = c // (s ** 3)
    v = x.reshape(b, co, s, s, s, d, h, w)
    v = jnp.transpose(v, (0, 1, 5, 2, 6, 3, 7, 4))
    return v.reshape(b, co, d * s, h * s, w * s)


def decoder_forward_reference(h, x, p):
    hx = jnp.concatenate([h, x], axis=1)
    z = jax.nn.sigmoid(_conv3d_ref(hx, p["wz"], p["bz"]))
    r = jax.nn.sigmoid(_conv3d_ref(hx, p["wr"], p["br"]))
    q = _conv3d_ref(jnp.concatenate([r * h, x], axis=1), p["wq"], p["bq"])
    q = jnp.tanh(p["dyt_alpha"] * q)
    q = (p["dyt_gamma"][None, :, None, None, None] * q
         + p["dyt_beta"][None, :, None, None, None])
    hn = (1.0 - z) * h + z * q

    h_up = _upsample2(hn, axes=(2, 3, 4))
    x1 = _lrelu(_conv3d_ref(hn, p["w1"], p["b1"], dil=1))
    x2 = _lrelu(_conv3d_ref(hn, p["w2"], p["b2"], dil=2))
    x3 = _lrelu(_conv3d_ref(hn, p["w3"], p["b3"], dil=3))
    x4 = _lrelu(_conv3d_ref(hn, p["w4"], p["b4"], dil=4))

    wt_eq = jnp.transpose(jnp.flip(p["wt"], axis=(2, 3, 4)), (1, 0, 2, 3, 4))
    x1_ = _conv3d_ref(jnp.concatenate([x1, x3], axis=1), wt_eq, p["bt"],
                      dil=1, pad=2, lhs_dil=2)
    x2_ = _shuffle_ref(jnp.concatenate([x2, x4], axis=1), 2)

    xc = jnp.concatenate([x1_, x2_], axis=1)
    y = _conv3d_ref(xc, p["wf"], p["bf"], dil=1) + h_up
    h_merge = _conv3d_ref(y, p["wf"], p["bf"], dil=1)

    flow = _conv3d_ref(_lrelu(_conv3d_ref(h_merge, p["wc1"], p["bc1"], dil=1)),
                       p["wc2"], p["bc2"], dil=1)
    return flow, h_merge


# ----------------------------------------------------------------------------
if __name__ == "__main__":
    B, HID, CX, D, H, W = 2, 8, 4, 6, 6, 6
    INPUTC = HID + CX

    keys = iter(jax.random.split(jax.random.PRNGKey(0), 32))

    def wgen(shape, scale=0.1):
        return scale * jax.random.normal(next(keys), shape, dtype=jnp.float32)

    h0 = jax.random.normal(next(keys), (B, HID, D, H, W), dtype=jnp.float32)
    x0 = jax.random.normal(next(keys), (B, CX, D, H, W), dtype=jnp.float32)

    params = {
        "wz": wgen((HID, INPUTC, 3, 3, 3)), "bz": wgen((HID,)),
        "wr": wgen((HID, INPUTC, 3, 3, 3)), "br": wgen((HID,)),
        "wq": wgen((HID, INPUTC, 3, 3, 3)), "bq": wgen((HID,)),
        "dyt_alpha": jnp.full((1,), 0.5, jnp.float32),
        "dyt_gamma": 1.0 + wgen((HID,)),
        "dyt_beta": wgen((HID,)),
        "w1": wgen((2 * HID, HID, 3, 3, 3)), "b1": wgen((2 * HID,)),
        "w2": wgen((2 * HID, HID, 3, 3, 3)), "b2": wgen((2 * HID,)),
        "w3": wgen((2 * HID, HID, 3, 3, 3)), "b3": wgen((2 * HID,)),
        "w4": wgen((2 * HID, HID, 3, 3, 3)), "b4": wgen((2 * HID,)),
        # ConvTranspose3d weight layout: (in_c, out_c, kD, kH, kW)
        "wt": wgen((4 * HID, HID // 2, 4, 4, 4)), "bt": wgen((HID // 2,)),
        "wf": wgen((HID, HID, 3, 3, 3)), "bf": wgen((HID,)),
        "wc1": wgen((HID, HID, 3, 3, 3)), "bc1": wgen((HID,)),
        "wc2": wgen((3, HID, 3, 3, 3)), "bc2": wgen((3,)),
    }

    fwd = jax.jit(decoder_forward_pallas)
    flow, h_merge = jax.block_until_ready(fwd(h0, x0, params))
    flow_ref, hm_ref = decoder_forward_reference(h0, x0, params)

    assert flow.shape == (B, 3, 2 * D, 2 * H, 2 * W)
    assert h_merge.shape == (B, HID, 2 * D, 2 * H, 2 * W)
    assert jnp.allclose(h_merge, hm_ref, atol=5e-3, rtol=5e-3), (
        "h_merge mismatch, max abs err %e"
        % float(jnp.max(jnp.abs(h_merge - hm_ref))))
    assert jnp.allclose(flow, flow_ref, atol=5e-3, rtol=5e-3), (
        "flow mismatch, max abs err %e"
        % float(jnp.max(jnp.abs(flow - flow_ref))))

    print("KERNEL_OK")
</pallas_src>

<mosaic_0001>
module attributes {stable_mosaic.version = 11 : i64} {
  func.func @_conv_plane_kernel(%arg0: i32, %arg1: i32, %arg2: memref<1x8x16x64xf32, #tpu.memory_space<vmem>>, %arg3: memref<1x3x16x144xf32, #tpu.memory_space<vmem>>, %arg4: memref<16x1xf32, #tpu.memory_space<vmem>>, %arg5: memref<1x1x8x48xf32, #tpu.memory_space<vmem>>, %arg6: memref<1x1x16x48xf32, #tpu.memory_space<vmem>>) attributes {dimension_semantics = [#tpu.dimension_semantics<parallel>, #tpu.dimension_semantics<parallel>], iteration_bounds = array<i64: 2, 6>, scalar_prefetch = 0 : i64, scratch_operands = 0 : i64, tpu.core_type = #tpu.core_type<tc>, window_params = [{transform_indices = @transform_0, window_bounds = array<i64: 1, 8, 16, 64>}, {pipeline_mode = #tpu.pipeline_mode<synchronous>, transform_indices = @transform_1, window_bounds = array<i64: 1, 3, 16, 144>}, {pipeline_mode = #tpu.pipeline_mode<synchronous>, transform_indices = @transform_2, window_bounds = array<i64: 16, 1>}, {transform_indices = @transform_3, window_bounds = array<i64: 1, 1, 8, 48>}, {transform_indices = @transform_4, window_bounds = array<i64: 1, 1, 16, 48>}]} {
    %cst = arith.constant 0.000000e+00 : f32
    %0 = vector.broadcast %cst : f32 to vector<16x46xf32>
    %c0_i32 = arith.constant 0 : i32
    %1 = arith.addi %arg1, %c0_i32 : i32
    %c0_i32_0 = arith.constant 0 : i32
    %2 = arith.addi %1, %c0_i32_0 : i32
    %c0 = arith.constant 0 : index
    %3 = arith.index_cast %2 : i32 to index
    %c0_1 = arith.constant 0 : index
    %c0_2 = arith.constant 0 : index
    %4 = vector.load %arg2[%c0, %3, %c0_1, %c0_2] : memref<1x8x16x64xf32, #tpu.memory_space<vmem>>, vector<1x1x16x64xf32>
    %5 = vector.shape_cast %4 : vector<1x1x16x64xf32> to vector<16x64xf32>
    %6 = vector.extract_strided_slice %5 {offsets = [0, 0], sizes = [16, 46], strides = [1, 1]} : vector<16x64xf32> to vector<16x46xf32>
    %7 = vector.extract_strided_slice %5 {offsets = [0, 1], sizes = [16, 46], strides = [1, 1]} : vector<16x64xf32> to vector<16x46xf32>
    %8 = vector.extract_strided_slice %5 {offsets = [0, 2], sizes = [16, 46], strides = [1, 1]} : vector<16x64xf32> to vector<16x46xf32>
    %9 = vector.extract_strided_slice %5 {offsets = [0, 8], sizes = [16, 46], strides = [1, 1]} : vector<16x64xf32> to vector<16x46xf32>
    %10 = vector.extract_strided_slice %5 {offsets = [0, 9], sizes = [16, 46], strides = [1, 1]} : vector<16x64xf32> to vector<16x46xf32>
    %11 = vector.extract_strided_slice %5 {offsets = [0, 10], sizes = [16, 46], strides = [1, 1]} : vector<16x64xf32> to vector<16x46xf32>
    %12 = vector.extract_strided_slice %5 {offsets = [0, 16], sizes = [16, 46], strides = [1, 1]} : vector<16x64xf32> to vector<16x46xf32>
    %13 = vector.extract_strided_slice %5 {offsets = [0, 17], sizes = [16, 46], strides = [1, 1]} : vector<16x64xf32> to vector<16x46xf32>
    %14 = vector.extract_strided_slice %5 {offsets = [0, 18], sizes = [16, 46], strides = [1, 1]} : vector<16x64xf32> to vector<16x46xf32>
    %15 = tpu.concatenate %6, %7, %8, %9, %10, %11, %12, %13, %14 in 0 : vector<16x46xf32>, vector<16x46xf32>, vector<16x46xf32>, vector<16x46xf32>, vector<16x46xf32>, vector<16x46xf32>, vector<16x46xf32>, vector<16x46xf32>, vector<16x46xf32> -> vector<144x46xf32>
    %c0_3 = arith.constant 0 : index
    %c0_4 = arith.constant 0 : index
    %c0_5 = arith.constant 0 : index
    %c0_6 = arith.constant 0 : index
    %16 = vector.load %arg3[%c0_3, %c0_4, %c0_5, %c0_6] : memref<1x3x16x144xf32, #tpu.memory_space<vmem>>, vector<1x1x16x144xf32>
    %17 = vector.shape_cast %16 : vector<1x1x16x144xf32> to vector<16x144xf32>
    %cst_7 = arith.constant dense<0.000000e+00> : vector<16x46xf32>
    %18 = tpu.matmul %17, %15, %cst_7 {dimension_numbers = #tpu.dot_dimension_numbers<[1], [0], [0], [1], [0, 0, 1, 1], [], []>} : vector<16x144xf32>, vector<144x46xf32>, vector<16x46xf32> -> vector<16x46xf32>
    %19 = arith.addf %0, %18 : vector<16x46xf32>
    %c0_i32_8 = arith.constant 0 : i32
    %20 = arith.addi %arg1, %c0_i32_8 : i32
    %c1_i32 = arith.constant 1 : i32
    %21 = arith.addi %20, %c1_i32 : i32
    %c0_9 = arith.constant 0 : index
    %22 = arith.index_cast %21 : i32 to index
    %c0_10 = arith.constant 0 : index
    %c0_11 = arith.constant 0 : index
    %23 = vector.load %arg2[%c0_9, %22, %c0_10, %c0_11] : memref<1x8x16x64xf32, #tpu.memory_space<vmem>>, vector<1x1x16x64xf32>
    %24 = vector.shape_cast %23 : vector<1x1x16x64xf32> to vector<16x64xf32>
    %25 = vector.extract_strided_slice %24 {offsets = [0, 0], sizes = [16, 46], strides = [1, 1]} : vector<16x64xf32> to vector<16x46xf32>
    %26 = vector.extract_strided_slice %24 {offsets = [0, 1], sizes = [16, 46], strides = [1, 1]} : vector<16x64xf32> to vector<16x46xf32>
    %27 = vector.extract_strided_slice %24 {offsets = [0, 2], sizes = [16, 46], strides = [1, 1]} : vector<16x64xf32> to vector<16x46xf32>
    %28 = vector.extract_strided_slice %24 {offsets = [0, 8], sizes = [16, 46], strides = [1, 1]} : vector<16x64xf32> to vector<16x46xf32>
    %29 = vector.extract_strided_slice %24 {offsets = [0, 9], sizes = [16, 46], strides = [1, 1]} : vector<16x64xf32> to vector<16x46xf32>
    %30 = vector.extract_strided_slice %24 {offsets = [0, 10], sizes = [16, 46], strides = [1, 1]} : vector<16x64xf32> to vector<16x46xf32>
    %31 = vector.extract_strided_slice %24 {offsets = [0, 16], sizes = [16, 46], strides = [1, 1]} : vector<16x64xf32> to vector<16x46xf32>
    %32 = vector.extract_strided_slice %24 {offsets = [0, 17], sizes = [16, 46], strides = [1, 1]} : vector<16x64xf32> to vector<16x46xf32>
    %33 = vector.extract_strided_slice %24 {offsets = [0, 18], sizes = [16, 46], strides = [1, 1]} : vector<16x64xf32> to vector<16x46xf32>
    %34 = tpu.concatenate %25, %26, %27, %28, %29, %30, %31, %32, %33 in 0 : vector<16x46xf32>, vector<16x46xf32>, vector<16x46xf32>, vector<16x46xf32>, vector<16x46xf32>, vector<16x46xf32>, vector<16x46xf32>, vector<16x46xf32>, vector<16x46xf32> -> vector<144x46xf32>
    %c0_12 = arith.constant 0 : index
    %c1 = arith.constant 1 : index
    %c0_13 = arith.constant 0 : index
    %c0_14 = arith.constant 0 : index
    %35 = vector.load %arg3[%c0_12, %c1, %c0_13, %c0_14] : memref<1x3x16x144xf32, #tpu.memory_space<vmem>>, vector<1x1x16x144xf32>
    %36 = vector.shape_cast %35 : vector<1x1x16x144xf32> to vector<16x144xf32>
    %cst_15 = arith.constant dense<0.000000e+00> : vector<16x46xf32>
    %37 = tpu.matmul %36, %34, %cst_15 {dimension_numbers = #tpu.dot_dimension_numbers<[1], [0], [0], [1], [0, 0, 1, 1], [], []>} : vector<16x144xf32>, vector<144x46xf32>, vector<16x46xf32> -> vector<16x46xf32>
    %38 = arith.addf %19, %37 : vector<16x46xf32>
    %c0_i32_16 = arith.constant 0 : i32
    %39 = arith.addi %arg1, %c0_i32_16 : i32
    %c2_i32 = arith.constant 2 : i32
    %40 = arith.addi %39, %c2_i32 : i32
    %c0_17 = arith.constant 0 : index
    %41 = arith.index_cast %40 : i32 to index
    %c0_18 = arith.constant 0 : index
    %c0_19 = arith.constant 0 : index
    %42 = vector.load %arg2[%c0_17, %41, %c0_18, %c0_19] : memref<1x8x16x64xf32, #tpu.memory_space<vmem>>, vector<1x1x16x64xf32>
    %43 = vector.shape_cast %42 : vector<1x1x16x64xf32> to vector<16x64xf32>
    %44 = vector.extract_strided_slice %43 {offsets = [0, 0], sizes = [16, 46], strides = [1, 1]} : vector<16x64xf32> to vector<16x46xf32>
    %45 = vector.extract_strided_slice %43 {offsets = [0, 1], sizes = [16, 46], strides = [1, 1]} : vector<16x64xf32> to vector<16x46xf32>
    %46 = vector.extract_strided_slice %43 {offsets = [0, 2], sizes = [16, 46], strides = [1, 1]} : vector<16x64xf32> to vector<16x46xf32>
    %47 = vector.extract_strided_slice %43 {offsets = [0, 8], sizes = [16, 46], strides = [1, 1]} : vector<16x64xf32> to vector<16x46xf32>
    %48 = vector.extract_strided_slice %43 {offsets = [0, 9], sizes = [16, 46], strides = [1, 1]} : vector<16x64xf32> to vector<16x46xf32>
    %49 = vector.extract_strided_slice %43 {offsets = [0, 10], sizes = [16, 46], strides = [1, 1]} : vector<16x64xf32> to vector<16x46xf32>
    %50 = vector.extract_strided_slice %43 {offsets = [0, 16], sizes = [16, 46], strides = [1, 1]} : vector<16x64xf32> to vector<16x46xf32>
    %51 = vector.extract_strided_slice %43 {offsets = [0, 17], sizes = [16, 46], strides = [1, 1]} : vector<16x64xf32> to vector<16x46xf32>
    %52 = vector.extract_strided_slice %43 {offsets = [0, 18], sizes = [16, 46], strides = [1, 1]} : vector<16x64xf32> to vector<16x46xf32>
    %53 = tpu.concatenate %44, %45, %46, %47, %48, %49, %50, %51, %52 in 0 : vector<16x46xf32>, vector<16x46xf32>, vector<16x46xf32>, vector<16x46xf32>, vector<16x46xf32>, vector<16x46xf32>, vector<16x46xf32>, vector<16x46xf32>, vector<16x46xf32> -> vector<144x46xf32>
    %c0_20 = arith.constant 0 : index
    %c2 = arith.constant 2 : index
    %c0_21 = arith.constant 0 : index
    %c0_22 = arith.constant 0 : index
    %54 = vector.load %arg3[%c0_20, %c2, %c0_21, %c0_22] : memref<1x3x16x144xf32, #tpu.memory_space<vmem>>, vector<1x1x16x144xf32>
    %55 = vector.shape_cast %54 : vector<1x1x16x144xf32> to vector<16x144xf32>
    %cst_23 = arith.constant dense<0.000000e+00> : vector<16x46xf32>
    %56 = tpu.matmul %55, %53, %cst_23 {dimension_numbers = #tpu.dot_dimension_numbers<[1], [0], [0], [1], [0, 0, 1, 1], [], []>} : vector<16x144xf32>, vector<144x46xf32>, vector<16x46xf32> -> vector<16x46xf32>
    %57 = arith.addf %38, %56 : vector<16x46xf32>
    %c0_24 = arith.constant 0 : index
    %c0_25 = arith.constant 0 : index
    %58 = vector.load %arg4[%c0_24, %c0_25] : memref<16x1xf32, #tpu.memory_space<vmem>>, vector<16x1xf32>
    %59 = vector.broadcast %58 : vector<16x1xf32> to vector<16x46xf32>
    %60 = arith.addf %57, %59 : vector<16x46xf32>
    %61 = arith.negf %60 : vector<16x46xf32>
    %62 = math.exp %61 : vector<16x46xf32>
    %cst_26 = arith.constant 1.000000e+00 : f32
    %63 = vector.broadcast %cst_26 : f32 to vector<16x46xf32>
    %64 = arith.addf %63, %62 : vector<16x46xf32>
    %65 = arith.divf %63, %64 : vector<16x46xf32>
    %66 = vector.extract_strided_slice %65 {offsets = [0, 0], sizes = [8, 46], strides = [1, 1]} : vector<16x46xf32> to vector<8x46xf32>
    %67 = vector.extract_strided_slice %65 {offsets = [8, 0], sizes = [8, 46], strides = [1, 1]} : vector<16x46xf32> to vector<8x46xf32>
    %c0_27 = arith.constant 0 : index
    %c0_28 = arith.constant 0 : index
    %c0_29 = arith.constant 0 : index
    %c0_30 = arith.constant 0 : index
    %68 = vector.load %arg5[%c0_27, %c0_28, %c0_29, %c0_30] : memref<1x1x8x48xf32, #tpu.memory_space<vmem>>, vector<1x1x8x46xf32>
    %69 = vector.shape_cast %68 : vector<1x1x8x46xf32> to vector<8x46xf32>
    %70 = arith.mulf %67, %69 : vector<8x46xf32>
    %71 = tpu.concatenate %66, %70 in 0 : vector<8x46xf32>, vector<8x46xf32> -> vector<16x46xf32>
    %c0_31 = arith.constant 0 : index
    %c0_32 = arith.constant 0 : index
    %c0_33 = arith.constant 0 : index
    %c0_34 = arith.constant 0 : index
    %72 = vector.load %arg6[%c0_31, %c0_32, %c0_33, %c0_34] : memref<1x1x16x48xf32, #tpu.memory_space<vmem>>, vector<1x1x16x46xf32>
    %73 = vector.shape_cast %72 : vector<1x1x16x46xf32> to vector<16x46xf32>
    %74 = vector.shape_cast %71 : vector<16x46xf32> to vector<1x1x16x46xf32>
    tpu.vector_store %arg6[%c0_31, %c0_32, %c0_33, %c0_34], %74 {strides = array<i32>} : memref<1x1x16x48xf32, #tpu.memory_space<vmem>>, vector<1x1x16x46xf32>,
    return
  }
  func.func @transform_0(%arg0: i32, %arg1: i32) -> (i32, i32, i32, i32) {
    %c0_i32 = arith.constant 0 : i32
    %c0_i32_0 = arith.constant 0 : i32
    %c0_i32_1 = arith.constant 0 : i32
    %c0_i32_2 = arith.constant 0 : i32
    return %arg0, %c0_i32, %c0_i32_0, %c0_i32_1 : i32, i32, i32, i32
  }
  func.func @transform_1(%arg0: i32, %arg1: i32) -> (i32, i32, i32, i32) {
    %c0_i32 = arith.constant 0 : i32
    %c0_i32_0 = arith.constant 0 : i32
    %c0_i32_1 = arith.constant 0 : i32
    %c0_i32_2 = arith.constant 0 : i32
    %c0_i32_3 = arith.constant 0 : i32
    return %c0_i32, %c0_i32_0, %c0_i32_1, %c0_i32_2 : i32, i32, i32, i32
  }
  func.func @transform_2(%arg0: i32, %arg1: i32) -> (i32, i32) {
    %c0_i32 = arith.constant 0 : i32
    %c0_i32_0 = arith.constant 0 : i32
    %c0_i32_1 = arith.constant 0 : i32
    return %c0_i32, %c0_i32_0 : i32, i32
  }
  func.func @transform_3(%arg0: i32, %arg1: i32) -> (i32, i32, i32, i32) {
    %c0_i32 = arith.constant 0 : i32
    %c0_i32_0 = arith.constant 0 : i32
    %c0_i32_1 = arith.constant 0 : i32
    return %arg0, %arg1, %c0_i32, %c0_i32_0 : i32, i32, i32, i32
  }
  func.func @transform_4(%arg0: i32, %arg1: i32) -> (i32, i32, i32, i32) {
    %c0_i32 = arith.constant 0 : i32
    %c0_i32_0 = arith.constant 0 : i32
    %c0_i32_1 = arith.constant 0 : i32
    return %arg0, %arg1, %c0_i32, %c0_i32_0 : i32, i32, i32, i32
  }
}

module attributes {stable_mosaic.version = 11 : i64} {
  func.func @_conv_plane_kernel(%arg0: i32, %arg1: i32, %arg2: memref<1x8x16x64xf32, #tpu.memory_space<vmem>>, %arg3: memref<1x3x8x144xf32, #tpu.memory_space<vmem>>, %arg4: memref<8x1xf32, #tpu.memory_space<vmem>>, %arg5: memref<1x1x8x48xf32, #tpu.memory_space<vmem>>, %arg6: memref<1x1x8x48xf32, #tpu.memory_space<vmem>>, %arg7: memref<8x1xf32, #tpu.memory_space<vmem>>, %arg8: memref<8x1xf32, #tpu.memory_space<vmem>>, %arg9: memref<1x1x8x48xf32, #tpu.memory_space<vmem>>) attributes {dimension_semantics = [#tpu.dimension_semantics<parallel>, #tpu.dimension_semantics<parallel>], iteration_bounds = array<i64: 2, 6>, scalar_prefetch = 0 : i64, scratch_operands = 0 : i64, tpu.core_type = #tpu.core_type<tc>, window_params = [{transform_indices = @transform_0, window_bounds = array<i64: 1, 8, 16, 64>}, {pipeline_mode = #tpu.pipeline_mode<synchronous>, transform_indices = @transform_1, window_bounds = array<i64: 1, 3, 8, 144>}, {pipeline_mode = #tpu.pipeline_mode<synchronous>, transform_indices = @transform_2, window_bounds = array<i64: 8, 1>}, {transform_indices = @transform_3, window_bounds = array<i64: 1, 1, 8, 48>}, {transform_indices = @transform_4, window_bounds = array<i64: 1, 1, 8, 48>}, {pipeline_mode = #tpu.pipeline_mode<synchronous>, transform_indices = @transform_5, window_bounds = array<i64: 8, 1>}, {pipeline_mode = #tpu.pipeline_mode<synchronous>, transform_indices = @transform_6, window_bounds = array<i64: 8, 1>}, {transform_indices = @transform_7, window_bounds = array<i64: 1, 1, 8, 48>}]} {
    %cst = arith.constant 0.000000e+00 : f32
    %0 = vector.broadcast %cst : f32 to vector<8x46xf32>
    %c0_i32 = arith.constant 0 : i32
    %1 = arith.addi %arg1, %c0_i32 : i32
    %c0_i32_0 = arith.constant 0 : i32
    %2 = arith.addi %1, %c0_i32_0 : i32
    %c0 = arith.constant 0 : index
    %3 = arith.index_cast %2 : i32 to index
    %c0_1 = arith.constant 0 : index
    %c0_2 = arith.constant 0 : index
    %4 = vector.load %arg2[%c0, %3, %c0_1, %c0_2] : memref<1x8x16x64xf32, #tpu.memory_space<vmem>>, vector<1x1x16x64xf32>
    %5 = vector.shape_cast %4 : vector<1x1x16x64xf32> to vector<16x64xf32>
    %6 = vector.extract_strided_slice %5 {offsets = [0, 0], sizes = [16, 46], strides = [1, 1]} : vector<16x64xf32> to vector<16x46xf32>
    %7 = vector.extract_strided_slice %5 {offsets = [0, 1], sizes = [16, 46], strides = [1, 1]} : vector<16x64xf32> to vector<16x46xf32>
    %8 = vector.extract_strided_slice %5 {offsets = [0, 2], sizes = [16, 46], strides = [1, 1]} : vector<16x64xf32> to vector<16x46xf32>
    %9 = vector.extract_strided_slice %5 {offsets = [0, 8], sizes = [16, 46], strides = [1, 1]} : vector<16x64xf32> to vector<16x46xf32>
    %10 = vector.extract_strided_slice %5 {offsets = [0, 9], sizes = [16, 46], strides = [1, 1]} : vector<16x64xf32> to vector<16x46xf32>
    %11 = vector.extract_strided_slice %5 {offsets = [0, 10], sizes = [16, 46], strides = [1, 1]} : vector<16x64xf32> to vector<16x46xf32>
    %12 = vector.extract_strided_slice %5 {offsets = [0, 16], sizes = [16, 46], strides = [1, 1]} : vector<16x64xf32> to vector<16x46xf32>
    %13 = vector.extract_strided_slice %5 {offsets = [0, 17], sizes = [16, 46], strides = [1, 1]} : vector<16x64xf32> to vector<16x46xf32>
    %14 = vector.extract_strided_slice %5 {offsets = [0, 18], sizes = [16, 46], strides = [1, 1]} : vector<16x64xf32> to vector<16x46xf32>
    %15 = tpu.concatenate %6, %7, %8, %9, %10, %11, %12, %13, %14 in 0 : vector<16x46xf32>, vector<16x46xf32>, vector<16x46xf32>, vector<16x46xf32>, vector<16x46xf32>, vector<16x46xf32>, vector<16x46xf32>, vector<16x46xf32>, vector<16x46xf32> -> vector<144x46xf32>
    %c0_3 = arith.constant 0 : index
    %c0_4 = arith.constant 0 : index
    %c0_5 = arith.constant 0 : index
    %c0_6 = arith.constant 0 : index
    %16 = vector.load %arg3[%c0_3, %c0_4, %c0_5, %c0_6] : memref<1x3x8x144xf32, #tpu.memory_space<vmem>>, vector<1x1x8x144xf32>
    %17 = vector.shape_cast %16 : vector<1x1x8x144xf32> to vector<8x144xf32>
    %cst_7 = arith.constant dense<0.000000e+00> : vector<8x46xf32>
    %18 = tpu.matmul %17, %15, %cst_7 {dimension_numbers = #tpu.dot_dimension_numbers<[1], [0], [0], [1], [0, 0, 1, 1], [], []>} : vector<8x144xf32>, vector<144x46xf32>, vector<8x46xf32> -> vector<8x46xf32>
    %19 = arith.addf %0, %18 : vector<8x46xf32>
    %c0_i32_8 = arith.constant 0 : i32
    %20 = arith.addi %arg1, %c0_i32_8 : i32
    %c1_i32 = arith.constant 1 : i32
    %21 = arith.addi %20, %c1_i32 : i32
    %c0_9 = arith.constant 0 : index
    %22 = arith.index_cast %21 : i32 to index
    %c0_10 = arith.constant 0 : index
    %c0_11 = arith.constant 0 : index
    %23 = vector.load %arg2[%c0_9, %22, %c0_10, %c0_11] : memref<1x8x16x64xf32, #tpu.memory_space<vmem>>, vector<1x1x16x64xf32>
    %24 = vector.shape_cast %23 : vector<1x1x16x64xf32> to vector<16x64xf32>
    %25 = vector.extract_strided_slice %24 {offsets = [0, 0], sizes = [16, 46], strides = [1, 1]} : vector<16x64xf32> to vector<16x46xf32>
    %26 = vector.extract_strided_slice %24 {offsets = [0, 1], sizes = [16, 46], strides = [1, 1]} : vector<16x64xf32> to vector<16x46xf32>
    %27 = vector.extract_strided_slice %24 {offsets = [0, 2], sizes = [16, 46], strides = [1, 1]} : vector<16x64xf32> to vector<16x46xf32>
    %28 = vector.extract_strided_slice %24 {offsets = [0, 8], sizes = [16, 46], strides = [1, 1]} : vector<16x64xf32> to vector<16x46xf32>
    %29 = vector.extract_strided_slice %24 {offsets = [0, 9], sizes = [16, 46], strides = [1, 1]} : vector<16x64xf32> to vector<16x46xf32>
    %30 = vector.extract_strided_slice %24 {offsets = [0, 10], sizes = [16, 46], strides = [1, 1]} : vector<16x64xf32> to vector<16x46xf32>
    %31 = vector.extract_strided_slice %24 {offsets = [0, 16], sizes = [16, 46], strides = [1, 1]} : vector<16x64xf32> to vector<16x46xf32>
    %32 = vector.extract_strided_slice %24 {offsets = [0, 17], sizes = [16, 46], strides = [1, 1]} : vector<16x64xf32> to vector<16x46xf32>
    %33 = vector.extract_strided_slice %24 {offsets = [0, 18], sizes = [16, 46], strides = [1, 1]} : vector<16x64xf32> to vector<16x46xf32>
    %34 = tpu.concatenate %25, %26, %27, %28, %29, %30, %31, %32, %33 in 0 : vector<16x46xf32>, vector<16x46xf32>, vector<16x46xf32>, vector<16x46xf32>, vector<16x46xf32>, vector<16x46xf32>, vector<16x46xf32>, vector<16x46xf32>, vector<16x46xf32> -> vector<144x46xf32>
    %c0_12 = arith.constant 0 : index
    %c1 = arith.constant 1 : index
    %c0_13 = arith.constant 0 : index
    %c0_14 = arith.constant 0 : index
    %35 = vector.load %arg3[%c0_12, %c1, %c0_13, %c0_14] : memref<1x3x8x144xf32, #tpu.memory_space<vmem>>, vector<1x1x8x144xf32>
    %36 = vector.shape_cast %35 : vector<1x1x8x144xf32> to vector<8x144xf32>
    %cst_15 = arith.constant dense<0.000000e+00> : vector<8x46xf32>
    %37 = tpu.matmul %36, %34, %cst_15 {dimension_numbers = #tpu.dot_dimension_numbers<[1], [0], [0], [1], [0, 0, 1, 1], [], []>} : vector<8x144xf32>, vector<144x46xf32>, vector<8x46xf32> -> vector<8x46xf32>
    %38 = arith.addf %19, %37 : vector<8x46xf32>
    %c0_i32_16 = arith.constant 0 : i32
    %39 = arith.addi %arg1, %c0_i32_16 : i32
    %c2_i32 = arith.constant 2 : i32
    %40 = arith.addi %39, %c2_i32 : i32
    %c0_17 = arith.constant 0 : index
    %41 = arith.index_cast %40 : i32 to index
    %c0_18 = arith.constant 0 : index
    %c0_19 = arith.constant 0 : index
    %42 = vector.load %arg2[%c0_17, %41, %c0_18, %c0_19] : memref<1x8x16x64xf32, #tpu.memory_space<vmem>>, vector<1x1x16x64xf32>
    %43 = vector.shape_cast %42 : vector<1x1x16x64xf32> to vector<16x64xf32>
    %44 = vector.extract_strided_slice %43 {offsets = [0, 0], sizes = [16, 46], strides = [1, 1]} : vector<16x64xf32> to vector<16x46xf32>
    %45 = vector.extract_strided_slice %43 {offsets = [0, 1], sizes = [16, 46], strides = [1, 1]} : vector<16x64xf32> to vector<16x46xf32>
    %46 = vector.extract_strided_slice %43 {offsets = [0, 2], sizes = [16, 46], strides = [1, 1]} : vector<16x64xf32> to vector<16x46xf32>
    %47 = vector.extract_strided_slice %43 {offsets = [0, 8], sizes = [16, 46], strides = [1, 1]} : vector<16x64xf32> to vector<16x46xf32>
    %48 = vector.extract_strided_slice %43 {offsets = [0, 9], sizes = [16, 46], strides = [1, 1]} : vector<16x64xf32> to vector<16x46xf32>
    %49 = vector.extract_strided_slice %43 {offsets = [0, 10], sizes = [16, 46], strides = [1, 1]} : vector<16x64xf32> to vector<16x46xf32>
    %50 = vector.extract_strided_slice %43 {offsets = [0, 16], sizes = [16, 46], strides = [1, 1]} : vector<16x64xf32> to vector<16x46xf32>
    %51 = vector.extract_strided_slice %43 {offsets = [0, 17], sizes = [16, 46], strides = [1, 1]} : vector<16x64xf32> to vector<16x46xf32>
    %52 = vector.extract_strided_slice %43 {offsets = [0, 18], sizes = [16, 46], strides = [1, 1]} : vector<16x64xf32> to vector<16x46xf32>
    %53 = tpu.concatenate %44, %45, %46, %47, %48, %49, %50, %51, %52 in 0 : vector<16x46xf32>, vector<16x46xf32>, vector<16x46xf32>, vector<16x46xf32>, vector<16x46xf32>, vector<16x46xf32>, vector<16x46xf32>, vector<16x46xf32>, vector<16x46xf32> -> vector<144x46xf32>
    %c0_20 = arith.constant 0 : index
    %c2 = arith.constant 2 : index
    %c0_21 = arith.constant 0 : index
    %c0_22 = arith.constant 0 : index
    %54 = vector.load %arg3[%c0_20, %c2, %c0_21, %c0_22] : memref<1x3x8x144xf32, #tpu.memory_space<vmem>>, vector<1x1x8x144xf32>
    %55 = vector.shape_cast %54 : vector<1x1x8x144xf32> to vector<8x144xf32>
    %cst_23 = arith.constant dense<0.000000e+00> : vector<8x46xf32>
    %56 = tpu.matmul %55, %53, %cst_23 {dimension_numbers = #tpu.dot_dimension_numbers<[1], [0], [0], [1], [0, 0, 1, 1], [], []>} : vector<8x144xf32>, vector<144x46xf32>, vector<8x46xf32> -> vector<8x46xf32>
    %57 = arith.addf %38, %56 : vector<8x46xf32>
    %c0_24 = arith.constant 0 : index
    %c0_25 = arith.constant 0 : index
    %58 = vector.load %arg4[%c0_24, %c0_25] : memref<8x1xf32, #tpu.memory_space<vmem>>, vector<8x1xf32>
    %59 = vector.broadcast %58 : vector<8x1xf32> to vector<8x46xf32>
    %60 = arith.addf %57, %59 : vector<8x46xf32>
    %c0_26 = arith.constant 0 : index
    %c0_27 = arith.constant 0 : index
    %c0_28 = arith.constant 0 : index
    %c0_29 = arith.constant 0 : index
    %61 = vector.load %arg5[%c0_26, %c0_27, %c0_28, %c0_29] : memref<1x1x8x48xf32, #tpu.memory_space<vmem>>, vector<1x1x8x46xf32>
    %62 = vector.shape_cast %61 : vector<1x1x8x46xf32> to vector<8x46xf32>
    %c0_30 = arith.constant 0 : index
    %c0_31 = arith.constant 0 : index
    %c0_32 = arith.constant 0 : index
    %c0_33 = arith.constant 0 : index
    %63 = vector.load %arg6[%c0_30, %c0_31, %c0_32, %c0_33] : memref<1x1x8x48xf32, #tpu.memory_space<vmem>>, vector<1x1x8x46xf32>
    %64 = vector.shape_cast %63 : vector<1x1x8x46xf32> to vector<8x46xf32>
    %c0_34 = arith.constant 0 : index
    %c0_35 = arith.constant 0 : index
    %65 = vector.load %arg7[%c0_34, %c0_35] : memref<8x1xf32, #tpu.memory_space<vmem>>, vector<8x1xf32>
    %c0_36 = arith.constant 0 : index
    %c0_37 = arith.constant 0 : index
    %66 = vector.load %arg8[%c0_36, %c0_37] : memref<8x1xf32, #tpu.memory_space<vmem>>, vector<8x1xf32>
    %67 = math.tanh %60 : vector<8x46xf32>
    %68 = vector.broadcast %65 : vector<8x1xf32> to vector<8x46xf32>
    %69 = arith.mulf %67, %68 : vector<8x46xf32>
    %70 = vector.broadcast %66 : vector<8x1xf32> to vector<8x46xf32>
    %71 = arith.addf %69, %70 : vector<8x46xf32>
    %cst_38 = arith.constant 1.000000e+00 : f32
    %72 = vector.broadcast %cst_38 : f32 to vector<8x46xf32>
    %73 = arith.subf %72, %62 : vector<8x46xf32>
    %74 = arith.mulf %73, %64 : vector<8x46xf32>
    %75 = arith.mulf %62, %71 : vector<8x46xf32>
    %76 = arith.addf %74, %75 : vector<8x46xf32>
    %c0_39 = arith.constant 0 : index
    %c0_40 = arith.constant 0 : index
    %c0_41 = arith.constant 0 : index
    %c0_42 = arith.constant 0 : index
    %77 = vector.load %arg9[%c0_39, %c0_40, %c0_41, %c0_42] : memref<1x1x8x48xf32, #tpu.memory_space<vmem>>, vector<1x1x8x46xf32>
    %78 = vector.shape_cast %77 : vector<1x1x8x46xf32> to vector<8x46xf32>
    %79 = vector.shape_cast %76 : vector<8x46xf32> to vector<1x1x8x46xf32>
    tpu.vector_store %arg9[%c0_39, %c0_40, %c0_41, %c0_42], %79 {strides = array<i32>} : memref<1x1x8x48xf32, #tpu.memory_space<vmem>>, vector<1x1x8x46xf32>,
    return
  }
  func.func @transform_0(%arg0: i32, %arg1: i32) -> (i32, i32, i32, i32) {
    %c0_i32 = arith.constant 0 : i32
    %c0_i32_0 = arith.constant 0 : i32
    %c0_i32_1 = arith.constant 0 : i32
    %c0_i32_2 = arith.constant 0 : i32
    return %arg0, %c0_i32, %c0_i32_0, %c0_i32_1 : i32, i32, i32, i32
  }
  func.func @transform_1(%arg0: i32, %arg1: i32) -> (i32, i32, i32, i32) {
    %c0_i32 = arith.constant 0 : i32
    %c0_i32_0 = arith.constant 0 : i32
    %c0_i32_1 = arith.constant 0 : i32
    %c0_i32_2 = arith.constant 0 : i32
    %c0_i32_3 = arith.constant 0 : i32
    return %c0_i32, %c0_i32_0, %c0_i32_1, %c0_i32_2 : i32, i32, i32, i32
  }
  func.func @transform_2(%arg0: i32, %arg1: i32) -> (i32, i32) {
    %c0_i32 = arith.constant 0 : i32
    %c0_i32_0 = arith.constant 0 : i32
    %c0_i32_1 = arith.constant 0 : i32
    return %c0_i32, %c0_i32_0 : i32, i32
  }
  func.func @transform_3(%arg0: i32, %arg1: i32) -> (i32, i32, i32, i32) {
    %c0_i32 = arith.constant 0 : i32
    %c0_i32_0 = arith.constant 0 : i32
    %c0_i32_1 = arith.constant 0 : i32
    return %arg0, %arg1, %c0_i32, %c0_i32_0 : i32, i32, i32, i32
  }
  func.func @transform_4(%arg0: i32, %arg1: i32) -> (i32, i32, i32, i32) {
    %c0_i32 = arith.constant 0 : i32
    %c0_i32_0 = arith.constant 0 : i32
    %c0_i32_1 = arith.constant 0 : i32
    return %arg0, %arg1, %c0_i32, %c0_i32_0 : i32, i32, i32, i32
  }
  func.func @transform_5(%arg0: i32, %arg1: i32) -> (i32, i32) {
    %c0_i32 = arith.constant 0 : i32
    %c0_i32_0 = arith.constant 0 : i32
    %c0_i32_1 = arith.constant 0 : i32
    return %c0_i32, %c0_i32_0 : i32, i32
  }
  func.func @transform_6(%arg0: i32, %arg1: i32) -> (i32, i32) {
    %c0_i32 = arith.constant 0 : i32
    %c0_i32_0 = arith.constant 0 : i32
    %c0_i32_1 = arith.constant 0 : i32
    return %c0_i32, %c0_i32_0 : i32, i32
  }
  func.func @transform_7(%arg0: i32, %arg1: i32) -> (i32, i32, i32, i32) {
    %c0_i32 = arith.constant 0 : i32
    %c0_i32_0 = arith.constant 0 : i32
    %c0_i32_1 = arith.constant 0 : i32
    return %arg0, %arg1, %c0_i32, %c0_i32_0 : i32, i32, i32, i32
  }
}

module attributes {stable_mosaic.version = 11 : i64} {
  func.func @_conv_plane_kernel(%arg0: i32, %arg1: i32, %arg2: memref<1x14x8x196xf32, #tpu.memory_space<vmem>>, %arg3: memref<4x3x16x72xf32, #tpu.memory_space<vmem>>, %arg4: memref<64x1xf32, #tpu.memory_space<vmem>>, %arg5: memref<1x1x64x84xf32, #tpu.memory_space<vmem>>) attributes {dimension_semantics = [#tpu.dimension_semantics<parallel>, #tpu.dimension_semantics<parallel>], iteration_bounds = array<i64: 2, 6>, scalar_prefetch = 0 : i64, scratch_operands = 0 : i64, tpu.core_type = #tpu.core_type<tc>, window_params = [{transform_indices = @transform_0, window_bounds = array<i64: 1, 14, 8, 196>}, {pipeline_mode = #tpu.pipeline_mode<synchronous>, transform_indices = @transform_1, window_bounds = array<i64: 4, 3, 16, 72>}, {pipeline_mode = #tpu.pipeline_mode<synchronous>, transform_indices = @transform_2, window_bounds = array<i64: 64, 1>}, {transform_indices = @transform_3, window_bounds = array<i64: 1, 1, 64, 84>}]} {
    %cst = arith.constant 0.000000e+00 : f32
    %0 = vector.broadcast %cst : f32 to vector<16x76xf32>
    %c3_i32 = arith.constant 3 : i32
    %1 = arith.addi %arg1, %c3_i32 : i32
    %c0_i32 = arith.constant 0 : i32
    %2 = arith.addi %1, %c0_i32 : i32
    %c0 = arith.constant 0 : index
    %3 = arith.index_cast %2 : i32 to index
    %c0_0 = arith.constant 0 : index
    %c0_1 = arith.constant 0 : index
    %4 = vector.load %arg2[%c0, %3, %c0_0, %c0_1] : memref<1x14x8x196xf32, #tpu.memory_space<vmem>>, vector<1x1x8x196xf32>
    %5 = vector.shape_cast %4 : vector<1x1x8x196xf32> to vector<8x196xf32>
    %6 = vector.extract_strided_slice %5 {offsets = [0, 45], sizes = [8, 76], strides = [1, 1]} : vector<8x196xf32> to vector<8x76xf32>
    %7 = vector.extract_strided_slice %5 {offsets = [0, 46], sizes = [8, 76], strides = [1, 1]} : vector<8x196xf32> to vector<8x76xf32>
    %8 = vector.extract_strided_slice %5 {offsets = [0, 47], sizes = [8, 76], strides = [1, 1]} : vector<8x196xf32> to vector<8x76xf32>
    %9 = vector.extract_strided_slice %5 {offsets = [0, 59], sizes = [8, 76], strides = [1, 1]} : vector<8x196xf32> to vector<8x76xf32>
    %10 = vector.extract_strided_slice %5 {offsets = [0, 60], sizes = [8, 76], strides = [1, 1]} : vector<8x196xf32> to vector<8x76xf32>
    %11 = vector.extract_strided_slice %5 {offsets = [0, 61], sizes = [8, 76], strides = [1, 1]} : vector<8x196xf32> to vector<8x76xf32>
    %12 = vector.extract_strided_slice %5 {offsets = [0, 73], sizes = [8, 76], strides = [1, 1]} : vector<8x196xf32> to vector<8x76xf32>
    %13 = vector.extract_strided_slice %5 {offsets = [0, 74], sizes = [8, 76], strides = [1, 1]} : vector<8x196xf32> to vector<8x76xf32>
    %14 = vector.extract_strided_slice %5 {offsets = [0, 75], sizes = [8, 76], strides = [1, 1]} : vector<8x196xf32> to vector<8x76xf32>
    %15 = tpu.concatenate %6, %7, %8, %9, %10, %11, %12, %13, %14 in 0 : vector<8x76xf32>, vector<8x76xf32>, vector<8x76xf32>, vector<8x76xf32>, vector<8x76xf32>, vector<8x76xf32>, vector<8x76xf32>, vector<8x76xf32>, vector<8x76xf32> -> vector<72x76xf32>
    %c0_2 = arith.constant 0 : index
    %c0_3 = arith.constant 0 : index
    %c0_4 = arith.constant 0 : index
    %c0_5 = arith.constant 0 : index
    %16 = vector.load %arg3[%c0_2, %c0_3, %c0_4, %c0_5] : memref<4x3x16x72xf32, #tpu.memory_space<vmem>>, vector<1x1x16x72xf32>
    %17 = vector.shape_cast %16 : vector<1x1x16x72xf32> to vector<16x72xf32>
    %cst_6 = arith.constant dense<0.000000e+00> : vector<16x76xf32>
    %18 = tpu.matmul %17, %15, %cst_6 {dimension_numbers = #tpu.dot_dimension_numbers<[1], [0], [0], [1], [0, 0, 1, 1], [], []>} : vector<16x72xf32>, vector<72x76xf32>, vector<16x76xf32> -> vector<16x76xf32>
    %19 = arith.addf %0, %18 : vector<16x76xf32>
    %c3_i32_7 = arith.constant 3 : i32
    %20 = arith.addi %arg1, %c3_i32_7 : i32
    %c1_i32 = arith.constant 1 : i32
    %21 = arith.addi %20, %c1_i32 : i32
    %c0_8 = arith.constant 0 : index
    %22 = arith.index_cast %21 : i32 to index
    %c0_9 = arith.constant 0 : index
    %c0_10 = arith.constant 0 : index
    %23 = vector.load %arg2[%c0_8, %22, %c0_9, %c0_10] : memref<1x14x8x196xf32, #tpu.memory_space<vmem>>, vector<1x1x8x196xf32>
    %24 = vector.shape_cast %23 : vector<1x1x8x196xf32> to vector<8x196xf32>
    %25 = vector.extract_strided_slice %24 {offsets = [0, 45], sizes = [8, 76], strides = [1, 1]} : vector<8x196xf32> to vector<8x76xf32>
    %26 = vector.extract_strided_slice %24 {offsets = [0, 46], sizes = [8, 76], strides = [1, 1]} : vector<8x196xf32> to vector<8x76xf32>
    %27 = vector.extract_strided_slice %24 {offsets = [0, 47], sizes = [8, 76], strides = [1, 1]} : vector<8x196xf32> to vector<8x76xf32>
    %28 = vector.extract_strided_slice %24 {offsets = [0, 59], sizes = [8, 76], strides = [1, 1]} : vector<8x196xf32> to vector<8x76xf32>
    %29 = vector.extract_strided_slice %24 {offsets = [0, 60], sizes = [8, 76], strides = [1, 1]} : vector<8x196xf32> to vector<8x76xf32>
    %30 = vector.extract_strided_slice %24 {offsets = [0, 61], sizes = [8, 76], strides = [1, 1]} : vector<8x196xf32> to vector<8x76xf32>
    %31 = vector.extract_strided_slice %24 {offsets = [0, 73], sizes = [8, 76], strides = [1, 1]} : vector<8x196xf32> to vector<8x76xf32>
    %32 = vector.extract_strided_slice %24 {offsets = [0, 74], sizes = [8, 76], strides = [1, 1]} : vector<8x196xf32> to vector<8x76xf32>
    %33 = vector.extract_strided_slice %24 {offsets = [0, 75], sizes = [8, 76], strides = [1, 1]} : vector<8x196xf32> to vector<8x76xf32>
    %34 = tpu.concatenate %25, %26, %27, %28, %29, %30, %31, %32, %33 in 0 : vector<8x76xf32>, vector<8x76xf32>, vector<8x76xf32>, vector<8x76xf32>, vector<8x76xf32>, vector<8x76xf32>, vector<8x76xf32>, vector<8x76xf32>, vector<8x76xf32> -> vector<72x76xf32>
    %c0_11 = arith.constant 0 : index
    %c1 = arith.constant 1 : index
    %c0_12 = arith.constant 0 : index
    %c0_13 = arith.constant 0 : index
    %35 = vector.load %arg3[%c0_11, %c1, %c0_12, %c0_13] : memref<4x3x16x72xf32, #tpu.memory_space<vmem>>, vector<1x1x16x72xf32>
    %36 = vector.shape_cast %35 : vector<1x1x16x72xf32> to vector<16x72xf32>
    %cst_14 = arith.constant dense<0.000000e+00> : vector<16x76xf32>
    %37 = tpu.matmul %36, %34, %cst_14 {dimension_numbers = #tpu.dot_dimension_numbers<[1], [0], [0], [1], [0, 0, 1, 1], [], []>} : vector<16x72xf32>, vector<72x76xf32>, vector<16x76xf32> -> vector<16x76xf32>
    %38 = arith.addf %19, %37 : vector<16x76xf32>
    %c3_i32_15 = arith.constant 3 : i32
    %39 = arith.addi %arg1, %c3_i32_15 : i32
    %c2_i32 = arith.constant 2 : i32
    %40 = arith.addi %39, %c2_i32 : i32
    %c0_16 = arith.constant 0 : index
    %41 = arith.index_cast %40 : i32 to index
    %c0_17 = arith.constant 0 : index
    %c0_18 = arith.constant 0 : index
    %42 = vector.load %arg2[%c0_16, %41, %c0_17, %c0_18] : memref<1x14x8x196xf32, #tpu.memory_space<vmem>>, vector<1x1x8x196xf32>
    %43 = vector.shape_cast %42 : vector<1x1x8x196xf32> to vector<8x196xf32>
    %44 = vector.extract_strided_slice %43 {offsets = [0, 45], sizes = [8, 76], strides = [1, 1]} : vector<8x196xf32> to vector<8x76xf32>
    %45 = vector.extract_strided_slice %43 {offsets = [0, 46], sizes = [8, 76], strides = [1, 1]} : vector<8x196xf32> to vector<8x76xf32>
    %46 = vector.extract_strided_slice %43 {offsets = [0, 47], sizes = [8, 76], strides = [1, 1]} : vector<8x196xf32> to vector<8x76xf32>
    %47 = vector.extract_strided_slice %43 {offsets = [0, 59], sizes = [8, 76], strides = [1, 1]} : vector<8x196xf32> to vector<8x76xf32>
    %48 = vector.extract_strided_slice %43 {offsets = [0, 60], sizes = [8, 76], strides = [1, 1]} : vector<8x196xf32> to vector<8x76xf32>
    %49 = vector.extract_strided_slice %43 {offsets = [0, 61], sizes = [8, 76], strides = [1, 1]} : vector<8x196xf32> to vector<8x76xf32>
    %50 = vector.extract_strided_slice %43 {offsets = [0, 73], sizes = [8, 76], strides = [1, 1]} : vector<8x196xf32> to vector<8x76xf32>
    %51 = vector.extract_strided_slice %43 {offsets = [0, 74], sizes = [8, 76], strides = [1, 1]} : vector<8x196xf32> to vector<8x76xf32>
    %52 = vector.extract_strided_slice %43 {offsets = [0, 75], sizes = [8, 76], strides = [1, 1]} : vector<8x196xf32> to vector<8x76xf32>
    %53 = tpu.concatenate %44, %45, %46, %47, %48, %49, %50, %51, %52 in 0 : vector<8x76xf32>, vector<8x76xf32>, vector<8x76xf32>, vector<8x76xf32>, vector<8x76xf32>, vector<8x76xf32>, vector<8x76xf32>, vector<8x76xf32>, vector<8x76xf32> -> vector<72x76xf32>
    %c0_19 = arith.constant 0 : index
    %c2 = arith.constant 2 : index
    %c0_20 = arith.constant 0 : index
    %c0_21 = arith.constant 0 : index
    %54 = vector.load %arg3[%c0_19, %c2, %c0_20, %c0_21] : memref<4x3x16x72xf32, #tpu.memory_space<vmem>>, vector<1x1x16x72xf32>
    %55 = vector.shape_cast %54 : vector<1x1x16x72xf32> to vector<16x72xf32>
    %cst_22 = arith.constant dense<0.000000e+00> : vector<16x76xf32>
    %56 = tpu.matmul %55, %53, %cst_22 {dimension_numbers = #tpu.dot_dimension_numbers<[1], [0], [0], [1], [0, 0, 1, 1], [], []>} : vector<16x72xf32>, vector<72x76xf32>, vector<16x76xf32> -> vector<16x76xf32>
    %57 = arith.addf %38, %56 : vector<16x76xf32>
    %c0_23 = arith.constant 0 : index
    %c0_24 = arith.constant 0 : index
    %58 = vector.load %arg4[%c0_23, %c0_24] : memref<64x1xf32, #tpu.memory_space<vmem>>, vector<16x1xf32>
    %59 = vector.broadcast %58 : vector<16x1xf32> to vector<16x76xf32>
    %60 = arith.addf %57, %59 : vector<16x76xf32>
    %cst_25 = arith.constant 0.000000e+00 : f32
    %61 = vector.broadcast %cst_25 : f32 to vector<16x76xf32>
    %c1_i32_26 = arith.constant 1 : i32
    %62 = arith.addi %arg1, %c1_i32_26 : i32
    %c0_i32_27 = arith.constant 0 : i32
    %63 = arith.addi %62, %c0_i32_27 : i32
    %c0_28 = arith.constant 0 : index
    %64 = arith.index_cast %63 : i32 to index
    %c0_29 = arith.constant 0 : index
    %c0_30 = arith.constant 0 : index
    %65 = vector.load %arg2[%c0_28, %64, %c0_29, %c0_30] : memref<1x14x8x196xf32, #tpu.memory_space<vmem>>, vector<1x1x8x196xf32>
    %66 = vector.shape_cast %65 : vector<1x1x8x196xf32> to vector<8x196xf32>
    %67 = vector.extract_strided_slice %66 {offsets = [0, 15], sizes = [8, 76], strides = [1, 1]} : vector<8x196xf32> to vector<8x76xf32>
    %68 = vector.extract_strided_slice %66 {offsets = [0, 18], sizes = [8, 76], strides = [1, 1]} : vector<8x196xf32> to vector<8x76xf32>
    %69 = vector.extract_strided_slice %66 {offsets = [0, 21], sizes = [8, 76], strides = [1, 1]} : vector<8x196xf32> to vector<8x76xf32>
    %70 = vector.extract_strided_slice %66 {offsets = [0, 57], sizes = [8, 76], strides = [1, 1]} : vector<8x196xf32> to vector<8x76xf32>
    %71 = vector.extract_strided_slice %66 {offsets = [0, 60], sizes = [8, 76], strides = [1, 1]} : vector<8x196xf32> to vector<8x76xf32>
    %72 = vector.extract_strided_slice %66 {offsets = [0, 63], sizes = [8, 76], strides = [1, 1]} : vector<8x196xf32> to vector<8x76xf32>
    %73 = vector.extract_strided_slice %66 {offsets = [0, 99], sizes = [8, 76], strides = [1, 1]} : vector<8x196xf32> to vector<8x76xf32>
    %74 = vector.extract_strided_slice %66 {offsets = [0, 102], sizes = [8, 76], strides = [1, 1]} : vector<8x196xf32> to vector<8x76xf32>
    %75 = vector.extract_strided_slice %66 {offsets = [0, 105], sizes = [8, 76], strides = [1, 1]} : vector<8x196xf32> to vector<8x76xf32>
    %76 = tpu.concatenate %67, %68, %69, %70, %71, %72, %73, %74, %75 in 0 : vector<8x76xf32>, vector<8x76xf32>, vector<8x76xf32>, vector<8x76xf32>, vector<8x76xf32>, vector<8x76xf32>, vector<8x76xf32>, vector<8x76xf32>, vector<8x76xf32> -> vector<72x76xf32>
    %c1_31 = arith.constant 1 : index
    %c0_32 = arith.constant 0 : index
    %c0_33 = arith.constant 0 : index
    %c0_34 = arith.constant 0 : index
    %77 = vector.load %arg3[%c1_31, %c0_32, %c0_33, %c0_34] : memref<4x3x16x72xf32, #tpu.memory_space<vmem>>, vector<1x1x16x72xf32>
    %78 = vector.shape_cast %77 : vector<1x1x16x72xf32> to vector<16x72xf32>
    %cst_35 = arith.constant dense<0.000000e+00> : vector<16x76xf32>
    %79 = tpu.matmul %78, %76, %cst_35 {dimension_numbers = #tpu.dot_dimension_numbers<[1], [0], [0], [1], [0, 0, 1, 1], [], []>} : vector<16x72xf32>, vector<72x76xf32>, vector<16x76xf32> -> vector<16x76xf32>
    %80 = arith.addf %61, %79 : vector<16x76xf32>
    %c1_i32_36 = arith.constant 1 : i32
    %81 = arith.addi %arg1, %c1_i32_36 : i32
    %c3_i32_37 = arith.constant 3 : i32
    %82 = arith.addi %81, %c3_i32_37 : i32
    %c0_38 = arith.constant 0 : index
    %83 = arith.index_cast %82 : i32 to index
    %c0_39 = arith.constant 0 : index
    %c0_40 = arith.constant 0 : index
    %84 = vector.load %arg2[%c0_38, %83, %c0_39, %c0_40] : memref<1x14x8x196xf32, #tpu.memory_space<vmem>>, vector<1x1x8x196xf32>
    %85 = vector.shape_cast %84 : vector<1x1x8x196xf32> to vector<8x196xf32>
    %86 = vector.extract_strided_slice %85 {offsets = [0, 15], sizes = [8, 76], strides = [1, 1]} : vector<8x196xf32> to vector<8x76xf32>
    %87 = vector.extract_strided_slice %85 {offsets = [0, 18], sizes = [8, 76], strides = [1, 1]} : vector<8x196xf32> to vector<8x76xf32>
    %88 = vector.extract_strided_slice %85 {offsets = [0, 21], sizes = [8, 76], strides = [1, 1]} : vector<8x196xf32> to vector<8x76xf32>
    %89 = vector.extract_strided_slice %85 {offsets = [0, 57], sizes = [8, 76], strides = [1, 1]} : vector<8x196xf32> to vector<8x76xf32>
    %90 = vector.extract_strided_slice %85 {offsets = [0, 60], sizes = [8, 76], strides = [1, 1]} : vector<8x196xf32> to vector<8x76xf32>
    %91 = vector.extract_strided_slice %85 {offsets = [0, 63], sizes = [8, 76], strides = [1, 1]} : vector<8x196xf32> to vector<8x76xf32>
    %92 = vector.extract_strided_slice %85 {offsets = [0, 99], sizes = [8, 76], strides = [1, 1]} : vector<8x196xf32> to vector<8x76xf32>
    %93 = vector.extract_strided_slice %85 {offsets = [0, 102], sizes = [8, 76], strides = [1, 1]} : vector<8x196xf32> to vector<8x76xf32>
    %94 = vector.extract_strided_slice %85 {offsets = [0, 105], sizes = [8, 76], strides = [1, 1]} : vector<8x196xf32> to vector<8x76xf32>
    %95 = tpu.concatenate %86, %87, %88, %89, %90, %91, %92, %93, %94 in 0 : vector<8x76xf32>, vector<8x76xf32>, vector<8x76xf32>, vector<8x76xf32>, vector<8x76xf32>, vector<8x76xf32>, vector<8x76xf32>, vector<8x76xf32>, vector<8x76xf32> -> vector<72x76xf32>
    %c1_41 = arith.constant 1 : index
    %c1_42 = arith.constant 1 : index
    %c0_43 = arith.constant 0 : index
    %c0_44 = arith.constant 0 : index
    %96 = vector.load %arg3[%c1_41, %c1_42, %c0_43, %c0_44] : memref<4x3x16x72xf32, #tpu.memory_space<vmem>>, vector<1x1x16x72xf32>
    %97 = vector.shape_cast %96 : vector<1x1x16x72xf32> to vector<16x72xf32>
    %cst_45 = arith.constant dense<0.000000e+00> : vector<16x76xf32>
    %98 = tpu.matmul %97, %95, %cst_45 {dimension_numbers = #tpu.dot_dimension_numbers<[1], [0], [0], [1], [0, 0, 1, 1], [], []>} : vector<16x72xf32>, vector<72x76xf32>, vector<16x76xf32> -> vector<16x76xf32>
    %99 = arith.addf %80, %98 : vector<16x76xf32>
    %c1_i32_46 = arith.constant 1 : i32
    %100 = arith.addi %arg1, %c1_i32_46 : i32
    %c6_i32 = arith.constant 6 : i32
    %101 = arith.addi %100, %c6_i32 : i32
    %c0_47 = arith.constant 0 : index
    %102 = arith.index_cast %101 : i32 to index
    %c0_48 = arith.constant 0 : index
    %c0_49 = arith.constant 0 : index
    %103 = vector.load %arg2[%c0_47, %102, %c0_48, %c0_49] : memref<1x14x8x196xf32, #tpu.memory_space<vmem>>, vector<1x1x8x196xf32>
    %104 = vector.shape_cast %103 : vector<1x1x8x196xf32> to vector<8x196xf32>
    %105 = vector.extract_strided_slice %104 {offsets = [0, 15], sizes = [8, 76], strides = [1, 1]} : vector<8x196xf32> to vector<8x76xf32>
    %106 = vector.extract_strided_slice %104 {offsets = [0, 18], sizes = [8, 76], strides = [1, 1]} : vector<8x196xf32> to vector<8x76xf32>
    %107 = vector.extract_strided_slice %104 {offsets = [0, 21], sizes = [8, 76], strides = [1, 1]} : vector<8x196xf32> to vector<8x76xf32>
    %108 = vector.extract_strided_slice %104 {offsets = [0, 57], sizes = [8, 76], strides = [1, 1]} : vector<8x196xf32> to vector<8x76xf32>
    %109 = vector.extract_strided_slice %104 {offsets = [0, 60], sizes = [8, 76], strides = [1, 1]} : vector<8x196xf32> to vector<8x76xf32>
    %110 = vector.extract_strided_slice %104 {offsets = [0, 63], sizes = [8, 76], strides = [1, 1]} : vector<8x196xf32> to vector<8x76xf32>
    %111 = vector.extract_strided_slice %104 {offsets = [0, 99], sizes = [8, 76], strides = [1, 1]} : vector<8x196xf32> to vector<8x76xf32>
    %112 = vector.extract_strided_slice %104 {offsets = [0, 102], sizes = [8, 76], strides = [1, 1]} : vector<8x196xf32> to vector<8x76xf32>
    %113 = vector.extract_strided_slice %104 {offsets = [0, 105], sizes = [8, 76], strides = [1, 1]} : vector<8x196xf32> to vector<8x76xf32>
    %114 = tpu.concatenate %105, %106, %107, %108, %109, %110, %111, %112, %113 in 0 : vector<8x76xf32>, vector<8x76xf32>, vector<8x76xf32>, vector<8x76xf32>, vector<8x76xf32>, vector<8x76xf32>, vector<8x76xf32>, vector<8x76xf32>, vector<8x76xf32> -> vector<72x76xf32>
    %c1_50 = arith.constant 1 : index
    %c2_51 = arith.constant 2 : index
    %c0_52 = arith.constant 0 : index
    %c0_53 = arith.constant 0 : index
    %115 = vector.load %arg3[%c1_50, %c2_51, %c0_52, %c0_53] : memref<4x3x16x72xf32, #tpu.memory_space<vmem>>, vector<1x1x16x72xf32>
    %116 = vector.shape_cast %115 : vector<1x1x16x72xf32> to vector<16x72xf32>
    %cst_54 = arith.constant dense<0.000000e+00> : vector<16x76xf32>
    %117 = tpu.matmul %116, %114, %cst_54 {dimension_numbers = #tpu.dot_dimension_numbers<[1], [0], [0], [1], [0, 0, 1, 1], [], []>} : vector<16x72xf32>, vector<72x76xf32>, vector<16x76xf32> -> vector<16x76xf32>
    %118 = arith.addf %99, %117 : vector<16x76xf32>
    %c16 = arith.constant 16 : index
    %c0_55 = arith.constant 0 : index
    %119 = vector.load %arg4[%c16, %c0_55] : memref<64x1xf32, #tpu.memory_space<vmem>>, vector<16x1xf32>
    %120 = vector.broadcast %119 : vector<16x1xf32> to vector<16x76xf32>
    %121 = arith.addf %118, %120 : vector<16x76xf32>
    %cst_56 = arith.constant 0.000000e+00 : f32
    %122 = vector.broadcast %cst_56 : f32 to vector<16x76xf32>
    %c2_i32_57 = arith.constant 2 : i32
    %123 = arith.addi %arg1, %c2_i32_57 : i32
    %c0_i32_58 = arith.constant 0 : i32
    %124 = arith.addi %123, %c0_i32_58 : i32
    %c0_59 = arith.constant 0 : index
    %125 = arith.index_cast %124 : i32 to index
    %c0_60 = arith.constant 0 : index
    %c0_61 = arith.constant 0 : index
    %126 = vector.load %arg2[%c0_59, %125, %c0_60, %c0_61] : memref<1x14x8x196xf32, #tpu.memory_space<vmem>>, vector<1x1x8x196xf32>
    %127 = vector.shape_cast %126 : vector<1x1x8x196xf32> to vector<8x196xf32>
    %128 = vector.extract_strided_slice %127 {offsets = [0, 30], sizes = [8, 76], strides = [1, 1]} : vector<8x196xf32> to vector<8x76xf32>
    %129 = vector.extract_strided_slice %127 {offsets = [0, 32], sizes = [8, 76], strides = [1, 1]} : vector<8x196xf32> to vector<8x76xf32>
    %130 = vector.extract_strided_slice %127 {offsets = [0, 34], sizes = [8, 76], strides = [1, 1]} : vector<8x196xf32> to vector<8x76xf32>
    %131 = vector.extract_strided_slice %127 {offsets = [0, 58], sizes = [8, 76], strides = [1, 1]} : vector<8x196xf32> to vector<8x76xf32>
    %132 = vector.extract_strided_slice %127 {offsets = [0, 60], sizes = [8, 76], strides = [1, 1]} : vector<8x196xf32> to vector<8x76xf32>
    %133 = vector.extract_strided_slice %127 {offsets = [0, 62], sizes = [8, 76], strides = [1, 1]} : vector<8x196xf32> to vector<8x76xf32>
    %134 = vector.extract_strided_slice %127 {offsets = [0, 86], sizes = [8, 76], strides = [1, 1]} : vector<8x196xf32> to vector<8x76xf32>
    %135 = vector.extract_strided_slice %127 {offsets = [0, 88], sizes = [8, 76], strides = [1, 1]} : vector<8x196xf32> to vector<8x76xf32>
    %136 = vector.extract_strided_slice %127 {offsets = [0, 90], sizes = [8, 76], strides = [1, 1]} : vector<8x196xf32> to vector<8x76xf32>
    %137 = tpu.concatenate %128, %129, %130, %131, %132, %133, %134, %135, %136 in 0 : vector<8x76xf32>, vector<8x76xf32>, vector<8x76xf32>, vector<8x76xf32>, vector<8x76xf32>, vector<8x76xf32>, vector<8x76xf32>, vector<8x76xf32>, vector<8x76xf32> -> vector<72x76xf32>
    %c2_62 = arith.constant 2 : index
    %c0_63 = arith.constant 0 : index
    %c0_64 = arith.constant 0 : index
    %c0_65 = arith.constant 0 : index
    %138 = vector.load %arg3[%c2_62, %c0_63, %c0_64, %c0_65] : memref<4x3x16x72xf32, #tpu.memory_space<vmem>>, vector<1x1x16x72xf32>
    %139 = vector.shape_cast %138 : vector<1x1x16x72xf32> to vector<16x72xf32>
    %cst_66 = arith.constant dense<0.000000e+00> : vector<16x76xf32>
    %140 = tpu.matmul %139, %137, %cst_66 {dimension_numbers = #tpu.dot_dimension_numbers<[1], [0], [0], [1], [0, 0, 1, 1], [], []>} : vector<16x72xf32>, vector<72x76xf32>, vector<16x76xf32> -> vector<16x76xf32>
    %141 = arith.addf %122, %140 : vector<16x76xf32>
    %c2_i32_67 = arith.constant 2 : i32
    %142 = arith.addi %arg1, %c2_i32_67 : i32
    %c2_i32_68 = arith.constant 2 : i32
    %143 = arith.addi %142, %c2_i32_68 : i32
    %c0_69 = arith.constant 0 : index
    %144 = arith.index_cast %143 : i32 to index
    %c0_70 = arith.constant 0 : index
    %c0_71 = arith.constant 0 : index
    %145 = vector.load %arg2[%c0_69, %144, %c0_70, %c0_71] : memref<1x14x8x196xf32, #tpu.memory_space<vmem>>, vector<1x1x8x196xf32>
    %146 = vector.shape_cast %145 : vector<1x1x8x196xf32> to vector<8x196xf32>
    %147 = vector.extract_strided_slice %146 {offsets = [0, 30], sizes = [8, 76], strides = [1, 1]} : vector<8x196xf32> to vector<8x76xf32>
    %148 = vector.extract_strided_slice %146 {offsets = [0, 32], sizes = [8, 76], strides = [1, 1]} : vector<8x196xf32> to vector<8x76xf32>
    %149 = vector.extract_strided_slice %146 {offsets = [0, 34], sizes = [8, 76], strides = [1, 1]} : vector<8x196xf32> to vector<8x76xf32>
    %150 = vector.extract_strided_slice %146 {offsets = [0, 58], sizes = [8, 76], strides = [1, 1]} : vector<8x196xf32> to vector<8x76xf32>
    %151 = vector.extract_strided_slice %146 {offsets = [0, 60], sizes = [8, 76], strides = [1, 1]} : vector<8x196xf32> to vector<8x76xf32>
    %152 = vector.extract_strided_slice %146 {offsets = [0, 62], sizes = [8, 76], strides = [1, 1]} : vector<8x196xf32> to vector<8x76xf32>
    %153 = vector.extract_strided_slice %146 {offsets = [0, 86], sizes = [8, 76], strides = [1, 1]} : vector<8x196xf32> to vector<8x76xf32>
    %154 = vector.extract_strided_slice %146 {offsets = [0, 88], sizes = [8, 76], strides = [1, 1]} : vector<8x196xf32> to vector<8x76xf32>
    %155 = vector.extract_strided_slice %146 {offsets = [0, 90], sizes = [8, 76], strides = [1, 1]} : vector<8x196xf32> to vector<8x76xf32>
    %156 = tpu.concatenate %147, %148, %149, %150, %151, %152, %153, %154, %155 in 0 : vector<8x76xf32>, vector<8x76xf32>, vector<8x76xf32>, vector<8x76xf32>, vector<8x76xf32>, vector<8x76xf32>, vector<8x76xf32>, vector<8x76xf32>, vector<8x76xf32> -> vector<72x76xf32>
    %c2_72 = arith.constant 2 : index
    %c1_73 = arith.constant 1 : index
    %c0_74 = arith.constant 0 : index
    %c0_75 = arith.constant 0 : index
    %157 = vector.load %arg3[%c2_72, %c1_73, %c0_74, %c0_75] : memref<4x3x16x72xf32, #tpu.memory_space<vmem>>, vector<1x1x16x72xf32>
    %158 = vector.shape_cast %157 : vector<1x1x16x72xf32> to vector<16x72xf32>
    %cst_76 = arith.constant dense<0.000000e+00> : vector<16x76xf32>
    %159 = tpu.matmul %158, %156, %cst_76 {dimension_numbers = #tpu.dot_dimension_numbers<[1], [0], [0], [1], [0, 0, 1, 1], [], []>} : vector<16x72xf32>, vector<72x76xf32>, vector<16x76xf32> -> vector<16x76xf32>
    %160 = arith.addf %141, %159 : vector<16x76xf32>
    %c2_i32_77 = arith.constant 2 : i32
    %161 = arith.addi %arg1, %c2_i32_77 : i32
    %c4_i32 = arith.constant 4 : i32
    %162 = arith.addi %161, %c4_i32 : i32
    %c0_78 = arith.constant 0 : index
    %163 = arith.index_cast %162 : i32 to index
    %c0_79 = arith.constant 0 : index
    %c0_80 = arith.constant 0 : index
    %164 = vector.load %arg2[%c0_78, %163, %c0_79, %c0_80] : memref<1x14x8x196xf32, #tpu.memory_space<vmem>>, vector<1x1x8x196xf32>
    %165 = vector.shape_cast %164 : vector<1x1x8x196xf32> to vector<8x196xf32>
    %166 = vector.extract_strided_slice %165 {offsets = [0, 30], sizes = [8, 76], strides = [1, 1]} : vector<8x196xf32> to vector<8x76xf32>
    %167 = vector.extract_strided_slice %165 {offsets = [0, 32], sizes = [8, 76], strides = [1, 1]} : vector<8x196xf32> to vector<8x76xf32>
    %168 = vector.extract_strided_slice %165 {offsets = [0, 34], sizes = [8, 76], strides = [1, 1]} : vector<8x196xf32> to vector<8x76xf32>
    %169 = vector.extract_strided_slice %165 {offsets = [0, 58], sizes = [8, 76], strides = [1, 1]} : vector<8x196xf32> to vector<8x76xf32>
    %170 = vector.extract_strided_slice %165 {offsets = [0, 60], sizes = [8, 76], strides = [1, 1]} : vector<8x196xf32> to vector<8x76xf32>
    %171 = vector.extract_strided_slice %165 {offsets = [0, 62], sizes = [8, 76], strides = [1, 1]} : vector<8x196xf32> to vector<8x76xf32>
    %172 = vector.extract_strided_slice %165 {offsets = [0, 86], sizes = [8, 76], strides = [1, 1]} : vector<8x196xf32> to vector<8x76xf32>
    %173 = vector.extract_strided_slice %165 {offsets = [0, 88], sizes = [8, 76], strides = [1, 1]} : vector<8x196xf32> to vector<8x76xf32>
    %174 = vector.extract_strided_slice %165 {offsets = [0, 90], sizes = [8, 76], strides = [1, 1]} : vector<8x196xf32> to vector<8x76xf32>
    %175 = tpu.concatenate %166, %167, %168, %169, %170, %171, %172, %173, %174 in 0 : vector<8x76xf32>, vector<8x76xf32>, vector<8x76xf32>, vector<8x76xf32>, vector<8x76xf32>, vector<8x76xf32>, vector<8x76xf32>, vector<8x76xf32>, vector<8x76xf32> -> vector<72x76xf32>
    %c2_81 = arith.constant 2 : index
    %c2_82 = arith.constant 2 : index
    %c0_83 = arith.constant 0 : index
    %c0_84 = arith.constant 0 : index
    %176 = vector.load %arg3[%c2_81, %c2_82, %c0_83, %c0_84] : memref<4x3x16x72xf32, #tpu.memory_space<vmem>>, vector<1x1x16x72xf32>
    %177 = vector.shape_cast %176 : vector<1x1x16x72xf32> to vector<16x72xf32>
    %cst_85 = arith.constant dense<0.000000e+00> : vector<16x76xf32>
    %178 = tpu.matmul %177, %175, %cst_85 {dimension_numbers = #tpu.dot_dimension_numbers<[1], [0], [0], [1], [0, 0, 1, 1], [], []>} : vector<16x72xf32>, vector<72x76xf32>, vector<16x76xf32> -> vector<16x76xf32>
    %179 = arith.addf %160, %178 : vector<16x76xf32>
    %c32 = arith.constant 32 : index
    %c0_86 = arith.constant 0 : index
    %180 = vector.load %arg4[%c32, %c0_86] : memref<64x1xf32, #tpu.memory_space<vmem>>, vector<16x1xf32>
    %181 = vector.broadcast %180 : vector<16x1xf32> to vector<16x76xf32>
    %182 = arith.addf %179, %181 : vector<16x76xf32>
    %cst_87 = arith.constant 0.000000e+00 : f32
    %183 = vector.broadcast %cst_87 : f32 to vector<16x76xf32>
    %c0_i32_88 = arith.constant 0 : i32
    %184 = arith.addi %arg1, %c0_i32_88 : i32
    %c0_i32_89 = arith.constant 0 : i32
    %185 = arith.addi %184, %c0_i32_89 : i32
    %c0_90 = arith.constant 0 : index
    %186 = arith.index_cast %185 : i32 to index
    %c0_91 = arith.constant 0 : index
    %c0_92 = arith.constant 0 : index
    %187 = vector.load %arg2[%c0_90, %186, %c0_91, %c0_92] : memref<1x14x8x196xf32, #tpu.memory_space<vmem>>, vector<1x1x8x196xf32>
    %188 = vector.shape_cast %187 : vector<1x1x8x196xf32> to vector<8x196xf32>
    %189 = vector.extract_strided_slice %188 {offsets = [0, 0], sizes = [8, 76], strides = [1, 1]} : vector<8x196xf32> to vector<8x76xf32>
    %190 = vector.extract_strided_slice %188 {offsets = [0, 4], sizes = [8, 76], strides = [1, 1]} : vector<8x196xf32> to vector<8x76xf32>
    %191 = vector.extract_strided_slice %188 {offsets = [0, 8], sizes = [8, 76], strides = [1, 1]} : vector<8x196xf32> to vector<8x76xf32>
    %192 = vector.extract_strided_slice %188 {offsets = [0, 56], sizes = [8, 76], strides = [1, 1]} : vector<8x196xf32> to vector<8x76xf32>
    %193 = vector.extract_strided_slice %188 {offsets = [0, 60], sizes = [8, 76], strides = [1, 1]} : vector<8x196xf32> to vector<8x76xf32>
    %194 = vector.extract_strided_slice %188 {offsets = [0, 64], sizes = [8, 76], strides = [1, 1]} : vector<8x196xf32> to vector<8x76xf32>
    %195 = vector.extract_strided_slice %188 {offsets = [0, 112], sizes = [8, 76], strides = [1, 1]} : vector<8x196xf32> to vector<8x76xf32>
    %196 = vector.extract_strided_slice %188 {offsets = [0, 116], sizes = [8, 76], strides = [1, 1]} : vector<8x196xf32> to vector<8x76xf32>
    %197 = vector.extract_strided_slice %188 {offsets = [0, 120], sizes = [8, 76], strides = [1, 1]} : vector<8x196xf32> to vector<8x76xf32>
    %198 = tpu.concatenate %189, %190, %191, %192, %193, %194, %195, %196, %197 in 0 : vector<8x76xf32>, vector<8x76xf32>, vector<8x76xf32>, vector<8x76xf32>, vector<8x76xf32>, vector<8x76xf32>, vector<8x76xf32>, vector<8x76xf32>, vector<8x76xf32> -> vector<72x76xf32>
    %c3 = arith.constant 3 : index
    %c0_93 = arith.constant 0 : index
    %c0_94 = arith.constant 0 : index
    %c0_95 = arith.constant 0 : index
    %199 = vector.load %arg3[%c3, %c0_93, %c0_94, %c0_95] : memref<4x3x16x72xf32, #tpu.memory_space<vmem>>, vector<1x1x16x72xf32>
    %200 = vector.shape_cast %199 : vector<1x1x16x72xf32> to vector<16x72xf32>
    %cst_96 = arith.constant dense<0.000000e+00> : vector<16x76xf32>
    %201 = tpu.matmul %200, %198, %cst_96 {dimension_numbers = #tpu.dot_dimension_numbers<[1], [0], [0], [1], [0, 0, 1, 1], [], []>} : vector<16x72xf32>, vector<72x76xf32>, vector<16x76xf32> -> vector<16x76xf32>
    %202 = arith.addf %183, %201 : vector<16x76xf32>
    %c0_i32_97 = arith.constant 0 : i32
    %203 = arith.addi %arg1, %c0_i32_97 : i32
    %c4_i32_98 = arith.constant 4 : i32
    %204 = arith.addi %203, %c4_i32_98 : i32
    %c0_99 = arith.constant 0 : index
    %205 = arith.index_cast %204 : i32 to index
    %c0_100 = arith.constant 0 : index
    %c0_101 = arith.constant 0 : index
    %206 = vector.load %arg2[%c0_99, %205, %c0_100, %c0_101] : memref<1x14x8x196xf32, #tpu.memory_space<vmem>>, vector<1x1x8x196xf32>
    %207 = vector.shape_cast %206 : vector<1x1x8x196xf32> to vector<8x196xf32>
    %208 = vector.extract_strided_slice %207 {offsets = [0, 0], sizes = [8, 76], strides = [1, 1]} : vector<8x196xf32> to vector<8x76xf32>
    %209 = vector.extract_strided_slice %207 {offsets = [0, 4], sizes = [8, 76], strides = [1, 1]} : vector<8x196xf32> to vector<8x76xf32>
    %210 = vector.extract_strided_slice %207 {offsets = [0, 8], sizes = [8, 76], strides = [1, 1]} : vector<8x196xf32> to vector<8x76xf32>
    %211 = vector.extract_strided_slice %207 {offsets = [0, 56], sizes = [8, 76], strides = [1, 1]} : vector<8x196xf32> to vector<8x76xf32>
    %212 = vector.extract_strided_slice %207 {offsets = [0, 60], sizes = [8, 76], strides = [1, 1]} : vector<8x196xf32> to vector<8x76xf32>
    %213 = vector.extract_strided_slice %207 {offsets = [0, 64], sizes = [8, 76], strides = [1, 1]} : vector<8x196xf32> to vector<8x76xf32>
    %214 = vector.extract_strided_slice %207 {offsets = [0, 112], sizes = [8, 76], strides = [1, 1]} : vector<8x196xf32> to vector<8x76xf32>
    %215 = vector.extract_strided_slice %207 {offsets = [0, 116], sizes = [8, 76], strides = [1, 1]} : vector<8x196xf32> to vector<8x76xf32>
    %216 = vector.extract_strided_slice %207 {offsets = [0, 120], sizes = [8, 76], strides = [1, 1]} : vector<8x196xf32> to vector<8x76xf32>
    %217 = tpu.concatenate %208, %209, %210, %211, %212, %213, %214, %215, %216 in 0 : vector<8x76xf32>, vector<8x76xf32>, vector<8x76xf32>, vector<8x76xf32>, vector<8x76xf32>, vector<8x76xf32>, vector<8x76xf32>, vector<8x76xf32>, vector<8x76xf32> -> vector<72x76xf32>
    %c3_102 = arith.constant 3 : index
    %c1_103 = arith.constant 1 : index
    %c0_104 = arith.constant 0 : index
    %c0_105 = arith.constant 0 : index
    %218 = vector.load %arg3[%c3_102, %c1_103, %c0_104, %c0_105] : memref<4x3x16x72xf32, #tpu.memory_space<vmem>>, vector<1x1x16x72xf32>
    %219 = vector.shape_cast %218 : vector<1x1x16x72xf32> to vector<16x72xf32>
    %cst_106 = arith.constant dense<0.000000e+00> : vector<16x76xf32>
    %220 = tpu.matmul %219, %217, %cst_106 {dimension_numbers = #tpu.dot_dimension_numbers<[1], [0], [0], [1], [0, 0, 1, 1], [], []>} : vector<16x72xf32>, vector<72x76xf32>, vector<16x76xf32> -> vector<16x76xf32>
    %221 = arith.addf %202, %220 : vector<16x76xf32>
    %c0_i32_107 = arith.constant 0 : i32
    %222 = arith.addi %arg1, %c0_i32_107 : i32
    %c8_i32 = arith.constant 8 : i32
    %223 = arith.addi %222, %c8_i32 : i32
    %c0_108 = arith.constant 0 : index
    %224 = arith.index_cast %223 : i32 to index
    %c0_109 = arith.constant 0 : index
    %c0_110 = arith.constant 0 : index
    %225 = vector.load %arg2[%c0_108, %224, %c0_109, %c0_110] : memref<1x14x8x196xf32, #tpu.memory_space<vmem>>, vector<1x1x8x196xf32>
    %226 = vector.shape_cast %225 : vector<1x1x8x196xf32> to vector<8x196xf32>
    %227 = vector.extract_strided_slice %226 {offsets = [0, 0], sizes = [8, 76], strides = [1, 1]} : vector<8x196xf32> to vector<8x76xf32>
    %228 = vector.extract_strided_slice %226 {offsets = [0, 4], sizes = [8, 76], strides = [1, 1]} : vector<8x196xf32> to vector<8x76xf32>
    %229 = vector.extract_strided_slice %226 {offsets = [0, 8], sizes = [8, 76], strides = [1, 1]} : vector<8x196xf32> to vector<8x76xf32>
    %230 = vector.extract_strided_slice %226 {offsets = [0, 56], sizes = [8, 76], strides = [1, 1]} : vector<8x196xf32> to vector<8x76xf32>
    %231 = vector.extract_strided_slice %226 {offsets = [0, 60], sizes = [8, 76], strides = [1, 1]} : vector<8x196xf32> to vector<8x76xf32>
    %232 = vector.extract_strided_slice %226 {offsets = [0, 64], sizes = [8, 76], strides = [1, 1]} : vector<8x196xf32> to vector<8x76xf32>
    %233 = vector.extract_strided_slice %226 {offsets = [0, 112], sizes = [8, 76], strides = [1, 1]} : vector<8x196xf32> to vector<8x76xf32>
    %234 = vector.extract_strided_slice %226 {offsets = [0, 116], sizes = [8, 76], strides = [1, 1]} : vector<8x196xf32> to vector<8x76xf32>
    %235 = vector.extract_strided_slice %226 {offsets = [0, 120], sizes = [8, 76], strides = [1, 1]} : vector<8x196xf32> to vector<8x76xf32>
    %236 = tpu.concatenate %227, %228, %229, %230, %231, %232, %233, %234, %235 in 0 : vector<8x76xf32>, vector<8x76xf32>, vector<8x76xf32>, vector<8x76xf32>, vector<8x76xf32>, vector<8x76xf32>, vector<8x76xf32>, vector<8x76xf32>, vector<8x76xf32> -> vector<72x76xf32>
    %c3_111 = arith.constant 3 : index
    %c2_112 = arith.constant 2 : index
    %c0_113 = arith.constant 0 : index
    %c0_114 = arith.constant 0 : index
    %237 = vector.load %arg3[%c3_111, %c2_112, %c0_113, %c0_114] : memref<4x3x16x72xf32, #tpu.memory_space<vmem>>, vector<1x1x16x72xf32>
    %238 = vector.shape_cast %237 : vector<1x1x16x72xf32> to vector<16x72xf32>
    %cst_115 = arith.constant dense<0.000000e+00> : vector<16x76xf32>
    %239 = tpu.matmul %238, %236, %cst_115 {dimension_numbers = #tpu.dot_dimension_numbers<[1], [0], [0], [1], [0, 0, 1, 1], [], []>} : vector<16x72xf32>, vector<72x76xf32>, vector<16x76xf32> -> vector<16x76xf32>
    %240 = arith.addf %221, %239 : vector<16x76xf32>
    %c48 = arith.constant 48 : index
    %c0_116 = arith.constant 0 : index
    %241 = vector.load %arg4[%c48, %c0_116] : memref<64x1xf32, #tpu.memory_space<vmem>>, vector<16x1xf32>
    %242 = vector.broadcast %241 : vector<16x1xf32> to vector<16x76xf32>
    %243 = arith.addf %240, %242 : vector<16x76xf32>
    %244 = tpu.concatenate %60, %121, %182, %243 in 0 : vector<16x76xf32>, vector<16x76xf32>, vector<16x76xf32>, vector<16x76xf32> -> vector<64x76xf32>
    %cst_117 = arith.constant 0.000000e+00 : f32
    %245 = vector.broadcast %cst_117 : f32 to vector<64x76xf32>
    %246 = arith.cmpf oge, %244, %245 : vector<64x76xf32>
    %cst_118 = arith.constant 1.000000e-01 : f32
    %247 = vector.broadcast %cst_118 : f32 to vector<64x76xf32>
    %248 = arith.mulf %247, %244 : vector<64x76xf32>
    %249 = arith.select %246, %244, %248 : vector<64x76xi1>, vector<64x76xf32>
    %c0_119 = arith.constant 0 : index
    %c0_120 = arith.constant 0 : index
    %c0_121 = arith.constant 0 : index
    %c0_122 = arith.constant 0 : index
    %250 = vector.load %arg5[%c0_119, %c0_120, %c0_121, %c0_122] : memref<1x1x64x84xf32, #tpu.memory_space<vmem>>, vector<1x1x64x76xf32>
    %251 = vector.shape_cast %250 : vector<1x1x64x76xf32> to vector<64x76xf32>
    %252 = vector.shape_cast %249 : vector<64x76xf32> to vector<1x1x64x76xf32>
    tpu.vector_store %arg5[%c0_119, %c0_120, %c0_121, %c0_122], %252 {strides = array<i32>} : memref<1x1x64x84xf32, #tpu.memory_space<vmem>>, vector<1x1x64x76xf32>,
    return
  }
  func.func @transform_0(%arg0: i32, %arg1: i32) -> (i32, i32, i32, i32) {
    %c0_i32 = arith.constant 0 : i32
    %c0_i32_0 = arith.constant 0 : i32
    %c0_i32_1 = arith.constant 0 : i32
    %c0_i32_2 = arith.constant 0 : i32
    return %arg0, %c0_i32, %c0_i32_0, %c0_i32_1 : i32, i32, i32, i32
  }
  func.func @transform_1(%arg0: i32, %arg1: i32) -> (i32, i32, i32, i32) {
    %c0_i32 = arith.constant 0 : i32
    %c0_i32_0 = arith.constant 0 : i32
    %c0_i32_1 = arith.constant 0 : i32
    %c0_i32_2 = arith.constant 0 : i32
    %c0_i32_3 = arith.constant 0 : i32
    return %c0_i32, %c0_i32_0, %c0_i32_1, %c0_i32_2 : i32, i32, i32, i32
  }
  func.func @transform_2(%arg0: i32, %arg1: i32) -> (i32, i32) {
    %c0_i32 = arith.constant 0 : i32
    %c0_i32_0 = arith.constant 0 : i32
    %c0_i32_1 = arith.constant 0 : i32
    return %c0_i32, %c0_i32_0 : i32, i32
  }
  func.func @transform_3(%arg0: i32, %arg1: i32) -> (i32, i32, i32, i32) {
    %c0_i32 = arith.constant 0 : i32
    %c0_i32_0 = arith.constant 0 : i32
    %c0_i32_1 = arith.constant 0 : i32
    return %arg0, %arg1, %c0_i32, %c0_i32_0 : i32, i32, i32, i32
  }
}

module attributes {stable_mosaic.version = 11 : i64} {
  func.func @_conv_plane_kernel(%arg0: i32, %arg1: i32, %arg2: memref<1x15x32x225xf32, #tpu.memory_space<vmem>>, %arg3: memref<1x4x4x512xf32, #tpu.memory_space<vmem>>, %arg4: memref<4x1xf32, #tpu.memory_space<vmem>>, %arg5: memref<1x1x4x180xf32, #tpu.memory_space<vmem>>) attributes {dimension_semantics = [#tpu.dimension_semantics<parallel>, #tpu.dimension_semantics<parallel>], iteration_bounds = array<i64: 2, 12>, scalar_prefetch = 0 : i64, scratch_operands = 0 : i64, tpu.core_type = #tpu.core_type<tc>, window_params = [{transform_indices = @transform_0, window_bounds = array<i64: 1, 15, 32, 225>}, {pipeline_mode = #tpu.pipeline_mode<synchronous>, transform_indices = @transform_1, window_bounds = array<i64: 1, 4, 4, 512>}, {pipeline_mode = #tpu.pipeline_mode<synchronous>, transform_indices = @transform_2, window_bounds = array<i64: 4, 1>}, {transform_indices = @transform_3, window_bounds = array<i64: 1, 1, 4, 180>}]} {
    %cst = arith.constant 0.000000e+00 : f32
    %0 = vector.broadcast %cst : f32 to vector<4x177xf32>
    %c0_i32 = arith.constant 0 : i32
    %1 = arith.addi %arg1, %c0_i32 : i32
    %c0_i32_0 = arith.constant 0 : i32
    %2 = arith.addi %1, %c0_i32_0 : i32
    %c0 = arith.constant 0 : index
    %3 = arith.index_cast %2 : i32 to index
    %c0_1 = arith.constant 0 : index
    %c0_2 = arith.constant 0 : index
    %4 = vector.load %arg2[%c0, %3, %c0_1, %c0_2] : memref<1x15x32x225xf32, #tpu.memory_space<vmem>>, vector<1x1x32x225xf32>
    %5 = vector.shape_cast %4 : vector<1x1x32x225xf32> to vector<32x225xf32>
    %6 = vector.extract_strided_slice %5 {offsets = [0, 0], sizes = [32, 177], strides = [1, 1]} : vector<32x225xf32> to vector<32x177xf32>
    %7 = vector.extract_strided_slice %5 {offsets = [0, 1], sizes = [32, 177], strides = [1, 1]} : vector<32x225xf32> to vector<32x177xf32>
    %8 = vector.extract_strided_slice %5 {offsets = [0, 2], sizes = [32, 177], strides = [1, 1]} : vector<32x225xf32> to vector<32x177xf32>
    %9 = vector.extract_strided_slice %5 {offsets = [0, 3], sizes = [32, 177], strides = [1, 1]} : vector<32x225xf32> to vector<32x177xf32>
    %10 = vector.extract_strided_slice %5 {offsets = [0, 15], sizes = [32, 177], strides = [1, 1]} : vector<32x225xf32> to vector<32x177xf32>
    %11 = vector.extract_strided_slice %5 {offsets = [0, 16], sizes = [32, 177], strides = [1, 1]} : vector<32x225xf32> to vector<32x177xf32>
    %12 = vector.extract_strided_slice %5 {offsets = [0, 17], sizes = [32, 177], strides = [1, 1]} : vector<32x225xf32> to vector<32x177xf32>
    %13 = vector.extract_strided_slice %5 {offsets = [0, 18], sizes = [32, 177], strides = [1, 1]} : vector<32x225xf32> to vector<32x177xf32>
    %14 = vector.extract_strided_slice %5 {offsets = [0, 30], sizes = [32, 177], strides = [1, 1]} : vector<32x225xf32> to vector<32x177xf32>
    %15 = vector.extract_strided_slice %5 {offsets = [0, 31], sizes = [32, 177], strides = [1, 1]} : vector<32x225xf32> to vector<32x177xf32>
    %16 = vector.extract_strided_slice %5 {offsets = [0, 32], sizes = [32, 177], strides = [1, 1]} : vector<32x225xf32> to vector<32x177xf32>
    %17 = vector.extract_strided_slice %5 {offsets = [0, 33], sizes = [32, 177], strides = [1, 1]} : vector<32x225xf32> to vector<32x177xf32>
    %18 = vector.extract_strided_slice %5 {offsets = [0, 45], sizes = [32, 177], strides = [1, 1]} : vector<32x225xf32> to vector<32x177xf32>
    %19 = vector.extract_strided_slice %5 {offsets = [0, 46], sizes = [32, 177], strides = [1, 1]} : vector<32x225xf32> to vector<32x177xf32>
    %20 = vector.extract_strided_slice %5 {offsets = [0, 47], sizes = [32, 177], strides = [1, 1]} : vector<32x225xf32> to vector<32x177xf32>
    %21 = vector.extract_strided_slice %5 {offsets = [0, 48], sizes = [32, 177], strides = [1, 1]} : vector<32x225xf32> to vector<32x177xf32>
    %22 = tpu.concatenate %6, %7, %8, %9, %10, %11, %12, %13, %14, %15, %16, %17, %18, %19, %20, %21 in 0 : vector<32x177xf32>, vector<32x177xf32>, vector<32x177xf32>, vector<32x177xf32>, vector<32x177xf32>, vector<32x177xf32>, vector<32x177xf32>, vector<32x177xf32>, vector<32x177xf32>, vector<32x177xf32>, vector<32x177xf32>, vector<32x177xf32>, vector<32x177xf32>, vector<32x177xf32>, vector<32x177xf32>, vector<32x177xf32> -> vector<512x177xf32>
    %c0_3 = arith.constant 0 : index
    %c0_4 = arith.constant 0 : index
    %c0_5 = arith.constant 0 : index
    %c0_6 = arith.constant 0 : index
    %23 = vector.load %arg3[%c0_3, %c0_4, %c0_5, %c0_6] : memref<1x4x4x512xf32, #tpu.memory_space<vmem>>, vector<1x1x4x512xf32>
    %24 = vector.shape_cast %23 : vector<1x1x4x512xf32> to vector<4x512xf32>
    %cst_7 = arith.constant dense<0.000000e+00> : vector<4x177xf32>
    %25 = tpu.matmul %24, %22, %cst_7 {dimension_numbers = #tpu.dot_dimension_numbers<[1], [0], [0], [1], [0, 0, 1, 1], [], []>} : vector<4x512xf32>, vector<512x177xf32>, vector<4x177xf32> -> vector<4x177xf32>
    %26 = arith.addf %0, %25 : vector<4x177xf32>
    %c0_i32_8 = arith.constant 0 : i32
    %27 = arith.addi %arg1, %c0_i32_8 : i32
    %c1_i32 = arith.constant 1 : i32
    %28 = arith.addi %27, %c1_i32 : i32
    %c0_9 = arith.constant 0 : index
    %29 = arith.index_cast %28 : i32 to index
    %c0_10 = arith.constant 0 : index
    %c0_11 = arith.constant 0 : index
    %30 = vector.load %arg2[%c0_9, %29, %c0_10, %c0_11] : memref<1x15x32x225xf32, #tpu.memory_space<vmem>>, vector<1x1x32x225xf32>
    %31 = vector.shape_cast %30 : vector<1x1x32x225xf32> to vector<32x225xf32>
    %32 = vector.extract_strided_slice %31 {offsets = [0, 0], sizes = [32, 177], strides = [1, 1]} : vector<32x225xf32> to vector<32x177xf32>
    %33 = vector.extract_strided_slice %31 {offsets = [0, 1], sizes = [32, 177], strides = [1, 1]} : vector<32x225xf32> to vector<32x177xf32>
    %34 = vector.extract_strided_slice %31 {offsets = [0, 2], sizes = [32, 177], strides = [1, 1]} : vector<32x225xf32> to vector<32x177xf32>
    %35 = vector.extract_strided_slice %31 {offsets = [0, 3], sizes = [32, 177], strides = [1, 1]} : vector<32x225xf32> to vector<32x177xf32>
    %36 = vector.extract_strided_slice %31 {offsets = [0, 15], sizes = [32, 177], strides = [1, 1]} : vector<32x225xf32> to vector<32x177xf32>
    %37 = vector.extract_strided_slice %31 {offsets = [0, 16], sizes = [32, 177], strides = [1, 1]} : vector<32x225xf32> to vector<32x177xf32>
    %38 = vector.extract_strided_slice %31 {offsets = [0, 17], sizes = [32, 177], strides = [1, 1]} : vector<32x225xf32> to vector<32x177xf32>
    %39 = vector.extract_strided_slice %31 {offsets = [0, 18], sizes = [32, 177], strides = [1, 1]} : vector<32x225xf32> to vector<32x177xf32>
    %40 = vector.extract_strided_slice %31 {offsets = [0, 30], sizes = [32, 177], strides = [1, 1]} : vector<32x225xf32> to vector<32x177xf32>
    %41 = vector.extract_strided_slice %31 {offsets = [0, 31], sizes = [32, 177], strides = [1, 1]} : vector<32x225xf32> to vector<32x177xf32>
    %42 = vector.extract_strided_slice %31 {offsets = [0, 32], sizes = [32, 177], strides = [1, 1]} : vector<32x225xf32> to vector<32x177xf32>
    %43 = vector.extract_strided_slice %31 {offsets = [0, 33], sizes = [32, 177], strides = [1, 1]} : vector<32x225xf32> to vector<32x177xf32>
    %44 = vector.extract_strided_slice %31 {offsets = [0, 45], sizes = [32, 177], strides = [1, 1]} : vector<32x225xf32> to vector<32x177xf32>
    %45 = vector.extract_strided_slice %31 {offsets = [0, 46], sizes = [32, 177], strides = [1, 1]} : vector<32x225xf32> to vector<32x177xf32>
    %46 = vector.extract_strided_slice %31 {offsets = [0, 47], sizes = [32, 177], strides = [1, 1]} : vector<32x225xf32> to vector<32x177xf32>
    %47 = vector.extract_strided_slice %31 {offsets = [0, 48], sizes = [32, 177], strides = [1, 1]} : vector<32x225xf32> to vector<32x177xf32>
    %48 = tpu.concatenate %32, %33, %34, %35, %36, %37, %38, %39, %40, %41, %42, %43, %44, %45, %46, %47 in 0 : vector<32x177xf32>, vector<32x177xf32>, vector<32x177xf32>, vector<32x177xf32>, vector<32x177xf32>, vector<32x177xf32>, vector<32x177xf32>, vector<32x177xf32>, vector<32x177xf32>, vector<32x177xf32>, vector<32x177xf32>, vector<32x177xf32>, vector<32x177xf32>, vector<32x177xf32>, vector<32x177xf32>, vector<32x177xf32> -> vector<512x177xf32>
    %c0_12 = arith.constant 0 : index
    %c1 = arith.constant 1 : index
    %c0_13 = arith.constant 0 : index
    %c0_14 = arith.constant 0 : index
    %49 = vector.load %arg3[%c0_12, %c1, %c0_13, %c0_14] : memref<1x4x4x512xf32, #tpu.memory_space<vmem>>, vector<1x1x4x512xf32>
    %50 = vector.shape_cast %49 : vector<1x1x4x512xf32> to vector<4x512xf32>
    %cst_15 = arith.constant dense<0.000000e+00> : vector<4x177xf32>
    %51 = tpu.matmul %50, %48, %cst_15 {dimension_numbers = #tpu.dot_dimension_numbers<[1], [0], [0], [1], [0, 0, 1, 1], [], []>} : vector<4x512xf32>, vector<512x177xf32>, vector<4x177xf32> -> vector<4x177xf32>
    %52 = arith.addf %26, %51 : vector<4x177xf32>
    %c0_i32_16 = arith.constant 0 : i32
    %53 = arith.addi %arg1, %c0_i32_16 : i32
    %c2_i32 = arith.constant 2 : i32
    %54 = arith.addi %53, %c2_i32 : i32
    %c0_17 = arith.constant 0 : index
    %55 = arith.index_cast %54 : i32 to index
    %c0_18 = arith.constant 0 : index
    %c0_19 = arith.constant 0 : index
    %56 = vector.load %arg2[%c0_17, %55, %c0_18, %c0_19] : memref<1x15x32x225xf32, #tpu.memory_space<vmem>>, vector<1x1x32x225xf32>
    %57 = vector.shape_cast %56 : vector<1x1x32x225xf32> to vector<32x225xf32>
    %58 = vector.extract_strided_slice %57 {offsets = [0, 0], sizes = [32, 177], strides = [1, 1]} : vector<32x225xf32> to vector<32x177xf32>
    %59 = vector.extract_strided_slice %57 {offsets = [0, 1], sizes = [32, 177], strides = [1, 1]} : vector<32x225xf32> to vector<32x177xf32>
    %60 = vector.extract_strided_slice %57 {offsets = [0, 2], sizes = [32, 177], strides = [1, 1]} : vector<32x225xf32> to vector<32x177xf32>
    %61 = vector.extract_strided_slice %57 {offsets = [0, 3], sizes = [32, 177], strides = [1, 1]} : vector<32x225xf32> to vector<32x177xf32>
    %62 = vector.extract_strided_slice %57 {offsets = [0, 15], sizes = [32, 177], strides = [1, 1]} : vector<32x225xf32> to vector<32x177xf32>
    %63 = vector.extract_strided_slice %57 {offsets = [0, 16], sizes = [32, 177], strides = [1, 1]} : vector<32x225xf32> to vector<32x177xf32>
    %64 = vector.extract_strided_slice %57 {offsets = [0, 17], sizes = [32, 177], strides = [1, 1]} : vector<32x225xf32> to vector<32x177xf32>
    %65 = vector.extract_strided_slice %57 {offsets = [0, 18], sizes = [32, 177], strides = [1, 1]} : vector<32x225xf32> to vector<32x177xf32>
    %66 = vector.extract_strided_slice %57 {offsets = [0, 30], sizes = [32, 177], strides = [1, 1]} : vector<32x225xf32> to vector<32x177xf32>
    %67 = vector.extract_strided_slice %57 {offsets = [0, 31], sizes = [32, 177], strides = [1, 1]} : vector<32x225xf32> to vector<32x177xf32>
    %68 = vector.extract_strided_slice %57 {offsets = [0, 32], sizes = [32, 177], strides = [1, 1]} : vector<32x225xf32> to vector<32x177xf32>
    %69 = vector.extract_strided_slice %57 {offsets = [0, 33], sizes = [32, 177], strides = [1, 1]} : vector<32x225xf32> to vector<32x177xf32>
    %70 = vector.extract_strided_slice %57 {offsets = [0, 45], sizes = [32, 177], strides = [1, 1]} : vector<32x225xf32> to vector<32x177xf32>
    %71 = vector.extract_strided_slice %57 {offsets = [0, 46], sizes = [32, 177], strides = [1, 1]} : vector<32x225xf32> to vector<32x177xf32>
    %72 = vector.extract_strided_slice %57 {offsets = [0, 47], sizes = [32, 177], strides = [1, 1]} : vector<32x225xf32> to vector<32x177xf32>
    %73 = vector.extract_strided_slice %57 {offsets = [0, 48], sizes = [32, 177], strides = [1, 1]} : vector<32x225xf32> to vector<32x177xf32>
    %74 = tpu.concatenate %58, %59, %60, %61, %62, %63, %64, %65, %66, %67, %68, %69, %70, %71, %72, %73 in 0 : vector<32x177xf32>, vector<32x177xf32>, vector<32x177xf32>, vector<32x177xf32>, vector<32x177xf32>, vector<32x177xf32>, vector<32x177xf32>, vector<32x177xf32>, vector<32x177xf32>, vector<32x177xf32>, vector<32x177xf32>, vector<32x177xf32>, vector<32x177xf32>, vector<32x177xf32>, vector<32x177xf32>, vector<32x177xf32> -> vector<512x177xf32>
    %c0_20 = arith.constant 0 : index
    %c2 = arith.constant 2 : index
    %c0_21 = arith.constant 0 : index
    %c0_22 = arith.constant 0 : index
    %75 = vector.load %arg3[%c0_20, %c2, %c0_21, %c0_22] : memref<1x4x4x512xf32, #tpu.memory_space<vmem>>, vector<1x1x4x512xf32>
    %76 = vector.shape_cast %75 : vector<1x1x4x512xf32> to vector<4x512xf32>
    %cst_23 = arith.constant dense<0.000000e+00> : vector<4x177xf32>
    %77 = tpu.matmul %76, %74, %cst_23 {dimension_numbers = #tpu.dot_dimension_numbers<[1], [0], [0], [1], [0, 0, 1, 1], [], []>} : vector<4x512xf32>, vector<512x177xf32>, vector<4x177xf32> -> vector<4x177xf32>
    %78 = arith.addf %52, %77 : vector<4x177xf32>
    %c0_i32_24 = arith.constant 0 : i32
    %79 = arith.addi %arg1, %c0_i32_24 : i32
    %c3_i32 = arith.constant 3 : i32
    %80 = arith.addi %79, %c3_i32 : i32
    %c0_25 = arith.constant 0 : index
    %81 = arith.index_cast %80 : i32 to index
    %c0_26 = arith.constant 0 : index
    %c0_27 = arith.constant 0 : index
    %82 = vector.load %arg2[%c0_25, %81, %c0_26, %c0_27] : memref<1x15x32x225xf32, #tpu.memory_space<vmem>>, vector<1x1x32x225xf32>
    %83 = vector.shape_cast %82 : vector<1x1x32x225xf32> to vector<32x225xf32>
    %84 = vector.extract_strided_slice %83 {offsets = [0, 0], sizes = [32, 177], strides = [1, 1]} : vector<32x225xf32> to vector<32x177xf32>
    %85 = vector.extract_strided_slice %83 {offsets = [0, 1], sizes = [32, 177], strides = [1, 1]} : vector<32x225xf32> to vector<32x177xf32>
    %86 = vector.extract_strided_slice %83 {offsets = [0, 2], sizes = [32, 177], strides = [1, 1]} : vector<32x225xf32> to vector<32x177xf32>
    %87 = vector.extract_strided_slice %83 {offsets = [0, 3], sizes = [32, 177], strides = [1, 1]} : vector<32x225xf32> to vector<32x177xf32>
    %88 = vector.extract_strided_slice %83 {offsets = [0, 15], sizes = [32, 177], strides = [1, 1]} : vector<32x225xf32> to vector<32x177xf32>
    %89 = vector.extract_strided_slice %83 {offsets = [0, 16], sizes = [32, 177], strides = [1, 1]} : vector<32x225xf32> to vector<32x177xf32>
    %90 = vector.extract_strided_slice %83 {offsets = [0, 17], sizes = [32, 177], strides = [1, 1]} : vector<32x225xf32> to vector<32x177xf32>
    %91 = vector.extract_strided_slice %83 {offsets = [0, 18], sizes = [32, 177], strides = [1, 1]} : vector<32x225xf32> to vector<32x177xf32>
    %92 = vector.extract_strided_slice %83 {offsets = [0, 30], sizes = [32, 177], strides = [1, 1]} : vector<32x225xf32> to vector<32x177xf32>
    %93 = vector.extract_strided_slice %83 {offsets = [0, 31], sizes = [32, 177], strides = [1, 1]} : vector<32x225xf32> to vector<32x177xf32>
    %94 = vector.extract_strided_slice %83 {offsets = [0, 32], sizes = [32, 177], strides = [1, 1]} : vector<32x225xf32> to vector<32x177xf32>
    %95 = vector.extract_strided_slice %83 {offsets = [0, 33], sizes = [32, 177], strides = [1, 1]} : vector<32x225xf32> to vector<32x177xf32>
    %96 = vector.extract_strided_slice %83 {offsets = [0, 45], sizes = [32, 177], strides = [1, 1]} : vector<32x225xf32> to vector<32x177xf32>
    %97 = vector.extract_strided_slice %83 {offsets = [0, 46], sizes = [32, 177], strides = [1, 1]} : vector<32x225xf32> to vector<32x177xf32>
    %98 = vector.extract_strided_slice %83 {offsets = [0, 47], sizes = [32, 177], strides = [1, 1]} : vector<32x225xf32> to vector<32x177xf32>
    %99 = vector.extract_strided_slice %83 {offsets = [0, 48], sizes = [32, 177], strides = [1, 1]} : vector<32x225xf32> to vector<32x177xf32>
    %100 = tpu.concatenate %84, %85, %86, %87, %88, %89, %90, %91, %92, %93, %94, %95, %96, %97, %98, %99 in 0 : vector<32x177xf32>, vector<32x177xf32>, vector<32x177xf32>, vector<32x177xf32>, vector<32x177xf32>, vector<32x177xf32>, vector<32x177xf32>, vector<32x177xf32>, vector<32x177xf32>, vector<32x177xf32>, vector<32x177xf32>, vector<32x177xf32>, vector<32x177xf32>, vector<32x177xf32>, vector<32x177xf32>, vector<32x177xf32> -> vector<512x177xf32>
    %c0_28 = arith.constant 0 : index
    %c3 = arith.constant 3 : index
    %c0_29 = arith.constant 0 : index
    %c0_30 = arith.constant 0 : index
    %101 = vector.load %arg3[%c0_28, %c3, %c0_29, %c0_30] : memref<1x4x4x512xf32, #tpu.memory_space<vmem>>, vector<1x1x4x512xf32>
    %102 = vector.shape_cast %101 : vector<1x1x4x512xf32> to vector<4x512xf32>
    %cst_31 = arith.constant dense<0.000000e+00> : vector<4x177xf32>
    %103 = tpu.matmul %102, %100, %cst_31 {dimension_numbers = #tpu.dot_dimension_numbers<[1], [0], [0], [1], [0, 0, 1, 1], [], []>} : vector<4x512xf32>, vector<512x177xf32>, vector<4x177xf32> -> vector<4x177xf32>
    %104 = arith.addf %78, %103 : vector<4x177xf32>
    %c0_32 = arith.constant 0 : index
    %c0_33 = arith.constant 0 : index
    %105 = vector.load %arg4[%c0_32, %c0_33] : memref<4x1xf32, #tpu.memory_space<vmem>>, vector<4x1xf32>
    %106 = vector.broadcast %105 : vector<4x1xf32> to vector<4x177xf32>
    %107 = arith.addf %104, %106 : vector<4x177xf32>
    %c0_34 = arith.constant 0 : index
    %c0_35 = arith.constant 0 : index
    %c0_36 = arith.constant 0 : index
    %c0_37 = arith.constant 0 : index
    %108 = vector.load %arg5[%c0_34, %c0_35, %c0_36, %c0_37] : memref<1x1x4x180xf32, #tpu.memory_space<vmem>>, vector<1x1x4x177xf32>
    %109 = vector.shape_cast %108 : vector<1x1x4x177xf32> to vector<4x177xf32>
    %110 = vector.shape_cast %107 : vector<4x177xf32> to vector<1x1x4x177xf32>
    tpu.vector_store %arg5[%c0_34, %c0_35, %c0_36, %c0_37], %110 {strides = array<i32>} : memref<1x1x4x180xf32, #tpu.memory_space<vmem>>, vector<1x1x4x177xf32>,
    return
  }
  func.func @transform_0(%arg0: i32, %arg1: i32) -> (i32, i32, i32, i32) {
    %c0_i32 = arith.constant 0 : i32
    %c0_i32_0 = arith.constant 0 : i32
    %c0_i32_1 = arith.constant 0 : i32
    %c0_i32_2 = arith.constant 0 : i32
    return %arg0, %c0_i32, %c0_i32_0, %c0_i32_1 : i32, i32, i32, i32
  }
  func.func @transform_1(%arg0: i32, %arg1: i32) -> (i32, i32, i32, i32) {
    %c0_i32 = arith.constant 0 : i32
    %c0_i32_0 = arith.constant 0 : i32
    %c0_i32_1 = arith.constant 0 : i32
    %c0_i32_2 = arith.constant 0 : i32
    %c0_i32_3 = arith.constant 0 : i32
    return %c0_i32, %c0_i32_0, %c0_i32_1, %c0_i32_2 : i32, i32, i32, i32
  }
  func.func @transform_2(%arg0: i32, %arg1: i32) -> (i32, i32) {
    %c0_i32 = arith.constant 0 : i32
    %c0_i32_0 = arith.constant 0 : i32
    %c0_i32_1 = arith.constant 0 : i32
    return %c0_i32, %c0_i32_0 : i32, i32
  }
  func.func @transform_3(%arg0: i32, %arg1: i32) -> (i32, i32, i32, i32) {
    %c0_i32 = arith.constant 0 : i32
    %c0_i32_0 = arith.constant 0 : i32
    %c0_i32_1 = arith.constant 0 : i32
    return %arg0, %arg1, %c0_i32, %c0_i32_0 : i32, i32, i32, i32
  }
}

module attributes {stable_mosaic.version = 11 : i64} {
  func.func @_conv_plane_kernel(%arg0: i32, %arg1: i32, %arg2: memref<1x14x8x196xf32, #tpu.memory_space<vmem>>, %arg3: memref<1x3x8x72xf32, #tpu.memory_space<vmem>>, %arg4: memref<8x1xf32, #tpu.memory_space<vmem>>, %arg5: memref<1x1x8x168xf32, #tpu.memory_space<vmem>>, %arg6: memref<1x1x8x168xf32, #tpu.memory_space<vmem>>) attributes {dimension_semantics = [#tpu.dimension_semantics<parallel>, #tpu.dimension_semantics<parallel>], iteration_bounds = array<i64: 2, 12>, scalar_prefetch = 0 : i64, scratch_operands = 0 : i64, tpu.core_type = #tpu.core_type<tc>, window_params = [{transform_indices = @transform_0, window_bounds = array<i64: 1, 14, 8, 196>}, {pipeline_mode = #tpu.pipeline_mode<synchronous>, transform_indices = @transform_1, window_bounds = array<i64: 1, 3, 8, 72>}, {pipeline_mode = #tpu.pipeline_mode<synchronous>, transform_indices = @transform_2, window_bounds = array<i64: 8, 1>}, {transform_indices = @transform_3, window_bounds = array<i64: 1, 1, 8, 168>}, {transform_indices = @transform_4, window_bounds = array<i64: 1, 1, 8, 168>}]} {
    %cst = arith.constant 0.000000e+00 : f32
    %0 = vector.broadcast %cst : f32 to vector<8x166xf32>
    %c0_i32 = arith.constant 0 : i32
    %1 = arith.addi %arg1, %c0_i32 : i32
    %c0_i32_0 = arith.constant 0 : i32
    %2 = arith.addi %1, %c0_i32_0 : i32
    %c0 = arith.constant 0 : index
    %3 = arith.index_cast %2 : i32 to index
    %c0_1 = arith.constant 0 : index
    %c0_2 = arith.constant 0 : index
    %4 = vector.load %arg2[%c0, %3, %c0_1, %c0_2] : memref<1x14x8x196xf32, #tpu.memory_space<vmem>>, vector<1x1x8x196xf32>
    %5 = vector.shape_cast %4 : vector<1x1x8x196xf32> to vector<8x196xf32>
    %6 = vector.extract_strided_slice %5 {offsets = [0, 0], sizes = [8, 166], strides = [1, 1]} : vector<8x196xf32> to vector<8x166xf32>
    %7 = vector.extract_strided_slice %5 {offsets = [0, 1], sizes = [8, 166], strides = [1, 1]} : vector<8x196xf32> to vector<8x166xf32>
    %8 = vector.extract_strided_slice %5 {offsets = [0, 2], sizes = [8, 166], strides = [1, 1]} : vector<8x196xf32> to vector<8x166xf32>
    %9 = vector.extract_strided_slice %5 {offsets = [0, 14], sizes = [8, 166], strides = [1, 1]} : vector<8x196xf32> to vector<8x166xf32>
    %10 = vector.extract_strided_slice %5 {offsets = [0, 15], sizes = [8, 166], strides = [1, 1]} : vector<8x196xf32> to vector<8x166xf32>
    %11 = vector.extract_strided_slice %5 {offsets = [0, 16], sizes = [8, 166], strides = [1, 1]} : vector<8x196xf32> to vector<8x166xf32>
    %12 = vector.extract_strided_slice %5 {offsets = [0, 28], sizes = [8, 166], strides = [1, 1]} : vector<8x196xf32> to vector<8x166xf32>
    %13 = vector.extract_strided_slice %5 {offsets = [0, 29], sizes = [8, 166], strides = [1, 1]} : vector<8x196xf32> to vector<8x166xf32>
    %14 = vector.extract_strided_slice %5 {offsets = [0, 30], sizes = [8, 166], strides = [1, 1]} : vector<8x196xf32> to vector<8x166xf32>
    %15 = tpu.concatenate %6, %7, %8, %9, %10, %11, %12, %13, %14 in 0 : vector<8x166xf32>, vector<8x166xf32>, vector<8x166xf32>, vector<8x166xf32>, vector<8x166xf32>, vector<8x166xf32>, vector<8x166xf32>, vector<8x166xf32>, vector<8x166xf32> -> vector<72x166xf32>
    %c0_3 = arith.constant 0 : index
    %c0_4 = arith.constant 0 : index
    %c0_5 = arith.constant 0 : index
    %c0_6 = arith.constant 0 : index
    %16 = vector.load %arg3[%c0_3, %c0_4, %c0_5, %c0_6] : memref<1x3x8x72xf32, #tpu.memory_space<vmem>>, vector<1x1x8x72xf32>
    %17 = vector.shape_cast %16 : vector<1x1x8x72xf32> to vector<8x72xf32>
    %cst_7 = arith.constant dense<0.000000e+00> : vector<8x166xf32>
    %18 = tpu.matmul %17, %15, %cst_7 {dimension_numbers = #tpu.dot_dimension_numbers<[1], [0], [0], [1], [0, 0, 1, 1], [], []>} : vector<8x72xf32>, vector<72x166xf32>, vector<8x166xf32> -> vector<8x166xf32>
    %19 = arith.addf %0, %18 : vector<8x166xf32>
    %c0_i32_8 = arith.constant 0 : i32
    %20 = arith.addi %arg1, %c0_i32_8 : i32
    %c1_i32 = arith.constant 1 : i32
    %21 = arith.addi %20, %c1_i32 : i32
    %c0_9 = arith.constant 0 : index
    %22 = arith.index_cast %21 : i32 to index
    %c0_10 = arith.constant 0 : index
    %c0_11 = arith.constant 0 : index
    %23 = vector.load %arg2[%c0_9, %22, %c0_10, %c0_11] : memref<1x14x8x196xf32, #tpu.memory_space<vmem>>, vector<1x1x8x196xf32>
    %24 = vector.shape_cast %23 : vector<1x1x8x196xf32> to vector<8x196xf32>
    %25 = vector.extract_strided_slice %24 {offsets = [0, 0], sizes = [8, 166], strides = [1, 1]} : vector<8x196xf32> to vector<8x166xf32>
    %26 = vector.extract_strided_slice %24 {offsets = [0, 1], sizes = [8, 166], strides = [1, 1]} : vector<8x196xf32> to vector<8x166xf32>
    %27 = vector.extract_strided_slice %24 {offsets = [0, 2], sizes = [8, 166], strides = [1, 1]} : vector<8x196xf32> to vector<8x166xf32>
    %28 = vector.extract_strided_slice %24 {offsets = [0, 14], sizes = [8, 166], strides = [1, 1]} : vector<8x196xf32> to vector<8x166xf32>
    %29 = vector.extract_strided_slice %24 {offsets = [0, 15], sizes = [8, 166], strides = [1, 1]} : vector<8x196xf32> to vector<8x166xf32>
    %30 = vector.extract_strided_slice %24 {offsets = [0, 16], sizes = [8, 166], strides = [1, 1]} : vector<8x196xf32> to vector<8x166xf32>
    %31 = vector.extract_strided_slice %24 {offsets = [0, 28], sizes = [8, 166], strides = [1, 1]} : vector<8x196xf32> to vector<8x166xf32>
    %32 = vector.extract_strided_slice %24 {offsets = [0, 29], sizes = [8, 166], strides = [1, 1]} : vector<8x196xf32> to vector<8x166xf32>
    %33 = vector.extract_strided_slice %24 {offsets = [0, 30], sizes = [8, 166], strides = [1, 1]} : vector<8x196xf32> to vector<8x166xf32>
    %34 = tpu.concatenate %25, %26, %27, %28, %29, %30, %31, %32, %33 in 0 : vector<8x166xf32>, vector<8x166xf32>, vector<8x166xf32>, vector<8x166xf32>, vector<8x166xf32>, vector<8x166xf32>, vector<8x166xf32>, vector<8x166xf32>, vector<8x166xf32> -> vector<72x166xf32>
    %c0_12 = arith.constant 0 : index
    %c1 = arith.constant 1 : index
    %c0_13 = arith.constant 0 : index
    %c0_14 = arith.constant 0 : index
    %35 = vector.load %arg3[%c0_12, %c1, %c0_13, %c0_14] : memref<1x3x8x72xf32, #tpu.memory_space<vmem>>, vector<1x1x8x72xf32>
    %36 = vector.shape_cast %35 : vector<1x1x8x72xf32> to vector<8x72xf32>
    %cst_15 = arith.constant dense<0.000000e+00> : vector<8x166xf32>
    %37 = tpu.matmul %36, %34, %cst_15 {dimension_numbers = #tpu.dot_dimension_numbers<[1], [0], [0], [1], [0, 0, 1, 1], [], []>} : vector<8x72xf32>, vector<72x166xf32>, vector<8x166xf32> -> vector<8x166xf32>
    %38 = arith.addf %19, %37 : vector<8x166xf32>
    %c0_i32_16 = arith.constant 0 : i32
    %39 = arith.addi %arg1, %c0_i32_16 : i32
    %c2_i32 = arith.constant 2 : i32
    %40 = arith.addi %39, %c2_i32 : i32
    %c0_17 = arith.constant 0 : index
    %41 = arith.index_cast %40 : i32 to index
    %c0_18 = arith.constant 0 : index
    %c0_19 = arith.constant 0 : index
    %42 = vector.load %arg2[%c0_17, %41, %c0_18, %c0_19] : memref<1x14x8x196xf32, #tpu.memory_space<vmem>>, vector<1x1x8x196xf32>
    %43 = vector.shape_cast %42 : vector<1x1x8x196xf32> to vector<8x196xf32>
    %44 = vector.extract_strided_slice %43 {offsets = [0, 0], sizes = [8, 166], strides = [1, 1]} : vector<8x196xf32> to vector<8x166xf32>
    %45 = vector.extract_strided_slice %43 {offsets = [0, 1], sizes = [8, 166], strides = [1, 1]} : vector<8x196xf32> to vector<8x166xf32>
    %46 = vector.extract_strided_slice %43 {offsets = [0, 2], sizes = [8, 166], strides = [1, 1]} : vector<8x196xf32> to vector<8x166xf32>
    %47 = vector.extract_strided_slice %43 {offsets = [0, 14], sizes = [8, 166], strides = [1, 1]} : vector<8x196xf32> to vector<8x166xf32>
    %48 = vector.extract_strided_slice %43 {offsets = [0, 15], sizes = [8, 166], strides = [1, 1]} : vector<8x196xf32> to vector<8x166xf32>
    %49 = vector.extract_strided_slice %43 {offsets = [0, 16], sizes = [8, 166], strides = [1, 1]} : vector<8x196xf32> to vector<8x166xf32>
    %50 = vector.extract_strided_slice %43 {offsets = [0, 28], sizes = [8, 166], strides = [1, 1]} : vector<8x196xf32> to vector<8x166xf32>
    %51 = vector.extract_strided_slice %43 {offsets = [0, 29], sizes = [8, 166], strides = [1, 1]} : vector<8x196xf32> to vector<8x166xf32>
    %52 = vector.extract_strided_slice %43 {offsets = [0, 30], sizes = [8, 166], strides = [1, 1]} : vector<8x196xf32> to vector<8x166xf32>
    %53 = tpu.concatenate %44, %45, %46, %47, %48, %49, %50, %51, %52 in 0 : vector<8x166xf32>, vector<8x166xf32>, vector<8x166xf32>, vector<8x166xf32>, vector<8x166xf32>, vector<8x166xf32>, vector<8x166xf32>, vector<8x166xf32>, vector<8x166xf32> -> vector<72x166xf32>
    %c0_20 = arith.constant 0 : index
    %c2 = arith.constant 2 : index
    %c0_21 = arith.constant 0 : index
    %c0_22 = arith.constant 0 : index
    %54 = vector.load %arg3[%c0_20, %c2, %c0_21, %c0_22] : memref<1x3x8x72xf32, #tpu.memory_space<vmem>>, vector<1x1x8x72xf32>
    %55 = vector.shape_cast %54 : vector<1x1x8x72xf32> to vector<8x72xf32>
    %cst_23 = arith.constant dense<0.000000e+00> : vector<8x166xf32>
    %56 = tpu.matmul %55, %53, %cst_23 {dimension_numbers = #tpu.dot_dimension_numbers<[1], [0], [0], [1], [0, 0, 1, 1], [], []>} : vector<8x72xf32>, vector<72x166xf32>, vector<8x166xf32> -> vector<8x166xf32>
    %57 = arith.addf %38, %56 : vector<8x166xf32>
    %c0_24 = arith.constant 0 : index
    %c0_25 = arith.constant 0 : index
    %58 = vector.load %arg4[%c0_24, %c0_25] : memref<8x1xf32, #tpu.memory_space<vmem>>, vector<8x1xf32>
    %59 = vector.broadcast %58 : vector<8x1xf32> to vector<8x166xf32>
    %60 = arith.addf %57, %59 : vector<8x166xf32>
    %c0_26 = arith.constant 0 : index
    %c0_27 = arith.constant 0 : index
    %c0_28 = arith.constant 0 : index
    %c0_29 = arith.constant 0 : index
    %61 = vector.load %arg5[%c0_26, %c0_27, %c0_28, %c0_29] : memref<1x1x8x168xf32, #tpu.memory_space<vmem>>, vector<1x1x8x166xf32>
    %62 = vector.shape_cast %61 : vector<1x1x8x166xf32> to vector<8x166xf32>
    %63 = arith.addf %60, %62 : vector<8x166xf32>
    %c0_30 = arith.constant 0 : index
    %c0_31 = arith.constant 0 : index
    %c0_32 = arith.constant 0 : index
    %c0_33 = arith.constant 0 : index
    %64 = vector.load %arg6[%c0_30, %c0_31, %c0_32, %c0_33] : memref<1x1x8x168xf32, #tpu.memory_space<vmem>>, vector<1x1x8x166xf32>
    %65 = vector.shape_cast %64 : vector<1x1x8x166xf32> to vector<8x166xf32>
    %66 = vector.shape_cast %63 : vector<8x166xf32> to vector<1x1x8x166xf32>
    tpu.vector_store %arg6[%c0_30, %c0_31, %c0_32, %c0_33], %66 {strides = array<i32>} : memref<1x1x8x168xf32, #tpu.memory_space<vmem>>, vector<1x1x8x166xf32>,
    return
  }
  func.func @transform_0(%arg0: i32, %arg1: i32) -> (i32, i32, i32, i32) {
    %c0_i32 = arith.constant 0 : i32
    %c0_i32_0 = arith.constant 0 : i32
    %c0_i32_1 = arith.constant 0 : i32
    %c0_i32_2 = arith.constant 0 : i32
    return %arg0, %c0_i32, %c0_i32_0, %c0_i32_1 : i32, i32, i32, i32
  }
  func.func @transform_1(%arg0: i32, %arg1: i32) -> (i32, i32, i32, i32) {
    %c0_i32 = arith.constant 0 : i32
    %c0_i32_0 = arith.constant 0 : i32
    %c0_i32_1 = arith.constant 0 : i32
    %c0_i32_2 = arith.constant 0 : i32
    %c0_i32_3 = arith.constant 0 : i32
    return %c0_i32, %c0_i32_0, %c0_i32_1, %c0_i32_2 : i32, i32, i32, i32
  }
  func.func @transform_2(%arg0: i32, %arg1: i32) -> (i32, i32) {
    %c0_i32 = arith.constant 0 : i32
    %c0_i32_0 = arith.constant 0 : i32
    %c0_i32_1 = arith.constant 0 : i32
    return %c0_i32, %c0_i32_0 : i32, i32
  }
  func.func @transform_3(%arg0: i32, %arg1: i32) -> (i32, i32, i32, i32) {
    %c0_i32 = arith.constant 0 : i32
    %c0_i32_0 = arith.constant 0 : i32
    %c0_i32_1 = arith.constant 0 : i32
    return %arg0, %arg1, %c0_i32, %c0_i32_0 : i32, i32, i32, i32
  }
  func.func @transform_4(%arg0: i32, %arg1: i32) -> (i32, i32, i32, i32) {
    %c0_i32 = arith.constant 0 : i32
    %c0_i32_0 = arith.constant 0 : i32
    %c0_i32_1 = arith.constant 0 : i32
    return %arg0, %arg1, %c0_i32, %c0_i32_0 : i32, i32, i32, i32
  }
}

module attributes {stable_mosaic.version = 11 : i64} {
  func.func @_conv_plane_kernel(%arg0: i32, %arg1: i32, %arg2: memref<1x14x8x196xf32, #tpu.memory_space<vmem>>, %arg3: memref<1x3x8x72xf32, #tpu.memory_space<vmem>>, %arg4: memref<8x1xf32, #tpu.memory_space<vmem>>, %arg5: memref<1x1x8x168xf32, #tpu.memory_space<vmem>>) attributes {dimension_semantics = [#tpu.dimension_semantics<parallel>, #tpu.dimension_semantics<parallel>], iteration_bounds = array<i64: 2, 12>, scalar_prefetch = 0 : i64, scratch_operands = 0 : i64, tpu.core_type = #tpu.core_type<tc>, window_params = [{transform_indices = @transform_0, window_bounds = array<i64: 1, 14, 8, 196>}, {pipeline_mode = #tpu.pipeline_mode<synchronous>, transform_indices = @transform_1, window_bounds = array<i64: 1, 3, 8, 72>}, {pipeline_mode = #tpu.pipeline_mode<synchronous>, transform_indices = @transform_2, window_bounds = array<i64: 8, 1>}, {transform_indices = @transform_3, window_bounds = array<i64: 1, 1, 8, 168>}]} {
    %cst = arith.constant 0.000000e+00 : f32
    %0 = vector.broadcast %cst : f32 to vector<8x166xf32>
    %c0_i32 = arith.constant 0 : i32
    %1 = arith.addi %arg1, %c0_i32 : i32
    %c0_i32_0 = arith.constant 0 : i32
    %2 = arith.addi %1, %c0_i32_0 : i32
    %c0 = arith.constant 0 : index
    %3 = arith.index_cast %2 : i32 to index
    %c0_1 = arith.constant 0 : index
    %c0_2 = arith.constant 0 : index
    %4 = vector.load %arg2[%c0, %3, %c0_1, %c0_2] : memref<1x14x8x196xf32, #tpu.memory_space<vmem>>, vector<1x1x8x196xf32>
    %5 = vector.shape_cast %4 : vector<1x1x8x196xf32> to vector<8x196xf32>
    %6 = vector.extract_strided_slice %5 {offsets = [0, 0], sizes = [8, 166], strides = [1, 1]} : vector<8x196xf32> to vector<8x166xf32>
    %7 = vector.extract_strided_slice %5 {offsets = [0, 1], sizes = [8, 166], strides = [1, 1]} : vector<8x196xf32> to vector<8x166xf32>
    %8 = vector.extract_strided_slice %5 {offsets = [0, 2], sizes = [8, 166], strides = [1, 1]} : vector<8x196xf32> to vector<8x166xf32>
    %9 = vector.extract_strided_slice %5 {offsets = [0, 14], sizes = [8, 166], strides = [1, 1]} : vector<8x196xf32> to vector<8x166xf32>
    %10 = vector.extract_strided_slice %5 {offsets = [0, 15], sizes = [8, 166], strides = [1, 1]} : vector<8x196xf32> to vector<8x166xf32>
    %11 = vector.extract_strided_slice %5 {offsets = [0, 16], sizes = [8, 166], strides = [1, 1]} : vector<8x196xf32> to vector<8x166xf32>
    %12 = vector.extract_strided_slice %5 {offsets = [0, 28], sizes = [8, 166], strides = [1, 1]} : vector<8x196xf32> to vector<8x166xf32>
    %13 = vector.extract_strided_slice %5 {offsets = [0, 29], sizes = [8, 166], strides = [1, 1]} : vector<8x196xf32> to vector<8x166xf32>
    %14 = vector.extract_strided_slice %5 {offsets = [0, 30], sizes = [8, 166], strides = [1, 1]} : vector<8x196xf32> to vector<8x166xf32>
    %15 = tpu.concatenate %6, %7, %8, %9, %10, %11, %12, %13, %14 in 0 : vector<8x166xf32>, vector<8x166xf32>, vector<8x166xf32>, vector<8x166xf32>, vector<8x166xf32>, vector<8x166xf32>, vector<8x166xf32>, vector<8x166xf32>, vector<8x166xf32> -> vector<72x166xf32>
    %c0_3 = arith.constant 0 : index
    %c0_4 = arith.constant 0 : index
    %c0_5 = arith.constant 0 : index
    %c0_6 = arith.constant 0 : index
    %16 = vector.load %arg3[%c0_3, %c0_4, %c0_5, %c0_6] : memref<1x3x8x72xf32, #tpu.memory_space<vmem>>, vector<1x1x8x72xf32>
    %17 = vector.shape_cast %16 : vector<1x1x8x72xf32> to vector<8x72xf32>
    %cst_7 = arith.constant dense<0.000000e+00> : vector<8x166xf32>
    %18 = tpu.matmul %17, %15, %cst_7 {dimension_numbers = #tpu.dot_dimension_numbers<[1], [0], [0], [1], [0, 0, 1, 1], [], []>} : vector<8x72xf32>, vector<72x166xf32>, vector<8x166xf32> -> vector<8x166xf32>
    %19 = arith.addf %0, %18 : vector<8x166xf32>
    %c0_i32_8 = arith.constant 0 : i32
    %20 = arith.addi %arg1, %c0_i32_8 : i32
    %c1_i32 = arith.constant 1 : i32
    %21 = arith.addi %20, %c1_i32 : i32
    %c0_9 = arith.constant 0 : index
    %22 = arith.index_cast %21 : i32 to index
    %c0_10 = arith.constant 0 : index
    %c0_11 = arith.constant 0 : index
    %23 = vector.load %arg2[%c0_9, %22, %c0_10, %c0_11] : memref<1x14x8x196xf32, #tpu.memory_space<vmem>>, vector<1x1x8x196xf32>
    %24 = vector.shape_cast %23 : vector<1x1x8x196xf32> to vector<8x196xf32>
    %25 = vector.extract_strided_slice %24 {offsets = [0, 0], sizes = [8, 166], strides = [1, 1]} : vector<8x196xf32> to vector<8x166xf32>
    %26 = vector.extract_strided_slice %24 {offsets = [0, 1], sizes = [8, 166], strides = [1, 1]} : vector<8x196xf32> to vector<8x166xf32>
    %27 = vector.extract_strided_slice %24 {offsets = [0, 2], sizes = [8, 166], strides = [1, 1]} : vector<8x196xf32> to vector<8x166xf32>
    %28 = vector.extract_strided_slice %24 {offsets = [0, 14], sizes = [8, 166], strides = [1, 1]} : vector<8x196xf32> to vector<8x166xf32>
    %29 = vector.extract_strided_slice %24 {offsets = [0, 15], sizes = [8, 166], strides = [1, 1]} : vector<8x196xf32> to vector<8x166xf32>
    %30 = vector.extract_strided_slice %24 {offsets = [0, 16], sizes = [8, 166], strides = [1, 1]} : vector<8x196xf32> to vector<8x166xf32>
    %31 = vector.extract_strided_slice %24 {offsets = [0, 28], sizes = [8, 166], strides = [1, 1]} : vector<8x196xf32> to vector<8x166xf32>
    %32 = vector.extract_strided_slice %24 {offsets = [0, 29], sizes = [8, 166], strides = [1, 1]} : vector<8x196xf32> to vector<8x166xf32>
    %33 = vector.extract_strided_slice %24 {offsets = [0, 30], sizes = [8, 166], strides = [1, 1]} : vector<8x196xf32> to vector<8x166xf32>
    %34 = tpu.concatenate %25, %26, %27, %28, %29, %30, %31, %32, %33 in 0 : vector<8x166xf32>, vector<8x166xf32>, vector<8x166xf32>, vector<8x166xf32>, vector<8x166xf32>, vector<8x166xf32>, vector<8x166xf32>, vector<8x166xf32>, vector<8x166xf32> -> vector<72x166xf32>
    %c0_12 = arith.constant 0 : index
    %c1 = arith.constant 1 : index
    %c0_13 = arith.constant 0 : index
    %c0_14 = arith.constant 0 : index
    %35 = vector.load %arg3[%c0_12, %c1, %c0_13, %c0_14] : memref<1x3x8x72xf32, #tpu.memory_space<vmem>>, vector<1x1x8x72xf32>
    %36 = vector.shape_cast %35 : vector<1x1x8x72xf32> to vector<8x72xf32>
    %cst_15 = arith.constant dense<0.000000e+00> : vector<8x166xf32>
    %37 = tpu.matmul %36, %34, %cst_15 {dimension_numbers = #tpu.dot_dimension_numbers<[1], [0], [0], [1], [0, 0, 1, 1], [], []>} : vector<8x72xf32>, vector<72x166xf32>, vector<8x166xf32> -> vector<8x166xf32>
    %38 = arith.addf %19, %37 : vector<8x166xf32>
    %c0_i32_16 = arith.constant 0 : i32
    %39 = arith.addi %arg1, %c0_i32_16 : i32
    %c2_i32 = arith.constant 2 : i32
    %40 = arith.addi %39, %c2_i32 : i32
    %c0_17 = arith.constant 0 : index
    %41 = arith.index_cast %40 : i32 to index
    %c0_18 = arith.constant 0 : index
    %c0_19 = arith.constant 0 : index
    %42 = vector.load %arg2[%c0_17, %41, %c0_18, %c0_19] : memref<1x14x8x196xf32, #tpu.memory_space<vmem>>, vector<1x1x8x196xf32>
    %43 = vector.shape_cast %42 : vector<1x1x8x196xf32> to vector<8x196xf32>
    %44 = vector.extract_strided_slice %43 {offsets = [0, 0], sizes = [8, 166], strides = [1, 1]} : vector<8x196xf32> to vector<8x166xf32>
    %45 = vector.extract_strided_slice %43 {offsets = [0, 1], sizes = [8, 166], strides = [1, 1]} : vector<8x196xf32> to vector<8x166xf32>
    %46 = vector.extract_strided_slice %43 {offsets = [0, 2], sizes = [8, 166], strides = [1, 1]} : vector<8x196xf32> to vector<8x166xf32>
    %47 = vector.extract_strided_slice %43 {offsets = [0, 14], sizes = [8, 166], strides = [1, 1]} : vector<8x196xf32> to vector<8x166xf32>
    %48 = vector.extract_strided_slice %43 {offsets = [0, 15], sizes = [8, 166], strides = [1, 1]} : vector<8x196xf32> to vector<8x166xf32>
    %49 = vector.extract_strided_slice %43 {offsets = [0, 16], sizes = [8, 166], strides = [1, 1]} : vector<8x196xf32> to vector<8x166xf32>
    %50 = vector.extract_strided_slice %43 {offsets = [0, 28], sizes = [8, 166], strides = [1, 1]} : vector<8x196xf32> to vector<8x166xf32>
    %51 = vector.extract_strided_slice %43 {offsets = [0, 29], sizes = [8, 166], strides = [1, 1]} : vector<8x196xf32> to vector<8x166xf32>
    %52 = vector.extract_strided_slice %43 {offsets = [0, 30], sizes = [8, 166], strides = [1, 1]} : vector<8x196xf32> to vector<8x166xf32>
    %53 = tpu.concatenate %44, %45, %46, %47, %48, %49, %50, %51, %52 in 0 : vector<8x166xf32>, vector<8x166xf32>, vector<8x166xf32>, vector<8x166xf32>, vector<8x166xf32>, vector<8x166xf32>, vector<8x166xf32>, vector<8x166xf32>, vector<8x166xf32> -> vector<72x166xf32>
    %c0_20 = arith.constant 0 : index
    %c2 = arith.constant 2 : index
    %c0_21 = arith.constant 0 : index
    %c0_22 = arith.constant 0 : index
    %54 = vector.load %arg3[%c0_20, %c2, %c0_21, %c0_22] : memref<1x3x8x72xf32, #tpu.memory_space<vmem>>, vector<1x1x8x72xf32>
    %55 = vector.shape_cast %54 : vector<1x1x8x72xf32> to vector<8x72xf32>
    %cst_23 = arith.constant dense<0.000000e+00> : vector<8x166xf32>
    %56 = tpu.matmul %55, %53, %cst_23 {dimension_numbers = #tpu.dot_dimension_numbers<[1], [0], [0], [1], [0, 0, 1, 1], [], []>} : vector<8x72xf32>, vector<72x166xf32>, vector<8x166xf32> -> vector<8x166xf32>
    %57 = arith.addf %38, %56 : vector<8x166xf32>
    %c0_24 = arith.constant 0 : index
    %c0_25 = arith.constant 0 : index
    %58 = vector.load %arg4[%c0_24, %c0_25] : memref<8x1xf32, #tpu.memory_space<vmem>>, vector<8x1xf32>
    %59 = vector.broadcast %58 : vector<8x1xf32> to vector<8x166xf32>
    %60 = arith.addf %57, %59 : vector<8x166xf32>
    %c0_26 = arith.constant 0 : index
    %c0_27 = arith.constant 0 : index
    %c0_28 = arith.constant 0 : index
    %c0_29 = arith.constant 0 : index
    %61 = vector.load %arg5[%c0_26, %c0_27, %c0_28, %c0_29] : memref<1x1x8x168xf32, #tpu.memory_space<vmem>>, vector<1x1x8x166xf32>
    %62 = vector.shape_cast %61 : vector<1x1x8x166xf32> to vector<8x166xf32>
    %63 = vector.shape_cast %60 : vector<8x166xf32> to vector<1x1x8x166xf32>
    tpu.vector_store %arg5[%c0_26, %c0_27, %c0_28, %c0_29], %63 {strides = array<i32>} : memref<1x1x8x168xf32, #tpu.memory_space<vmem>>, vector<1x1x8x166xf32>,
    return
  }
  func.func @transform_0(%arg0: i32, %arg1: i32) -> (i32, i32, i32, i32) {
    %c0_i32 = arith.constant 0 : i32
    %c0_i32_0 = arith.constant 0 : i32
    %c0_i32_1 = arith.constant 0 : i32
    %c0_i32_2 = arith.constant 0 : i32
    return %arg0, %c0_i32, %c0_i32_0, %c0_i32_1 : i32, i32, i32, i32
  }
  func.func @transform_1(%arg0: i32, %arg1: i32) -> (i32, i32, i32, i32) {
    %c0_i32 = arith.constant 0 : i32
    %c0_i32_0 = arith.constant 0 : i32
    %c0_i32_1 = arith.constant 0 : i32
    %c0_i32_2 = arith.constant 0 : i32
    %c0_i32_3 = arith.constant 0 : i32
    return %c0_i32, %c0_i32_0, %c0_i32_1, %c0_i32_2 : i32, i32, i32, i32
  }
  func.func @transform_2(%arg0: i32, %arg1: i32) -> (i32, i32) {
    %c0_i32 = arith.constant 0 : i32
    %c0_i32_0 = arith.constant 0 : i32
    %c0_i32_1 = arith.constant 0 : i32
    return %c0_i32, %c0_i32_0 : i32, i32
  }
  func.func @transform_3(%arg0: i32, %arg1: i32) -> (i32, i32, i32, i32) {
    %c0_i32 = arith.constant 0 : i32
    %c0_i32_0 = arith.constant 0 : i32
    %c0_i32_1 = arith.constant 0 : i32
    return %arg0, %arg1, %c0_i32, %c0_i32_0 : i32, i32, i32, i32
  }
}

module attributes {stable_mosaic.version = 11 : i64} {
  func.func @_conv_plane_kernel(%arg0: i32, %arg1: i32, %arg2: memref<1x14x8x196xf32, #tpu.memory_space<vmem>>, %arg3: memref<1x3x8x72xf32, #tpu.memory_space<vmem>>, %arg4: memref<8x1xf32, #tpu.memory_space<vmem>>, %arg5: memref<1x1x8x168xf32, #tpu.memory_space<vmem>>) attributes {dimension_semantics = [#tpu.dimension_semantics<parallel>, #tpu.dimension_semantics<parallel>], iteration_bounds = array<i64: 2, 12>, scalar_prefetch = 0 : i64, scratch_operands = 0 : i64, tpu.core_type = #tpu.core_type<tc>, window_params = [{transform_indices = @transform_0, window_bounds = array<i64: 1, 14, 8, 196>}, {pipeline_mode = #tpu.pipeline_mode<synchronous>, transform_indices = @transform_1, window_bounds = array<i64: 1, 3, 8, 72>}, {pipeline_mode = #tpu.pipeline_mode<synchronous>, transform_indices = @transform_2, window_bounds = array<i64: 8, 1>}, {transform_indices = @transform_3, window_bounds = array<i64: 1, 1, 8, 168>}]} {
    %cst = arith.constant 0.000000e+00 : f32
    %0 = vector.broadcast %cst : f32 to vector<8x166xf32>
    %c0_i32 = arith.constant 0 : i32
    %1 = arith.addi %arg1, %c0_i32 : i32
    %c0_i32_0 = arith.constant 0 : i32
    %2 = arith.addi %1, %c0_i32_0 : i32
    %c0 = arith.constant 0 : index
    %3 = arith.index_cast %2 : i32 to index
    %c0_1 = arith.constant 0 : index
    %c0_2 = arith.constant 0 : index
    %4 = vector.load %arg2[%c0, %3, %c0_1, %c0_2] : memref<1x14x8x196xf32, #tpu.memory_space<vmem>>, vector<1x1x8x196xf32>
    %5 = vector.shape_cast %4 : vector<1x1x8x196xf32> to vector<8x196xf32>
    %6 = vector.extract_strided_slice %5 {offsets = [0, 0], sizes = [8, 166], strides = [1, 1]} : vector<8x196xf32> to vector<8x166xf32>
    %7 = vector.extract_strided_slice %5 {offsets = [0, 1], sizes = [8, 166], strides = [1, 1]} : vector<8x196xf32> to vector<8x166xf32>
    %8 = vector.extract_strided_slice %5 {offsets = [0, 2], sizes = [8, 166], strides = [1, 1]} : vector<8x196xf32> to vector<8x166xf32>
    %9 = vector.extract_strided_slice %5 {offsets = [0, 14], sizes = [8, 166], strides = [1, 1]} : vector<8x196xf32> to vector<8x166xf32>
    %10 = vector.extract_strided_slice %5 {offsets = [0, 15], sizes = [8, 166], strides = [1, 1]} : vector<8x196xf32> to vector<8x166xf32>
    %11 = vector.extract_strided_slice %5 {offsets = [0, 16], sizes = [8, 166], strides = [1, 1]} : vector<8x196xf32> to vector<8x166xf32>
    %12 = vector.extract_strided_slice %5 {offsets = [0, 28], sizes = [8, 166], strides = [1, 1]} : vector<8x196xf32> to vector<8x166xf32>
    %13 = vector.extract_strided_slice %5 {offsets = [0, 29], sizes = [8, 166], strides = [1, 1]} : vector<8x196xf32> to vector<8x166xf32>
    %14 = vector.extract_strided_slice %5 {offsets = [0, 30], sizes = [8, 166], strides = [1, 1]} : vector<8x196xf32> to vector<8x166xf32>
    %15 = tpu.concatenate %6, %7, %8, %9, %10, %11, %12, %13, %14 in 0 : vector<8x166xf32>, vector<8x166xf32>, vector<8x166xf32>, vector<8x166xf32>, vector<8x166xf32>, vector<8x166xf32>, vector<8x166xf32>, vector<8x166xf32>, vector<8x166xf32> -> vector<72x166xf32>
    %c0_3 = arith.constant 0 : index
    %c0_4 = arith.constant 0 : index
    %c0_5 = arith.constant 0 : index
    %c0_6 = arith.constant 0 : index
    %16 = vector.load %arg3[%c0_3, %c0_4, %c0_5, %c0_6] : memref<1x3x8x72xf32, #tpu.memory_space<vmem>>, vector<1x1x8x72xf32>
    %17 = vector.shape_cast %16 : vector<1x1x8x72xf32> to vector<8x72xf32>
    %cst_7 = arith.constant dense<0.000000e+00> : vector<8x166xf32>
    %18 = tpu.matmul %17, %15, %cst_7 {dimension_numbers = #tpu.dot_dimension_numbers<[1], [0], [0], [1], [0, 0, 1, 1], [], []>} : vector<8x72xf32>, vector<72x166xf32>, vector<8x166xf32> -> vector<8x166xf32>
    %19 = arith.addf %0, %18 : vector<8x166xf32>
    %c0_i32_8 = arith.constant 0 : i32
    %20 = arith.addi %arg1, %c0_i32_8 : i32
    %c1_i32 = arith.constant 1 : i32
    %21 = arith.addi %20, %c1_i32 : i32
    %c0_9 = arith.constant 0 : index
    %22 = arith.index_cast %21 : i32 to index
    %c0_10 = arith.constant 0 : index
    %c0_11 = arith.constant 0 : index
    %23 = vector.load %arg2[%c0_9, %22, %c0_10, %c0_11] : memref<1x14x8x196xf32, #tpu.memory_space<vmem>>, vector<1x1x8x196xf32>
    %24 = vector.shape_cast %23 : vector<1x1x8x196xf32> to vector<8x196xf32>
    %25 = vector.extract_strided_slice %24 {offsets = [0, 0], sizes = [8, 166], strides = [1, 1]} : vector<8x196xf32> to vector<8x166xf32>
    %26 = vector.extract_strided_slice %24 {offsets = [0, 1], sizes = [8, 166], strides = [1, 1]} : vector<8x196xf32> to vector<8x166xf32>
    %27 = vector.extract_strided_slice %24 {offsets = [0, 2], sizes = [8, 166], strides = [1, 1]} : vector<8x196xf32> to vector<8x166xf32>
    %28 = vector.extract_strided_slice %24 {offsets = [0, 14], sizes = [8, 166], strides = [1, 1]} : vector<8x196xf32> to vector<8x166xf32>
    %29 = vector.extract_strided_slice %24 {offsets = [0, 15], sizes = [8, 166], strides = [1, 1]} : vector<8x196xf32> to vector<8x166xf32>
    %30 = vector.extract_strided_slice %24 {offsets = [0, 16], sizes = [8, 166], strides = [1, 1]} : vector<8x196xf32> to vector<8x166xf32>
    %31 = vector.extract_strided_slice %24 {offsets = [0, 28], sizes = [8, 166], strides = [1, 1]} : vector<8x196xf32> to vector<8x166xf32>
    %32 = vector.extract_strided_slice %24 {offsets = [0, 29], sizes = [8, 166], strides = [1, 1]} : vector<8x196xf32> to vector<8x166xf32>
    %33 = vector.extract_strided_slice %24 {offsets = [0, 30], sizes = [8, 166], strides = [1, 1]} : vector<8x196xf32> to vector<8x166xf32>
    %34 = tpu.concatenate %25, %26, %27, %28, %29, %30, %31, %32, %33 in 0 : vector<8x166xf32>, vector<8x166xf32>, vector<8x166xf32>, vector<8x166xf32>, vector<8x166xf32>, vector<8x166xf32>, vector<8x166xf32>, vector<8x166xf32>, vector<8x166xf32> -> vector<72x166xf32>
    %c0_12 = arith.constant 0 : index
    %c1 = arith.constant 1 : index
    %c0_13 = arith.constant 0 : index
    %c0_14 = arith.constant 0 : index
    %35 = vector.load %arg3[%c0_12, %c1, %c0_13, %c0_14] : memref<1x3x8x72xf32, #tpu.memory_space<vmem>>, vector<1x1x8x72xf32>
    %36 = vector.shape_cast %35 : vector<1x1x8x72xf32> to vector<8x72xf32>
    %cst_15 = arith.constant dense<0.000000e+00> : vector<8x166xf32>
    %37 = tpu.matmul %36, %34, %cst_15 {dimension_numbers = #tpu.dot_dimension_numbers<[1], [0], [0], [1], [0, 0, 1, 1], [], []>} : vector<8x72xf32>, vector<72x166xf32>, vector<8x166xf32> -> vector<8x166xf32>
    %38 = arith.addf %19, %37 : vector<8x166xf32>
    %c0_i32_16 = arith.constant 0 : i32
    %39 = arith.addi %arg1, %c0_i32_16 : i32
    %c2_i32 = arith.constant 2 : i32
    %40 = arith.addi %39, %c2_i32 : i32
    %c0_17 = arith.constant 0 : index
    %41 = arith.index_cast %40 : i32 to index
    %c0_18 = arith.constant 0 : index
    %c0_19 = arith.constant 0 : index
    %42 = vector.load %arg2[%c0_17, %41, %c0_18, %c0_19] : memref<1x14x8x196xf32, #tpu.memory_space<vmem>>, vector<1x1x8x196xf32>
    %43 = vector.shape_cast %42 : vector<1x1x8x196xf32> to vector<8x196xf32>
    %44 = vector.extract_strided_slice %43 {offsets = [0, 0], sizes = [8, 166], strides = [1, 1]} : vector<8x196xf32> to vector<8x166xf32>
    %45 = vector.extract_strided_slice %43 {offsets = [0, 1], sizes = [8, 166], strides = [1, 1]} : vector<8x196xf32> to vector<8x166xf32>
    %46 = vector.extract_strided_slice %43 {offsets = [0, 2], sizes = [8, 166], strides = [1, 1]} : vector<8x196xf32> to vector<8x166xf32>
    %47 = vector.extract_strided_slice %43 {offsets = [0, 14], sizes = [8, 166], strides = [1, 1]} : vector<8x196xf32> to vector<8x166xf32>
    %48 = vector.extract_strided_slice %43 {offsets = [0, 15], sizes = [8, 166], strides = [1, 1]} : vector<8x196xf32> to vector<8x166xf32>
    %49 = vector.extract_strided_slice %43 {offsets = [0, 16], sizes = [8, 166], strides = [1, 1]} : vector<8x196xf32> to vector<8x166xf32>
    %50 = vector.extract_strided_slice %43 {offsets = [0, 28], sizes = [8, 166], strides = [1, 1]} : vector<8x196xf32> to vector<8x166xf32>
    %51 = vector.extract_strided_slice %43 {offsets = [0, 29], sizes = [8, 166], strides = [1, 1]} : vector<8x196xf32> to vector<8x166xf32>
    %52 = vector.extract_strided_slice %43 {offsets = [0, 30], sizes = [8, 166], strides = [1, 1]} : vector<8x196xf32> to vector<8x166xf32>
    %53 = tpu.concatenate %44, %45, %46, %47, %48, %49, %50, %51, %52 in 0 : vector<8x166xf32>, vector<8x166xf32>, vector<8x166xf32>, vector<8x166xf32>, vector<8x166xf32>, vector<8x166xf32>, vector<8x166xf32>, vector<8x166xf32>, vector<8x166xf32> -> vector<72x166xf32>
    %c0_20 = arith.constant 0 : index
    %c2 = arith.constant 2 : index
    %c0_21 = arith.constant 0 : index
    %c0_22 = arith.constant 0 : index
    %54 = vector.load %arg3[%c0_20, %c2, %c0_21, %c0_22] : memref<1x3x8x72xf32, #tpu.memory_space<vmem>>, vector<1x1x8x72xf32>
    %55 = vector.shape_cast %54 : vector<1x1x8x72xf32> to vector<8x72xf32>
    %cst_23 = arith.constant dense<0.000000e+00> : vector<8x166xf32>
    %56 = tpu.matmul %55, %53, %cst_23 {dimension_numbers = #tpu.dot_dimension_numbers<[1], [0], [0], [1], [0, 0, 1, 1], [], []>} : vector<8x72xf32>, vector<72x166xf32>, vector<8x166xf32> -> vector<8x166xf32>
    %57 = arith.addf %38, %56 : vector<8x166xf32>
    %c0_24 = arith.constant 0 : index
    %c0_25 = arith.constant 0 : index
    %58 = vector.load %arg4[%c0_24, %c0_25] : memref<8x1xf32, #tpu.memory_space<vmem>>, vector<8x1xf32>
    %59 = vector.broadcast %58 : vector<8x1xf32> to vector<8x166xf32>
    %60 = arith.addf %57, %59 : vector<8x166xf32>
    %cst_26 = arith.constant 0.000000e+00 : f32
    %61 = vector.broadcast %cst_26 : f32 to vector<8x166xf32>
    %62 = arith.cmpf oge, %60, %61 : vector<8x166xf32>
    %cst_27 = arith.constant 1.000000e-01 : f32
    %63 = vector.broadcast %cst_27 : f32 to vector<8x166xf32>
    %64 = arith.mulf %63, %60 : vector<8x166xf32>
    %65 = arith.select %62, %60, %64 : vector<8x166xi1>, vector<8x166xf32>
    %c0_28 = arith.constant 0 : index
    %c0_29 = arith.constant 0 : index
    %c0_30 = arith.constant 0 : index
    %c0_31 = arith.constant 0 : index
    %66 = vector.load %arg5[%c0_28, %c0_29, %c0_30, %c0_31] : memref<1x1x8x168xf32, #tpu.memory_space<vmem>>, vector<1x1x8x166xf32>
    %67 = vector.shape_cast %66 : vector<1x1x8x166xf32> to vector<8x166xf32>
    %68 = vector.shape_cast %65 : vector<8x166xf32> to vector<1x1x8x166xf32>
    tpu.vector_store %arg5[%c0_28, %c0_29, %c0_30, %c0_31], %68 {strides = array<i32>} : memref<1x1x8x168xf32, #tpu.memory_space<vmem>>, vector<1x1x8x166xf32>,
    return
  }
  func.func @transform_0(%arg0: i32, %arg1: i32) -> (i32, i32, i32, i32) {
    %c0_i32 = arith.constant 0 : i32
    %c0_i32_0 = arith.constant 0 : i32
    %c0_i32_1 = arith.constant 0 : i32
    %c0_i32_2 = arith.constant 0 : i32
    return %arg0, %c0_i32, %c0_i32_0, %c0_i32_1 : i32, i32, i32, i32
  }
  func.func @transform_1(%arg0: i32, %arg1: i32) -> (i32, i32, i32, i32) {
    %c0_i32 = arith.constant 0 : i32
    %c0_i32_0 = arith.constant 0 : i32
    %c0_i32_1 = arith.constant 0 : i32
    %c0_i32_2 = arith.constant 0 : i32
    %c0_i32_3 = arith.constant 0 : i32
    return %c0_i32, %c0_i32_0, %c0_i32_1, %c0_i32_2 : i32, i32, i32, i32
  }
  func.func @transform_2(%arg0: i32, %arg1: i32) -> (i32, i32) {
    %c0_i32 = arith.constant 0 : i32
    %c0_i32_0 = arith.constant 0 : i32
    %c0_i32_1 = arith.constant 0 : i32
    return %c0_i32, %c0_i32_0 : i32, i32
  }
  func.func @transform_3(%arg0: i32, %arg1: i32) -> (i32, i32, i32, i32) {
    %c0_i32 = arith.constant 0 : i32
    %c0_i32_0 = arith.constant 0 : i32
    %c0_i32_1 = arith.constant 0 : i32
    return %arg0, %arg1, %c0_i32, %c0_i32_0 : i32, i32, i32, i32
  }
}

module attributes {stable_mosaic.version = 11 : i64} {
  func.func @_conv_plane_kernel(%arg0: i32, %arg1: i32, %arg2: memref<1x14x8x196xf32, #tpu.memory_space<vmem>>, %arg3: memref<1x3x3x72xf32, #tpu.memory_space<vmem>>, %arg4: memref<3x1xf32, #tpu.memory_space<vmem>>, %arg5: memref<1x1x3x168xf32, #tpu.memory_space<vmem>>) attributes {dimension_semantics = [#tpu.dimension_semantics<parallel>, #tpu.dimension_semantics<parallel>], iteration_bounds = array<i64: 2, 12>, scalar_prefetch = 0 : i64, scratch_operands = 0 : i64, tpu.core_type = #tpu.core_type<tc>, window_params = [{transform_indices = @transform_0, window_bounds = array<i64: 1, 14, 8, 196>}, {pipeline_mode = #tpu.pipeline_mode<synchronous>, transform_indices = @transform_1, window_bounds = array<i64: 1, 3, 3, 72>}, {pipeline_mode = #tpu.pipeline_mode<synchronous>, transform_indices = @transform_2, window_bounds = array<i64: 3, 1>}, {transform_indices = @transform_3, window_bounds = array<i64: 1, 1, 3, 168>}]} {
    %cst = arith.constant 0.000000e+00 : f32
    %0 = vector.broadcast %cst : f32 to vector<3x166xf32>
    %c0_i32 = arith.constant 0 : i32
    %1 = arith.addi %arg1, %c0_i32 : i32
    %c0_i32_0 = arith.constant 0 : i32
    %2 = arith.addi %1, %c0_i32_0 : i32
    %c0 = arith.constant 0 : index
    %3 = arith.index_cast %2 : i32 to index
    %c0_1 = arith.constant 0 : index
    %c0_2 = arith.constant 0 : index
    %4 = vector.load %arg2[%c0, %3, %c0_1, %c0_2] : memref<1x14x8x196xf32, #tpu.memory_space<vmem>>, vector<1x1x8x196xf32>
    %5 = vector.shape_cast %4 : vector<1x1x8x196xf32> to vector<8x196xf32>
    %6 = vector.extract_strided_slice %5 {offsets = [0, 0], sizes = [8, 166], strides = [1, 1]} : vector<8x196xf32> to vector<8x166xf32>
    %7 = vector.extract_strided_slice %5 {offsets = [0, 1], sizes = [8, 166], strides = [1, 1]} : vector<8x196xf32> to vector<8x166xf32>
    %8 = vector.extract_strided_slice %5 {offsets = [0, 2], sizes = [8, 166], strides = [1, 1]} : vector<8x196xf32> to vector<8x166xf32>
    %9 = vector.extract_strided_slice %5 {offsets = [0, 14], sizes = [8, 166], strides = [1, 1]} : vector<8x196xf32> to vector<8x166xf32>
    %10 = vector.extract_strided_slice %5 {offsets = [0, 15], sizes = [8, 166], strides = [1, 1]} : vector<8x196xf32> to vector<8x166xf32>
    %11 = vector.extract_strided_slice %5 {offsets = [0, 16], sizes = [8, 166], strides = [1, 1]} : vector<8x196xf32> to vector<8x166xf32>
    %12 = vector.extract_strided_slice %5 {offsets = [0, 28], sizes = [8, 166], strides = [1, 1]} : vector<8x196xf32> to vector<8x166xf32>
    %13 = vector.extract_strided_slice %5 {offsets = [0, 29], sizes = [8, 166], strides = [1, 1]} : vector<8x196xf32> to vector<8x166xf32>
    %14 = vector.extract_strided_slice %5 {offsets = [0, 30], sizes = [8, 166], strides = [1, 1]} : vector<8x196xf32> to vector<8x166xf32>
    %15 = tpu.concatenate %6, %7, %8, %9, %10, %11, %12, %13, %14 in 0 : vector<8x166xf32>, vector<8x166xf32>, vector<8x166xf32>, vector<8x166xf32>, vector<8x166xf32>, vector<8x166xf32>, vector<8x166xf32>, vector<8x166xf32>, vector<8x166xf32> -> vector<72x166xf32>
    %c0_3 = arith.constant 0 : index
    %c0_4 = arith.constant 0 : index
    %c0_5 = arith.constant 0 : index
    %c0_6 = arith.constant 0 : index
    %16 = vector.load %arg3[%c0_3, %c0_4, %c0_5, %c0_6] : memref<1x3x3x72xf32, #tpu.memory_space<vmem>>, vector<1x1x3x72xf32>
    %17 = vector.shape_cast %16 : vector<1x1x3x72xf32> to vector<3x72xf32>
    %cst_7 = arith.constant dense<0.000000e+00> : vector<3x166xf32>
    %18 = tpu.matmul %17, %15, %cst_7 {dimension_numbers = #tpu.dot_dimension_numbers<[1], [0], [0], [1], [0, 0, 1, 1], [], []>} : vector<3x72xf32>, vector<72x166xf32>, vector<3x166xf32> -> vector<3x166xf32>
    %19 = arith.addf %0, %18 : vector<3x166xf32>
    %c0_i32_8 = arith.constant 0 : i32
    %20 = arith.addi %arg1, %c0_i32_8 : i32
    %c1_i32 = arith.constant 1 : i32
    %21 = arith.addi %20, %c1_i32 : i32
    %c0_9 = arith.constant 0 : index
    %22 = arith.index_cast %21 : i32 to index
    %c0_10 = arith.constant 0 : index
    %c0_11 = arith.constant 0 : index
    %23 = vector.load %arg2[%c0_9, %22, %c0_10, %c0_11] : memref<1x14x8x196xf32, #tpu.memory_space<vmem>>, vector<1x1x8x196xf32>
    %24 = vector.shape_cast %23 : vector<1x1x8x196xf32> to vector<8x196xf32>
    %25 = vector.extract_strided_slice %24 {offsets = [0, 0], sizes = [8, 166], strides = [1, 1]} : vector<8x196xf32> to vector<8x166xf32>
    %26 = vector.extract_strided_slice %24 {offsets = [0, 1], sizes = [8, 166], strides = [1, 1]} : vector<8x196xf32> to vector<8x166xf32>
    %27 = vector.extract_strided_slice %24 {offsets = [0, 2], sizes = [8, 166], strides = [1, 1]} : vector<8x196xf32> to vector<8x166xf32>
    %28 = vector.extract_strided_slice %24 {offsets = [0, 14], sizes = [8, 166], strides = [1, 1]} : vector<8x196xf32> to vector<8x166xf32>
    %29 = vector.extract_strided_slice %24 {offsets = [0, 15], sizes = [8, 166], strides = [1, 1]} : vector<8x196xf32> to vector<8x166xf32>
    %30 = vector.extract_strided_slice %24 {offsets = [0, 16], sizes = [8, 166], strides = [1, 1]} : vector<8x196xf32> to vector<8x166xf32>
    %31 = vector.extract_strided_slice %24 {offsets = [0, 28], sizes = [8, 166], strides = [1, 1]} : vector<8x196xf32> to vector<8x166xf32>
    %32 = vector.extract_strided_slice %24 {offsets = [0, 29], sizes = [8, 166], strides = [1, 1]} : vector<8x196xf32> to vector<8x166xf32>
    %33 = vector.extract_strided_slice %24 {offsets = [0, 30], sizes = [8, 166], strides = [1, 1]} : vector<8x196xf32> to vector<8x166xf32>
    %34 = tpu.concatenate %25, %26, %27, %28, %29, %30, %31, %32, %33 in 0 : vector<8x166xf32>, vector<8x166xf32>, vector<8x166xf32>, vector<8x166xf32>, vector<8x166xf32>, vector<8x166xf32>, vector<8x166xf32>, vector<8x166xf32>, vector<8x166xf32> -> vector<72x166xf32>
    %c0_12 = arith.constant 0 : index
    %c1 = arith.constant 1 : index
    %c0_13 = arith.constant 0 : index
    %c0_14 = arith.constant 0 : index
    %35 = vector.load %arg3[%c0_12, %c1, %c0_13, %c0_14] : memref<1x3x3x72xf32, #tpu.memory_space<vmem>>, vector<1x1x3x72xf32>
    %36 = vector.shape_cast %35 : vector<1x1x3x72xf32> to vector<3x72xf32>
    %cst_15 = arith.constant dense<0.000000e+00> : vector<3x166xf32>
    %37 = tpu.matmul %36, %34, %cst_15 {dimension_numbers = #tpu.dot_dimension_numbers<[1], [0], [0], [1], [0, 0, 1, 1], [], []>} : vector<3x72xf32>, vector<72x166xf32>, vector<3x166xf32> -> vector<3x166xf32>
    %38 = arith.addf %19, %37 : vector<3x166xf32>
    %c0_i32_16 = arith.constant 0 : i32
    %39 = arith.addi %arg1, %c0_i32_16 : i32
    %c2_i32 = arith.constant 2 : i32
    %40 = arith.addi %39, %c2_i32 : i32
    %c0_17 = arith.constant 0 : index
    %41 = arith.index_cast %40 : i32 to index
    %c0_18 = arith.constant 0 : index
    %c0_19 = arith.constant 0 : index
    %42 = vector.load %arg2[%c0_17, %41, %c0_18, %c0_19] : memref<1x14x8x196xf32, #tpu.memory_space<vmem>>, vector<1x1x8x196xf32>
    %43 = vector.shape_cast %42 : vector<1x1x8x196xf32> to vector<8x196xf32>
    %44 = vector.extract_strided_slice %43 {offsets = [0, 0], sizes = [8, 166], strides = [1, 1]} : vector<8x196xf32> to vector<8x166xf32>
    %45 = vector.extract_strided_slice %43 {offsets = [0, 1], sizes = [8, 166], strides = [1, 1]} : vector<8x196xf32> to vector<8x166xf32>
    %46 = vector.extract_strided_slice %43 {offsets = [0, 2], sizes = [8, 166], strides = [1, 1]} : vector<8x196xf32> to vector<8x166xf32>
    %47 = vector.extract_strided_slice %43 {offsets = [0, 14], sizes = [8, 166], strides = [1, 1]} : vector<8x196xf32> to vector<8x166xf32>
    %48 = vector.extract_strided_slice %43 {offsets = [0, 15], sizes = [8, 166], strides = [1, 1]} : vector<8x196xf32> to vector<8x166xf32>
    %49 = vector.extract_strided_slice %43 {offsets = [0, 16], sizes = [8, 166], strides = [1, 1]} : vector<8x196xf32> to vector<8x166xf32>
    %50 = vector.extract_strided_slice %43 {offsets = [0, 28], sizes = [8, 166], strides = [1, 1]} : vector<8x196xf32> to vector<8x166xf32>
    %51 = vector.extract_strided_slice %43 {offsets = [0, 29], sizes = [8, 166], strides = [1, 1]} : vector<8x196xf32> to vector<8x166xf32>
    %52 = vector.extract_strided_slice %43 {offsets = [0, 30], sizes = [8, 166], strides = [1, 1]} : vector<8x196xf32> to vector<8x166xf32>
    %53 = tpu.concatenate %44, %45, %46, %47, %48, %49, %50, %51, %52 in 0 : vector<8x166xf32>, vector<8x166xf32>, vector<8x166xf32>, vector<8x166xf32>, vector<8x166xf32>, vector<8x166xf32>, vector<8x166xf32>, vector<8x166xf32>, vector<8x166xf32> -> vector<72x166xf32>
    %c0_20 = arith.constant 0 : index
    %c2 = arith.constant 2 : index
    %c0_21 = arith.constant 0 : index
    %c0_22 = arith.constant 0 : index
    %54 = vector.load %arg3[%c0_20, %c2, %c0_21, %c0_22] : memref<1x3x3x72xf32, #tpu.memory_space<vmem>>, vector<1x1x3x72xf32>
    %55 = vector.shape_cast %54 : vector<1x1x3x72xf32> to vector<3x72xf32>
    %cst_23 = arith.constant dense<0.000000e+00> : vector<3x166xf32>
    %56 = tpu.matmul %55, %53, %cst_23 {dimension_numbers = #tpu.dot_dimension_numbers<[1], [0], [0], [1], [0, 0, 1, 1], [], []>} : vector<3x72xf32>, vector<72x166xf32>, vector<3x166xf32> -> vector<3x166xf32>
    %57 = arith.addf %38, %56 : vector<3x166xf32>
    %c0_24 = arith.constant 0 : index
    %c0_25 = arith.constant 0 : index
    %58 = vector.load %arg4[%c0_24, %c0_25] : memref<3x1xf32, #tpu.memory_space<vmem>>, vector<3x1xf32>
    %59 = vector.broadcast %58 : vector<3x1xf32> to vector<3x166xf32>
    %60 = arith.addf %57, %59 : vector<3x166xf32>
    %c0_26 = arith.constant 0 : index
    %c0_27 = arith.constant 0 : index
    %c0_28 = arith.constant 0 : index
    %c0_29 = arith.constant 0 : index
    %61 = vector.load %arg5[%c0_26, %c0_27, %c0_28, %c0_29] : memref<1x1x3x168xf32, #tpu.memory_space<vmem>>, vector<1x1x3x166xf32>
    %62 = vector.shape_cast %61 : vector<1x1x3x166xf32> to vector<3x166xf32>
    %63 = vector.shape_cast %60 : vector<3x166xf32> to vector<1x1x3x166xf32>
    tpu.vector_store %arg5[%c0_26, %c0_27, %c0_28, %c0_29], %63 {strides = array<i32>} : memref<1x1x3x168xf32, #tpu.memory_space<vmem>>, vector<1x1x3x166xf32>,
    return
  }
  func.func @transform_0(%arg0: i32, %arg1: i32) -> (i32, i32, i32, i32) {
    %c0_i32 = arith.constant 0 : i32
    %c0_i32_0 = arith.constant 0 : i32
    %c0_i32_1 = arith.constant 0 : i32
    %c0_i32_2 = arith.constant 0 : i32
    return %arg0, %c0_i32, %c0_i32_0, %c0_i32_1 : i32, i32, i32, i32
  }
  func.func @transform_1(%arg0: i32, %arg1: i32) -> (i32, i32, i32, i32) {
    %c0_i32 = arith.constant 0 : i32
    %c0_i32_0 = arith.constant 0 : i32
    %c0_i32_1 = arith.constant 0 : i32
    %c0_i32_2 = arith.constant 0 : i32
    %c0_i32_3 = arith.constant 0 : i32
    return %c0_i32, %c0_i32_0, %c0_i32_1, %c0_i32_2 : i32, i32, i32, i32
  }
  func.func @transform_2(%arg0: i32, %arg1: i32) -> (i32, i32) {
    %c0_i32 = arith.constant 0 : i32
    %c0_i32_0 = arith.constant 0 : i32
    %c0_i32_1 = arith.constant 0 : i32
    return %c0_i32, %c0_i32_0 : i32, i32
  }
  func.func @transform_3(%arg0: i32, %arg1: i32) -> (i32, i32, i32, i32) {
    %c0_i32 = arith.constant 0 : i32
    %c0_i32_0 = arith.constant 0 : i32
    %c0_i32_1 = arith.constant 0 : i32
    return %arg0, %arg1, %c0_i32, %c0_i32_0 : i32, i32, i32, i32
  }
}

</mosaic_0001>

<bundles_post_ra>
// kernel: decoder_forward_pallas.8
= control target key start
LH: loop header
LB: loop body
LE: loop exit
PB: predicated region body
PF: predicated region fallthrough
CT: control target
= control target key end

     0   :  { %s1048_s15 = smov 0   ;;  %s1050_s16 = smov 0   ;;  %s1194_s0 = inlined_call_operand.vmem [shape: f32[2,8,16,64], index: 0, kind: input, shape index: {}]   ;;  %s1195_s1 = inlined_call_operand.vmem [shape: f32[1,3,16,144], index: 1, kind: input, shape index: {}]   ;;  %s1196_s2 = inlined_call_operand.vmem [shape: f32[16,1], index: 2, kind: input, shape index: {}]   ;;  %s1197_s3 = inlined_call_operand.vmem [shape: f32[2,6,8,48], index: 3, kind: input, shape index: {}]   ;;  %s1198_s4 = inlined_call_operand.vmem [shape: f32[2,6,16,48], index: 4, kind: output, shape index: {}]  }
   0x1   :  { %s1052_s17 = smov 0   ;;  %s1054_s18 = smov 0  }
   0x2   :  { %s1056_s19 = smov 0  }
   0x3 LB: > { %s23_s20 = sadd.s32 1, %s1004_s17  ;;  %s26_s21 = sadd.s32 1, %s1008_s18  ;;  %s1012_s19 = sphi %s1056_s19, %s14_s19   ;;  %s1008_s18 = sphi %s1054_s18, %s1202_s18   ;;  %s1004_s17 = sphi %s1052_s17, %s1201_s17   ;;  %s1000_s16 = sphi %s1050_s16, %s1200_s16   ;;  %s996_s15 = sphi %s1048_s15, %s1199_s15  }
   0x4   : > { %p24_p0 = scmp.ge.s32.totalorder %s23_s20, 6  ;;  %p761_p1 = scmp.ge.s32.totalorder %s1012_s19, 1 }
   0x5   : > { %p191_p2 = scmp.lt.s32.totalorder %s1012_s19, 13 }
   0x6   : > { %s1204_s20 = smov (%p24_p0, %s23_s20), 0  ;;  %s1206_s21 = smov (!%p24_p0, %s26_s21), %s1008_s18 }
   0x7   : > { %p192_p3 = pnand %p761_p1, %p191_p2  ;;  %p28_p4 = scmp.ge.s32.totalorder %s1206_s21, 2 }
   0x8   : > { %p229_p5 = scmp.lt.s32.totalorder (!%p192_p3), %s1000_s16, 1  ;;  %s767_s22 = sshll.u32 (!%p192_p3), %s996_s15, 4 }
   0x9   : > { %s1208_s21 = smov (%p28_p4, %s1206_s21), 0  ;;  %195 = sbr.rel (%p192_p3) target bundleno = 385 (0x181), region = 36 }
   0xa   : > { %s1014_s28 = smov (!%p192_p3), 111   ;;  %s1015_s29 = smov (!%p192_p3), 112  }
   0xb   : > { %s1016_s30 = smov (!%p192_p3), 118   ;;  %s1017_s5 = smov (!%p192_p3), 119  }
   0xc   : > { %s1018_s6 = smov (!%p192_p3), 120   ;;  %s1019_s7 = smov (!%p192_p3), 110  }
   0xd   : > { %s1020_s8 = smov (!%p192_p3), 126   ;;  %s1021_s9 = smov (!%p192_p3), 127  }
   0xe   : > { %s1210_s16 = smov (!%p229_p5, %s1000_s16), 1  ;;  %v306_v44 = vld [vmem:[%s1195_s1 + $0x8] sm:$0xff]  ;;  %vm369_vm0 = vcmask 130048   ;;  %v308_v51 = vld [vmem:[%s1195_s1 + $0x18] sm:$0xff]  ;;  %v305_v56 = vld [vmem:[%s1195_s1] sm:$0xff]  ;;  %p236_p6 = scmp.lt.s32.totalorder %s996_s15, 5 }
   0xf   : > { %s792_s23 = sshll.u32 %s1210_s16, 7  ;;  %v772_v59 = vld [vmem:[%s1195_s1 + $0x28] sm:$0xff]  ;;  %vm642_vm3 = vcmask 375808  }
  0x10   : > { %s233_s26 = scalar_lea.vmem %s1194_s0, %s792_s23  ;;  %s1212_s15 = smov (!%p236_p6, %s996_s15), 5 }
  0x11   : > { %s252_s27 = scalar_lea.vmem %s233_s26, %s767_s22  ;;  %s794_s26 = smul.u32 12, %s1210_s16 }
  0x12   : > { %v1087_v0 = vld [vmem:[%s252_s27 + $0x10] sm:$0xff]  ;;  %v1089_v1 = vld [vmem:[%s252_s27 + $0x18] sm:$0xff]  ;;  %v1091_v2 = vld [vmem:[%s252_s27] sm:$0xff] }
  0x13   : > { %v854_v3 = vpack.i.bf16 %v1087_v0, %v1089_v1  ;;  %v1095_v4 = vld [vmem:[%s252_s27 + $0x8] sm:$0xff]  ;;  %v1099_v6 = vld [vmem:[%s252_s27 + $0x20] sm:$0xff] }
  0x14   : > { %v844_v5 = vpack.i.bf16 %v1091_v2, %v1095_v4  ;;  %v1101_v7 = vld [vmem:[%s252_s27 + $0x28] sm:$0xff]  ;;  %s765_s27 = sshll.u32 %s1212_s15, 1 }
  0x15   : > { %855 = vrot.lane.b32.xlu1 %v854_v3, %s1014_s28  ;;  %865 = vrot.lane.b32.xlu2 %v854_v3, %s1015_s29  ;;  %v869_v8 = vpack.i.bf16 %v1099_v6, %v1101_v7 }
  0x16   : > { %845 = vrot.lane.b32.xlu0 %v844_v5, %s1014_s28 }
  0x1d   : > { %860 = vrot.lane.b32.xlu1 %v844_v5, %s1016_s30  ;;  %870 = vrot.lane.b32.xlu2 %v869_v8, %s1014_s28  ;;  %s248_s28 = sadd.s32 %s794_s26, %s765_s27 }
  0x1e   : > { %850 = vrot.lane.b32.xlu0 %v844_v5, %s1015_s29 }
  0x25   : > { %880 = vrot.lane.b32.xlu1 %v854_v3, %s1016_s30  ;;  %885 = vrot.lane.b32.xlu2 %v869_v8, %s1015_s29  ;;  %s793_s29 = smul.u32 6, %s1210_s16 }
  0x26   : > { %875 = vrot.lane.b32.xlu0 %v844_v5, %s1017_s5 }
  0x2d   : > { %895 = vrot.lane.b32.xlu1 %v844_v5, %s1018_s6  ;;  %900 = vrot.lane.b32.xlu2 %v854_v3, %s1017_s5 }
  0x2e   : > { %890 = vrot.lane.b32.xlu0 %v844_v5, %s1019_s7 }
  0x35   : > { %910 = vrot.lane.b32.xlu1 %v844_v5, %s1020_s8  ;;  %915 = vrot.lane.b32.xlu2 %v854_v3, %s1018_s6 }
  0x36   : > { %905 = vrot.lane.b32.xlu0 %v869_v8, %s1016_s30  ;;  %s766_s30 = sshll.u32 %s248_s28, 3 }
  0x3d   : > { %925 = vrot.lane.b32.xlu1 %v869_v8, %s1017_s5  ;;  %930 = vrot.lane.b32.xlu2 %v844_v5, %s1021_s9  ;;  %s239_s5 = sadd.s32 %s793_s29, %s1212_s15 }
  0x3e   : > { %920 = vrot.lane.b32.xlu0 %v854_v3, %s1019_s7  ;;  %s764_s16 = sshll.u32 %s239_s5, 3 }
  0x3f   : > { %s241_s15 = scalar_lea.vmem %s1197_s3, %s764_s16 }
  0x45   : > { %940 = vrot.lane.b32.xlu1 %v869_v8, %s1018_s6  ;;  %945 = vrot.lane.b32.xlu2 %v854_v3, %s1021_s9 }
  0x46   : > { %935 = vrot.lane.b32.xlu0 %v854_v3, %s1020_s8 }
  0x4d   : > { %955 = vrot.lane.b32.xlu1 %v869_v8, %s1019_s7  ;;  %960 = vrot.lane.b32.xlu2 %v869_v8, %s1021_s9 }
  0x4e   : > { %950 = vrot.lane.b32.xlu0 %v869_v8, %s1020_s8  ;;  %v307_v8 = vld [vmem:[%s1195_s1 + $0x10] sm:$0xff]  ;;  %s250_s8 = scalar_lea.vmem %s1198_s4, %s766_s30 }
  0x6f   : > { %v866_v9 = vpop.permute.xlu2 %865 }
  0x70   : > { %v867_v17 = vunpack.i.l.bf16 %v866_v9  ;;  %v868_v19 = vunpack.i.h.bf16 %v866_v9 }
  0x77   : > { %v1105_v10 = vpop.permute.xlu2 %870 }
  0x78   : > { %v872_v58 = vunpack.i.l.bf16 %v1105_v10  ;;  %v873_v60 = vunpack.i.h.bf16 %v1105_v10 }
  0x7f   : > { %v1107_v16 = vpop.permute.xlu2 %885 }
  0x80   : > { %v887_v63 = vunpack.i.l.bf16 %v1107_v16 }
  0x87   : > { %v856_v11 = vpop.permute.xlu1 %855  ;;  %v901_v25 = vpop.permute.xlu2 %900 }
  0x88   : > { %v846_v12 = vpop.permute.xlu0 %845  ;;  %v857_v13 = vunpack.i.l.bf16 %v856_v11  ;;  %v858_v14 = vunpack.i.h.bf16 %v856_v11  ;;  %v902_v32 = vunpack.i.l.bf16 %v901_v25  ;;  %v903_v34 = vunpack.i.h.bf16 %v901_v25  ;;  %v774_v11 = vld [vmem:[%s1195_s1 + $0x38] sm:$0xff] }
  0x89   : > { %v847_v15 = vunpack.i.l.bf16 %v846_v12  ;;  %v848_v18 = vunpack.i.h.bf16 %v846_v12 }
  0x8a   : > { %376 = vmatpush.msra.mxu0 %v857_v13  ;;  %v588_v13 = vld [vmem:[%s1196_s2] sm:$0xff] }
  0x8b   : > { %428 = vmatpush.msra.mxu2 %v847_v15  ;;  %v1022_v15 = vmov 0  }
  0x8c   : > { %377 = vmatpush.msra.mxu0 %v858_v14  ;;  %965 = vset.pattern.permute.xlu1 %v1022_v15 }
  0x8d   : > { %429 = vmatpush.msra.mxu2 %v848_v18  ;;  %592 = vperm.xlu1 %965, %v588_v13  }
  0x8e   : > { %378 = vmatpush.msra.mxu0 %v867_v17  ;;  %964 = vset.pattern.permute.xlu0 %v1022_v15 }
  0x8f   : > { %v861_v20 = vpop.permute.xlu1 %860  ;;  %v916_v35 = vpop.permute.xlu2 %915 }
  0x90   : > { %v851_v21 = vpop.permute.xlu0 %850  ;;  %379 = vmatpush.msra.mxu0 %v868_v19  ;;  %v862_v24 = vunpack.i.l.bf16 %v861_v20  ;;  %v863_v26 = vunpack.i.h.bf16 %v861_v20  ;;  %v917_v36 = vunpack.i.l.bf16 %v916_v35  ;;  %v918_v41 = vunpack.i.h.bf16 %v916_v35  ;;  %v589_v20 = vld [vmem:[%s1196_s2 + $0x8] sm:$0xff] }
  0x91   : > { %v852_v22 = vunpack.i.l.bf16 %v851_v21  ;;  %v853_v23 = vunpack.i.h.bf16 %v851_v21  ;;  %597 = vperm.xlu0 %964, %v589_v20  }
  0x93   : > { %430 = vmatpush.msra.mxu2 %v852_v22  ;;  %v783_v22 = vld [vmem:[%s1195_s1 + $0x48] sm:$0xff] }
  0x95   : > { %431 = vmatpush.msra.mxu2 %v853_v23  ;;  %v771_v23 = vld [vmem:[%s1195_s1 + $0x20] sm:$0xff] }
  0x97   : > { %432 = vmatpush.msra.mxu2 %v862_v24  ;;  %v881_v27 = vpop.permute.xlu1 %880  ;;  %v931_v49 = vpop.permute.xlu2 %930 }
  0x98   : > { %v876_v28 = vpop.permute.xlu0 %875  ;;  %v882_v29 = vunpack.i.l.bf16 %v881_v27  ;;  %v883_v30 = vunpack.i.h.bf16 %v881_v27  ;;  %v932_v50 = vunpack.i.l.bf16 %v931_v49  ;;  %v933_v52 = vunpack.i.h.bf16 %v931_v49 }
  0x99   : > { %433 = vmatpush.msra.mxu2 %v863_v26  ;;  %v877_v31 = vunpack.i.l.bf16 %v876_v28  ;;  %v878_v33 = vunpack.i.h.bf16 %v876_v28 }
  0x9a   : > { %380 = vmatpush.msra.mxu0 %v882_v29 }
  0x9b   : > { %434 = vmatpush.msra.mxu2 %v877_v31  ;;  %v773_v31 = vld [vmem:[%s1195_s1 + $0x30] sm:$0xff] }
  0x9c   : > { %381 = vmatpush.msra.mxu0 %v883_v30  ;;  %v785_v30 = vld [vmem:[%s1195_s1 + $0x58] sm:$0xff] }
  0x9d   : > { %435 = vmatpush.msra.mxu2 %v878_v33  ;;  %v784_v33 = vld [vmem:[%s1195_s1 + $0x50] sm:$0xff] }
  0x9e   : > { %382 = vmatpush.msra.mxu0 %v902_v32  ;;  %v782_v32 = vld [vmem:[%s1195_s1 + $0x40] sm:$0xff] }
  0x9f   : > { %v896_v37 = vpop.permute.xlu1 %895  ;;  %v946_v3 = vpop.permute.xlu2 %945 }
  0xa0   : > { %v891_v38 = vpop.permute.xlu0 %890  ;;  %v897_v39 = vunpack.i.l.bf16 %v896_v37  ;;  %v898_v40 = vunpack.i.h.bf16 %v896_v37  ;;  %383 = vmatpush.msra.mxu0 %v903_v34  ;;  %v947_v9 = vunpack.i.l.bf16 %v946_v3  ;;  %v948_v12 = vunpack.i.h.bf16 %v946_v3 }
  0xa1   : > { %v892_v42 = vunpack.i.l.bf16 %v891_v38  ;;  %v893_v43 = vunpack.i.h.bf16 %v891_v38 }
  0xa2   : > { %436 = vmatpush.msra.mxu2 %v897_v39  ;;  %384 = vmatpush.msra.mxu0 %v917_v36 }
  0xa3   : > { %465 = vmatpush.msra.mxu3 %v892_v42 }
  0xa4   : > { %437 = vmatpush.msra.mxu2 %v898_v40  ;;  %385 = vmatpush.msra.mxu0 %v918_v41 }
  0xa5   : > { %466 = vmatpush.msra.mxu3 %v893_v43 }
  0xa6   : > { %777 = vmatmul.msk.f32.vlgmr.msra.gmra.mxu3 %vm369_vm0, %v306_v44 }
  0xa7   : > { %v911_v45 = vpop.permute.xlu1 %910  ;;  %v961_v28 = vpop.permute.xlu2 %960 }
  0xa8   : > { %v906_v46 = vpop.permute.xlu0 %905  ;;  %v912_v47 = vunpack.i.l.bf16 %v911_v45  ;;  %v913_v48 = vunpack.i.h.bf16 %v911_v45 }
  0xa9   : > { %v907_v10 = vunpack.i.l.bf16 %v906_v46  ;;  %v908_v14 = vunpack.i.h.bf16 %v906_v46 }
  0xaa   : > { %438 = vmatpush.msra.mxu2 %v912_v47 }
  0xac   : > { %439 = vmatpush.msra.mxu2 %v913_v48 }
  0xae   : > { %440 = vmatpush.msra.mxu2 %v932_v50  ;;  %778 = vmatmul.msk.f32.gmra.mxu3 %vm369_vm0, %v308_v51 }
  0xaf   : > { %v926_v53 = vpop.permute.xlu1 %925 }
  0xb0   : > { %v921_v54 = vpop.permute.xlu0 %920  ;;  %441 = vmatpush.msra.mxu2 %v933_v52  ;;  %v927_v17 = vunpack.i.l.bf16 %v926_v53  ;;  %v928_v21 = vunpack.i.h.bf16 %v926_v53 }
  0xb1   : > { %v922_v55 = vunpack.i.l.bf16 %v921_v54  ;;  %v923_v57 = vunpack.i.h.bf16 %v921_v54 }
  0xb2   : > { %442 = vmatpush.msra.mxu2 %v1095_v4 }
  0xb3   : > { %413 = vmatpush.msra.mxu1 %v922_v55 }
  0xb4   : > { %443 = vmatpush.msra.mxu2 %v1091_v2  ;;  %v888_v2 = vunpack.i.h.bf16 %v1107_v16 }
  0xb5   : > { %414 = vmatpush.msra.mxu1 %v923_v57  ;;  %444 = vmatmul.f32.vlgmr.msra.gmra.mxu2 %v305_v56 }
  0xb6   : > { %775 = vmatmul.msk.f32.vlgmr.msra.gmra.mxu1 %vm369_vm0, %v772_v59 }
  0xb7   : > { %540 = vmatpush.msrb.mxu1 %v872_v58  ;;  %v941_v61 = vpop.permute.xlu1 %940 }
  0xb8   : > { %v936_v62 = vpop.permute.xlu0 %935  ;;  %v942_v25 = vunpack.i.l.bf16 %v941_v61  ;;  %v943_v26 = vunpack.i.h.bf16 %v941_v61 }
  0xb9   : > { %541 = vmatpush.msrb.mxu1 %v873_v60  ;;  %v937_v4 = vunpack.i.l.bf16 %v936_v62  ;;  %v938_v5 = vunpack.i.h.bf16 %v936_v62 }
  0xbb   : > { %542 = vmatpush.msrb.mxu1 %v887_v63  ;;  %386 = vmatpush.msra.mxu0 %v937_v4 }
  0xbd   : > { %543 = vmatpush.msrb.mxu1 %v888_v2  ;;  %387 = vmatpush.msra.mxu0 %v938_v5 }
  0xbe   : > { %447 = vmatmul.f32.gmra.mxu2 %v307_v8  ;;  %776 = vmatmul.msk.f32.gmra.mxu1 %vm369_vm0, %v774_v11 }
  0xbf   : > { %544 = vmatpush.msrb.mxu1 %v907_v10  ;;  %388 = vmatpush.msra.mxu0 %v947_v9  ;;  %v956_v16 = vpop.permute.xlu1 %955 }
  0xc0   : > { %v957_v18 = vunpack.i.l.bf16 %v956_v16  ;;  %v958_v19 = vunpack.i.h.bf16 %v956_v16  ;;  %v951_v24 = vpop.permute.xlu0 %950 }
  0xc1   : > { %545 = vmatpush.msrb.mxu1 %v908_v14  ;;  %389 = vmatpush.msra.mxu0 %v948_v12  ;;  %v952_v27 = vunpack.i.l.bf16 %v951_v24  ;;  %v953_v29 = vunpack.i.h.bf16 %v951_v24 }
  0xc2   : > { %577 = vmatpush.msrb.mxu3 %v957_v18 }
  0xc3   : > { %546 = vmatpush.msrb.mxu1 %v927_v17  ;;  %390 = vmatpush.msra.mxu0 %v1089_v1  ;;  %v962_v1 = vunpack.i.l.bf16 %v961_v28 }
  0xc4   : > { %578 = vmatpush.msrb.mxu3 %v958_v19 }
  0xc5   : > { %547 = vmatpush.msrb.mxu1 %v928_v21  ;;  %391 = vmatpush.msra.mxu0 %v1087_v0  ;;  %v963_v0 = vunpack.i.h.bf16 %v961_v28  ;;  %v640_v21 = vld [vmem:[%s241_s15] sm:$0xff] }
  0xc6   : > { %786 = vmatmul.msk.f32.vlgmr.msrb.gmra.mxu3 %vm369_vm0, %v783_v22  ;;  %392 = vmatmul.f32.vlgmr.msra.gmra.mxu0 %v771_v23 }
  0xc7   : > { %548 = vmatpush.msrb.mxu1 %v942_v25 }
  0xc9   : > { %549 = vmatpush.msrb.mxu1 %v943_v26 }
  0xcb   : > { %550 = vmatpush.msrb.mxu1 %v952_v27 }
  0xcd   : > { %551 = vmatpush.msrb.mxu1 %v953_v29 }
  0xce   : > { %787 = vmatmul.msk.f32.gmra.mxu3 %vm369_vm0, %v785_v30  ;;  %395 = vmatmul.f32.gmra.mxu0 %v773_v31 }
  0xcf   : > { %552 = vmatpush.msrb.mxu1 %v962_v1 }
  0xd1   : > { %553 = vmatpush.msrb.mxu1 %v963_v0 }
  0xd3   : > { %554 = vmatpush.msrb.mxu1 %v1101_v7 }
  0xd5   : > { %555 = vmatpush.msrb.mxu1 %v1099_v6 }
  0xd6   : > { %556 = vmatmul.f32.vlgmr.msrb.gmra.mxu1 %v782_v32 }
  0xde   : > { %559 = vmatmul.f32.gmra.mxu1 %v784_v33 }
  0xff   : > { %v593_v47 = vpop.permute.xlu1 %592 }
 0x103   : > { %v598_v56 = vpop.permute.xlu0 %597 }
 0x129   : > { %v468_v34 = vpop.f32.mrf.mxu3 }
 0x131   : > { %v471_v36 = vpop.f32.mrf.mxu3 }
 0x133   : > { %v416_v35 = vpop.f32.mrf.mxu1 }
 0x138   : > { %v445_v39 = vpop.f32.mrf.mxu2 }
 0x13b   : > { %v419_v38 = vpop.f32.mrf.mxu1 }
 0x141   : > { %v448_v46 = vpop.f32.mrf.mxu2 }
 0x143   : > { %v393_v37 = vpop.f32.mrf.mxu0 }
 0x144   : > { %v417_v40 = vadd.f32 %v416_v35, %v393_v37 }
 0x146   : > { %v446_v41 = vadd.f32 %v445_v39, %v417_v40 }
 0x148   : > { %v469_v44 = vadd.f32 %v468_v34, %v446_v41 }
 0x149   : > { %v580_v7 = vpop.f32.mrf.mxu3 }
 0x14b   : > { %v396_v42 = vpop.f32.mrf.mxu0 }
 0x14c   : > { %v420_v45 = vadd.f32 %v419_v38, %v396_v42 }
 0x14e   : > { %v449_v49 = vadd.f32 %v448_v46, %v420_v45 }
 0x150   : > { %v472_v54 = vadd.f32 %v471_v36, %v449_v49 }
 0x151   : > { %v583_v51 = vpop.f32.mrf.mxu3 }
 0x153   : > { %v557_v43 = vpop.f32.mrf.mxu1 }
 0x154   : > { %v581_v6 = vadd.f32 %v580_v7, %v557_v43 }
 0x156   : > { %v586_v48 = vadd.f32 %v581_v6, %v469_v44 }
 0x158   : > { %v600_v50 = vadd.f32 %v593_v47, %v586_v48 }
 0x15a   : > { %v788_v52 = vmul.f32 -1.442695, %v600_v50 }
 0x15b   : > { %v560_v53 = vpop.f32.mrf.mxu1 }
 0x15c   : > { %966 = vpow2.f32 %v788_v52  ;;  %v584_v55 = vadd.f32 %v583_v51, %v560_v53 }
 0x15e   : > { %v587_v57 = vadd.f32 %v584_v55, %v472_v54 }
 0x160   : > { %v601_v58 = vadd.f32 %v598_v56, %v587_v57 }
 0x162   : > { %v967_v59 = vpop.eup %966  ;;  %v789_v60 = vmul.f32 -1.442695, %v601_v58 }
 0x163   : > { %v608_v61 = vadd.f32 1.0, %v967_v59 }
 0x164   : > { %968 = vpow2.f32 %v789_v60 }
 0x165   : > { %970 = vrcp.f32 %v608_v61  ;;  %v621_v2 = vand.u32 2147483648, %v608_v61  ;;  %v619_v9 = vand.u32 2147483647, %v608_v61  ;;  %vm615_vm2 = vweird.f32 %v608_v61 }
 0x167   : > { %v622_v12 = vor.u32 1.1754944e-38, %v621_v2  ;;  %vm620_vm5 = vcmp.eq.f32.partialorder %v619_v9, 8.507059e+37 }
 0x16a   : > { %v969_v62 = vpop.eup %968 }
 0x16b   : > { %v971_v63 = vpop.eup %970  ;;  %v609_v3 = vadd.f32 1.0, %v969_v62 }
 0x16c   : > { %v611_v4 = vmul.f32 %v971_v63, %v608_v61  ;;  %vm616_vm1 = vweird.f32 %v971_v63 }
 0x16d   : > { %972 = vrcp.f32 %v609_v3  ;;  %vm617_vm4 = vmor %vm615_vm2, %vm616_vm1  ;;  %v636_v17 = vand.u32 2147483648, %v609_v3  ;;  %v634_v19 = vand.u32 2147483647, %v609_v3  ;;  %vm630_vm7 = vweird.f32 %v609_v3 }
 0x16e   : > { %v612_v5 = vsub.f32 1.0, %v611_v4 }
 0x16f   : > { %v637_v22 = vor.u32 1.1754944e-38, %v636_v17  ;;  %vm635_vm9 = vcmp.eq.f32.partialorder %v634_v19, 8.507059e+37 }
 0x170   : > { %v613_v8 = vmul.f32 %v971_v63, %v612_v5 }
 0x172   : > { %v614_v10 = vadd.f32 %v971_v63, %v613_v8 }
 0x173   : > { %v973_v11 = vpop.eup %972 }
 0x174   : > { %v618_v13 = vsel %vm617_vm4, %v971_v63, %v614_v10  ;;  %v626_v14 = vmul.f32 %v973_v11, %v609_v3  ;;  %vm631_vm6 = vweird.f32 %v973_v11 }
 0x175   : > { %v623_v15 = vsel %vm620_vm5, %v622_v12, %v618_v13  ;;  %vm632_vm8 = vmor %vm630_vm7, %vm631_vm6 }
 0x176   : > { %643 = vst.msk [vmem:[%s250_s8] sm:$0xff] %vm642_vm3, %v623_v15  ;;  %v627_v16 = vsub.f32 1.0, %v626_v14 }
 0x178   : > { %v628_v18 = vmul.f32 %v973_v11, %v627_v16 }
 0x17a   : > { %v629_v20 = vadd.f32 %v973_v11, %v628_v18 }
 0x17c   : > { %v633_v23 = vsel %vm632_vm8, %v973_v11, %v629_v20 }
 0x17d   : > { %v638_v24 = vsel %vm635_vm9, %v637_v22, %v633_v23 }
 0x17e   : > { %v641_v25 = vmul.f32 %v640_v21, %v638_v24 }
 0x180   : > { %644 = vst.msk [vmem:[%s250_s8 + $0x8] sm:$0xff] %vm642_vm3, %v641_v25 }
 0x181 PF: > { %s14_s19 = sadd.s32 1, %s1012_s19   ;;  %s1199_s15 = smov %s1004_s17 }
 0x182   : > { %p11_p7 = scmp.ge.s32.totalorder %s14_s19, 14   ;;  %s1200_s16 = smov %s1008_s18 }
 0x183   : > { %s1201_s17 = smov %s1204_s20  ;;  %s1202_s18 = smov %s1208_s21 }
 0x184   :  { %13 = sbr.rel (!%p11_p7) target bundleno = 3 (0x3), region = 74 }

// kernel: decoder_forward_pallas.9
= control target key start
LH: loop header
LB: loop body
LE: loop exit
PB: predicated region body
PF: predicated region fallthrough
CT: control target
= control target key end

     0   :  { %s1109_s24 = smov 0   ;;  %s1111_s25 = smov 0   ;;  %s1229_s0 = inlined_call_operand.vmem [shape: f32[2,8,16,64], index: 0, kind: input, shape index: {}]   ;;  %s1230_s1 = inlined_call_operand.vmem [shape: f32[1,3,8,144], index: 1, kind: input, shape index: {}]   ;;  %s1231_s2 = inlined_call_operand.vmem [shape: f32[8,1], index: 2, kind: input, shape index: {}]   ;;  %s1232_s3 = inlined_call_operand.vmem [shape: f32[2,6,8,48], index: 3, kind: input, shape index: {}]   ;;  %s1233_s4 = inlined_call_operand.vmem [shape: f32[2,6,8,48], index: 4, kind: input, shape index: {}]   ;;  %s1234_s5 = inlined_call_operand.vmem [shape: f32[8,1], index: 5, kind: input, shape index: {}]   ;;  %s1235_s6 = inlined_call_operand.vmem [shape: f32[8,1], index: 6, kind: input, shape index: {}]   ;;  %s1236_s7 = inlined_call_operand.vmem [shape: f32[2,6,8,48], index: 7, kind: output, shape index: {}]  }
   0x1   :  { %s1113_s26 = smov 0   ;;  %s1115_s27 = smov 0  }
   0x2   :  { %s1117_s28 = smov 0  }
   0x3 LB: > { %s26_s29 = sadd.s32 1, %s1050_s26  ;;  %s29_s30 = sadd.s32 1, %s1054_s27  ;;  %s1058_s28 = sphi %s1117_s28, %s17_s28   ;;  %s1054_s27 = sphi %s1115_s27, %s1240_s27   ;;  %s1050_s26 = sphi %s1113_s26, %s1239_s26   ;;  %s1046_s25 = sphi %s1111_s25, %s1238_s25   ;;  %s1042_s24 = sphi %s1109_s24, %s1237_s24  }
   0x4   : > { %p27_p0 = scmp.ge.s32.totalorder %s26_s29, 6  ;;  %p822_p1 = scmp.ge.s32.totalorder %s1058_s28, 1 }
   0x5   : > { %p281_p2 = scmp.lt.s32.totalorder %s1058_s28, 13 }
   0x6   : > { %s1242_s29 = smov (%p27_p0, %s26_s29), 0  ;;  %s1244_s30 = smov (!%p27_p0, %s29_s30), %s1054_s27 }
   0x7   : > { %p282_p3 = pnand %p822_p1, %p281_p2  ;;  %p31_p4 = scmp.ge.s32.totalorder %s1244_s30, 2 }
   0x8   : > { %p332_p5 = scmp.lt.s32.totalorder (!%p282_p3), %s1046_s25, 1  ;;  %s828_s8 = sshll.u32 (!%p282_p3), %s1042_s24, 4 }
   0x9   : > { %s1246_s30 = smov (%p31_p4, %s1244_s30), 0  ;;  %285 = sbr.rel (%p282_p3) target bundleno = 354 (0x162), region = 48 }
   0xa   : > { %s1060_s14 = smov (!%p282_p3), 111   ;;  %s1061_s15 = smov (!%p282_p3), 112  }
   0xb   : > { %s1062_s16 = smov (!%p282_p3), 118   ;;  %s1063_s17 = smov (!%p282_p3), 119  }
   0xc   : > { %s1064_s18 = smov (!%p282_p3), 120   ;;  %s1065_s19 = smov (!%p282_p3), 110  }
   0xd   : > { %s1066_s20 = smov (!%p282_p3), 126   ;;  %s1067_s21 = smov (!%p282_p3), 127  }
   0xe   : > { %s1248_s25 = smov (!%p332_p5, %s1046_s25), 1  ;;  %v833_v48 = vld [vmem:[%s1230_s1 + $0x18] sm:$0xff]  ;;  %vm475_vm0 = vcmask 130048   ;;  %v664_v58 = vld [vmem:[%s1231_s2] sm:$0xff]  ;;  %v1068_v61 = vmov 0   ;;  %p339_p6 = scmp.lt.s32.totalorder %s1042_s24, 5 }
   0xf   : > { %s844_s9 = sshll.u32 %s1248_s25, 7  ;;  %v673_v59 = vld [vmem:[%s1234_s5] sm:$0xff]  ;;  %1015 = vset.pattern.permute.xlu0 %v1068_v61  ;;  %1016 = vset.pattern.permute.xlu1 %v1068_v61  ;;  %vm692_vm1 = vcmask 375808  }
  0x10   : > { %s336_s12 = scalar_lea.vmem %s1229_s0, %s844_s9  ;;  %1017 = vset.pattern.permute.xlu2 %v1068_v61  ;;  %s1250_s24 = smov (!%p339_p6, %s1042_s24), 5 }
  0x11   : > { %s362_s13 = scalar_lea.vmem %s336_s12, %s828_s8  ;;  %s845_s8 = smul.u32 6, %s1248_s25 }
  0x12   : > { %v1148_v0 = vld [vmem:[%s362_s13 + $0x10] sm:$0xff]  ;;  %v1150_v1 = vld [vmem:[%s362_s13 + $0x18] sm:$0xff]  ;;  %v1152_v2 = vld [vmem:[%s362_s13] sm:$0xff] }
  0x13   : > { %v905_v3 = vpack.i.bf16 %v1148_v0, %v1150_v1  ;;  %v1156_v4 = vld [vmem:[%s362_s13 + $0x8] sm:$0xff]  ;;  %v1160_v6 = vld [vmem:[%s362_s13 + $0x20] sm:$0xff]  ;;  %s342_s9 = sadd.s32 %s845_s8, %s1250_s24 }
  0x14   : > { %v895_v5 = vpack.i.bf16 %v1152_v2, %v1156_v4  ;;  %v1162_v7 = vld [vmem:[%s362_s13 + $0x28] sm:$0xff]  ;;  %s825_s10 = sshll.u32 %s342_s9, 3 }
  0x15   : > { %906 = vrot.lane.b32.xlu1 %v905_v3, %s1060_s14  ;;  %916 = vrot.lane.b32.xlu2 %v905_v3, %s1061_s15  ;;  %v920_v8 = vpack.i.bf16 %v1160_v6, %v1162_v7  ;;  %s344_s13 = scalar_lea.vmem %s1232_s3, %s825_s10  ;;  %s352_s25 = scalar_lea.vmem %s1233_s4, %s825_s10 }
  0x16   : > { %896 = vrot.lane.b32.xlu0 %v895_v5, %s1060_s14 }
  0x1d   : > { %911 = vrot.lane.b32.xlu1 %v895_v5, %s1062_s16  ;;  %921 = vrot.lane.b32.xlu2 %v920_v8, %s1060_s14 }
  0x1e   : > { %901 = vrot.lane.b32.xlu0 %v895_v5, %s1061_s15 }
  0x25   : > { %931 = vrot.lane.b32.xlu1 %v905_v3, %s1062_s16  ;;  %936 = vrot.lane.b32.xlu2 %v920_v8, %s1061_s15 }
  0x26   : > { %926 = vrot.lane.b32.xlu0 %v895_v5, %s1063_s17 }
  0x2d   : > { %946 = vrot.lane.b32.xlu1 %v895_v5, %s1064_s18  ;;  %951 = vrot.lane.b32.xlu2 %v905_v3, %s1063_s17 }
  0x2e   : > { %941 = vrot.lane.b32.xlu0 %v905_v3, %s1065_s19 }
  0x35   : > { %961 = vrot.lane.b32.xlu1 %v895_v5, %s1066_s20  ;;  %966 = vrot.lane.b32.xlu2 %v905_v3, %s1064_s18 }
  0x36   : > { %956 = vrot.lane.b32.xlu0 %v920_v8, %s1062_s16 }
  0x3d   : > { %976 = vrot.lane.b32.xlu1 %v895_v5, %s1065_s19  ;;  %981 = vrot.lane.b32.xlu2 %v895_v5, %s1067_s21  ;;  %v674_v5 = vld [vmem:[%s1235_s6] sm:$0xff] }
  0x3e   : > { %971 = vrot.lane.b32.xlu0 %v920_v8, %s1063_s17  ;;  %s360_s17 = scalar_lea.vmem %s1236_s7, %s825_s10 }
  0x45   : > { %991 = vrot.lane.b32.xlu1 %v920_v8, %s1064_s18  ;;  %996 = vrot.lane.b32.xlu2 %v905_v3, %s1067_s21 }
  0x46   : > { %986 = vrot.lane.b32.xlu0 %v905_v3, %s1066_s20 }
  0x4d   : > { %1006 = vrot.lane.b32.xlu1 %v920_v8, %s1065_s19  ;;  %1011 = vrot.lane.b32.xlu2 %v920_v8, %s1067_s21 }
  0x4e   : > { %1001 = vrot.lane.b32.xlu0 %v920_v8, %s1066_s20 }
  0x55   : > { %678 = vperm.xlu1 %1016, %v673_v59   ;;  %684 = vperm.xlu2 %1017, %v674_v5  }
  0x56   : > { %667 = vperm.xlu0 %1015, %v664_v58  }
  0x6f   : > { %v917_v9 = vpop.permute.xlu2 %916 }
  0x70   : > { %v918_v21 = vunpack.i.l.bf16 %v917_v9  ;;  %v919_v23 = vunpack.i.h.bf16 %v917_v9  ;;  %v416_v9 = vld [vmem:[%s1230_s1 + $0x8] sm:$0xff] }
  0x77   : > { %v922_v10 = vpop.permute.xlu2 %921 }
  0x78   : > { %v923_v11 = vunpack.i.l.bf16 %v922_v10  ;;  %v924_v12 = vunpack.i.h.bf16 %v922_v10 }
  0x7a   : > { %623 = vmatpush.msra.mxu1 %v923_v11  ;;  %v415_v11 = vld [vmem:[%s1230_s1] sm:$0xff] }
  0x7c   : > { %624 = vmatpush.msra.mxu1 %v924_v12 }
  0x7f   : > { %v937_v13 = vpop.permute.xlu2 %936 }
  0x80   : > { %v938_v14 = vunpack.i.l.bf16 %v937_v13  ;;  %v939_v15 = vunpack.i.h.bf16 %v937_v13 }
  0x82   : > { %625 = vmatpush.msra.mxu1 %v938_v14 }
  0x84   : > { %626 = vmatpush.msra.mxu1 %v939_v15 }
  0x87   : > { %v907_v16 = vpop.permute.xlu1 %906  ;;  %v952_v27 = vpop.permute.xlu2 %951 }
  0x88   : > { %v897_v17 = vpop.permute.xlu0 %896  ;;  %v908_v18 = vunpack.i.l.bf16 %v907_v16  ;;  %v909_v19 = vunpack.i.h.bf16 %v907_v16  ;;  %v953_v36 = vunpack.i.l.bf16 %v952_v27  ;;  %v954_v39 = vunpack.i.h.bf16 %v952_v27 }
  0x89   : > { %v898_v20 = vunpack.i.l.bf16 %v897_v17  ;;  %v899_v22 = vunpack.i.h.bf16 %v897_v17 }
  0x8a   : > { %479 = vmatpush.msra.mxu0 %v908_v18 }
  0x8b   : > { %522 = vmatpush.msra.mxu2 %v898_v20 }
  0x8c   : > { %480 = vmatpush.msra.mxu0 %v909_v19 }
  0x8d   : > { %523 = vmatpush.msra.mxu2 %v899_v22 }
  0x8e   : > { %481 = vmatpush.msra.mxu0 %v918_v21 }
  0x8f   : > { %v912_v24 = vpop.permute.xlu1 %911  ;;  %v967_v38 = vpop.permute.xlu2 %966 }
  0x90   : > { %v902_v25 = vpop.permute.xlu0 %901  ;;  %482 = vmatpush.msra.mxu0 %v919_v23  ;;  %v913_v29 = vunpack.i.l.bf16 %v912_v24  ;;  %v914_v31 = vunpack.i.h.bf16 %v912_v24  ;;  %v968_v40 = vunpack.i.l.bf16 %v967_v38  ;;  %v969_v45 = vunpack.i.h.bf16 %v967_v38 }
  0x91   : > { %v903_v26 = vunpack.i.l.bf16 %v902_v25  ;;  %v904_v28 = vunpack.i.h.bf16 %v902_v25 }
  0x93   : > { %524 = vmatpush.msra.mxu2 %v903_v26  ;;  %v832_v26 = vld [vmem:[%s1230_s1 + $0x10] sm:$0xff] }
  0x95   : > { %525 = vmatpush.msra.mxu2 %v904_v28  ;;  %v840_v28 = vld [vmem:[%s1230_s1 + $0x28] sm:$0xff] }
  0x97   : > { %526 = vmatpush.msra.mxu2 %v913_v29  ;;  %v932_v30 = vpop.permute.xlu1 %931  ;;  %v982_v50 = vpop.permute.xlu2 %981  ;;  %v839_v29 = vld [vmem:[%s1230_s1 + $0x20] sm:$0xff] }
  0x98   : > { %v927_v32 = vpop.permute.xlu0 %926  ;;  %v933_v33 = vunpack.i.l.bf16 %v932_v30  ;;  %v934_v34 = vunpack.i.h.bf16 %v932_v30  ;;  %v983_v55 = vunpack.i.l.bf16 %v982_v50  ;;  %v984_v57 = vunpack.i.h.bf16 %v982_v50 }
  0x99   : > { %527 = vmatpush.msra.mxu2 %v914_v31  ;;  %v928_v35 = vunpack.i.l.bf16 %v927_v32  ;;  %v929_v37 = vunpack.i.h.bf16 %v927_v32 }
  0x9a   : > { %483 = vmatpush.msra.mxu0 %v933_v33 }
  0x9b   : > { %528 = vmatpush.msra.mxu2 %v928_v35 }
  0x9c   : > { %484 = vmatpush.msra.mxu0 %v934_v34 }
  0x9d   : > { %529 = vmatpush.msra.mxu2 %v929_v37 }
  0x9e   : > { %485 = vmatpush.msra.mxu0 %v953_v36 }
  0x9f   : > { %v947_v41 = vpop.permute.xlu1 %946  ;;  %v997_v12 = vpop.permute.xlu2 %996 }
  0xa0   : > { %v942_v42 = vpop.permute.xlu0 %941  ;;  %v948_v43 = vunpack.i.l.bf16 %v947_v41  ;;  %v949_v44 = vunpack.i.h.bf16 %v947_v41  ;;  %486 = vmatpush.msra.mxu0 %v954_v39  ;;  %v998_v18 = vunpack.i.l.bf16 %v997_v12  ;;  %v999_v20 = vunpack.i.h.bf16 %v997_v12 }
  0xa1   : > { %v943_v46 = vunpack.i.l.bf16 %v942_v42  ;;  %v944_v47 = vunpack.i.h.bf16 %v942_v42 }
  0xa2   : > { %530 = vmatpush.msra.mxu2 %v948_v43  ;;  %487 = vmatpush.msra.mxu0 %v968_v40 }
  0xa3   : > { %513 = vmatpush.msra.mxu3 %v943_v46 }
  0xa4   : > { %531 = vmatpush.msra.mxu2 %v949_v44  ;;  %488 = vmatpush.msra.mxu0 %v969_v45  ;;  %v672_v44 = vld [vmem:[%s352_s25] sm:$0xff] }
  0xa5   : > { %514 = vmatpush.msra.mxu3 %v944_v47 }
  0xa6   : > { %834 = vmatmul.msk.f32.vlgmr.msra.gmra.mxu3 %vm475_vm0, %v833_v48 }
  0xa7   : > { %v962_v49 = vpop.permute.xlu1 %961  ;;  %v1012_v23 = vpop.permute.xlu2 %1011 }
  0xa8   : > { %v957_v51 = vpop.permute.xlu0 %956  ;;  %v963_v52 = vunpack.i.l.bf16 %v962_v49  ;;  %v964_v53 = vunpack.i.h.bf16 %v962_v49  ;;  %v1013_v27 = vunpack.i.l.bf16 %v1012_v23 }
  0xa9   : > { %v958_v54 = vunpack.i.l.bf16 %v957_v51  ;;  %v959_v56 = vunpack.i.h.bf16 %v957_v51 }
  0xaa   : > { %532 = vmatpush.msra.mxu2 %v963_v52 }
  0xab   : > { %627 = vmatpush.msra.mxu1 %v958_v54 }
  0xac   : > { %533 = vmatpush.msra.mxu2 %v964_v53 }
  0xad   : > { %628 = vmatpush.msra.mxu1 %v959_v56 }
  0xae   : > { %534 = vmatpush.msra.mxu2 %v983_v55 }
  0xaf   : > { %v977_v60 = vpop.permute.xlu1 %976  ;;  %v685_v45 = vpop.permute.xlu2 %684 }
  0xb0   : > { %v972_v62 = vpop.permute.xlu0 %971  ;;  %v978_v63 = vunpack.i.l.bf16 %v977_v60  ;;  %v979_v3 = vunpack.i.h.bf16 %v977_v60  ;;  %535 = vmatpush.msra.mxu2 %v984_v57 }
  0xb1   : > { %v973_v8 = vunpack.i.l.bf16 %v972_v62  ;;  %v974_v10 = vunpack.i.h.bf16 %v972_v62 }
  0xb2   : > { %556 = vmatpush.msrb.mxu3 %v978_v63  ;;  %536 = vmatpush.msra.mxu2 %v1156_v4 }
  0xb3   : > { %629 = vmatpush.msra.mxu1 %v973_v8 }
  0xb4   : > { %557 = vmatpush.msrb.mxu3 %v979_v3  ;;  %537 = vmatpush.msra.mxu2 %v1152_v2 }
  0xb5   : > { %630 = vmatpush.msra.mxu1 %v974_v10  ;;  %835 = vmatmul.msk.f32.vlgmr.msrb.gmra.mxu3 %vm475_vm0, %v416_v9 }
  0xb6   : > { %538 = vmatmul.f32.vlgmr.msra.gmra.mxu2 %v415_v11 }
  0xb7   : > { %v992_v4 = vpop.permute.xlu1 %991 }
  0xb8   : > { %v987_v13 = vpop.permute.xlu0 %986  ;;  %v993_v14 = vunpack.i.l.bf16 %v992_v4  ;;  %v994_v15 = vunpack.i.h.bf16 %v992_v4 }
  0xb9   : > { %v988_v16 = vunpack.i.l.bf16 %v987_v13  ;;  %v989_v17 = vunpack.i.h.bf16 %v987_v13 }
  0xba   : > { %631 = vmatpush.msra.mxu1 %v993_v14 }
  0xbb   : > { %489 = vmatpush.msra.mxu0 %v988_v16 }
  0xbc   : > { %632 = vmatpush.msra.mxu1 %v994_v15 }
  0xbd   : > { %490 = vmatpush.msra.mxu0 %v989_v17 }
  0xbf   : > { %491 = vmatpush.msra.mxu0 %v998_v18  ;;  %v1007_v19 = vpop.permute.xlu1 %1006 }
  0xc0   : > { %v1009_v2 = vunpack.i.h.bf16 %v1007_v19  ;;  %v1008_v21 = vunpack.i.l.bf16 %v1007_v19  ;;  %v1002_v22 = vpop.permute.xlu0 %1001 }
  0xc1   : > { %492 = vmatpush.msra.mxu0 %v999_v20  ;;  %v1003_v24 = vunpack.i.l.bf16 %v1002_v22  ;;  %v1004_v25 = vunpack.i.h.bf16 %v1002_v22 }
  0xc2   : > { %657 = vmatpush.msra.mxu3 %v1008_v21 }
  0xc3   : > { %493 = vmatpush.msra.mxu0 %v1150_v1  ;;  %633 = vmatpush.msra.mxu1 %v1003_v24  ;;  %v1014_v1 = vunpack.i.h.bf16 %v1012_v23 }
  0xc4   : > { %658 = vmatpush.msra.mxu3 %v1009_v2 }
  0xc5   : > { %494 = vmatpush.msra.mxu0 %v1148_v0  ;;  %634 = vmatpush.msra.mxu1 %v1004_v25 }
  0xc6   : > { %495 = vmatmul.f32.vlgmr.msra.gmra.mxu0 %v832_v26  ;;  %841 = vmatmul.msk.f32.vlgmr.msra.gmra.mxu3 %vm475_vm0, %v840_v28 }
  0xc7   : > { %635 = vmatpush.msra.mxu1 %v1013_v27  ;;  %v679_v41 = vpop.permute.xlu1 %678 }
  0xc8   : > { %v668_v38 = vpop.permute.xlu0 %667 }
  0xc9   : > { %636 = vmatpush.msra.mxu1 %v1014_v1 }
  0xcb   : > { %637 = vmatpush.msra.mxu1 %v1162_v7 }
  0xcd   : > { %638 = vmatpush.msra.mxu1 %v1160_v6  ;;  %v671_v6 = vld [vmem:[%s344_s13] sm:$0xff] }
  0xce   : > { %639 = vmatmul.f32.vlgmr.msra.gmra.mxu1 %v839_v29  ;;  %v688_v42 = vsub.f32 1.0, %v671_v6 }
  0xd0   : > { %v689_v47 = vmul.f32 %v688_v42, %v672_v44 }
 0x129   : > { %v516_v30 = vpop.f32.mrf.mxu3 }
 0x138   : > { %v559_v0 = vpop.f32.mrf.mxu3 }
 0x139   : > { %v539_v33 = vpop.f32.mrf.mxu2 }
 0x143   : > { %v496_v31 = vpop.f32.mrf.mxu0 }
 0x144   : > { %v517_v32 = vadd.f32 %v516_v30, %v496_v31 }
 0x146   : > { %v540_v34 = vadd.f32 %v539_v33, %v517_v32 }
 0x148   : > { %v560_v7 = vadd.f32 %v559_v0, %v540_v34 }
 0x149   : > { %v660_v35 = vpop.f32.mrf.mxu3 }
 0x14b   : > { %v640_v36 = vpop.f32.mrf.mxu1 }
 0x14c   : > { %v661_v37 = vadd.f32 %v660_v35, %v640_v36 }
 0x14e   : > { %v663_v39 = vadd.f32 %v661_v37, %v560_v7 }
 0x150   : > { %v670_v40 = vadd.f32 %v668_v38, %v663_v39 }
 0x152   : > { %1018 = vtanh.f32 %v670_v40 }
 0x158   : > { %v1019_v43 = vpop.eup %1018 }
 0x159   : > { %v681_v46 = vmul.f32 %v1019_v43, %v679_v41 }
 0x15b   : > { %v687_v48 = vadd.f32 %v685_v45, %v681_v46 }
 0x15d   : > { %v690_v49 = vmul.f32 %v687_v48, %v671_v6 }
 0x15f   : > { %v691_v50 = vadd.f32 %v690_v49, %v689_v47 }
 0x161   : > { %693 = vst.msk [vmem:[%s360_s17] sm:$0xff] %vm692_vm1, %v691_v50 }
 0x162 PF: > { %s17_s28 = sadd.s32 1, %s1058_s28   ;;  %s1237_s24 = smov %s1050_s26 }
 0x163   : > { %p14_p7 = scmp.ge.s32.totalorder %s17_s28, 14   ;;  %s1238_s25 = smov %s1054_s27 }
 0x164   : > { %s1239_s26 = smov %s1242_s29  ;;  %s1240_s27 = smov %s1246_s30 }
 0x165   :  { %16 = sbr.rel (!%p14_p7) target bundleno = 3 (0x3), region = 89 }

// kernel: decoder_forward_pallas.10
= control target key start
LH: loop header
LB: loop body
LE: loop exit
PB: predicated region body
PF: predicated region fallthrough
CT: control target
= control target key end

     0   :  { %s2331_s12 = smov 0   ;;  %s2333_s13 = smov 0   ;;  %s2962_s0 = inlined_call_operand.vmem [shape: f32[2,14,8,196], index: 0, kind: input, shape index: {}]   ;;  %s2963_s1 = inlined_call_operand.vmem [shape: f32[4,3,16,72], index: 1, kind: input, shape index: {}]   ;;  %s2964_s2 = inlined_call_operand.vmem [shape: f32[64,1], index: 2, kind: input, shape index: {}]   ;;  %s2965_s3 = inlined_call_operand.vmem [shape: f32[2,6,64,84], index: 3, kind: output, shape index: {}]  }
   0x1   :  { %s2335_s14 = smov 0   ;;  %s2337_s15 = smov 0  }
   0x2   :  { %s2339_s16 = smov 0  }
   0x3 LB: > { %s22_s17 = sadd.s32 1, %s2274_s14  ;;  %s25_s18 = sadd.s32 1, %s2278_s15  ;;  %s2282_s16 = sphi %s2339_s16, %s13_s16   ;;  %s2278_s15 = sphi %s2337_s15, %s2969_s15   ;;  %s2274_s14 = sphi %s2335_s14, %s2968_s14   ;;  %s2270_s13 = sphi %s2333_s13, %s2967_s13   ;;  %s2266_s12 = sphi %s2331_s12, %s2966_s12  }
   0x4   : > { %p23_p0 = scmp.ge.s32.totalorder %s22_s17, 6  ;;  %p1521_p1 = scmp.ge.s32.totalorder %s2282_s16, 1 }
   0x5   : > { %p151_p2 = scmp.lt.s32.totalorder %s2282_s16, 13 }
   0x6   : > { %s2971_s17 = smov (%p23_p0, %s22_s17), 0  ;;  %s2973_s18 = smov (!%p23_p0, %s25_s18), %s2278_s15 }
   0x7   : > { %p152_p3 = pnand %p1521_p1, %p151_p2  ;;  %p27_p4 = scmp.ge.s32.totalorder %s2973_s18, 2 }
   0x8   : > { %p179_p5 = scmp.lt.s32.totalorder (!%p152_p3), %s2270_s13, 1  ;;  %s1525_s20 = sshll.u32 (!%p152_p3), %s2266_s12, 4 }
   0x9   : > { %s2975_s18 = smov (%p27_p4, %s2973_s18), 0  ;;  %155 = sbr.rel (%p152_p3) target bundleno = 986 (0x3da), region = 32 }
   0xa   : > { %s2284_s25 = smov (!%p152_p3), 114   ;;  %s2285_s26 = smov (!%p152_p3), 127  }
   0xb   : > { %s2286_s27 = smov (!%p152_p3), 112   ;;  %s2287_s28 = smov (!%p152_p3), 113  }
   0xc   : > { %s2288_s29 = smov (!%p152_p3), 126   ;;  %s2289_s30 = smov (!%p152_p3), 100  }
   0xd   : > { %s2290_s4 = smov (!%p152_p3), 98   ;;  %s2291_s5 = smov (!%p152_p3), 99  }
   0xe   : > { %s2977_s13 = smov (!%p179_p5, %s2270_s13), 1  ;;  %v2292_v7 = vmov 0   ;;  %v505_v15 = vld [vmem:[%s2964_s2 + $0x8] sm:$0xff]  ;;  %s2293_s8 = smov 125   ;;  %v504_v17 = vld [vmem:[%s2964_s2] sm:$0xff]  ;;  %vm209_vm0 = vcmask 932864  }
   0xf   : > { %s1600_s19 = smul.u32 224, %s2977_s13  ;;  %1774 = vset.pattern.permute.xlu0 %v2292_v7  ;;  %1775 = vset.pattern.permute.xlu1 %v2292_v7  ;;  %s2294_s11 = smov 122   ;;  %vm215_vm1 = vcmask 924672   ;;  %vm221_vm2 = vcmask 916480   ;;  %vm239_vm3 = vcmask 801792   ;;  %vm227_vm4 = vcmask 818176  }
  0x10   : > { %2006 = vset.pattern.permute.xlu2 %v2292_v7  ;;  %s2297_s21 = smov 80   ;;  %s2298_s22 = smov 44   ;;  %vm233_vm5 = vcmask 809984   ;;  %vm534_vm6 = vcmask 703488   ;;  %vm540_vm7 = vcmask 678912   ;;  %vm552_vm8 = vcmask 359424  }
  0x11   : > { %s183_s23 = scalar_lea.vmem %s2962_s0, %s1600_s19  ;;  %s2295_s19 = smov 86   ;;  %vm558_vm9 = vcmask 334848   ;;  %vm546_vm10 = vcmask 654336   ;;  %vm315_vm11 = vcmask 588800   ;;  %vm564_vm12 = vcmask 310272  }
  0x12   : > { %s2370_s24 = scalar_lea.vmem %s183_s23, %s1525_s20  ;;  %s2296_s20 = smov 83   ;;  %vm1396_vm14 = vcmask 621568  }
  0x13   : > { %v2373_v0 = vld [vmem:[%s2370_s24 + $0x30] sm:$0xff]  ;;  %v1527_v1 = vld [vmem:[%s2370_s24 + $0x38] sm:$0xff]  ;;  %v2377_v2 = vld [vmem:[%s2370_s24 + $0x40] sm:$0xff]  ;;  %s2299_s23 = smov 38   ;;  %p186_p6 = scmp.lt.s32.totalorder %s2266_s12, 5 }
  0x14   : > { %v1679_v3 = vpack.i.bf16 %v1527_v1, %v2373_v0  ;;  %v1669_v4 = vpack.i.bf16 %v2377_v2, %v2373_v0  ;;  %v2388_v5 = vld [vmem:[%s2370_s24 + $0x48] sm:$0xff]  ;;  %v2407_v8 = vld [vmem:[%s2370_s24 + $0x50] sm:$0xff]  ;;  %v1539_v9 = vld [vmem:[%s2370_s24 + $0x58] sm:$0xff]  ;;  %s2301_s10 = smov 124   ;;  %s2307_s9 = smov 8  }
  0x15   : > { %v2392_v6 = vpack.i.bf16 %v2388_v5, %v2377_v2  ;;  %v2411_v10 = vld [vmem:[%s2370_s24 + $0x20] sm:$0xff]  ;;  %v1744_v11 = vpack.i.bf16 %v1539_v9, %v2407_v8  ;;  %v2423_v13 = vld [vmem:[%s2370_s24 + $0x10] sm:$0xff]  ;;  %v1546_v16 = vld [vmem:[%s2370_s24 + $0x18] sm:$0xff]  ;;  %s2979_s12 = smov (!%p186_p6, %s2266_s12), 5 }
  0x16   : > { %1680 = vrot.lane.b32.xlu1 %v1679_v3, %s2284_s25  ;;  %1670 = vrot.lane.b32.xlu0 %v1669_v4, %s2285_s26  ;;  %v1739_v12 = vpack.i.bf16 %v2411_v10, %v2407_v8  ;;  %v1776_v14 = vpack.i.bf16 %v2377_v2, %v2423_v13  ;;  %v1786_v18 = vpack.i.bf16 %v1546_v16, %v2423_v13 }
  0x17   : > { %1690 = vrot.lane.b32.xlu2 %v1679_v3, %s2286_s27  ;;  %v1791_v19 = vpack.i.bf16 %v2388_v5, %v1546_v16 }
  0x1e   : > { %1685 = vrot.lane.b32.xlu1 %v1679_v3, %s2287_s28  ;;  %1675 = vrot.lane.b32.xlu0 %v1669_v4, %s2288_s29 }
  0x1f   : > { %1695 = vrot.lane.b32.xlu2 %v1679_v3, %s2289_s30 }
  0x26   : > { %1705 = vrot.lane.b32.xlu1 %v1679_v3, %s2290_s4  ;;  %1700 = vrot.lane.b32.xlu0 %v1679_v3, %s2291_s5 }
  0x27   : > { %1710 = vrot.lane.b32.xlu2 %v2392_v6, %s2284_s25 }
  0x2e   : > { %1720 = vrot.lane.b32.xlu1 %v2392_v6, %s2286_s27  ;;  %1715 = vrot.lane.b32.xlu0 %v2392_v6, %s2287_s28 }
  0x2f   : > { %1725 = vrot.lane.b32.xlu2 %v2392_v6, %s2289_s30 }
  0x36   : > { %1735 = vrot.lane.b32.xlu1 %v2392_v6, %s2290_s4  ;;  %1730 = vrot.lane.b32.xlu0 %v2392_v6, %s2291_s5 }
  0x37   : > { %408 = vrot.lane.b32.xlu2 %v2407_v8, %s2285_s26  ;;  %s2304_s26 = smov 70  }
  0x3e   : > { %1745 = vrot.lane.b32.xlu1 %v1744_v11, %s2284_s25  ;;  %1740 = vrot.lane.b32.xlu0 %v1739_v12, %s2288_s29  ;;  %s2300_s25 = smov 41  }
  0x3f   : > { %1750 = vrot.lane.b32.xlu2 %v1744_v11, %s2287_s28 }
  0x46   : > { %1760 = vrot.lane.b32.xlu1 %v1744_v11, %s2289_s30  ;;  %1755 = vrot.lane.b32.xlu0 %v1744_v11, %s2286_s27  ;;  %s2305_s27 = smov 68  }
  0x47   : > { %1765 = vrot.lane.b32.xlu2 %v1744_v11, %s2291_s5 }
  0x4e   : > { %1770 = vrot.lane.b32.xlu0 %v1744_v11, %s2290_s4  ;;  %513 = vperm.xlu1 %1775, %v505_v15  }
  0x4f   : > { %1777 = vrot.lane.b32.xlu2 %v1776_v14, %s2293_s8 }
  0x56   : > { %508 = vperm.xlu0 %1774, %v504_v17   ;;  %1782 = vrot.lane.b32.xlu1 %v1776_v14, %s2294_s11 }
  0x57   : > { %1787 = vrot.lane.b32.xlu2 %v1786_v18, %s2295_s19 }
  0x5e   : > { %1792 = vrot.lane.b32.xlu0 %v1791_v19, %s2296_s20  ;;  %1797 = vrot.lane.b32.xlu1 %v1786_v18, %s2297_s21 }
  0x5f   : > { %1802 = vrot.lane.b32.xlu2 %v1786_v18, %s2298_s22 }
  0x66   : > { %1812 = vrot.lane.b32.xlu1 %v1786_v18, %s2299_s23  ;;  %1807 = vrot.lane.b32.xlu0 %v1786_v18, %s2300_s25 }
  0x67   : > { %1817 = vrot.lane.b32.xlu2 %v2392_v6, %s2295_s19 }
  0x71   : > { %v2447_v20 = vpop.permute.xlu2 %1690 }
  0x72   : > { %v1693_v58 = vunpack.i.h.bf16 %v2447_v20  ;;  %v1692_v4 = vunpack.i.l.bf16 %v2447_v20 }
  0x79   : > { %v2449_v21 = vpop.permute.xlu2 %1695 }
  0x7a   : > { %v1698_v7 = vunpack.i.h.bf16 %v2449_v21  ;;  %v1697_v11 = vunpack.i.l.bf16 %v2449_v21 }
  0x81   : > { %v1711_v22 = vpop.permute.xlu2 %1710 }
  0x82   : > { %v1713_v27 = vunpack.i.h.bf16 %v1711_v22  ;;  %v1712_v28 = vunpack.i.l.bf16 %v1711_v22 }
  0x84   : > { %v259_v31 = vsel %vm209_vm0, %v1712_v28, %v1713_v27 }
  0x88   : > { %v2451_v23 = vpop.permute.xlu1 %1680  ;;  %v1671_v24 = vpop.permute.xlu0 %1670 }
  0x89   : > { %v1673_v25 = vunpack.i.h.bf16 %v1671_v24  ;;  %v1726_v29 = vpop.permute.xlu2 %1725  ;;  %v1672_v33 = vunpack.i.l.bf16 %v1671_v24  ;;  %v1683_v21 = vunpack.i.h.bf16 %v2451_v23  ;;  %v1682_v22 = vunpack.i.l.bf16 %v2451_v23 }
  0x8a   : > { %v1728_v50 = vunpack.i.h.bf16 %v1726_v29  ;;  %v1727_v51 = vunpack.i.l.bf16 %v1726_v29 }
  0x8b   : > { %v1821_v26 = vpack.i.bf16 %v1673_v25, %v2377_v2  ;;  %v210_v29 = vsel %vm209_vm0, %v1682_v22, %v1683_v21 }
  0x8c   : > { %v2481_v61 = vsel %vm227_vm4, %v1727_v51, %v1728_v50 }
  0x8d   : > { %1822 = vrot.lane.b32.xlu2 %v1821_v26, %s2296_s20  ;;  %v228_v26 = vsel %vm227_vm4, %v1697_v11, %v1698_v7 }
  0x90   : > { %v2455_v30 = vpop.permute.xlu1 %1685  ;;  %v2458_v32 = vpop.permute.xlu0 %1675 }
  0x91   : > { %v1678_v34 = vunpack.i.h.bf16 %v2458_v32  ;;  %v1677_v35 = vunpack.i.l.bf16 %v2458_v32  ;;  %v409_v38 = vpop.permute.xlu2 %408  ;;  %v1688_v12 = vunpack.i.h.bf16 %v2455_v30  ;;  %v1687_v16 = vunpack.i.l.bf16 %v2455_v30  ;;  %v1558_v32 = vld [vmem:[%s2963_s1 + $0x50] sm:$0xff] }
  0x92   : > { %v1831_v41 = vpack.i.bf16 %v409_v38, %v2407_v8 }
  0x93   : > { %v1836_v36 = vpack.i.bf16 %v259_v31, %v1678_v34  ;;  %v1826_v37 = vpack.i.bf16 %v1677_v35, %v1672_v33  ;;  %v216_v27 = vsel %vm215_vm1, %v1687_v16, %v1688_v12 }
  0x94   : > { %v1856_v33 = vpack.i.bf16 %v216_v27, %v210_v29 }
  0x95   : > { %1837 = vrot.lane.b32.xlu0 %v1836_v36, %s2296_s20  ;;  %1827 = vrot.lane.b32.xlu1 %v1826_v37, %s2296_s20 }
  0x98   : > { %v1706_v39 = vpop.permute.xlu1 %1705  ;;  %v1701_v40 = vpop.permute.xlu0 %1700 }
  0x99   : > { %v1708_v53 = vunpack.i.h.bf16 %v1706_v39  ;;  %v1707_v54 = vunpack.i.l.bf16 %v1706_v39  ;;  %v1703_v55 = vunpack.i.h.bf16 %v1701_v40  ;;  %v1702_v56 = vunpack.i.l.bf16 %v1701_v40  ;;  %v1751_v57 = vpop.permute.xlu2 %1750 }
  0x9a   : > { %v1753_v30 = vunpack.i.h.bf16 %v1751_v57  ;;  %v1752_v23 = vunpack.i.l.bf16 %v1751_v57 }
  0x9b   : > { %v234_v8 = vsel %vm233_vm5, %v1702_v56, %v1703_v55  ;;  %v240_v9 = vsel %vm239_vm3, %v1707_v54, %v1708_v53 }
  0x9c   : > { %v1866_v20 = vpack.i.bf16 %v240_v9, %v234_v8 }
  0x9d   : > { %1832 = vrot.lane.b32.xlu1 %v1831_v41, %s2296_s20 }
  0xa0   : > { %v1721_v42 = vpop.permute.xlu1 %1720  ;;  %v2468_v43 = vpop.permute.xlu0 %1715 }
  0xa1   : > { %v1723_v44 = vunpack.i.h.bf16 %v1721_v42  ;;  %v1722_v45 = vunpack.i.l.bf16 %v1721_v42  ;;  %v1718_v46 = vunpack.i.h.bf16 %v2468_v43  ;;  %v1717_v47 = vunpack.i.l.bf16 %v2468_v43  ;;  %v1766_v28 = vpop.permute.xlu2 %1765 }
  0xa2   : > { %v1768_v37 = vunpack.i.h.bf16 %v1766_v28  ;;  %v1767_v38 = vunpack.i.l.bf16 %v1766_v28 }
  0xa3   : > { %v264_v48 = vsel %vm215_vm1, %v1717_v47, %v1718_v46  ;;  %v269_v49 = vsel %vm221_vm2, %v1722_v45, %v1723_v44  ;;  %v422_v44 = vsel %vm215_vm1, %v1752_v23, %v1753_v30  ;;  %vm868_vm1 = vcmask 572416  }
  0xa4   : > { %v1841_v52 = vpack.i.bf16 %v269_v49, %v264_v48  ;;  %v437_v45 = vsel %vm233_vm5, %v1767_v38, %v1768_v37 }
  0xa6   : > { %1842 = vrot.lane.b32.xlu1 %v1841_v52, %s2296_s20 }
  0xa8   : > { %v2478_v59 = vpop.permute.xlu1 %1735  ;;  %v1731_v60 = vpop.permute.xlu0 %1730 }
  0xa9   : > { %v1738_v62 = vunpack.i.h.bf16 %v2478_v59  ;;  %v1737_v63 = vunpack.i.l.bf16 %v2478_v59  ;;  %v1733_v1 = vunpack.i.h.bf16 %v1731_v60  ;;  %v1732_v3 = vunpack.i.l.bf16 %v1731_v60  ;;  %v1778_v56 = vpop.permute.xlu2 %1777 }
  0xaa   : > { %v1780_v9 = vunpack.i.h.bf16 %v1778_v56 }
  0xab   : > { %v2494_v14 = vsel %vm239_vm3, %v1737_v63, %v1738_v62  ;;  %v279_v15 = vsel %vm233_vm5, %v1732_v3, %v1733_v1  ;;  %vm1177_vm5 = vcmask 64512  }
  0xac   : > { %v1851_v17 = vpack.i.bf16 %v2373_v0, %v2494_v14  ;;  %v1846_v18 = vpack.i.bf16 %v279_v15, %v2481_v61  ;;  %v2067_v19 = vpack.i.bf16 %v2494_v14, %v2481_v61  ;;  %v222_v0 = vsel %vm221_vm2, %v1692_v4, %v1693_v58  ;;  %v1549_v61 = vld [vmem:[%s2963_s1 + $0x40] sm:$0xff]  ;;  %v1547_v14 = vld [vmem:[%s2963_s1 + $0x30] sm:$0xff] }
  0xad   : > { %v1861_v31 = vpack.i.bf16 %v228_v26, %v222_v0 }
  0xae   : > { %1852 = vrot.lane.b32.xlu0 %v1851_v17, %s2296_s20  ;;  %1847 = vrot.lane.b32.xlu2 %v1846_v18, %s2296_s20 }
  0xaf   : > { %1867 = vrot.lane.b32.xlu1 %v1866_v20, %s2296_s20 }
  0xb0   : > { %v1746_v24 = vpop.permute.xlu1 %1745  ;;  %v2508_v25 = vpop.permute.xlu0 %1740 }
  0xb1   : > { %v1748_v35 = vunpack.i.h.bf16 %v1746_v24  ;;  %v1747_v36 = vunpack.i.l.bf16 %v1746_v24  ;;  %v1742_v40 = vunpack.i.l.bf16 %v2508_v25  ;;  %v1788_v4 = vpop.permute.xlu2 %1787 }
  0xb2   : > { %v1790_v7 = vunpack.i.h.bf16 %v1788_v4  ;;  %v1789_v8 = vunpack.i.l.bf16 %v1788_v4 }
  0xb3   : > { %v417_v39 = vsel %vm209_vm0, %v1747_v36, %v1748_v35  ;;  %vm874_vm0 = vcmask 556032  }
  0xb4   : > { %v1871_v53 = vpack.i.bf16 %v417_v39, %v1742_v40  ;;  %v535_v11 = vsel %vm534_vm6, %v1789_v8, %v1790_v7 }
  0xb6   : > { %1862 = vrot.lane.b32.xlu0 %v1861_v31, %s2296_s20  ;;  %1857 = vrot.lane.b32.xlu2 %v1856_v33, %s2296_s20  ;;  %v1779_v31 = vunpack.i.l.bf16 %v1778_v56 }
  0xb8   : > { %v1761_v41 = vpop.permute.xlu1 %1760  ;;  %v1756_v42 = vpop.permute.xlu0 %1755  ;;  %v1931_v33 = vpack.i.bf16 %v1779_v31, %v2423_v13 }
  0xb9   : > { %v1763_v46 = vunpack.i.h.bf16 %v1761_v41  ;;  %v1762_v48 = vunpack.i.l.bf16 %v1761_v41  ;;  %v1758_v49 = vunpack.i.h.bf16 %v1756_v42  ;;  %v1757_v50 = vunpack.i.l.bf16 %v1756_v42  ;;  %v1803_v20 = vpop.permute.xlu2 %1802 }
  0xba   : > { %v1805_v36 = vunpack.i.h.bf16 %v1803_v20  ;;  %v1804_v37 = vunpack.i.l.bf16 %v1803_v20 }
  0xbb   : > { %v427_v51 = vsel %vm221_vm2, %v1757_v50, %v1758_v49  ;;  %v432_v52 = vsel %vm227_vm4, %v1762_v48, %v1763_v46  ;;  %v2562_v48 = vld [vmem:[%s2370_s24 + $0x70] sm:$0xff]  ;;  %vm857_vm2 = vcmask 785408  }
  0xbc   : > { %v1876_v54 = vpack.i.bf16 %v427_v51, %v422_v44  ;;  %v1886_v55 = vpack.i.bf16 %v437_v45, %v432_v52  ;;  %v553_v41 = vsel %vm552_vm8, %v1804_v37, %v1805_v36  ;;  %v1531_v36 = vld [vmem:[%s2963_s1 + $0x10] sm:$0xff] }
  0xbe   : > { %1877 = vrot.lane.b32.xlu0 %v1876_v54, %s2296_s20  ;;  %1872 = vrot.lane.b32.xlu2 %v1871_v53, %s2296_s20 }
  0xbf   : > { %1887 = vrot.lane.b32.xlu1 %v1886_v55, %s2296_s20 }
  0xc0   : > { %v1771_v57 = vpop.permute.xlu0 %1770  ;;  %v2526_v1 = vpop.permute.xlu1 %513 }
  0xc1   : > { %v1773_v58 = vunpack.i.h.bf16 %v1771_v57  ;;  %v1772_v60 = vunpack.i.l.bf16 %v1771_v57  ;;  %v1818_v22 = vpop.permute.xlu2 %1817 }
  0xc2   : > { %v1820_v0 = vunpack.i.h.bf16 %v1818_v22  ;;  %v1819_v26 = vunpack.i.l.bf16 %v1818_v22 }
  0xc3   : > { %v442_v62 = vsel %vm239_vm3, %v1772_v60, %v1773_v58 }
  0xc4   : > { %v1896_v3 = vpack.i.bf16 %v2423_v13, %v442_v62  ;;  %v577_v29 = vsel %vm534_vm6, %v1819_v26, %v1820_v0 }
  0xc6   : > { %1882 = vrot.lane.b32.xlu0 %v2392_v6, %s2297_s21  ;;  %1897 = vrot.lane.b32.xlu2 %v1896_v3, %s2296_s20 }
  0xc7   : > { %1892 = vrot.lane.b32.xlu1 %v2392_v6, %s2298_s22 }
  0xc8   : > { %v1783_v12 = vpop.permute.xlu1 %1782  ;;  %v2542_v21 = vpop.permute.xlu0 %508 }
  0xc9   : > { %v1785_v15 = vunpack.i.h.bf16 %v1783_v12  ;;  %v1784_v16 = vunpack.i.l.bf16 %v1783_v12 }
  0xcb   : > { %v1911_v17 = vpack.i.bf16 %v1785_v15, %v1780_v9  ;;  %v2539_v18 = vpack.i.bf16 %v535_v11, %v1784_v16 }
  0xce   : > { %1907 = vrot.lane.b32.xlu0 %v2392_v6, %s2299_s23  ;;  %1902 = vrot.lane.b32.xlu2 %v2392_v6, %s2300_s25 }
  0xcf   : > { %1912 = vrot.lane.b32.xlu1 %v1911_v17, %s2287_s28 }
  0xd0   : > { %v1793_v24 = vpop.permute.xlu0 %1792  ;;  %v1798_v40 = vpop.permute.xlu1 %1797 }
  0xd1   : > { %v1795_v27 = vunpack.i.h.bf16 %v1793_v24  ;;  %v1800_v54 = vunpack.i.h.bf16 %v1798_v40  ;;  %v1799_v55 = vunpack.i.l.bf16 %v1798_v40  ;;  %v1794_v58 = vunpack.i.l.bf16 %v1793_v24 }
  0xd3   : > { %v2574_v11 = vsel %vm546_vm10, %v1799_v55, %v1800_v54 }
  0xd8   : > { %v1808_v35 = vpop.permute.xlu0 %1807  ;;  %v2556_v45 = vpop.permute.xlu1 %1812 }
  0xd9   : > { %v1810_v38 = vunpack.i.h.bf16 %v1808_v35  ;;  %v1809_v39 = vunpack.i.l.bf16 %v1808_v35 }
  0xdb   : > { %v559_v42 = vsel %vm558_vm9, %v1809_v39, %v1810_v38 }
  0xdc   : > { %v1946_v44 = vpack.i.bf16 %v559_v42, %v553_v41  ;;  %v241_v41 = vld [vmem:[%s2963_s1] sm:$0xff] }
  0xe7   : > { %v2544_v28 = vpop.permute.xlu2 %1822 }
  0xe8   : > { %v1824_v6 = vunpack.i.l.bf16 %v2544_v28 }
  0xea   : > { %v580_v30 = vsel %vm540_vm7, %v1824_v6, %v1795_v27 }
  0xeb   : > { %v1916_v23 = vpack.i.bf16 %v580_v30, %v577_v29  ;;  %v1825_v30 = vunpack.i.h.bf16 %v2544_v28 }
  0xed   : > { %1917 = vrot.lane.b32.xlu2 %v1916_v23, %s2287_s28 }
  0xf5   : > { %1932 = vrot.lane.b32.xlu2 %v1931_v33, %s2287_s28 }
  0xfd   : > { %1947 = vrot.lane.b32.xlu2 %v1946_v44, %s2287_s28 }
 0x105   : > { %723 = vrot.lane.b32.xlu2 %v2562_v48, %s2294_s11  ;;  %s2302_s11 = smov 96  }
 0x107   : > { %v2559_v13 = vpop.permute.xlu1 %1827  ;;  %v1838_v51 = vpop.permute.xlu0 %1837 }
 0x108   : > { %v1848_v46 = vpop.permute.xlu2 %1847  ;;  %v1840_v0 = vunpack.i.h.bf16 %v1838_v51  ;;  %v1839_v27 = vunpack.i.l.bf16 %v1838_v51  ;;  %v1830_v35 = vunpack.i.h.bf16 %v2559_v13  ;;  %v1829_v39 = vunpack.i.l.bf16 %v2559_v13 }
 0x109   : > { %v1850_v8 = vunpack.i.h.bf16 %v1848_v46  ;;  %v1849_v16 = vunpack.i.l.bf16 %v1848_v46 }
 0x10f   : > { %v2566_v49 = vpop.permute.xlu1 %1832 }
 0x110   : > { %v1858_v50 = vpop.permute.xlu2 %1857 }
 0x111   : > { %v1860_v29 = vunpack.i.h.bf16 %v1858_v50  ;;  %v1859_v23 = vunpack.i.l.bf16 %v1858_v50  ;;  %v1532_v50 = vld [vmem:[%s2963_s1 + $0x18] sm:$0xff] }
 0x118   : > { %v2568_v52 = vpop.permute.xlu2 %1872  ;;  %v1843_v53 = vpop.permute.xlu1 %1842 }
 0x119   : > { %v1845_v17 = vunpack.i.h.bf16 %v1843_v53  ;;  %v1844_v22 = vunpack.i.l.bf16 %v1843_v53  ;;  %v1875_v54 = vunpack.i.h.bf16 %v2568_v52 }
 0x120   : > { %v1853_v56 = vpop.permute.xlu0 %1852  ;;  %v1898_v57 = vpop.permute.xlu2 %1897 }
 0x121   : > { %v1900_v60 = vunpack.i.h.bf16 %v1898_v57  ;;  %v1868_v62 = vpop.permute.xlu1 %1867  ;;  %v1854_v3 = vunpack.i.l.bf16 %v1853_v56  ;;  %v1899_v4 = vunpack.i.l.bf16 %v1898_v57  ;;  %v1855_v40 = vunpack.i.h.bf16 %v1853_v56 }
 0x122   : > { %v1870_v7 = vunpack.i.h.bf16 %v1868_v62  ;;  %v1869_v12 = vunpack.i.l.bf16 %v1868_v62  ;;  %v1874_v57 = vunpack.i.l.bf16 %v2568_v52  ;;  %v1834_v52 = vunpack.i.l.bf16 %v2566_v49 }
 0x123   : > { %329 = vmatpush.msra.mxu0 %v1854_v3  ;;  %486 = vmatpush.msra.mxu2 %v1899_v4  ;;  %v2571_v9 = vsel %vm540_vm7, %v1900_v60, %v1794_v58  ;;  %v242_v4 = vld [vmem:[%s2963_s1 + $0x8] sm:$0xff] }
 0x124   : > { %385 = vmatpush.msra.mxu1 %v1870_v7  ;;  %v1941_v15 = vpack.i.bf16 %v2574_v11, %v2571_v9  ;;  %v1835_v7 = vunpack.i.h.bf16 %v2566_v49  ;;  %v1815_v49 = vunpack.i.h.bf16 %v2556_v45 }
 0x125   : > { %330 = vmatpush.msra.mxu0 %v1850_v8 }
 0x126   : > { %386 = vmatpush.msra.mxu1 %v1869_v12  ;;  %v1540_v12 = vld [vmem:[%s2963_s1 + $0x20] sm:$0xff] }
 0x127   : > { %331 = vmatpush.msra.mxu0 %v1849_v16 }
 0x128   : > { %v1863_v20 = vpop.permute.xlu0 %1862  ;;  %v1903_v55 = vpop.permute.xlu2 %1902 }
 0x129   : > { %332 = vmatpush.msra.mxu0 %v1845_v17  ;;  %v1865_v24 = vunpack.i.h.bf16 %v1863_v20  ;;  %v1864_v26 = vunpack.i.l.bf16 %v1863_v20  ;;  %v1905_v62 = vunpack.i.h.bf16 %v1903_v55  ;;  %v1904_v3 = vunpack.i.l.bf16 %v1903_v55 }
 0x12b   : > { %333 = vmatpush.msra.mxu0 %v1844_v22  ;;  %387 = vmatpush.msra.mxu1 %v1865_v24  ;;  %v595_v20 = vsel %vm558_vm9, %v1904_v3, %v1905_v62 }
 0x12d   : > { %334 = vmatpush.msra.mxu0 %v1840_v0  ;;  %388 = vmatpush.msra.mxu1 %v1864_v26  ;;  %v1557_v0 = vld [vmem:[%s2370_s24 + $0x78] sm:$0xff]  ;;  %v1814_v26 = vunpack.i.l.bf16 %v2556_v45 }
 0x12f   : > { %335 = vmatpush.msra.mxu0 %v1839_v27  ;;  %389 = vmatpush.msra.mxu1 %v1860_v29  ;;  %v1966_v27 = vpack.i.bf16 %v1557_v0, %v2562_v48  ;;  %v1541_v29 = vld [vmem:[%s2963_s1 + $0x28] sm:$0xff] }
 0x130   : > { %v1878_v31 = vpop.permute.xlu0 %1877 }
 0x131   : > { %v1888_v33 = vpop.permute.xlu1 %1887  ;;  %336 = vmatpush.msra.mxu0 %v1825_v30  ;;  %390 = vmatpush.msra.mxu1 %v1859_v23  ;;  %v1880_v42 = vunpack.i.h.bf16 %v1878_v31  ;;  %v1879_v28 = vunpack.i.l.bf16 %v1878_v31  ;;  %v565_v30 = vsel %vm564_vm12, %v1814_v26, %v1815_v49 }
 0x132   : > { %v1890_v37 = vunpack.i.h.bf16 %v1888_v33  ;;  %v1889_v38 = vunpack.i.l.bf16 %v1888_v33  ;;  %1967 = vrot.lane.b32.xlu2 %v1966_v27, %s2297_s21  ;;  %v1951_v23 = vpack.i.bf16 %v2562_v48, %v565_v30 }
 0x133   : > { %337 = vmatpush.msra.mxu0 %v1824_v6  ;;  %391 = vmatpush.msra.mxu1 %v1830_v35 }
 0x134   : > { %487 = vmatpush.msra.mxu2 %v1890_v37  ;;  %1533 = vmatmul.msk.f32.vlgmr.msra.gmra.mxu0 %vm315_vm11, %v1531_v36 }
 0x135   : > { %392 = vmatpush.msra.mxu1 %v1829_v39 }
 0x136   : > { %488 = vmatpush.msra.mxu2 %v1889_v38 }
 0x137   : > { %393 = vmatpush.msra.mxu1 %v1855_v40 }
 0x138   : > { %489 = vmatpush.msra.mxu2 %v1880_v42  ;;  %v1883_v44 = vpop.permute.xlu0 %1882  ;;  %1535 = vmatmul.msk.f32.vlgmr.msra.gmra.mxu1 %vm315_vm11, %v241_v41 }
 0x139   : > { %v1885_v6 = vunpack.i.h.bf16 %v1883_v44  ;;  %v1884_v13 = vunpack.i.l.bf16 %v1883_v44  ;;  %v1893_v46 = vpop.permute.xlu1 %1892 }
 0x13a   : > { %v1895_v51 = vunpack.i.h.bf16 %v1893_v46  ;;  %v1894_v53 = vunpack.i.l.bf16 %v1893_v46  ;;  %490 = vmatpush.msra.mxu2 %v1879_v28  ;;  %1982 = vrot.lane.b32.xlu2 %v1966_v27, %s2299_s23 }
 0x13b   : > { %v585_v56 = vsel %vm546_vm10, %v1884_v13, %v1885_v6 }
 0x13c   : > { %491 = vmatpush.msra.mxu2 %v1875_v54  ;;  %v590_v58 = vsel %vm552_vm8, %v1894_v53, %v1895_v51  ;;  %1534 = vmatmul.msk.f32.gmra.mxu0 %vm315_vm11, %v1532_v50 }
 0x13d   : > { %v1921_v60 = vpack.i.bf16 %v590_v58, %v585_v56 }
 0x13e   : > { %492 = vmatpush.msra.mxu2 %v1874_v57 }
 0x13f   : > { %1922 = vrot.lane.b32.xlu0 %v1921_v60, %s2287_s28 }
 0x140   : > { %493 = vmatpush.msra.mxu2 %v1835_v7  ;;  %v1908_v8 = vpop.permute.xlu0 %1907  ;;  %1536 = vmatmul.msk.f32.gmra.mxu1 %vm315_vm11, %v242_v4 }
 0x141   : > { %v1910_v16 = vunpack.i.h.bf16 %v1908_v8  ;;  %v1909_v17 = vunpack.i.l.bf16 %v1908_v8  ;;  %v1913_v9 = vpop.permute.xlu1 %1912 }
 0x142   : > { %494 = vmatpush.msra.mxu2 %v1834_v52  ;;  %v1915_v50 = vunpack.i.h.bf16 %v1913_v9  ;;  %v1914_v55 = vunpack.i.l.bf16 %v1913_v9 }
 0x143   : > { %1542 = vmatmul.msk.f32.vlgmr.msra.gmra.mxu2 %vm315_vm11, %v1540_v12  ;;  %v600_v22 = vsel %vm564_vm12, %v1909_v17, %v1910_v16 }
 0x144   : > { %v1926_v24 = vpack.i.bf16 %v600_v22, %v595_v20 }
 0x146   : > { %1927 = vrot.lane.b32.xlu1 %v1926_v24, %s2287_s28 }
 0x147   : > { %1937 = vrot.lane.b32.xlu0 %v2539_v18, %s2287_s28  ;;  %v1918_v18 = vpop.permute.xlu2 %1917 }
 0x148   : > { %v1920_v44 = vunpack.i.h.bf16 %v1918_v18  ;;  %v1919_v13 = vunpack.i.l.bf16 %v1918_v18 }
 0x14b   : > { %1543 = vmatmul.msk.f32.gmra.mxu2 %vm315_vm11, %v1541_v29 }
 0x14e   : > { %1942 = vrot.lane.b32.xlu1 %v1941_v15, %s2287_s28 }
 0x14f   : > { %1952 = vrot.lane.b32.xlu0 %v1951_v23, %s2287_s28  ;;  %v2638_v45 = vpop.permute.xlu2 %1932 }
 0x150   : > { %v1935_v43 = vunpack.i.h.bf16 %v2638_v45 }
 0x156   : > { %721 = vrot.lane.b32.xlu1 %v2562_v48, %s2293_s8  ;;  %s1601_s8 = smul.u32 48, %s2977_s13 }
 0x157   : > { %1957 = vrot.lane.b32.xlu0 %v1966_v27, %s2295_s19  ;;  %v1948_v15 = vpop.permute.xlu2 %1947  ;;  %s1523_s19 = sshll.u32 %s2979_s12, 3 }
 0x158   : > { %v1950_v46 = vunpack.i.h.bf16 %v1948_v15  ;;  %v1949_v53 = vunpack.i.l.bf16 %v1948_v15  ;;  %v1934_v15 = vunpack.i.l.bf16 %v2638_v45 }
 0x15e   : > { %1962 = vrot.lane.b32.xlu1 %v1966_v27, %s2296_s20  ;;  %s190_s20 = sadd.s32 %s1601_s8, %s1523_s19 }
 0x15f   : > { %1972 = vrot.lane.b32.xlu0 %v1966_v27, %s2298_s22  ;;  %v724_v38 = vpop.permute.xlu2 %723  ;;  %s1524_s13 = sshll.u32 %s190_s20, 3 }
 0x160   : > { %s2652_s22 = scalar_lea.vmem %s2965_s3, %s1524_s13 }
 0x166   : > { %1977 = vrot.lane.b32.xlu1 %v1966_v27, %s2300_s25 }
 0x18c   : > { %v1968_v57 = vpop.permute.xlu2 %1967 }
 0x18d   : > { %v1970_v0 = vunpack.i.h.bf16 %v1968_v57  ;;  %v1969_v49 = vunpack.i.l.bf16 %v1968_v57 }
 0x1b1   : > { %v1923_v11 = vpop.permute.xlu0 %1922  ;;  %v339_v37 = vpop.f32.mrf.mxu0 }
 0x1b2   : > { %v1925_v36 = vunpack.i.h.bf16 %v1923_v11  ;;  %v1924_v40 = vunpack.i.l.bf16 %v1923_v11 }
 0x1b5   : > { %v395_v39 = vpop.f32.mrf.mxu1 }
 0x1b6   : > { %v396_v6 = vadd.f32 %v395_v39, %v339_v37 }
 0x1b8   : > { %v1928_v31 = vpop.permute.xlu1 %1927 }
 0x1b9   : > { %v2640_v33 = vpop.permute.xlu0 %1937  ;;  %v1930_v35 = vunpack.i.h.bf16 %v1928_v31  ;;  %v1929_v48 = vunpack.i.l.bf16 %v1928_v31  ;;  %v342_v56 = vpop.f32.mrf.mxu0  ;;  %v740_v31 = vsel %vm546_vm10, %v1969_v49, %v1970_v0 }
 0x1ba   : > { %v1939_v24 = vunpack.i.l.bf16 %v2640_v33 }
 0x1bb   : > { %642 = vmatpush.msra.mxu3 %v1930_v35 }
 0x1bd   : > { %643 = vmatpush.msra.mxu3 %v1929_v48  ;;  %v398_v62 = vpop.f32.mrf.mxu1 }
 0x1be   : > { %v399_v12 = vadd.f32 %v398_v62, %v342_v56  ;;  %v1575_v56 = vld [vmem:[%s2370_s24 + $0x68] sm:$0xff] }
 0x1bf   : > { %644 = vmatpush.msra.mxu3 %v1925_v36 }
 0x1c0   : > { %v1943_v41 = vpop.permute.xlu1 %1942 }
 0x1c1   : > { %v2644_v42 = vpop.permute.xlu0 %1952  ;;  %645 = vmatpush.msra.mxu3 %v1924_v40  ;;  %v1945_v60 = vunpack.i.h.bf16 %v1943_v41  ;;  %v1944_v8 = vunpack.i.l.bf16 %v1943_v41 }
 0x1c2   : > { %v1954_v28 = vunpack.i.l.bf16 %v2644_v42 }
 0x1c3   : > { %646 = vmatpush.msra.mxu3 %v1920_v44 }
 0x1c4   : > { %698 = vmatpush.msrb.mxu0 %v1954_v28 }
 0x1c5   : > { %647 = vmatpush.msra.mxu3 %v1919_v13  ;;  %v817_v13 = vld [vmem:[%s2964_s2 + $0x10] sm:$0xff] }
 0x1c6   : > { %v496_v51 = vpop.f32.mrf.mxu2  ;;  %699 = vmatpush.msrb.mxu0 %v1950_v46 }
 0x1c7   : > { %v502_v54 = vadd.f32 %v496_v51, %v396_v6  ;;  %648 = vmatpush.msra.mxu3 %v1915_v50  ;;  %v818_v50 = vld [vmem:[%s2964_s2 + $0x18] sm:$0xff]  ;;  %v1564_v51 = vld [vmem:[%s2370_s24 + $0x28] sm:$0xff] }
 0x1c8   : > { %700 = vmatpush.msrb.mxu0 %v1949_v53  ;;  %v722_v58 = vpop.permute.xlu1 %721  ;;  %v2007_v53 = vpack.i.bf16 %v2377_v2, %v2411_v10  ;;  %v2691_v2 = vld [vmem:[%s2370_s24 + $0x40] sm:$0xff] }
 0x1c9   : > { %v516_v3 = vadd.f32 %v2542_v21, %v502_v54  ;;  %v1986_v4 = vpack.i.bf16 %v724_v38, %v722_v58  ;;  %v1958_v7 = vpop.permute.xlu0 %1957  ;;  %649 = vmatpush.msra.mxu3 %v1914_v55  ;;  %v1940_v21 = vunpack.i.h.bf16 %v2640_v33  ;;  %v1983_v33 = vpop.permute.xlu2 %1982  ;;  %v2012_v54 = vpack.i.bf16 %v1564_v51, %v2411_v10  ;;  %v2704_v55 = vld [vmem:[%s2370_s24 + $0x60] sm:$0xff]  ;;  %v1550_v58 = vld [vmem:[%s2963_s1 + $0x48] sm:$0xff] }
 0x1ca   : > { %701 = vmatpush.msrb.mxu0 %v1945_v60  ;;  %v1960_v17 = vunpack.i.h.bf16 %v1958_v7  ;;  %v1959_v20 = vunpack.i.l.bf16 %v1958_v7  ;;  %v1985_v39 = vunpack.i.h.bf16 %v1983_v33  ;;  %v1984_v40 = vunpack.i.l.bf16 %v1983_v33 }
 0x1cb   : > { %vm1372_vm13 = vcmp.ge.f32.partialorder %v516_v3, 0.0  ;;  %v1380_v52 = vmul.f32 0.1, %v516_v3  ;;  %1987 = vrot.lane.b32.xlu0 %v1986_v4, %s2287_s28  ;;  %650 = vmatpush.msra.mxu3 %v1717_v47  ;;  %v2042_v10 = vpack.i.bf16 %v2388_v5, %v2691_v2  ;;  %v2708_v5 = vpack.i.bf16 %v1575_v56, %v2704_v55 }
 0x1cc   : > { %702 = vmatpush.msrb.mxu0 %v1944_v8  ;;  %v730_v18 = vsel %vm534_vm6, %v1959_v20, %v1960_v17  ;;  %v755_v28 = vsel %vm564_vm12, %v1984_v40, %v1985_v39  ;;  %1551 = vmatmul.msk.f32.vlgmr.msra.gmra.mxu3 %vm315_vm11, %v1549_v61  ;;  %vm1170_vm6 = vcmask 97280  }
 0x1cd   : > { %v1388_v16 = vsel %vm1372_vm13, %v516_v3, %v1380_v52  ;;  %v1548_v3 = vld [vmem:[%s2963_s1 + $0x38] sm:$0xff] }
 0x1ce   : > { %1397 = vst.msk [vmem:[%s2652_s22] sm:$0xff] %vm1396_vm14, %v1388_v16  ;;  %v499_v22 = vpop.f32.mrf.mxu2  ;;  %703 = vmatpush.msrb.mxu0 %v1940_v21 }
 0x1cf   : > { %v503_v26 = vadd.f32 %v499_v22, %v399_v12 }
 0x1d0   : > { %704 = vmatpush.msrb.mxu0 %v1939_v24  ;;  %v1963_v27 = vpop.permute.xlu1 %1962 }
 0x1d1   : > { %v517_v47 = vadd.f32 %v2526_v1, %v503_v26  ;;  %v1965_v29 = vunpack.i.h.bf16 %v1963_v27  ;;  %v1964_v30 = vunpack.i.l.bf16 %v1963_v27  ;;  %v1973_v23 = vpop.permute.xlu0 %1972 }
 0x1d2   : > { %v1975_v9 = vunpack.i.h.bf16 %v1973_v23  ;;  %v1974_v11 = vunpack.i.l.bf16 %v1973_v23  ;;  %705 = vmatpush.msrb.mxu0 %v1935_v43 }
 0x1d3   : > { %vm1373_vm15 = vcmp.ge.f32.partialorder %v517_v47, 0.0  ;;  %v1381_v35 = vmul.f32 0.1, %v517_v47  ;;  %v735_v48 = vsel %vm540_vm7, %v1964_v30, %v1965_v29  ;;  %v1955_v30 = vunpack.i.h.bf16 %v2644_v42  ;;  %v1559_v42 = vld [vmem:[%s2963_s1 + $0x58] sm:$0xff] }
 0x1d4   : > { %706 = vmatpush.msrb.mxu0 %v1934_v15  ;;  %v745_v1 = vsel %vm552_vm8, %v1974_v11, %v1975_v9  ;;  %v1991_v36 = vpack.i.bf16 %v735_v48, %v730_v18  ;;  %1552 = vmatmul.msk.f32.gmra.mxu3 %vm315_vm11, %v1550_v58  ;;  %vm1163_vm7 = vcmask 130048   ;;  %vm1156_vm8 = vcmask 523264  }
 0x1d5   : > { %v1389_v37 = vsel %vm1373_vm15, %v517_v47, %v1381_v35  ;;  %v1996_v38 = vpack.i.bf16 %v745_v1, %v740_v31  ;;  %1553 = vmatmul.msk.f32.vlgmr.msrb.gmra.mxu0 %vm315_vm11, %v1547_v14 }
 0x1d6   : > { %1398 = vst.msk [vmem:[%s2652_s22 + $0x8] sm:$0xff] %vm1396_vm14, %v1389_v37  ;;  %1992 = vrot.lane.b32.xlu1 %v1991_v36, %s2287_s28 }
 0x1d7   : > { %1997 = vrot.lane.b32.xlu2 %v1996_v38, %s2287_s28 }
 0x1d8   : > { %v1978_v45 = vpop.permute.xlu1 %1977 }
 0x1d9   : > { %v1980_v41 = vunpack.i.h.bf16 %v1978_v45  ;;  %v1979_v44 = vunpack.i.l.bf16 %v1978_v45 }
 0x1db   : > { %v750_v6 = vsel %vm558_vm9, %v1979_v44, %v1980_v41 }
 0x1dc   : > { %v2001_v46 = vpack.i.bf16 %v755_v28, %v750_v6 }
 0x1dd   : > { %1554 = vmatmul.msk.f32.gmra.mxu0 %vm315_vm11, %v1548_v3 }
 0x1de   : > { %2002 = vrot.lane.b32.xlu0 %v2001_v46, %s2287_s28  ;;  %821 = vperm.xlu1 %1775, %v817_v13   ;;  %s2303_s28 = smov 72  }
 0x1df   : > { %826 = vperm.xlu2 %2006, %v818_v50  }
 0x1e6   : > { %2008 = vrot.lane.b32.xlu0 %v2007_v53, %s2301_s10  ;;  %2013 = vrot.lane.b32.xlu1 %v2012_v54, %s2289_s30 }
 0x1e7   : > { %2018 = vrot.lane.b32.xlu2 %v2012_v54, %s2290_s4 }
 0x1ee   : > { %2023 = vrot.lane.b32.xlu0 %v2012_v54, %s2302_s11  ;;  %2028 = vrot.lane.b32.xlu1 %v2012_v54, %s2303_s28 }
 0x1ef   : > { %2033 = vrot.lane.b32.xlu2 %v2012_v54, %s2304_s26 }
 0x1f6   : > { %2038 = vrot.lane.b32.xlu0 %v2012_v54, %s2305_s27  ;;  %2043 = vrot.lane.b32.xlu1 %v2042_v10, %s2302_s11 }
 0x1f7   : > { %2048 = vrot.lane.b32.xlu2 %v2042_v10, %s2303_s28 }
 0x1fe   : > { %2053 = vrot.lane.b32.xlu0 %v2042_v10, %s2305_s27  ;;  %2058 = vrot.lane.b32.xlu1 %v2042_v10, %s2304_s26 }
 0x206   : > { %2068 = vrot.lane.b32.xlu0 %v2067_v19, %s2290_s4  ;;  %2073 = vrot.lane.b32.xlu1 %v2708_v5, %s2305_s27 }
 0x20e   : > { %2083 = vrot.lane.b32.xlu0 %v2708_v5, %s2303_s28  ;;  %2088 = vrot.lane.b32.xlu1 %v2708_v5, %s2302_s11  ;;  %s2308_s11 = smov 16  }
 0x216   : > { %2098 = vrot.lane.b32.xlu0 %v2708_v5, %s2289_s30  ;;  %1021 = vrot.lane.b32.xlu1 %v2704_v55, %s2301_s10 }
 0x231   : > { %v1998_v57 = vpop.permute.xlu2 %1997 }
 0x232   : > { %v2000_v21 = vunpack.i.h.bf16 %v1998_v57  ;;  %v1999_v16 = vunpack.i.l.bf16 %v1998_v57 }
 0x239   : > { %v2727_v19 = vpop.permute.xlu2 %826 }
 0x23d   : > { %v1988_v60 = vpop.permute.xlu0 %1987 }
 0x23e   : > { %v1990_v27 = vunpack.i.h.bf16 %v1988_v60  ;;  %v1989_v43 = vunpack.i.l.bf16 %v1988_v60 }
 0x241   : > { %v2737_v4 = vpop.permute.xlu2 %2018 }
 0x242   : > { %v2021_v35 = vunpack.i.h.bf16 %v2737_v4  ;;  %v2020_v1 = vunpack.i.l.bf16 %v2737_v4  ;;  %v1567_v4 = vld [vmem:[%s2963_s1 + $0x70] sm:$0xff] }
 0x244   : > { %v852_v41 = vsel %vm239_vm3, %v2020_v1, %v2021_v35  ;;  %v1114_v35 = vld [vmem:[%s2964_s2 + $0x28] sm:$0xff] }
 0x248   : > { %v1993_v62 = vpop.permute.xlu1 %1992 }
 0x249   : > { %v2741_v17 = vpop.permute.xlu2 %2033  ;;  %v1995_v0 = vunpack.i.h.bf16 %v1993_v62  ;;  %v1994_v26 = vunpack.i.l.bf16 %v1993_v62 }
 0x24a   : > { %v2036_v46 = vunpack.i.h.bf16 %v2741_v17  ;;  %v2035_v50 = vunpack.i.l.bf16 %v2741_v17 }
 0x24c   : > { %v869_v60 = vsel %vm868_vm1, %v2035_v50, %v2036_v46 }
 0x250   : > { %v2003_v7 = vpop.permute.xlu0 %2002  ;;  %v2739_v8 = vpop.permute.xlu1 %821 }
 0x251   : > { %v2005_v52 = vunpack.i.h.bf16 %v2003_v7  ;;  %v2004_v12 = vunpack.i.l.bf16 %v2003_v7  ;;  %v2049_v23 = vpop.permute.xlu2 %2048 }
 0x252   : > { %v2050_v18 = vunpack.i.l.bf16 %v2049_v23 }
 0x253   : > { %799 = vmatpush.msrb.mxu1 %v2005_v52 }
 0x255   : > { %800 = vmatpush.msrb.mxu1 %v2004_v12  ;;  %v2792_v12 = vld [vmem:[%s2370_s24] sm:$0xff] }
 0x257   : > { %801 = vmatpush.msrb.mxu1 %v2000_v21  ;;  %v1131_v21 = vld [vmem:[%s2370_s24 + $0x8] sm:$0xff] }
 0x258   : > { %v2743_v20 = vpop.permute.xlu0 %2008  ;;  %v2014_v22 = vpop.permute.xlu1 %2013 }
 0x259   : > { %v2011_v24 = vunpack.i.h.bf16 %v2743_v20  ;;  %802 = vmatpush.msrb.mxu1 %v1999_v16  ;;  %v2016_v36 = vunpack.i.h.bf16 %v2014_v22  ;;  %v2015_v37 = vunpack.i.l.bf16 %v2014_v22  ;;  %v2010_v17 = vunpack.i.l.bf16 %v2743_v20  ;;  %v2800_v22 = vld [vmem:[%s2370_s24 + $0x80] sm:$0xff] }
 0x25b   : > { %v2062_v49 = vpack.i.bf16 %v2011_v24, %v1678_v34  ;;  %803 = vmatpush.msrb.mxu1 %v1995_v0  ;;  %v2051_v34 = vunpack.i.h.bf16 %v2049_v23  ;;  %v847_v45 = vsel %vm227_vm4, %v2015_v37, %v2016_v36  ;;  %v1592_v0 = vld [vmem:[%s2370_s24 + $0x88] sm:$0xff] }
 0x25d   : > { %2063 = vrot.lane.b32.xlu2 %v2062_v49, %s2290_s4  ;;  %804 = vmatpush.msrb.mxu1 %v1994_v26  ;;  %v2762_v33 = vsel %vm315_vm11, %v2050_v18, %v2051_v34  ;;  %v1743_v49 = vunpack.i.h.bf16 %v2508_v25  ;;  %v2152_v26 = vpack.i.bf16 %v1592_v0, %v2800_v22  ;;  %v2227_v25 = vpack.i.bf16 %v2800_v22, %v2792_v12 }
 0x25f   : > { %805 = vmatpush.msrb.mxu1 %v1990_v27  ;;  %v2127_v27 = vpack.i.bf16 %v1743_v49, %v2010_v17 }
 0x260   : > { %v2024_v47 = vpop.permute.xlu0 %2023  ;;  %v2029_v29 = vpop.permute.xlu1 %2028 }
 0x261   : > { %806 = vmatpush.msrb.mxu1 %v1989_v43  ;;  %v2026_v57 = vunpack.i.h.bf16 %v2024_v47  ;;  %v2025_v61 = vunpack.i.l.bf16 %v2024_v47  ;;  %v2031_v14 = vunpack.i.h.bf16 %v2029_v29  ;;  %v2030_v58 = vunpack.i.l.bf16 %v2029_v29  ;;  %v2243_v43 = vld [vmem:[%s2370_s24 + $0x48] sm:$0xff]  ;;  %s2310_s24 = smov 120  }
 0x262   : > { %v2162_v47 = vpack.i.bf16 %v2243_v43, %v2691_v2 }
 0x263   : > { %807 = vmatpush.msrb.mxu1 %v1955_v30  ;;  %v858_v7 = vsel %vm857_vm2, %v2025_v61, %v2026_v57  ;;  %v863_v52 = vsel %vm315_vm11, %v2030_v58, %v2031_v14  ;;  %v652_v14 = vpop.f32.mrf.mxu3 }
 0x264   : > { %1560 = vmatmul.msk.f32.vlgmr.msrb.gmra.mxu1 %vm315_vm11, %v1558_v32  ;;  %v2117_v16 = vpack.i.bf16 %v858_v7, %v863_v52 }
 0x265   : > { %2078 = vrot.lane.b32.xlu2 %v2708_v5, %s2304_s26  ;;  %s2309_s26 = smov 64  }
 0x268   : > { %v2039_v9 = vpop.permute.xlu0 %2038  ;;  %v2044_v11 = vpop.permute.xlu1 %2043 }
 0x269   : > { %v2041_v15 = vunpack.i.h.bf16 %v2039_v9  ;;  %v2040_v31 = vunpack.i.l.bf16 %v2039_v9  ;;  %v2046_v51 = vunpack.i.h.bf16 %v2044_v11  ;;  %v2045_v53 = vunpack.i.l.bf16 %v2044_v11 }
 0x26b   : > { %v875_v48 = vsel %vm874_vm0, %v2040_v31, %v2041_v15  ;;  %v885_v62 = vsel %vm857_vm2, %v2045_v53, %v2046_v51  ;;  %v655_v17 = vpop.f32.mrf.mxu3 }
 0x26c   : > { %1561 = vmatmul.msk.f32.gmra.mxu1 %vm315_vm11, %v1559_v42  ;;  %v2107_v38 = vpack.i.bf16 %v2762_v33, %v875_v48  ;;  %v2112_v3 = vpack.i.bf16 %v885_v62, %v869_v60  ;;  %v708_v60 = vpop.f32.mrf.mxu0 }
 0x26d   : > { %2093 = vrot.lane.b32.xlu2 %v2708_v5, %s2290_s4  ;;  %v2122_v5 = vpack.i.bf16 %v847_v45, %v852_v41 }
 0x26e   : > { %2108 = vrot.lane.b32.xlu1 %v2107_v38, %s2290_s4 }
 0x270   : > { %v2054_v39 = vpop.permute.xlu0 %2053  ;;  %v2059_v40 = vpop.permute.xlu1 %2058 }
 0x271   : > { %v2056_v44 = vunpack.i.h.bf16 %v2054_v39  ;;  %v2055_v28 = vunpack.i.l.bf16 %v2054_v39  ;;  %v2061_v6 = vunpack.i.h.bf16 %v2059_v40  ;;  %v2060_v13 = vunpack.i.l.bf16 %v2059_v40 }
 0x273   : > { %v895_v54 = vsel %vm868_vm1, %v2060_v13, %v2061_v6  ;;  %v2780_v10 = vsel %vm874_vm0, %v2055_v28, %v2056_v44 }
 0x274   : > { %v2102_v56 = vpack.i.bf16 %v895_v54, %v2780_v10 }
 0x275   : > { %1019 = vrot.lane.b32.xlu2 %v2704_v55, %s2288_s29  ;;  %v2137_v55 = vpack.i.bf16 %v1131_v21, %v2792_v12  ;;  %s2306_s29 = smov 12  }
 0x276   : > { %2103 = vrot.lane.b32.xlu0 %v2102_v56, %s2290_s4  ;;  %2123 = vrot.lane.b32.xlu1 %v2122_v5, %s2290_s4  ;;  %v1358_v5 = vld [vmem:[%s2964_s2 + $0x30] sm:$0xff] }
 0x278   : > { %v2074_v30 = vpop.permute.xlu1 %2073  ;;  %v2817_v34 = vpop.permute.xlu0 %2068 }
 0x279   : > { %v2076_v32 = vunpack.i.h.bf16 %v2074_v30  ;;  %v2075_v23 = vunpack.i.l.bf16 %v2074_v30 }
 0x27b   : > { %v1053_v15 = vsel %vm874_vm0, %v2075_v23, %v2076_v32 }
 0x27d   : > { %2113 = vrot.lane.b32.xlu2 %v2112_v3, %s2290_s4  ;;  %v709_v3 = vadd.f32 %v708_v60, %v652_v14 }
 0x27e   : > { %2118 = vrot.lane.b32.xlu0 %v2117_v16, %s2290_s4  ;;  %2138 = vrot.lane.b32.xlu1 %v2137_v55, %s2306_s29  ;;  %v1113_v16 = vld [vmem:[%s2964_s2 + $0x20] sm:$0xff] }
 0x280   : > { %v2089_v48 = vpop.permute.xlu1 %2088  ;;  %v2084_v36 = vpop.permute.xlu0 %2083 }
 0x281   : > { %v2086_v38 = vunpack.i.h.bf16 %v2084_v36  ;;  %v2085_v39 = vunpack.i.l.bf16 %v2084_v36  ;;  %v2091_v40 = vunpack.i.h.bf16 %v2089_v48  ;;  %v2090_v45 = vunpack.i.l.bf16 %v2089_v48 }
 0x283   : > { %v1038_v6 = vsel %vm857_vm2, %v2090_v45, %v2091_v40  ;;  %v1043_v13 = vsel %vm315_vm11, %v2085_v39, %v2086_v38  ;;  %v2071_v40 = vunpack.i.h.bf16 %v2817_v34 }
 0x284   : > { %v2217_v50 = vpack.i.bf16 %v1038_v6, %v1043_v13 }
 0x285   : > { %2128 = vrot.lane.b32.xlu2 %v2127_v27, %s2290_s4 }
 0x286   : > { %2133 = vrot.lane.b32.xlu0 %v2137_v55, %s2307_s9  ;;  %2153 = vrot.lane.b32.xlu1 %v2152_v26, %s2306_s29 }
 0x288   : > { %v1022_v41 = vpop.permute.xlu1 %1021  ;;  %v2099_v46 = vpop.permute.xlu0 %2098 }
 0x289   : > { %v2101_v51 = vunpack.i.h.bf16 %v2099_v46  ;;  %v2100_v53 = vunpack.i.l.bf16 %v2099_v46 }
 0x28b   : > { %v1028_v57 = vsel %vm227_vm4, %v2100_v53, %v2101_v51 }
 0x28d   : > { %2143 = vrot.lane.b32.xlu2 %v2152_v26, %s2307_s9 }
 0x28e   : > { %2148 = vrot.lane.b32.xlu0 %v2137_v55, %s2308_s11  ;;  %2168 = vrot.lane.b32.xlu1 %v2152_v26, %s2308_s11 }
 0x295   : > { %2158 = vrot.lane.b32.xlu2 %v2137_v55, %s2309_s26 }
 0x296   : > { %2163 = vrot.lane.b32.xlu0 %v2162_v47, %s2307_s9  ;;  %2183 = vrot.lane.b32.xlu1 %v2152_v26, %s2309_s26 }
 0x29d   : > { %2173 = vrot.lane.b32.xlu2 %v2137_v55, %s2305_s27 }
 0x29e   : > { %2178 = vrot.lane.b32.xlu0 %v2162_v47, %s2306_s29  ;;  %2198 = vrot.lane.b32.xlu1 %v2162_v47, %s2308_s11 }
 0x2a6   : > { %2193 = vrot.lane.b32.xlu0 %v2137_v55, %s2303_s28  ;;  %2213 = vrot.lane.b32.xlu1 %v2152_v26, %s2303_s28 }
 0x2ae   : > { %2208 = vrot.lane.b32.xlu0 %v2162_v47, %s2309_s26  ;;  %2228 = vrot.lane.b32.xlu1 %v2227_v25, %s2301_s10 }
 0x2b6   : > { %2223 = vrot.lane.b32.xlu0 %v2227_v25, %s2310_s24 }
 0x2b7   : > { %v2814_v29 = vpop.permute.xlu2 %2063 }
 0x2b8   : > { %v2065_v13 = vunpack.i.l.bf16 %v2814_v29 }
 0x2be   : > { %1184 = vrot.lane.b32.xlu0 %v2691_v2, %s2310_s24 }
 0x2bf   : > { %v2079_v18 = vpop.permute.xlu2 %2078 }
 0x2c0   : > { %v2081_v9 = vunpack.i.h.bf16 %v2079_v18  ;;  %v2080_v11 = vunpack.i.l.bf16 %v2079_v18 }
 0x2c2   : > { %v1048_v31 = vsel %vm868_vm1, %v2080_v11, %v2081_v9 }
 0x2c3   : > { %v2187_v42 = vpack.i.bf16 %v1048_v31, %v1053_v15  ;;  %v1359_v15 = vld [vmem:[%s2964_s2 + $0x38] sm:$0xff] }
 0x2c5   : > { %2188 = vrot.lane.b32.xlu2 %v2187_v42, %s2290_s4 }
 0x2c6   : > { %1122 = vperm.xlu0 %1774, %v1114_v35  }
 0x2c7   : > { %v2825_v37 = vpop.permute.xlu2 %2093 }
 0x2c8   : > { %v2096_v54 = vunpack.i.h.bf16 %v2825_v37  ;;  %v2095_v56 = vunpack.i.l.bf16 %v2825_v37 }
 0x2ca   : > { %v1033_v61 = vsel %vm239_vm3, %v2095_v56, %v2096_v54 }
 0x2cb   : > { %v2232_v62 = vpack.i.bf16 %v1028_v57, %v1033_v61 }
 0x2cd   : > { %2203 = vrot.lane.b32.xlu2 %v2152_v26, %s2305_s27  ;;  %v711_v26 = vpop.f32.mrf.mxu0 }
 0x2ce   : > { %v712_v47 = vadd.f32 %v711_v26, %v655_v17 }
 0x2cf   : > { %v1020_v44 = vpop.permute.xlu2 %1019 }
 0x2d0   : > { %v2237_v28 = vpack.i.bf16 %v1020_v44, %v1022_v41  ;;  %v2070_v41 = vunpack.i.l.bf16 %v2817_v34  ;;  %v2066_v44 = vunpack.i.h.bf16 %v2814_v29 }
 0x2d2   : > { %2238 = vrot.lane.b32.xlu1 %v2237_v28, %s2290_s4 }
 0x2d5   : > { %2218 = vrot.lane.b32.xlu2 %v2217_v50, %s2290_s4 }
 0x2d7   : > { %v2114_v58 = vpop.permute.xlu2 %2113 }
 0x2d8   : > { %v2115_v49 = vunpack.i.l.bf16 %v2114_v58  ;;  %v2116_v48 = vunpack.i.h.bf16 %v2114_v58 }
 0x2da   : > { %1362 = vperm.xlu1 %1775, %v1358_v5  }
 0x2dd   : > { %2233 = vrot.lane.b32.xlu2 %v2232_v62, %s2290_s4 }
 0x2df   : > { %v2845_v0 = vpop.permute.xlu2 %2128 }
 0x2e0   : > { %v2109_v7 = vpop.permute.xlu1 %2108  ;;  %v2130_v54 = vunpack.i.l.bf16 %v2845_v0  ;;  %v2131_v58 = vunpack.i.h.bf16 %v2845_v0 }
 0x2e1   : > { %v809_v52 = vpop.f32.mrf.mxu1  ;;  %v2110_v21 = vunpack.i.l.bf16 %v2109_v7 }
 0x2e2   : > { %v815_v55 = vadd.f32 %v809_v52, %v709_v3 }
 0x2e3   : > { %996 = vmatpush.msrb.mxu3 %v2110_v21 }
 0x2e4   : > { %v829_v27 = vadd.f32 %v2739_v8, %v815_v55  ;;  %v2111_v8 = vunpack.i.h.bf16 %v2109_v7 }
 0x2e5   : > { %1117 = vperm.xlu2 %2006, %v1113_v16   ;;  %997 = vmatpush.msrb.mxu3 %v2115_v49 }
 0x2e6   : > { %vm1374_vm3 = vcmp.ge.f32.partialorder %v829_v27, 0.0  ;;  %v1382_v43 = vmul.f32 0.1, %v829_v27 }
 0x2e7   : > { %v2144_v31 = vpop.permute.xlu2 %2143 }
 0x2e8   : > { %v1390_v25 = vsel %vm1374_vm3, %v829_v27, %v1382_v43  ;;  %v2104_v30 = vpop.permute.xlu0 %2103  ;;  %v2124_v32 = vpop.permute.xlu1 %2123  ;;  %v2146_v61 = vunpack.i.h.bf16 %v2144_v31  ;;  %v2145_v14 = vunpack.i.l.bf16 %v2144_v31  ;;  %v1568_v31 = vld [vmem:[%s2963_s1 + $0x78] sm:$0xff] }
 0x2e9   : > { %1399 = vst.msk [vmem:[%s2652_s22 + $0x10] sm:$0xff] %vm1396_vm14, %v1390_v25  ;;  %v812_v23 = vpop.f32.mrf.mxu1  ;;  %v2105_v18 = vunpack.i.l.bf16 %v2104_v30  ;;  %v2106_v9 = vunpack.i.h.bf16 %v2104_v30  ;;  %v2125_v28 = vunpack.i.l.bf16 %v2124_v32  ;;  %v2126_v46 = vunpack.i.h.bf16 %v2124_v32 }
 0x2ea   : > { %v816_v11 = vadd.f32 %v812_v23, %v712_v47  ;;  %v1322_v7 = vsel %vm1177_vm5, %v2145_v14, %v2146_v61 }
 0x2eb   : > { %942 = vmatpush.msrb.mxu2 %v2105_v18 }
 0x2ec   : > { %v830_v42 = vadd.f32 %v2727_v19, %v816_v11 }
 0x2ed   : > { %1367 = vperm.xlu2 %2006, %v1359_v15   ;;  %943 = vmatpush.msrb.mxu2 %v2106_v9 }
 0x2ee   : > { %vm1375_vm4 = vcmp.ge.f32.partialorder %v830_v42, 0.0  ;;  %v1383_v35 = vmul.f32 0.1, %v830_v42 }
 0x2ef   : > { %944 = vmatpush.msrb.mxu2 %v2111_v8  ;;  %v2159_v6 = vpop.permute.xlu2 %2158 }
 0x2f0   : > { %v1391_v36 = vsel %vm1375_vm4, %v830_v42, %v1383_v35  ;;  %v2119_v38 = vpop.permute.xlu0 %2118  ;;  %v2139_v39 = vpop.permute.xlu1 %2138  ;;  %v2161_v52 = vunpack.i.h.bf16 %v2159_v6  ;;  %v2160_v21 = vunpack.i.l.bf16 %v2159_v6 }
 0x2f1   : > { %1400 = vst.msk [vmem:[%s2652_s22 + $0x18] sm:$0xff] %vm1396_vm14, %v1391_v36  ;;  %945 = vmatpush.msrb.mxu2 %v2116_v48  ;;  %v2120_v45 = vunpack.i.l.bf16 %v2119_v38  ;;  %v2121_v19 = vunpack.i.h.bf16 %v2119_v38  ;;  %v2141_v50 = vunpack.i.h.bf16 %v2139_v39  ;;  %v2140_v51 = vunpack.i.l.bf16 %v2139_v39  ;;  %v1566_v48 = vld [vmem:[%s2963_s1 + $0x68] sm:$0xff] }
 0x2f2   : > { %v1157_v25 = vsel %vm1156_vm8, %v2160_v21, %v2161_v52 }
 0x2f3   : > { %946 = vmatpush.msrb.mxu2 %v2071_v40  ;;  %998 = vmatpush.msrb.mxu3 %v2120_v45  ;;  %v1171_v3 = vsel %vm1170_vm6, %v2140_v51, %v2141_v50 }
 0x2f5   : > { %947 = vmatpush.msrb.mxu2 %v2070_v41  ;;  %999 = vmatpush.msrb.mxu3 %v2121_v19 }
 0x2f7   : > { %948 = vmatpush.msrb.mxu2 %v2066_v44  ;;  %1000 = vmatpush.msrb.mxu3 %v2125_v28  ;;  %v2174_v55 = vpop.permute.xlu2 %2173 }
 0x2f8   : > { %v2134_v53 = vpop.permute.xlu0 %2133  ;;  %v2154_v5 = vpop.permute.xlu1 %2153  ;;  %v2176_v17 = vunpack.i.h.bf16 %v2174_v55  ;;  %v2175_v0 = vunpack.i.l.bf16 %v2174_v55 }
 0x2f9   : > { %v2136_v34 = vunpack.i.h.bf16 %v2134_v53  ;;  %v2135_v57 = vunpack.i.l.bf16 %v2134_v53  ;;  %949 = vmatpush.msrb.mxu2 %v2065_v13  ;;  %1001 = vmatpush.msrb.mxu3 %v2126_v46  ;;  %v2156_v29 = vunpack.i.h.bf16 %v2154_v5  ;;  %v2155_v60 = vunpack.i.l.bf16 %v2154_v5 }
 0x2fa   : > { %v1150_v32 = vsel %vm874_vm0, %v2175_v0, %v2176_v17 }
 0x2fb   : > { %950 = vmatpush.msrb.mxu2 %v1737_v63  ;;  %1002 = vmatpush.msrb.mxu3 %v2130_v54  ;;  %v1178_v62 = vsel %vm1177_vm5, %v2135_v57, %v2136_v34  ;;  %v1316_v59 = vsel %vm1170_vm6, %v2155_v60, %v2156_v29 }
 0x2fc   : > { %1569 = vmatmul.msk.f32.vlgmr.msrb.gmra.mxu2 %vm315_vm11, %v1567_v4 }
 0x2fd   : > { %1258 = vmatpush.msra.mxu2 %v1178_v62  ;;  %1003 = vmatpush.msrb.mxu3 %v2131_v58 }
 0x2ff   : > { %1259 = vmatpush.msra.mxu2 %v1171_v3  ;;  %1004 = vmatpush.msrb.mxu3 %v2020_v1  ;;  %v1565_v1 = vld [vmem:[%s2963_s1 + $0x60] sm:$0xff] }
 0x300   : > { %v2149_v63 = vpop.permute.xlu0 %2148  ;;  %v2169_v16 = vpop.permute.xlu1 %2168  ;;  %1571 = vmatmul.msk.f32.vlgmr.msrb.gmra.mxu3 %vm315_vm11, %v1565_v1 }
 0x301   : > { %1340 = vmatpush.msra.mxu3 %v1322_v7  ;;  %v2151_v49 = vunpack.i.h.bf16 %v2149_v63  ;;  %v2150_v26 = vunpack.i.l.bf16 %v2149_v63  ;;  %v2171_v27 = vunpack.i.h.bf16 %v2169_v16  ;;  %v2170_v43 = vunpack.i.l.bf16 %v2169_v16 }
 0x303   : > { %1341 = vmatpush.msra.mxu3 %v1316_v59  ;;  %v1164_v47 = vsel %vm1163_vm7, %v2150_v26, %v2151_v49  ;;  %v1310_v30 = vsel %vm1163_vm7, %v2170_v43, %v2171_v27  ;;  %v1593_v49 = vld [vmem:[%s2963_s1 + $0xb0] sm:$0xff]  ;;  %v1583_v27 = vld [vmem:[%s2963_s1 + $0x98] sm:$0xff] }
 0x304   : > { %1260 = vmatpush.msra.mxu2 %v1164_v47 }
 0x305   : > { %1342 = vmatpush.msra.mxu3 %v1310_v30  ;;  %1570 = vmatmul.msk.f32.gmra.mxu2 %vm315_vm11, %v1568_v31  ;;  %v1577_v30 = vld [vmem:[%s2963_s1 + $0x88] sm:$0xff] }
 0x306   : > { %1261 = vmatpush.msra.mxu2 %v1157_v25  ;;  %v1576_v25 = vld [vmem:[%s2963_s1 + $0x80] sm:$0xff] }
 0x308   : > { %v2164_v23 = vpop.permute.xlu0 %2163  ;;  %v2184_v18 = vpop.permute.xlu1 %2183  ;;  %1262 = vmatpush.msra.mxu2 %v1150_v32  ;;  %1572 = vmatmul.msk.f32.gmra.mxu3 %vm315_vm11, %v1566_v48 }
 0x309   : > { %v2166_v9 = vunpack.i.h.bf16 %v2164_v23  ;;  %v2165_v11 = vunpack.i.l.bf16 %v2164_v23  ;;  %v2186_v15 = vunpack.i.h.bf16 %v2184_v18  ;;  %v2185_v8 = vunpack.i.l.bf16 %v2184_v18 }
 0x30b   : > { %v1211_v42 = vsel %vm1177_vm5, %v2165_v11, %v2166_v9  ;;  %v1304_v35 = vsel %vm1156_vm8, %v2185_v8, %v2186_v15 }
 0x30c   : > { %1229 = vmatpush.msra.mxu1 %v1211_v42  ;;  %1343 = vmatpush.msra.mxu3 %v1304_v35 }
 0x310   : > { %v2179_v36 = vpop.permute.xlu0 %2178  ;;  %v2199_v38 = vpop.permute.xlu1 %2198 }
 0x311   : > { %v2181_v39 = vunpack.i.h.bf16 %v2179_v36  ;;  %v2180_v40 = vunpack.i.l.bf16 %v2179_v36  ;;  %v2201_v45 = vunpack.i.h.bf16 %v2199_v38  ;;  %v2200_v41 = vunpack.i.l.bf16 %v2199_v38 }
 0x313   : > { %v1205_v19 = vsel %vm1170_vm6, %v2180_v40, %v2181_v39  ;;  %v1199_v44 = vsel %vm1163_vm7, %v2200_v41, %v2201_v45 }
 0x314   : > { %1230 = vmatpush.msra.mxu1 %v1205_v19 }
 0x316   : > { %1231 = vmatpush.msra.mxu1 %v1199_v44 }
 0x318   : > { %v2194_v28 = vpop.permute.xlu0 %2193  ;;  %v2214_v50 = vpop.permute.xlu1 %2213 }
 0x319   : > { %v2196_v6 = vunpack.i.h.bf16 %v2194_v28  ;;  %v2195_v13 = vunpack.i.l.bf16 %v2194_v28  ;;  %v2216_v14 = vunpack.i.h.bf16 %v2214_v50  ;;  %v2215_v58 = vunpack.i.l.bf16 %v2214_v50 }
 0x31b   : > { %v1144_v46 = vsel %vm315_vm11, %v2195_v13, %v2196_v6  ;;  %v1292_v59 = vsel %vm315_vm11, %v2215_v58, %v2216_v14 }
 0x31c   : > { %1263 = vmatpush.msra.mxu2 %v1144_v46 }
 0x31f   : > { %v2189_v51 = vpop.permute.xlu2 %2188 }
 0x320   : > { %v2190_v53 = vunpack.i.l.bf16 %v2189_v51  ;;  %v2209_v54 = vpop.permute.xlu0 %2208  ;;  %v2191_v57 = vunpack.i.h.bf16 %v2189_v51  ;;  %v2229_v29 = vpop.permute.xlu1 %2228 }
 0x321   : > { %v2211_v5 = vunpack.i.h.bf16 %v2209_v54  ;;  %v2210_v34 = vunpack.i.l.bf16 %v2209_v54  ;;  %v2230_v21 = vunpack.i.l.bf16 %v2229_v29  ;;  %v2231_v16 = vunpack.i.h.bf16 %v2229_v29 }
 0x322   : > { %1095 = vmatpush.msra.mxu0 %v2190_v53 }
 0x323   : > { %v1193_v61 = vsel %vm1156_vm8, %v2210_v34, %v2211_v5 }
 0x324   : > { %1096 = vmatpush.msra.mxu0 %v2191_v57  ;;  %1232 = vmatpush.msra.mxu1 %v1193_v61 }
 0x326   : > { %1233 = vmatpush.msra.mxu1 %v2780_v10  ;;  %v1582_v10 = vld [vmem:[%s2963_s1 + $0x90] sm:$0xff] }
 0x327   : > { %v2204_v60 = vpop.permute.xlu2 %2203 }
 0x328   : > { %v2206_v62 = vunpack.i.h.bf16 %v2204_v60  ;;  %v2205_v3 = vunpack.i.l.bf16 %v2204_v60  ;;  %v2224_v7 = vpop.permute.xlu0 %2223  ;;  %1234 = vmatpush.msra.mxu1 %v2762_v33 }
 0x329   : > { %v2225_v52 = vunpack.i.l.bf16 %v2224_v7  ;;  %v2226_v63 = vunpack.i.h.bf16 %v2224_v7 }
 0x32a   : > { %v1298_v55 = vsel %vm874_vm0, %v2205_v3, %v2206_v62 }
 0x32b   : > { %1344 = vmatpush.msra.mxu3 %v1298_v55  ;;  %1264 = vmatpush.msra.mxu2 %v2225_v52 }
 0x32d   : > { %1345 = vmatpush.msra.mxu3 %v1292_v59  ;;  %1265 = vmatpush.msra.mxu2 %v2230_v21 }
 0x32f   : > { %v2219_v17 = vpop.permute.xlu2 %2218  ;;  %1346 = vmatpush.msra.mxu3 %v2226_v63  ;;  %1266 = vmatpush.msra.mxu2 %v2792_v12  ;;  %v1584_v12 = vld [vmem:[%s2963_s1 + $0xa0] sm:$0xff] }
 0x330   : > { %v2220_v33 = vunpack.i.l.bf16 %v2219_v17  ;;  %v1185_v0 = vpop.permute.xlu0 %1184  ;;  %1588 = vmatmul.msk.f32.vlgmr.msra.gmra.mxu2 %vm315_vm11, %v1582_v10  ;;  %v2221_v26 = vunpack.i.h.bf16 %v2219_v17 }
 0x331   : > { %1235 = vmatpush.msra.mxu1 %v1185_v0  ;;  %1347 = vmatpush.msra.mxu3 %v2231_v16 }
 0x332   : > { %1097 = vmatpush.msra.mxu0 %v2220_v33 }
 0x333   : > { %1236 = vmatpush.msra.mxu1 %v2011_v24  ;;  %1348 = vmatpush.msra.mxu3 %v2800_v22  ;;  %v1594_v24 = vld [vmem:[%s2963_s1 + $0xb8] sm:$0xff] }
 0x334   : > { %1098 = vmatpush.msra.mxu0 %v2221_v26  ;;  %1595 = vmatmul.msk.f32.vlgmr.msra.gmra.mxu3 %vm315_vm11, %v1593_v49 }
 0x335   : > { %1237 = vmatpush.msra.mxu1 %v2691_v2  ;;  %v1585_v2 = vld [vmem:[%s2963_s1 + $0xa8] sm:$0xff] }
 0x336   : > { %1586 = vmatmul.msk.f32.vlgmr.msra.gmra.mxu1 %vm315_vm11, %v1584_v12 }
 0x337   : > { %v2234_v43 = vpop.permute.xlu2 %2233 }
 0x338   : > { %v2235_v20 = vunpack.i.l.bf16 %v2234_v43  ;;  %1589 = vmatmul.msk.f32.gmra.mxu2 %vm315_vm11, %v1583_v27  ;;  %v2236_v22 = vunpack.i.h.bf16 %v2234_v43  ;;  %v1123_v61 = vpop.permute.xlu0 %1122 }
 0x33a   : > { %1099 = vmatpush.msra.mxu0 %v2235_v20 }
 0x33c   : > { %1100 = vmatpush.msra.mxu0 %v2236_v22  ;;  %1596 = vmatmul.msk.f32.gmra.mxu3 %vm315_vm11, %v1594_v24 }
 0x33e   : > { %1587 = vmatmul.msk.f32.gmra.mxu1 %vm315_vm11, %v1585_v2 }
 0x33f   : > { %v1118_v31 = vpop.permute.xlu2 %1117 }
 0x344   : > { %v2239_v4 = vpop.permute.xlu1 %2238 }
 0x345   : > { %v2240_v1 = vunpack.i.l.bf16 %v2239_v4  ;;  %v2241_v47 = vunpack.i.h.bf16 %v2239_v4 }
 0x347   : > { %1101 = vmatpush.msra.mxu0 %v2240_v1  ;;  %v1368_v19 = vpop.permute.xlu2 %1367 }
 0x349   : > { %1102 = vmatpush.msra.mxu0 %v2241_v47 }
 0x34b   : > { %1103 = vmatpush.msra.mxu0 %v2095_v56 }
 0x34c   : > { %1578 = vmatmul.msk.f32.vlgmr.msra.gmra.mxu0 %vm315_vm11, %v1576_v25  ;;  %v1363_v56 = vpop.permute.xlu1 %1362 }
 0x354   : > { %1579 = vmatmul.msk.f32.gmra.mxu0 %vm315_vm11, %v1577_v30 }
 0x37f   : > { %v952_v32 = vpop.f32.mrf.mxu2 }
 0x383   : > { %v1006_v23 = vpop.f32.mrf.mxu3 }
 0x384   : > { %v1007_v13 = vadd.f32 %v1006_v23, %v952_v32 }
 0x388   : > { %v955_v18 = vpop.f32.mrf.mxu2 }
 0x38b   : > { %v1009_v9 = vpop.f32.mrf.mxu3 }
 0x38c   : > { %v1010_v54 = vadd.f32 %v1009_v9, %v955_v18 }
 0x3b3   : > { %v1239_v11 = vpop.f32.mrf.mxu1  ;;  %v1268_v15 = vpop.f32.mrf.mxu2 }
 0x3b4   : > { %v1269_v8 = vadd.f32 %v1268_v15, %v1239_v11 }
 0x3b7   : > { %v1350_v42 = vpop.f32.mrf.mxu3 }
 0x3b8   : > { %v1356_v37 = vadd.f32 %v1350_v42, %v1269_v8 }
 0x3ba   : > { %v1370_v35 = vadd.f32 %v1363_v56, %v1356_v37 }
 0x3bb   : > { %v1242_v48 = vpop.f32.mrf.mxu1  ;;  %v1271_v36 = vpop.f32.mrf.mxu2 }
 0x3bc   : > { %vm1378_vm9 = vcmp.ge.f32.partialorder %v1370_v35, 0.0  ;;  %v1386_v38 = vmul.f32 0.1, %v1370_v35  ;;  %v1272_v39 = vadd.f32 %v1271_v36, %v1242_v48 }
 0x3be   : > { %v1394_v40 = vsel %vm1378_vm9, %v1370_v35, %v1386_v38 }
 0x3bf   : > { %1403 = vst.msk [vmem:[%s2652_s22 + $0x30] sm:$0xff] %vm1396_vm14, %v1394_v40  ;;  %v1353_v45 = vpop.f32.mrf.mxu3 }
 0x3c0   : > { %v1357_v41 = vadd.f32 %v1353_v45, %v1272_v39 }
 0x3c2   : > { %v1371_v44 = vadd.f32 %v1368_v19, %v1357_v41 }
 0x3c4   : > { %vm1379_vm10 = vcmp.ge.f32.partialorder %v1371_v44, 0.0  ;;  %v1387_v28 = vmul.f32 0.1, %v1371_v44 }
 0x3c6   : > { %v1395_v6 = vsel %vm1379_vm10, %v1371_v44, %v1387_v28 }
 0x3c7   : > { %1404 = vst.msk [vmem:[%s2652_s22 + $0x38] sm:$0xff] %vm1396_vm14, %v1395_v6 }
 0x3c9   : > { %v1105_v46 = vpop.f32.mrf.mxu0 }
 0x3ca   : > { %v1111_v50 = vadd.f32 %v1105_v46, %v1007_v13 }
 0x3cc   : > { %v1125_v51 = vadd.f32 %v1118_v31, %v1111_v50 }
 0x3ce   : > { %vm1376_vm11 = vcmp.ge.f32.partialorder %v1125_v51, 0.0  ;;  %v1384_v53 = vmul.f32 0.1, %v1125_v51 }
 0x3d0   : > { %v1392_v5 = vsel %vm1376_vm11, %v1125_v51, %v1384_v53 }
 0x3d1   : > { %1401 = vst.msk [vmem:[%s2652_s22 + $0x20] sm:$0xff] %vm1396_vm14, %v1392_v5  ;;  %v1108_v34 = vpop.f32.mrf.mxu0 }
 0x3d2   : > { %v1112_v57 = vadd.f32 %v1108_v34, %v1010_v54 }
 0x3d4   : > { %v1126_v14 = vadd.f32 %v1123_v61, %v1112_v57 }
 0x3d6   : > { %vm1377_vm12 = vcmp.ge.f32.partialorder %v1126_v14, 0.0  ;;  %v1385_v58 = vmul.f32 0.1, %v1126_v14 }
 0x3d8   : > { %v1393_v29 = vsel %vm1377_vm12, %v1126_v14, %v1385_v58 }
 0x3d9   : > { %1402 = vst.msk [vmem:[%s2652_s22 + $0x28] sm:$0xff] %vm1396_vm14, %v1393_v29 }
 0x3da PF: > { %s13_s16 = sadd.s32 1, %s2282_s16   ;;  %s2966_s12 = smov %s2274_s14 }
 0x3db   : > { %p10_p7 = scmp.ge.s32.totalorder %s13_s16, 14   ;;  %s2967_s13 = smov %s2278_s15 }
 0x3dc   : > { %s2968_s14 = smov %s2971_s17  ;;  %s2969_s15 = smov %s2975_s18 }
 0x3dd   :  { %12 = sbr.rel (!%p10_p7) target bundleno = 3 (0x3), region = 82 }

// kernel: decoder_forward_pallas.11
= control target key start
LH: loop header
LB: loop body
LE: loop exit
PB: predicated region body
PF: predicated region fallthrough
CT: control target
= control target key end

     0   :  { %s4193_s12 = smov 0   ;;  %s4195_s13 = smov 0   ;;  %s7108_s0 = inlined_call_operand.vmem [shape: f32[2,15,32,225], index: 0, kind: input, shape index: {}]   ;;  %s7109_s1 = inlined_call_operand.vmem [shape: f32[1,4,4,512], index: 1, kind: input, shape index: {}]   ;;  %s7110_s2 = inlined_call_operand.vmem [shape: f32[4,1], index: 2, kind: input, shape index: {}]   ;;  %s7111_s3 = inlined_call_operand.vmem [shape: f32[2,12,4,180], index: 3, kind: output, shape index: {}]  }
   0x1   :  { %s4197_s14 = smov 0   ;;  %s4199_s15 = smov 0  }
   0x2   :  { %s4201_s16 = smov 0  }
   0x3 LB: > { %s22_s17 = sadd.s32 1, %s4147_s14  ;;  %s25_s18 = sadd.s32 1, %s4151_s15  ;;  %s4155_s16 = sphi %s4201_s16, %s13_s16   ;;  %s4151_s15 = sphi %s4199_s15, %s7567_s15   ;;  %s4147_s14 = sphi %s4197_s14, %s7566_s14   ;;  %s4143_s13 = sphi %s4195_s13, %s7565_s13   ;;  %s4139_s12 = sphi %s4193_s12, %s7564_s12  }
   0x4   : > { %p23_p0 = scmp.ge.s32.totalorder %s22_s17, 12  ;;  %p2792_p1 = scmp.ge.s32.totalorder %s4155_s16, 1 }
   0x5   : > { %p151_p2 = scmp.lt.s32.totalorder %s4155_s16, 25 }
   0x6   : > { %s7569_s17 = smov (%p23_p0, %s22_s17), 0  ;;  %s7571_s18 = smov (!%p23_p0, %s25_s18), %s4151_s15 }
   0x7   : > { %p152_p3 = pnand %p2792_p1, %p151_p2  ;;  %p27_p4 = scmp.ge.s32.totalorder %s7571_s18, 2 }
   0x9   : > { %s7573_s18 = smov (%p27_p4, %s7571_s18), 0  ;;  %155 = sbr.rel (%p152_p3) target bundleno = 964 (0x3c4), region = 32 }
   0xe   : > { %p179_p5 = scmp.lt.s32.totalorder %s4143_s13, 1  ;;  %s2833_s20 = sshll.u32 %s4139_s12, 6  ;;  %vm286_vm0 = vcmask 1022976   ;;  %vm257_vm1 = vcmask 1031168   ;;  %vm228_vm2 = vcmask 1039360   ;;  %vm402_vm3 = vcmask 900096  }
   0xf   : > { %s4157_s25 = smov 127   ;;  %s4158_s26 = smov 126   ;;  %vm373_vm4 = vcmask 908288   ;;  %vm344_vm5 = vcmask 916480   ;;  %vm315_vm6 = vcmask 924672   ;;  %vm518_vm7 = vcmask 777216  }
  0x10   : > { %s7575_s13 = smov (!%p179_p5, %s4143_s13), 1  ;;  %s4159_s27 = smov 125   ;;  %vm489_vm8 = vcmask 785408   ;;  %vm634_vm9 = vcmask 654336   ;;  %vm460_vm10 = vcmask 793600   ;;  %vm431_vm11 = vcmask 801792  }
  0x11   : > { %s2834_s19 = smul.u32 960, %s7575_s13  ;;  %s4160_s28 = smov 113   ;;  %vm605_vm12 = vcmask 662528   ;;  %vm576_vm13 = vcmask 670720   ;;  %vm547_vm14 = vcmask 678912   ;;  %vm2685_vm15 = vcmask 1043456  }
  0x12   : > { %s4161_s29 = smov 112   ;;  %s4162_s30 = smov 111  }
  0x13   : > { %s183_s23 = scalar_lea.vmem %s7108_s0, %s2834_s19  ;;  %s4163_s4 = smov 110  }
  0x14   : > { %s4232_s24 = scalar_lea.vmem %s183_s23, %s2833_s20  ;;  %s4164_s5 = smov 98  }
  0x15   : > { %v200_v0 = vld [vmem:[%s4232_s24 + $0x20] sm:$0xff]  ;;  %v201_v1 = vld [vmem:[%s4232_s24 + $0x28] sm:$0xff]  ;;  %v202_v6 = vld [vmem:[%s4232_s24 + $0x30] sm:$0xff]  ;;  %s4165_s6 = smov 97   ;;  %s4166_s7 = smov 96  }
  0x16   : > { %v196_v2 = vld [vmem:[%s4232_s24] sm:$0xff]  ;;  %v4237_v3 = vpack.i.bf16 %v201_v1, %v200_v0  ;;  %v197_v4 = vld [vmem:[%s4232_s24 + $0x8] sm:$0xff]  ;;  %v203_v7 = vld [vmem:[%s4232_s24 + $0x38] sm:$0xff]  ;;  %s4167_s8 = smov 95   ;;  %s4168_s9 = smov 83  }
  0x17   : > { %v4240_v5 = vpack.i.bf16 %v197_v4, %v196_v2  ;;  %v198_v8 = vld [vmem:[%s4232_s24 + $0x10] sm:$0xff]  ;;  %v199_v9 = vld [vmem:[%s4232_s24 + $0x18] sm:$0xff]  ;;  %v4252_v10 = vpack.i.bf16 %v203_v7, %v202_v6  ;;  %s4169_s10 = smov 82   ;;  %s4170_s11 = smov 81   ;;  %v4415_v33 = vld [vmem:[%s4232_s24 + $0x40] sm:$0xff] }
  0x18   : > { %2903 = vrot.lane.b32.xlu1 %v4237_v3, %s4157_s25  ;;  %v4254_v11 = vpack.i.bf16 %v199_v9, %v198_v8  ;;  %s4171_s19 = smov 80   ;;  %v4405_v30 = vld [vmem:[%s4232_s24 + $0x50] sm:$0xff]  ;;  %v4408_v31 = vld [vmem:[%s4232_s24 + $0x58] sm:$0xff]  ;;  %v4418_v34 = vld [vmem:[%s4232_s24 + $0x48] sm:$0xff]  ;;  %p186_p6 = scmp.lt.s32.totalorder %s4139_s12, 11 }
  0x19   : > { %2893 = vrot.lane.b32.xlu0 %v4240_v5, %s4157_s25  ;;  %2913 = vrot.lane.b32.xlu2 %v4240_v5, %s4158_s26  ;;  %v4426_v37 = vpack.i.bf16 %v4408_v31, %v4405_v30  ;;  %v4429_v38 = vld [vmem:[%s4232_s24 + $0x60] sm:$0xff]  ;;  %v4432_v39 = vld [vmem:[%s4232_s24 + $0x68] sm:$0xff]  ;;  %v4436_v40 = vpack.i.bf16 %v4418_v34, %v4415_v33 }
  0x1a   : > { %v4440_v41 = vpack.i.bf16 %v4432_v39, %v4429_v38  ;;  %v4451_v43 = vld [vmem:[%s4232_s24 + $0x70] sm:$0xff]  ;;  %v4454_v44 = vld [vmem:[%s4232_s24 + $0x78] sm:$0xff]  ;;  %s7577_s12 = smov (!%p186_p6, %s4139_s12), 11 }
  0x1b   : > { %v4462_v47 = vpack.i.bf16 %v4454_v44, %v4451_v43 }
  0x20   : > { %2908 = vrot.lane.b32.xlu1 %v4252_v10, %s4157_s25 }
  0x21   : > { %2898 = vrot.lane.b32.xlu0 %v4254_v11, %s4157_s25  ;;  %2918 = vrot.lane.b32.xlu2 %v4254_v11, %s4158_s26 }
  0x28   : > { %2928 = vrot.lane.b32.xlu1 %v4252_v10, %s4158_s26 }
  0x29   : > { %2923 = vrot.lane.b32.xlu0 %v4237_v3, %s4158_s26  ;;  %2933 = vrot.lane.b32.xlu2 %v4240_v5, %s4159_s27 }
  0x30   : > { %2943 = vrot.lane.b32.xlu1 %v4237_v3, %s4159_s27 }
  0x31   : > { %2938 = vrot.lane.b32.xlu0 %v4254_v11, %s4159_s27  ;;  %2948 = vrot.lane.b32.xlu2 %v4252_v10, %s4159_s27 }
  0x38   : > { %2958 = vrot.lane.b32.xlu1 %v4254_v11, %s4160_s28 }
  0x39   : > { %2953 = vrot.lane.b32.xlu0 %v4240_v5, %s4160_s28  ;;  %2963 = vrot.lane.b32.xlu2 %v4237_v3, %s4160_s28 }
  0x40   : > { %2973 = vrot.lane.b32.xlu1 %v4240_v5, %s4161_s29 }
  0x41   : > { %2968 = vrot.lane.b32.xlu0 %v4252_v10, %s4160_s28  ;;  %2978 = vrot.lane.b32.xlu2 %v4254_v11, %s4161_s29 }
  0x48   : > { %2988 = vrot.lane.b32.xlu1 %v4252_v10, %s4161_s29 }
  0x49   : > { %2983 = vrot.lane.b32.xlu0 %v4237_v3, %s4161_s29  ;;  %2993 = vrot.lane.b32.xlu2 %v4240_v5, %s4162_s30 }
  0x50   : > { %3003 = vrot.lane.b32.xlu1 %v4237_v3, %s4162_s30 }
  0x51   : > { %2998 = vrot.lane.b32.xlu0 %v4254_v11, %s4162_s30  ;;  %3008 = vrot.lane.b32.xlu2 %v4252_v10, %s4162_s30 }
  0x58   : > { %3018 = vrot.lane.b32.xlu1 %v4254_v11, %s4163_s4 }
  0x59   : > { %3013 = vrot.lane.b32.xlu0 %v4240_v5, %s4163_s4  ;;  %3023 = vrot.lane.b32.xlu2 %v4237_v3, %s4163_s4 }
  0x60   : > { %3033 = vrot.lane.b32.xlu1 %v4240_v5, %s4164_s5 }
  0x61   : > { %3028 = vrot.lane.b32.xlu0 %v4252_v10, %s4163_s4  ;;  %3038 = vrot.lane.b32.xlu2 %v4254_v11, %s4164_s5 }
  0x68   : > { %3048 = vrot.lane.b32.xlu1 %v4252_v10, %s4164_s5 }
  0x69   : > { %3043 = vrot.lane.b32.xlu0 %v4237_v3, %s4164_s5  ;;  %3053 = vrot.lane.b32.xlu2 %v4240_v5, %s4165_s6 }
  0x70   : > { %3063 = vrot.lane.b32.xlu1 %v4237_v3, %s4165_s6 }
  0x71   : > { %3058 = vrot.lane.b32.xlu0 %v4254_v11, %s4165_s6  ;;  %3068 = vrot.lane.b32.xlu2 %v4252_v10, %s4165_s6 }
  0x73   : > { %v4322_v12 = vpop.permute.xlu2 %2913 }
  0x78   : > { %3078 = vrot.lane.b32.xlu1 %v4254_v11, %s4166_s7 }
  0x79   : > { %3073 = vrot.lane.b32.xlu0 %v4240_v5, %s4166_s7  ;;  %3083 = vrot.lane.b32.xlu2 %v4237_v3, %s4166_s7 }
  0x7b   : > { %v4330_v13 = vpop.permute.xlu2 %2918 }
  0x80   : > { %3093 = vrot.lane.b32.xlu1 %v4240_v5, %s4167_s8 }
  0x81   : > { %3088 = vrot.lane.b32.xlu0 %v4252_v10, %s4166_s7  ;;  %3098 = vrot.lane.b32.xlu2 %v4254_v11, %s4167_s8 }
  0x83   : > { %v4338_v14 = vpop.permute.xlu2 %2933 }
  0x88   : > { %3108 = vrot.lane.b32.xlu1 %v4252_v10, %s4167_s8 }
  0x89   : > { %3103 = vrot.lane.b32.xlu0 %v4237_v3, %s4167_s8  ;;  %3113 = vrot.lane.b32.xlu2 %v4240_v5, %s4168_s9 }
  0x8a   : > { %v4346_v15 = vpop.permute.xlu1 %2903 }
  0x8b   : > { %v4348_v16 = vpop.permute.xlu0 %2893  ;;  %v4350_v17 = vpop.permute.xlu2 %2948 }
  0x90   : > { %3123 = vrot.lane.b32.xlu1 %v4237_v3, %s4168_s9 }
  0x91   : > { %3118 = vrot.lane.b32.xlu0 %v4254_v11, %s4168_s9  ;;  %3128 = vrot.lane.b32.xlu2 %v4252_v10, %s4168_s9 }
  0x92   : > { %v4358_v18 = vpop.permute.xlu1 %2908 }
  0x93   : > { %v4360_v19 = vpop.permute.xlu0 %2898  ;;  %v4362_v20 = vpop.permute.xlu2 %2963 }
  0x94   : > { %7263 = vst [vmem:[#allocation2_spill] sm:$0xff] %v4362_v20 }
  0x98   : > { %3138 = vrot.lane.b32.xlu1 %v4254_v11, %s4169_s10 }
  0x99   : > { %3133 = vrot.lane.b32.xlu0 %v4240_v5, %s4169_s10  ;;  %3143 = vrot.lane.b32.xlu2 %v4237_v3, %s4169_s10 }
  0x9a   : > { %v4370_v21 = vpop.permute.xlu1 %2928 }
  0x9b   : > { %v4372_v22 = vpop.permute.xlu0 %2923  ;;  %v4374_v23 = vpop.permute.xlu2 %2978 }
  0x9c   : > { %7264 = vst [vmem:[#allocation3_spill] sm:$0xff] %v4374_v23 }
  0xa0   : > { %3153 = vrot.lane.b32.xlu1 %v4240_v5, %s4170_s11 }
  0xa1   : > { %3148 = vrot.lane.b32.xlu0 %v4252_v10, %s4169_s10  ;;  %3158 = vrot.lane.b32.xlu2 %v4254_v11, %s4170_s11 }
  0xa2   : > { %v4382_v24 = vpop.permute.xlu1 %2943 }
  0xa3   : > { %v4384_v25 = vpop.permute.xlu0 %2938  ;;  %v4386_v26 = vpop.permute.xlu2 %2993 }
  0xa4   : > { %7265 = vst [vmem:[#allocation4_spill] sm:$0xff] %v4386_v26 }
  0xa8   : > { %3168 = vrot.lane.b32.xlu1 %v4252_v10, %s4170_s11 }
  0xa9   : > { %3163 = vrot.lane.b32.xlu0 %v4237_v3, %s4170_s11  ;;  %3173 = vrot.lane.b32.xlu2 %v4240_v5, %s4171_s19 }
  0xaa   : > { %v4394_v27 = vpop.permute.xlu1 %2958 }
  0xab   : > { %7266 = vst [vmem:[#allocation5_spill] sm:$0xff] %v4394_v27  ;;  %v4396_v28 = vpop.permute.xlu0 %2953  ;;  %v4398_v29 = vpop.permute.xlu2 %3008 }
  0xac   : > { %7267 = vst [vmem:[#allocation6_spill] sm:$0xff] %v4396_v28 }
  0xb0   : > { %3183 = vrot.lane.b32.xlu1 %v4237_v3, %s4171_s19 }
  0xb1   : > { %3178 = vrot.lane.b32.xlu0 %v4254_v11, %s4171_s19  ;;  %3188 = vrot.lane.b32.xlu2 %v4252_v10, %s4171_s19 }
  0xb2   : > { %v4412_v32 = vpop.permute.xlu1 %2973 }
  0xb3   : > { %7268 = vst [vmem:[#allocation7_spill] sm:$0xff] %v4412_v32  ;;  %v4420_v35 = vpop.permute.xlu0 %2968  ;;  %v4422_v36 = vpop.permute.xlu2 %3023 }
  0xb4   : > { %7269 = vst [vmem:[#allocation8_spill] sm:$0xff] %v4420_v35 }
  0xb8   : > { %3198 = vrot.lane.b32.xlu1 %v4426_v37, %s4157_s25 }
  0xb9   : > { %3193 = vrot.lane.b32.xlu0 %v4436_v40, %s4157_s25  ;;  %3203 = vrot.lane.b32.xlu2 %v4440_v41, %s4157_s25 }
  0xba   : > { %v4448_v42 = vpop.permute.xlu1 %2988 }
  0xbb   : > { %7270 = vst [vmem:[#allocation9_spill] sm:$0xff] %v4448_v42  ;;  %v4456_v45 = vpop.permute.xlu0 %2983  ;;  %v4458_v46 = vpop.permute.xlu2 %3038 }
  0xbc   : > { %7271 = vst [vmem:[#allocation10_spill] sm:$0xff] %v4456_v45  ;;  %v2814_v45 = vld [vmem:[%s4232_s24 + $0xa0] sm:$0xff] }
  0xbd   : > { %7272 = vst [vmem:[#allocation11_spill] sm:$0xff] %v4458_v46 }
  0xc0   : > { %3213 = vrot.lane.b32.xlu1 %v4436_v40, %s4158_s26 }
  0xc1   : > { %3208 = vrot.lane.b32.xlu0 %v4462_v47, %s4157_s25  ;;  %3218 = vrot.lane.b32.xlu2 %v4426_v37, %s4158_s26 }
  0xc2   : > { %v4470_v48 = vpop.permute.xlu1 %3003 }
  0xc3   : > { %7273 = vst [vmem:[#allocation12_spill] sm:$0xff] %v4470_v48  ;;  %v4472_v49 = vpop.permute.xlu0 %2998  ;;  %v4474_v50 = vpop.permute.xlu2 %3053 }
  0xc4   : > { %7274 = vst [vmem:[#allocation13_spill] sm:$0xff] %v4472_v49 }
  0xc5   : > { %7275 = vst [vmem:[#allocation14_spill] sm:$0xff] %v4474_v50 }
  0xc8   : > { %3228 = vrot.lane.b32.xlu1 %v4462_v47, %s4158_s26 }
  0xc9   : > { %3223 = vrot.lane.b32.xlu0 %v4440_v41, %s4158_s26  ;;  %3233 = vrot.lane.b32.xlu2 %v4436_v40, %s4159_s27 }
  0xca   : > { %v4482_v51 = vpop.permute.xlu1 %3018 }
  0xcb   : > { %v4484_v52 = vpop.permute.xlu0 %3013  ;;  %v4486_v53 = vpop.permute.xlu2 %3068 }
  0xcc   : > { %7276 = vst [vmem:[#allocation15_spill] sm:$0xff] %v4486_v53 }
  0xd0   : > { %3243 = vrot.lane.b32.xlu1 %v4440_v41, %s4159_s27 }
  0xd1   : > { %3238 = vrot.lane.b32.xlu0 %v4426_v37, %s4159_s27  ;;  %3248 = vrot.lane.b32.xlu2 %v4462_v47, %s4159_s27 }
  0xd2   : > { %v4494_v54 = vpop.permute.xlu1 %3033 }
  0xd3   : > { %7277 = vst [vmem:[#allocation16_spill] sm:$0xff] %v4494_v54  ;;  %v4496_v55 = vpop.permute.xlu0 %3028  ;;  %v4498_v56 = vpop.permute.xlu2 %3083 }
  0xd4   : > { %7278 = vst [vmem:[#allocation17_spill] sm:$0xff] %v4498_v56 }
  0xd8   : > { %3258 = vrot.lane.b32.xlu1 %v4426_v37, %s4160_s28 }
  0xd9   : > { %3253 = vrot.lane.b32.xlu0 %v4436_v40, %s4160_s28  ;;  %3263 = vrot.lane.b32.xlu2 %v4440_v41, %s4160_s28 }
  0xda   : > { %v4506_v57 = vpop.permute.xlu1 %3048 }
  0xdb   : > { %7279 = vst [vmem:[#allocation18_spill] sm:$0xff] %v4506_v57  ;;  %v4508_v58 = vpop.permute.xlu0 %3043  ;;  %v4510_v59 = vpop.permute.xlu2 %3098 }
  0xdc   : > { %7280 = vst [vmem:[#allocation19_spill] sm:$0xff] %v4508_v58 }
  0xdd   : > { %7281 = vst [vmem:[#allocation20_spill] sm:$0xff] %v4510_v59 }
  0xe0   : > { %3273 = vrot.lane.b32.xlu1 %v4436_v40, %s4161_s29 }
  0xe1   : > { %3268 = vrot.lane.b32.xlu0 %v4462_v47, %s4160_s28  ;;  %3278 = vrot.lane.b32.xlu2 %v4426_v37, %s4161_s29 }
  0xe2   : > { %v4518_v60 = vpop.permute.xlu1 %3063 }
  0xe3   : > { %7282 = vst [vmem:[#allocation21_spill] sm:$0xff] %v4518_v60  ;;  %v4520_v61 = vpop.permute.xlu0 %3058  ;;  %v4522_v62 = vpop.permute.xlu2 %3113 }
  0xe4   : > { %7283 = vst [vmem:[#allocation22_spill] sm:$0xff] %v4520_v61 }
  0xe5   : > { %7284 = vst [vmem:[#allocation23_spill] sm:$0xff] %v4522_v62 }
  0xe8   : > { %3288 = vrot.lane.b32.xlu1 %v4462_v47, %s4161_s29 }
  0xe9   : > { %3283 = vrot.lane.b32.xlu0 %v4440_v41, %s4161_s29  ;;  %3293 = vrot.lane.b32.xlu2 %v4436_v40, %s4162_s30 }
  0xea   : > { %v4530_v63 = vpop.permute.xlu1 %3078 }
  0xeb   : > { %7285 = vst [vmem:[#allocation24_spill] sm:$0xff] %v4530_v63  ;;  %v4532_v0 = vpop.permute.xlu0 %3073  ;;  %v4534_v1 = vpop.permute.xlu2 %3128 }
  0xec   : > { %7286 = vst [vmem:[#allocation25_spill] sm:$0xff] %v4532_v0 }
  0xed   : > { %7287 = vst [vmem:[#allocation26_spill] sm:$0xff] %v4534_v1 }
  0xf0   : > { %3303 = vrot.lane.b32.xlu1 %v4440_v41, %s4162_s30 }
  0xf1   : > { %3298 = vrot.lane.b32.xlu0 %v4426_v37, %s4162_s30  ;;  %3308 = vrot.lane.b32.xlu2 %v4462_v47, %s4162_s30 }
  0xf2   : > { %v4542_v2 = vpop.permute.xlu1 %3093 }
  0xf3   : > { %7288 = vst [vmem:[#allocation27_spill] sm:$0xff] %v4542_v2  ;;  %v4544_v3 = vpop.permute.xlu0 %3088  ;;  %v4546_v4 = vpop.permute.xlu2 %3143 }
  0xf4   : > { %7289 = vst [vmem:[#allocation28_spill] sm:$0xff] %v4544_v3 }
  0xf5   : > { %7290 = vst [vmem:[#allocation29_spill] sm:$0xff] %v4546_v4 }
  0xf8   : > { %3318 = vrot.lane.b32.xlu1 %v4426_v37, %s4163_s4 }
  0xf9   : > { %3313 = vrot.lane.b32.xlu0 %v4436_v40, %s4163_s4  ;;  %3323 = vrot.lane.b32.xlu2 %v4440_v41, %s4163_s4 }
  0xfa   : > { %v4554_v5 = vpop.permute.xlu1 %3108 }
  0xfb   : > { %7291 = vst [vmem:[#allocation30_spill] sm:$0xff] %v4554_v5  ;;  %v4556_v6 = vpop.permute.xlu0 %3103  ;;  %v4558_v7 = vpop.permute.xlu2 %3158 }
  0xfc   : > { %7292 = vst [vmem:[#allocation31_spill] sm:$0xff] %v4556_v6 }
  0xfd   : > { %7293 = vst [vmem:[#allocation32_spill] sm:$0xff] %v4558_v7 }
 0x100   : > { %3333 = vrot.lane.b32.xlu1 %v4436_v40, %s4164_s5 }
 0x101   : > { %3328 = vrot.lane.b32.xlu0 %v4462_v47, %s4163_s4  ;;  %3338 = vrot.lane.b32.xlu2 %v4426_v37, %s4164_s5 }
 0x102   : > { %v4566_v8 = vpop.permute.xlu1 %3123 }
 0x103   : > { %7294 = vst [vmem:[#allocation33_spill] sm:$0xff] %v4566_v8  ;;  %v4568_v9 = vpop.permute.xlu0 %3118  ;;  %v4570_v10 = vpop.permute.xlu2 %3173 }
 0x104   : > { %7295 = vst [vmem:[#allocation34_spill] sm:$0xff] %v4568_v9 }
 0x105   : > { %7296 = vst [vmem:[#allocation35_spill] sm:$0xff] %v4570_v10 }
 0x108   : > { %3348 = vrot.lane.b32.xlu1 %v4462_v47, %s4164_s5 }
 0x109   : > { %3343 = vrot.lane.b32.xlu0 %v4440_v41, %s4164_s5  ;;  %3353 = vrot.lane.b32.xlu2 %v4436_v40, %s4165_s6 }
 0x10a   : > { %v4578_v11 = vpop.permute.xlu1 %3138 }
 0x10b   : > { %7297 = vst [vmem:[#allocation36_spill] sm:$0xff] %v4578_v11  ;;  %v4580_v62 = vpop.permute.xlu0 %3133  ;;  %v4582_v1 = vpop.permute.xlu2 %3188 }
 0x10c   : > { %7298 = vst [vmem:[#allocation37_spill] sm:$0xff] %v4580_v62 }
 0x10d   : > { %7299 = vst [vmem:[#allocation38_spill] sm:$0xff] %v4582_v1 }
 0x110   : > { %3363 = vrot.lane.b32.xlu1 %v4440_v41, %s4165_s6 }
 0x111   : > { %3358 = vrot.lane.b32.xlu0 %v4426_v37, %s4165_s6  ;;  %3368 = vrot.lane.b32.xlu2 %v4462_v47, %s4165_s6 }
 0x112   : > { %v4590_v9 = vpop.permute.xlu1 %3153 }
 0x113   : > { %7300 = vst [vmem:[#allocation39_spill] sm:$0xff] %v4590_v9  ;;  %v4592_v8 = vpop.permute.xlu0 %3148  ;;  %v4594_v4 = vpop.permute.xlu2 %3203 }
 0x114   : > { %7301 = vst [vmem:[#allocation40_spill] sm:$0xff] %v4592_v8 }
 0x118   : > { %3378 = vrot.lane.b32.xlu1 %v4426_v37, %s4166_s7 }
 0x119   : > { %3373 = vrot.lane.b32.xlu0 %v4436_v40, %s4166_s7  ;;  %3383 = vrot.lane.b32.xlu2 %v4440_v41, %s4166_s7 }
 0x11a   : > { %v4602_v62 = vpop.permute.xlu1 %3168 }
 0x11b   : > { %7302 = vst [vmem:[#allocation41_spill] sm:$0xff] %v4602_v62  ;;  %v4604_v11 = vpop.permute.xlu0 %3163  ;;  %v4606_v7 = vpop.permute.xlu2 %3218 }
 0x11c   : > { %7303 = vst [vmem:[#allocation42_spill] sm:$0xff] %v4604_v11 }
 0x120   : > { %3393 = vrot.lane.b32.xlu1 %v4436_v40, %s4167_s8 }
 0x121   : > { %3388 = vrot.lane.b32.xlu0 %v4462_v47, %s4166_s7  ;;  %3398 = vrot.lane.b32.xlu2 %v4426_v37, %s4167_s8 }
 0x122   : > { %v4614_v8 = vpop.permute.xlu1 %3183 }
 0x123   : > { %7304 = vst [vmem:[#allocation43_spill] sm:$0xff] %v4614_v8  ;;  %v4616_v9 = vpop.permute.xlu0 %3178  ;;  %v4618_v10 = vpop.permute.xlu2 %3233 }
 0x124   : > { %7305 = vst [vmem:[#allocation44_spill] sm:$0xff] %v4616_v9  ;;  %v3235_v2 = vunpack.i.l.bf16 %v4618_v10 }
 0x128   : > { %3408 = vrot.lane.b32.xlu1 %v4462_v47, %s4167_s8 }
 0x129   : > { %3403 = vrot.lane.b32.xlu0 %v4440_v41, %s4167_s8  ;;  %3413 = vrot.lane.b32.xlu2 %v4436_v40, %s4168_s9 }
 0x12a   : > { %v4626_v11 = vpop.permute.xlu1 %3198 }
 0x12b   : > { %v4628_v62 = vpop.permute.xlu0 %3193  ;;  %v4630_v1 = vpop.permute.xlu2 %3248 }
 0x12c   : > { %v7132_v8 = vunpack.i.h.bf16 %v4630_v1  ;;  %v3250_v9 = vunpack.i.l.bf16 %v4630_v1  ;;  %v3196_v42 = vunpack.i.h.bf16 %v4628_v62  ;;  %v3195_v26 = vunpack.i.l.bf16 %v4628_v62 }
 0x12d   : > { %v7165_v62 = vunpack.i.h.bf16 %v4350_v17 }
 0x12e   : > { %v744_v54 = vsel %vm286_vm0, %v3250_v9, %v7132_v8 }
 0x12f   : > { %1105 = vmatpush.msra.mxu0 %v744_v54 }
 0x130   : > { %3423 = vrot.lane.b32.xlu1 %v4440_v41, %s4168_s9 }
 0x131   : > { %3418 = vrot.lane.b32.xlu0 %v4426_v37, %s4168_s9  ;;  %3428 = vrot.lane.b32.xlu2 %v4462_v47, %s4168_s9 }
 0x132   : > { %v4643_v46 = vpop.permute.xlu1 %3213 }
 0x133   : > { %v4645_v58 = vpop.permute.xlu0 %3208  ;;  %v4647_v57 = vpop.permute.xlu2 %3263 }
 0x138   : > { %3438 = vrot.lane.b32.xlu1 %v4426_v37, %s4169_s10 }
 0x139   : > { %3433 = vrot.lane.b32.xlu0 %v4436_v40, %s4169_s10  ;;  %3443 = vrot.lane.b32.xlu2 %v4440_v41, %s4169_s10 }
 0x13a   : > { %v4655_v54 = vpop.permute.xlu1 %3228 }
 0x13b   : > { %v4657_v9 = vpop.permute.xlu0 %3223  ;;  %v4659_v8 = vpop.permute.xlu2 %3278  ;;  %v7150_v6 = vunpack.i.h.bf16 %v4655_v54  ;;  %v3230_v5 = vunpack.i.l.bf16 %v4655_v54 }
 0x13c   : > { %v3225_v27 = vunpack.i.l.bf16 %v4657_v9 }
 0x13d   : > { %v716_v63 = vsel %vm257_vm1, %v3230_v5, %v7150_v6  ;;  %v3210_v5 = vunpack.i.l.bf16 %v4645_v58  ;;  %v7308_v6 = vunpack.i.h.bf16 %v4606_v7 }
 0x140   : > { %3453 = vrot.lane.b32.xlu1 %v4436_v40, %s4170_s11 }
 0x141   : > { %3448 = vrot.lane.b32.xlu0 %v4462_v47, %s4169_s10  ;;  %3458 = vrot.lane.b32.xlu2 %v4426_v37, %s4170_s11 }
 0x142   : > { %v4667_v50 = vpop.permute.xlu1 %3243 }
 0x143   : > { %v7147_v61 = vunpack.i.h.bf16 %v4667_v50  ;;  %v3245_v60 = vunpack.i.l.bf16 %v4667_v50  ;;  %v4671_v53 = vpop.permute.xlu0 %3238  ;;  %v4673_v0 = vpop.permute.xlu2 %3293 }
 0x144   : > { %v7148_v3 = vunpack.i.h.bf16 %v4671_v53  ;;  %v3240_v56 = vunpack.i.l.bf16 %v4671_v53 }
 0x145   : > { %v743_v59 = vsel %vm286_vm0, %v3245_v60, %v7147_v61 }
 0x146   : > { %1106 = vmatpush.msra.mxu0 %v743_v59  ;;  %v742_v28 = vsel %vm286_vm0, %v3240_v56, %v7148_v3  ;;  %v7306_v59 = vunpack.i.h.bf16 %v4618_v10  ;;  %v3220_v56 = vunpack.i.l.bf16 %v4606_v7 }
 0x148   : > { %3468 = vrot.lane.b32.xlu1 %v4462_v47, %s4170_s11  ;;  %1107 = vmatpush.msra.mxu0 %v742_v28  ;;  %v741_v60 = vsel %vm286_vm0, %v3235_v2, %v7306_v59  ;;  %v3215_v2 = vunpack.i.l.bf16 %v4643_v46  ;;  %v7307_v59 = vunpack.i.h.bf16 %v4657_v9  ;;  %v714_v35 = vsel %vm257_vm1, %v3220_v56, %v7308_v6  ;;  %v2813_v28 = vld [vmem:[%s4232_s24 + $0x98] sm:$0xff]  ;;  %v2815_v56 = vld [vmem:[%s4232_s24 + $0xa8] sm:$0xff] }
 0x149   : > { %3463 = vrot.lane.b32.xlu0 %v4440_v41, %s4170_s11  ;;  %3473 = vrot.lane.b32.xlu2 %v4436_v40, %s4171_s19  ;;  %v3205_v40 = vunpack.i.l.bf16 %v4594_v4 }
 0x14a   : > { %v4698_v61 = vpop.permute.xlu1 %3258  ;;  %1108 = vmatpush.msra.mxu0 %v741_v60  ;;  %v715_v60 = vsel %vm257_vm1, %v3225_v27, %v7307_v59  ;;  %v7309_v27 = vunpack.i.h.bf16 %v4643_v46 }
 0x14b   : > { %v4702_v3 = vpop.permute.xlu0 %3253  ;;  %v4707_v20 = vpop.permute.xlu2 %3308 }
 0x14c   : > { %1109 = vmatpush.msra.mxu0 %v716_v63  ;;  %v713_v59 = vsel %vm257_vm1, %v3215_v2, %v7309_v27  ;;  %v7310_v2 = vunpack.i.h.bf16 %v4645_v58 }
 0x14e   : > { %1110 = vmatpush.msra.mxu0 %v715_v60  ;;  %v2812_v60 = vld [vmem:[%s4232_s24 + $0x90] sm:$0xff]  ;;  %v688_v27 = vsel %vm228_vm2, %v3210_v5, %v7310_v2  ;;  %v4756_v5 = vpack.i.bf16 %v2815_v56, %v2814_v45  ;;  %v7312_v2 = vunpack.i.h.bf16 %v4626_v11 }
 0x14f   : > { %v4748_v23 = vpack.i.bf16 %v2813_v28, %v2812_v60  ;;  %v685_v28 = vsel %vm228_vm2, %v3195_v26, %v3196_v42  ;;  %v2817_v60 = vld [vmem:[%s4232_s24 + $0xb8] sm:$0xff] }
 0x150   : > { %3483 = vrot.lane.b32.xlu1 %v4440_v41, %s4171_s19  ;;  %1111 = vmatpush.msra.mxu0 %v714_v35  ;;  %v2810_v41 = vld [vmem:[%s4232_s24 + $0x80] sm:$0xff]  ;;  %v2811_v35 = vld [vmem:[%s4232_s24 + $0x88] sm:$0xff] }
 0x151   : > { %3478 = vrot.lane.b32.xlu0 %v4426_v37, %s4171_s19  ;;  %3488 = vrot.lane.b32.xlu2 %v4462_v47, %s4171_s19  ;;  %v3200_v37 = vunpack.i.l.bf16 %v4626_v11  ;;  %v7311_v47 = vunpack.i.h.bf16 %v4594_v4  ;;  %v4754_v49 = vpack.i.bf16 %v2811_v35, %v2810_v41  ;;  %v2807_v41 = vld [vmem:[%s7109_s1 + $0x10] sm:$0xff] }
 0x152   : > { %v4732_v6 = vpop.permute.xlu1 %3273  ;;  %1112 = vmatpush.msra.mxu0 %v713_v59  ;;  %1094 = vst [vmem:[#allocation1] ss:$2 sm:$0xff] %v2807_v41 }
 0x153   : > { %v4738_v63 = vpop.permute.xlu0 %3268  ;;  %v4743_v32 = vpop.permute.xlu2 %3323  ;;  %v687_v59 = vsel %vm228_vm2, %v3205_v40, %v7311_v47  ;;  %v2816_v40 = vld [vmem:[%s4232_s24 + $0xb0] sm:$0xff] }
 0x154   : > { %1113 = vmatpush.msra.mxu0 %v688_v27  ;;  %v686_v27 = vsel %vm228_vm2, %v3200_v37, %v7312_v2  ;;  %v4782_v26 = vpack.i.bf16 %v2817_v60, %v2816_v40  ;;  %v7315_v2 = vunpack.i.h.bf16 %v4671_v53  ;;  %v7319_v40 = vunpack.i.h.bf16 %v4606_v7 }
 0x155   : > { %v7322_v7 = vunpack.i.h.bf16 %v4645_v58 }
 0x156   : > { %1114 = vmatpush.msra.mxu0 %v687_v59 }
 0x158   : > { %3498 = vrot.lane.b32.xlu1 %v4748_v23, %s4157_s25  ;;  %1115 = vmatpush.msra.mxu0 %v686_v27 }
 0x159   : > { %3493 = vrot.lane.b32.xlu0 %v4754_v49, %s4157_s25  ;;  %3503 = vrot.lane.b32.xlu2 %v4756_v5, %s4157_s25 }
 0x15a   : > { %v4770_v45 = vpop.permute.xlu1 %3288  ;;  %1116 = vmatpush.msra.mxu0 %v685_v28  ;;  %v7318_v28 = vunpack.i.h.bf16 %v4657_v9 }
 0x15b   : > { %v4777_v35 = vpop.permute.xlu0 %3283  ;;  %v4779_v56 = vpop.permute.xlu2 %3338 }
 0x15c   : > { %1117 = vmatpush.msra.mxu0 %v4451_v43  ;;  %v4795_v43 = vld.sshfl [vmem:[#allocation1] sm:$0xff pattern:$0x75316420] }
 0x15e   : > { %1118 = vmatpush.msra.mxu0 %v4429_v38  ;;  %v7313_v38 = vunpack.i.h.bf16 %v4630_v1 }
 0x160   : > { %3513 = vrot.lane.b32.xlu1 %v4754_v49, %s4158_s26  ;;  %1119 = vmatpush.msra.mxu0 %v4405_v30  ;;  %v7314_v30 = vunpack.i.h.bf16 %v4667_v50  ;;  %v7317_v50 = vunpack.i.h.bf16 %v4655_v54  ;;  %v7159_v54 = vunpack.i.h.bf16 %v4743_v32 }
 0x161   : > { %3508 = vrot.lane.b32.xlu0 %v4782_v26, %s4157_s25  ;;  %3518 = vrot.lane.b32.xlu2 %v4748_v23, %s4158_s26 }
 0x162   : > { %v4792_v37 = vpop.permute.xlu1 %3303  ;;  %1120 = vmatpush.msra.mxu0 %v4415_v33  ;;  %v7316_v33 = vunpack.i.h.bf16 %v4618_v10  ;;  %v7320_v10 = vunpack.i.h.bf16 %v4643_v46 }
 0x163   : > { %v4797_v47 = vpop.permute.xlu0 %3298  ;;  %v4801_v59 = vpop.permute.xlu2 %3353  ;;  %1121 = vmatmul.f32.vlgmr.msra.gmra.mxu0 %v4795_v43 }
 0x164   : > { %1185 = vmatpush.msrb.mxu0 %v7313_v38  ;;  %v3325_v38 = vunpack.i.l.bf16 %v4743_v32 }
 0x166   : > { %1186 = vmatpush.msrb.mxu0 %v7314_v30 }
 0x168   : > { %1187 = vmatpush.msrb.mxu0 %v7315_v2  ;;  %3528 = vrot.lane.b32.xlu1 %v4782_v26, %s4158_s26  ;;  %v7323_v2 = vunpack.i.h.bf16 %v4594_v4  ;;  %v855_v4 = vsel %vm402_vm3, %v3325_v38, %v7159_v54  ;;  %v7166_v54 = vunpack.i.h.bf16 %v4382_v24 }
 0x169   : > { %3523 = vrot.lane.b32.xlu0 %v4756_v5, %s4158_s26  ;;  %3533 = vrot.lane.b32.xlu2 %v4754_v49, %s4159_s27 }
 0x16a   : > { %1188 = vmatpush.msrb.mxu0 %v7316_v33  ;;  %v4814_v1 = vpop.permute.xlu1 %3318 }
 0x16b   : > { %v4818_v27 = vpop.permute.xlu0 %3313  ;;  %v4822_v53 = vpop.permute.xlu2 %3368  ;;  %v7158_v33 = vunpack.i.h.bf16 %v4814_v1 }
 0x16c   : > { %1189 = vmatpush.msrb.mxu0 %v7317_v50  ;;  %v3320_v50 = vunpack.i.l.bf16 %v4814_v1 }
 0x16e   : > { %1190 = vmatpush.msrb.mxu0 %v7318_v28  ;;  %v7324_v28 = vunpack.i.h.bf16 %v4626_v11  ;;  %v3310_v11 = vunpack.i.l.bf16 %v4707_v20 }
 0x170   : > { %1191 = vmatpush.msrb.mxu0 %v7319_v40  ;;  %3543 = vrot.lane.b32.xlu1 %v4756_v5, %s4159_s27  ;;  %v7160_v40 = vunpack.i.h.bf16 %v4818_v27 }
 0x171   : > { %3538 = vrot.lane.b32.xlu0 %v4748_v23, %s4159_s27  ;;  %3548 = vrot.lane.b32.xlu2 %v4782_v26, %s4159_s27 }
 0x172   : > { %1192 = vmatpush.msrb.mxu0 %v7320_v10  ;;  %v4834_v60 = vpop.permute.xlu1 %3333  ;;  %v3315_v10 = vunpack.i.l.bf16 %v4818_v27 }
 0x173   : > { %7321 = vst [vmem:[#allocation45_spill] sm:$0xff] %v4834_v60  ;;  %v4839_v9 = vpop.permute.xlu0 %3328  ;;  %v4843_v41 = vpop.permute.xlu2 %3383 }
 0x174   : > { %1193 = vmatpush.msrb.mxu0 %v7322_v7  ;;  %v7162_v30 = vunpack.i.h.bf16 %v4839_v9  ;;  %v3330_v46 = vunpack.i.l.bf16 %v4839_v9  ;;  %v7161_v7 = vunpack.i.h.bf16 %v4707_v20  ;;  %v7340_v60 = vunpack.i.h.bf16 %v4839_v9 }
 0x175   : > { %v7343_v9 = vunpack.i.h.bf16 %v4814_v1 }
 0x176   : > { %1194 = vmatpush.msrb.mxu0 %v7323_v2  ;;  %v856_v58 = vsel %vm402_vm3, %v3330_v46, %v7162_v30  ;;  %v854_v2 = vsel %vm402_vm3, %v3320_v50, %v7158_v33  ;;  %v2950_v50 = vunpack.i.l.bf16 %v4350_v17  ;;  %v3300_v33 = vunpack.i.l.bf16 %v4797_v47 }
 0x177   : > { %1125 = vmatpush.msra.mxu1 %v856_v58  ;;  %v3290_v30 = vunpack.i.l.bf16 %v4770_v45 }
 0x178   : > { %1195 = vmatpush.msrb.mxu0 %v7324_v28  ;;  %3558 = vrot.lane.b32.xlu1 %v4748_v23, %s4160_s28  ;;  %v7163_v28 = vunpack.i.h.bf16 %v4792_v37 }
 0x179   : > { %3553 = vrot.lane.b32.xlu0 %v4754_v49, %s4160_s28  ;;  %1126 = vmatpush.msra.mxu1 %v855_v4  ;;  %v3305_v4 = vunpack.i.l.bf16 %v4792_v37 }
 0x17a   : > { %1196 = vmatpush.msrb.mxu0 %v3196_v42  ;;  %v4870_v46 = vpop.permute.xlu1 %3348  ;;  %3563 = vrot.lane.b32.xlu2 %v4756_v5, %s4160_s28  ;;  %v853_v42 = vsel %vm402_vm3, %v3315_v10, %v7160_v40  ;;  %v2945_v10 = vunpack.i.l.bf16 %v4382_v24  ;;  %v7167_v40 = vunpack.i.h.bf16 %v4673_v0 }
 0x17b   : > { %v4877_v38 = vpop.permute.xlu0 %3343  ;;  %1127 = vmatpush.msra.mxu1 %v854_v2  ;;  %v4879_v58 = vpop.permute.xlu2 %3398  ;;  %v7164_v2 = vunpack.i.h.bf16 %v4797_v47 }
 0x17c   : > { %1197 = vmatpush.msrb.mxu0 %v4454_v44  ;;  %v828_v44 = vsel %vm373_vm4, %v3310_v11, %v7161_v7  ;;  %v2940_v7 = vunpack.i.l.bf16 %v4384_v25 }
 0x17d   : > { %1128 = vmatpush.msra.mxu1 %v853_v42  ;;  %v3295_v42 = vunpack.i.l.bf16 %v4673_v0 }
 0x17e   : > { %1198 = vmatpush.msrb.mxu0 %v4432_v39  ;;  %v827_v39 = vsel %vm373_vm4, %v3305_v4, %v7163_v28  ;;  %v826_v4 = vsel %vm373_vm4, %v3300_v33, %v7164_v2  ;;  %v290_v28 = vsel %vm286_vm0, %v2950_v50, %v7165_v62  ;;  %v3285_v2 = vunpack.i.l.bf16 %v4777_v35 }
 0x17f   : > { %1129 = vmatpush.msra.mxu1 %v828_v44  ;;  %v825_v50 = vsel %vm373_vm4, %v3295_v42, %v7167_v40  ;;  %v2935_v62 = vunpack.i.l.bf16 %v4338_v14 }
 0x180   : > { %1199 = vmatpush.msrb.mxu0 %v4408_v31  ;;  %3573 = vrot.lane.b32.xlu1 %v4754_v49, %s4161_s29 }
 0x181   : > { %3568 = vrot.lane.b32.xlu0 %v4782_v26, %s4160_s28  ;;  %1130 = vmatpush.msra.mxu1 %v827_v39  ;;  %v7327_v39 = vunpack.i.h.bf16 %v4770_v45 }
 0x182   : > { %1200 = vmatpush.msrb.mxu0 %v4418_v34  ;;  %v4912_v31 = vpop.permute.xlu1 %3363  ;;  %3578 = vrot.lane.b32.xlu2 %v4748_v23, %s4161_s29  ;;  %v289_v34 = vsel %vm286_vm0, %v2945_v10, %v7166_v54  ;;  %v3280_v54 = vunpack.i.l.bf16 %v4659_v8 }
 0x183   : > { %v4923_v44 = vpop.permute.xlu0 %3358  ;;  %1131 = vmatpush.msra.mxu1 %v826_v4  ;;  %v4928_v11 = vpop.permute.xlu2 %3413  ;;  %1201 = vmatmul.f32.vlgmr.msrb.gmra.mxu0 %v4795_v43  ;;  %v7168_v4 = vunpack.i.h.bf16 %v4659_v8  ;;  %v800_v33 = vsel %vm344_vm5, %v3290_v30, %v7327_v39  ;;  %v2930_v43 = vunpack.i.l.bf16 %v4370_v21  ;;  %v2925_v30 = vunpack.i.l.bf16 %v4372_v22 }
 0x184   : > { %1278 = vmatpush.msra.mxu0 %v290_v28  ;;  %7325 = vst [vmem:[#allocation46_spill] sm:$0xff] %v4928_v11  ;;  %v7326_v28 = vunpack.i.h.bf16 %v4384_v25  ;;  %v7329_v39 = vunpack.i.h.bf16 %v4338_v14  ;;  %v2915_v11 = vunpack.i.l.bf16 %v4322_v12 }
 0x185   : > { %1132 = vmatpush.msra.mxu1 %v825_v50  ;;  %v3275_v50 = vunpack.i.l.bf16 %v4732_v6 }
 0x186   : > { %1279 = vmatpush.msra.mxu0 %v289_v34  ;;  %v288_v10 = vsel %vm286_vm0, %v2940_v7, %v7326_v28  ;;  %v7328_v7 = vunpack.i.h.bf16 %v4777_v35  ;;  %v3270_v34 = vunpack.i.l.bf16 %v4738_v63 }
 0x187   : > { %1133 = vmatpush.msra.mxu1 %v800_v33  ;;  %v287_v33 = vsel %vm286_vm0, %v2935_v62, %v7329_v39  ;;  %v2920_v62 = vunpack.i.l.bf16 %v4330_v13 }
 0x188   : > { %1280 = vmatpush.msra.mxu0 %v288_v10  ;;  %3588 = vrot.lane.b32.xlu1 %v4782_v26, %s4161_s29  ;;  %v799_v28 = vsel %vm344_vm5, %v3285_v2, %v7328_v7  ;;  %v798_v2 = vsel %vm344_vm5, %v3280_v54, %v7168_v4  ;;  %v3265_v4 = vunpack.i.l.bf16 %v4647_v57  ;;  %v7332_v7 = vunpack.i.h.bf16 %v4732_v6 }
 0x189   : > { %3583 = vrot.lane.b32.xlu0 %v4756_v5, %s4161_s29  ;;  %1134 = vmatpush.msra.mxu1 %v799_v28  ;;  %v7334_v54 = vunpack.i.h.bf16 %v4738_v63 }
 0x18a   : > { %1281 = vmatpush.msra.mxu0 %v287_v33  ;;  %v4963_v42 = vpop.permute.xlu1 %3378  ;;  %3593 = vrot.lane.b32.xlu2 %v4754_v49, %s4162_s30  ;;  %v7330_v33 = vunpack.i.h.bf16 %v4370_v21  ;;  %v797_v28 = vsel %vm344_vm5, %v3275_v50, %v7332_v7  ;;  %v2910_v50 = vunpack.i.l.bf16 %v4358_v18  ;;  %v7335_v7 = vunpack.i.h.bf16 %v4330_v13 }
 0x18b   : > { %v4973_v39 = vpop.permute.xlu0 %3373  ;;  %1135 = vmatpush.msra.mxu1 %v798_v2  ;;  %v4978_v40 = vpop.permute.xlu2 %3428  ;;  %v7333_v2 = vunpack.i.h.bf16 %v4372_v22 }
 0x18c   : > { %v261_v10 = vsel %vm257_vm1, %v2930_v43, %v7330_v33  ;;  %7331 = vst [vmem:[#allocation47_spill] sm:$0xff] %v4978_v40  ;;  %v7172_v43 = vunpack.i.h.bf16 %v4698_v61  ;;  %v3260_v33 = vunpack.i.l.bf16 %v4698_v61  ;;  %v7174_v40 = vunpack.i.h.bf16 %v4358_v18 }
 0x18d   : > { %1282 = vmatpush.msra.mxu0 %v261_v10  ;;  %1136 = vmatpush.msra.mxu1 %v797_v28  ;;  %v260_v48 = vsel %vm257_vm1, %v2925_v30, %v7333_v2  ;;  %v772_v10 = vsel %vm315_vm6, %v3270_v34, %v7334_v54  ;;  %v259_v28 = vsel %vm257_vm1, %v2920_v62, %v7335_v7  ;;  %v3255_v2 = vunpack.i.l.bf16 %v4702_v3 }
 0x18e   : > { %v7337_v62 = vunpack.i.h.bf16 %v4322_v12  ;;  %v770_v30 = vsel %vm315_vm6, %v3260_v33, %v7172_v43  ;;  %v7338_v33 = vunpack.i.h.bf16 %v4702_v3  ;;  %v2895_v43 = vunpack.i.l.bf16 %v4348_v16 }
 0x18f   : > { %1283 = vmatpush.msra.mxu0 %v260_v48  ;;  %1137 = vmatpush.msra.mxu1 %v772_v10  ;;  %v7336_v48 = vunpack.i.h.bf16 %v4647_v57  ;;  %v2905_v10 = vunpack.i.l.bf16 %v4346_v15 }
 0x190   : > { %3603 = vrot.lane.b32.xlu1 %v4756_v5, %s4162_s30  ;;  %v258_v7 = vsel %vm257_vm1, %v2915_v11, %v7337_v62  ;;  %v232_v11 = vsel %vm228_vm2, %v2910_v50, %v7174_v40  ;;  %v2896_v62 = vunpack.i.h.bf16 %v4348_v16  ;;  %v647_v50 = vld [vmem:[%s7109_s1] sm:$0xff]  ;;  %v7341_v40 = vunpack.i.h.bf16 %v4360_v19 }
 0x191   : > { %1284 = vmatpush.msra.mxu0 %v259_v28  ;;  %v771_v34 = vsel %vm315_vm6, %v3265_v4, %v7336_v48  ;;  %3598 = vrot.lane.b32.xlu0 %v4748_v23, %s4162_s30  ;;  %v2900_v48 = vunpack.i.l.bf16 %v4360_v19  ;;  %v7339_v4 = vunpack.i.h.bf16 %v4346_v15 }
 0x192   : > { %1138 = vmatpush.msra.mxu1 %v771_v34  ;;  %v5013_v28 = vpop.permute.xlu1 %3393  ;;  %3608 = vrot.lane.b32.xlu2 %v4782_v26, %s4162_s30 }
 0x193   : > { %1285 = vmatpush.msra.mxu0 %v258_v7  ;;  %v5022_v54 = vpop.permute.xlu0 %3388  ;;  %v5027_v34 = vpop.permute.xlu2 %3443  ;;  %v769_v7 = vsel %vm315_vm6, %v3255_v2, %v7338_v33  ;;  %v230_v2 = vsel %vm228_vm2, %v2900_v48, %v7341_v40 }
 0x194   : > { %1139 = vmatpush.msra.mxu1 %v770_v30  ;;  %v231_v30 = vsel %vm228_vm2, %v2905_v10, %v7339_v4  ;;  %v7342_v10 = vunpack.i.h.bf16 %v4743_v32 }
 0x195   : > { %1286 = vmatpush.msra.mxu0 %v232_v11  ;;  %v5042_v11 = vld.sshfl [vmem:[#allocation1 + $0x8] sm:$0xff pattern:$0x75316420] }
 0x196   : > { %1140 = vmatpush.msra.mxu1 %v769_v7  ;;  %1267 = vst [vmem:[#allocation1] ss:$2 sm:$0xff] %v647_v50  ;;  %v7344_v7 = vunpack.i.h.bf16 %v4818_v27  ;;  %v3400_v27 = vunpack.i.l.bf16 %v4879_v58 }
 0x197   : > { %1287 = vmatpush.msra.mxu0 %v231_v30  ;;  %1141 = vmatmul.f32.vlgmr.msra.gmra.mxu1 %v5042_v11 }
 0x198   : > { %1205 = vmatpush.msrb.mxu1 %v7340_v60  ;;  %3618 = vrot.lane.b32.xlu1 %v4748_v23, %s4163_s4  ;;  %v229_v60 = vsel %vm228_vm2, %v2895_v43, %v2896_v62  ;;  %v4093_v43 = vld [vmem:[%s4232_s24 + $0x30] sm:$0xff] }
 0x199   : > { %1288 = vmatpush.msra.mxu0 %v230_v2  ;;  %3613 = vrot.lane.b32.xlu0 %v4754_v49, %s4163_s4  ;;  %v4094_v2 = vld [vmem:[%s4232_s24 + $0x20] sm:$0xff] }
 0x19a   : > { %1206 = vmatpush.msrb.mxu1 %v7342_v10  ;;  %v5059_v40 = vpop.permute.xlu1 %3408  ;;  %3623 = vrot.lane.b32.xlu2 %v4756_v5, %s4163_s4  ;;  %v7345_v10 = vunpack.i.h.bf16 %v4707_v20 }
 0x19b   : > { %1289 = vmatpush.msra.mxu0 %v229_v60  ;;  %v7175_v32 = vunpack.i.h.bf16 %v5059_v40  ;;  %v3410_v4 = vunpack.i.l.bf16 %v5059_v40  ;;  %v5063_v48 = vpop.permute.xlu0 %3403  ;;  %v5067_v33 = vpop.permute.xlu2 %3458  ;;  %v3401_v60 = vunpack.i.h.bf16 %v4879_v58  ;;  %v4100_v58 = vld [vmem:[%s4232_s24 + $0x8] sm:$0xff] }
 0x19c   : > { %1207 = vmatpush.msrb.mxu1 %v7343_v9  ;;  %v3406_v1 = vunpack.i.h.bf16 %v5063_v48  ;;  %v3405_v30 = vunpack.i.l.bf16 %v5063_v48  ;;  %v4095_v9 = vld [vmem:[%s4232_s24 + $0x10] sm:$0xff] }
 0x19d   : > { %1290 = vmatpush.msra.mxu0 %v4093_v43  ;;  %v968_v50 = vsel %vm518_vm7, %v3410_v4, %v7175_v32  ;;  %v7346_v43 = vunpack.i.h.bf16 %v4792_v37  ;;  %v3395_v4 = vunpack.i.l.bf16 %v5013_v28  ;;  %v3391_v37 = vunpack.i.h.bf16 %v5022_v54 }
 0x19e   : > { %1208 = vmatpush.msrb.mxu1 %v7344_v7  ;;  %1145 = vmatpush.msra.mxu2 %v968_v50  ;;  %v3396_v7 = vunpack.i.h.bf16 %v5013_v28  ;;  %v967_v20 = vsel %vm518_vm7, %v3405_v30, %v3406_v1  ;;  %v4096_v50 = vld [vmem:[%s4232_s24] sm:$0xff]  ;;  %v966_v30 = vsel %vm518_vm7, %v3400_v27, %v3401_v60  ;;  %v3385_v27 = vunpack.i.l.bf16 %v4843_v41 }
 0x19f   : > { %1291 = vmatpush.msra.mxu0 %v4094_v2 }
 0x1a0   : > { %1209 = vmatpush.msrb.mxu1 %v7345_v10  ;;  %3633 = vrot.lane.b32.xlu1 %v4754_v49, %s4164_s5  ;;  %v3390_v10 = vunpack.i.l.bf16 %v5022_v54 }
 0x1a1   : > { %1292 = vmatpush.msra.mxu0 %v4095_v9  ;;  %3628 = vrot.lane.b32.xlu0 %v4782_v26, %s4163_s4  ;;  %v7347_v9 = vunpack.i.h.bf16 %v4797_v47  ;;  %v7350_v47 = vunpack.i.h.bf16 %v4382_v24 }
 0x1a2   : > { %1210 = vmatpush.msrb.mxu1 %v7346_v43  ;;  %1146 = vmatpush.msra.mxu2 %v967_v20  ;;  %v5095_v2 = vpop.permute.xlu1 %3423  ;;  %v7348_v43 = vunpack.i.h.bf16 %v4350_v17  ;;  %v965_v17 = vsel %vm518_vm7, %v3395_v4, %v3396_v7  ;;  %v940_v24 = vsel %vm489_vm8, %v3390_v10, %v3391_v37  ;;  %v3380_v4 = vunpack.i.l.bf16 %v4963_v42 }
 0x1a3   : > { %1293 = vmatpush.msra.mxu0 %v4096_v50  ;;  %v5103_v32 = vpop.permute.xlu0 %3418  ;;  %v5108_v20 = vpop.permute.xlu2 %3473  ;;  %3638 = vrot.lane.b32.xlu2 %v4748_v23, %s4164_s5  ;;  %v7349_v50 = vunpack.i.h.bf16 %v4673_v0  ;;  %v7176_v0 = vunpack.i.h.bf16 %v4963_v42 }
 0x1a4   : > { %1211 = vmatpush.msrb.mxu1 %v7347_v9  ;;  %1147 = vmatpush.msra.mxu2 %v966_v30  ;;  %v3386_v9 = vunpack.i.h.bf16 %v4843_v41  ;;  %v7352_v30 = vunpack.i.h.bf16 %v4384_v25  ;;  %v3375_v25 = vunpack.i.l.bf16 %v4973_v39  ;;  %v7380_v41 = vld [vmem:[#allocation5_spill] sm:$0xff] }
 0x1a5   : > { %1358 = vmatpush.msrb.mxu0 %v7348_v43  ;;  %v7351_v43 = vunpack.i.h.bf16 %v4770_v45  ;;  %v7193_v45 = vunpack.i.h.bf16 %v4973_v39 }
 0x1a6   : > { %1212 = vmatpush.msrb.mxu1 %v7349_v50  ;;  %1148 = vmatpush.msra.mxu2 %v965_v17  ;;  %v7353_v50 = vunpack.i.h.bf16 %v4777_v35  ;;  %v939_v10 = vsel %vm489_vm8, %v3385_v27, %v3386_v9  ;;  %v7179_v35 = vunpack.i.h.bf16 %v4822_v53  ;;  %v938_v27 = vsel %vm489_vm8, %v3380_v4, %v7176_v0 }
 0x1a7   : > { %1359 = vmatpush.msrb.mxu0 %v7350_v47  ;;  %v7354_v47 = vunpack.i.h.bf16 %v4338_v14  ;;  %v7355_v14 = vunpack.i.h.bf16 %v4659_v8  ;;  %v937_v4 = vsel %vm489_vm8, %v3375_v25, %v7193_v45 }
 0x1a8   : > { %1213 = vmatpush.msrb.mxu1 %v7351_v43  ;;  %1149 = vmatpush.msra.mxu2 %v940_v24  ;;  %v3370_v24 = vunpack.i.l.bf16 %v4822_v53 }
 0x1a9   : > { %1360 = vmatpush.msrb.mxu0 %v7352_v30  ;;  %3648 = vrot.lane.b32.xlu1 %v4782_v26, %s4164_s5 }
 0x1aa   : > { %1214 = vmatpush.msrb.mxu1 %v7353_v50  ;;  %3643 = vrot.lane.b32.xlu0 %v4756_v5, %s4164_s5  ;;  %v5143_v17 = vpop.permute.xlu1 %3438  ;;  %v7356_v50 = vunpack.i.h.bf16 %v4370_v21  ;;  %v3365_v21 = vunpack.i.l.bf16 %v4912_v31  ;;  %v912_v25 = vsel %vm460_vm10, %v3370_v24, %v7179_v35  ;;  %v7181_v35 = vunpack.i.h.bf16 %v4877_v38 }
 0x1ab   : > { %1361 = vmatpush.msrb.mxu0 %v7354_v47  ;;  %1150 = vmatpush.msra.mxu2 %v939_v10  ;;  %v5148_v43 = vpop.permute.xlu0 %3433  ;;  %v5150_v30 = vpop.permute.xlu2 %3488  ;;  %v7178_v10 = vunpack.i.h.bf16 %v4912_v31 }
 0x1ac   : > { %1215 = vmatpush.msrb.mxu1 %v7355_v14  ;;  %3653 = vrot.lane.b32.xlu2 %v4754_v49, %s4165_s6  ;;  %v7177_v47 = vunpack.i.h.bf16 %v5150_v30  ;;  %v3490_v8 = vunpack.i.l.bf16 %v5150_v30  ;;  %v7357_v14 = vunpack.i.h.bf16 %v4732_v6  ;;  %v7192_v6 = vunpack.i.h.bf16 %v4923_v44 }
 0x1ad   : > { %1362 = vmatpush.msrb.mxu0 %v7356_v50  ;;  %1151 = vmatpush.msra.mxu2 %v938_v27  ;;  %v7358_v50 = vunpack.i.h.bf16 %v4372_v22  ;;  %v7359_v27 = vunpack.i.h.bf16 %v4738_v63  ;;  %v7360_v22 = vunpack.i.h.bf16 %v4330_v13  ;;  %v7361_v63 = vunpack.i.h.bf16 %v4647_v57 }
 0x1ae   : > { %1216 = vmatpush.msrb.mxu1 %v7357_v14  ;;  %v1080_v0 = vsel %vm634_vm9, %v3490_v8, %v7177_v47  ;;  %v3360_v14 = vunpack.i.l.bf16 %v4923_v44  ;;  %v3030_v8 = vunpack.i.l.bf16 %v4496_v55  ;;  %v7362_v13 = vunpack.i.h.bf16 %v4322_v12 }
 0x1af   : > { %1363 = vmatpush.msrb.mxu0 %v7358_v50  ;;  %1152 = vmatpush.msra.mxu2 %v937_v4  ;;  %v7180_v50 = vunpack.i.h.bf16 %v4496_v55  ;;  %v7190_v4 = vunpack.i.h.bf16 %v4801_v59  ;;  %v3025_v12 = vunpack.i.l.bf16 %v4422_v36  ;;  %v7364_v47 = vunpack.i.h.bf16 %v4358_v18 }
 0x1b0   : > { %1217 = vmatpush.msrb.mxu1 %v7359_v27  ;;  %1165 = vmatpush.msra.mxu3 %v1080_v0  ;;  %v3355_v27 = vunpack.i.l.bf16 %v4801_v59  ;;  %v911_v0 = vsel %vm460_vm10, %v3365_v21, %v7178_v10  ;;  %v7363_v21 = vunpack.i.h.bf16 %v4698_v61  ;;  %v3345_v61 = vunpack.i.l.bf16 %v4877_v38 }
 0x1b1   : > { %1364 = vmatpush.msrb.mxu0 %v7360_v22  ;;  %1153 = vmatpush.msra.mxu2 %v912_v25  ;;  %v7182_v22 = vunpack.i.h.bf16 %v4422_v36  ;;  %v406_v10 = vsel %vm402_vm3, %v3030_v8, %v7180_v50  ;;  %v7366_v18 = vunpack.i.h.bf16 %v4346_v15  ;;  %v3020_v8 = vunpack.i.l.bf16 %v4482_v51 }
 0x1b2   : > { %1218 = vmatpush.msrb.mxu1 %v7361_v63  ;;  %3663 = vrot.lane.b32.xlu1 %v4756_v5, %s4165_s6  ;;  %v5196_v24 = vpop.permute.xlu1 %3453  ;;  %v7186_v63 = vunpack.i.h.bf16 %v4870_v46  ;;  %v3340_v50 = vunpack.i.l.bf16 %v4779_v56 }
 0x1b3   : > { %1365 = vmatpush.msrb.mxu0 %v7362_v13  ;;  %3658 = vrot.lane.b32.xlu0 %v4748_v23, %s4165_s6  ;;  %v5201_v57 = vpop.permute.xlu0 %3448  ;;  %v5203_v25 = vpop.permute.xlu2 %3503  ;;  %v3350_v13 = vunpack.i.l.bf16 %v4870_v46 }
 0x1b4   : > { %1154 = vmatpush.msra.mxu2 %v911_v0  ;;  %1219 = vmatpush.msrb.mxu1 %v7363_v21  ;;  %v910_v0 = vsel %vm460_vm10, %v3360_v14, %v7192_v6  ;;  %v7365_v21 = vunpack.i.h.bf16 %v4702_v3  ;;  %v7184_v14 = vunpack.i.h.bf16 %v4482_v51  ;;  %v7367_v3 = vunpack.i.h.bf16 %v4360_v19 }
 0x1b5   : > { %1366 = vmatpush.msrb.mxu0 %v7364_v47  ;;  %3668 = vrot.lane.b32.xlu2 %v4782_v26, %s4165_s6  ;;  %v909_v47 = vsel %vm460_vm10, %v3355_v27, %v7190_v4  ;;  %v884_v15 = vsel %vm431_vm11, %v3350_v13, %v7186_v63  ;;  %v405_v27 = vsel %vm402_vm3, %v3025_v12, %v7182_v22  ;;  %v3015_v19 = vunpack.i.l.bf16 %v4484_v52 }
 0x1b6   : > { %1155 = vmatpush.msra.mxu2 %v910_v0  ;;  %1220 = vmatpush.msrb.mxu1 %v7365_v21  ;;  %v7183_v0 = vunpack.i.h.bf16 %v4779_v56  ;;  %v7187_v21 = vunpack.i.h.bf16 %v4398_v29  ;;  %v3010_v13 = vunpack.i.l.bf16 %v4398_v29 }
 0x1b7   : > { %1367 = vmatpush.msrb.mxu0 %v7366_v18  ;;  %1221 = vmatmul.f32.vlgmr.msrb.gmra.mxu1 %v5042_v11  ;;  %v7185_v18 = vunpack.i.h.bf16 %v4484_v52 }
 0x1b8   : > { %1156 = vmatpush.msra.mxu2 %v909_v47  ;;  %1298 = vmatpush.msra.mxu1 %v406_v10  ;;  %v2808_v10 = vld [vmem:[%s7109_s1 + $0x18] sm:$0xff]  ;;  %v7368_v47 = vld [vmem:[#allocation45_spill] sm:$0xff] }
 0x1b9   : > { %1368 = vmatpush.msrb.mxu0 %v7367_v3  ;;  %1096 = vst [vmem:[#allocation1 + $0x10] ss:$2 sm:$0xff] %v2808_v10  ;;  %v7189_v12 = vunpack.i.h.bf16 %v7368_v47  ;;  %v3335_v11 = vunpack.i.l.bf16 %v7368_v47  ;;  %v883_v3 = vsel %vm431_vm11, %v3345_v61, %v7181_v35  ;;  %v882_v61 = vsel %vm431_vm11, %v3340_v50, %v7183_v0  ;;  %v4097_v10 = vld [vmem:[%s4232_s24 + $0x38] sm:$0xff] }
 0x1ba   : > { %1157 = vmatpush.msra.mxu2 %v884_v15  ;;  %1299 = vmatpush.msra.mxu1 %v405_v27  ;;  %v5258_v15 = vpop.permute.xlu1 %3468  ;;  %v404_v27 = vsel %vm402_vm3, %v3020_v8, %v7184_v14  ;;  %v7369_v35 = vld [vmem:[#allocation12_spill] sm:$0xff]  ;;  %v403_v8 = vsel %vm402_vm3, %v3015_v19, %v7185_v18  ;;  %v7371_v19 = vunpack.i.h.bf16 %v5059_v40 }
 0x1bb   : > { %1369 = vmatpush.msrb.mxu0 %v2896_v62  ;;  %3678 = vrot.lane.b32.xlu1 %v4748_v23, %s4166_s7  ;;  %v5265_v16 = vpop.permute.xlu0 %3463  ;;  %v5267_v62 = vpop.permute.xlu2 %3518  ;;  %v7188_v22 = vunpack.i.h.bf16 %v7369_v35  ;;  %v881_v50 = vsel %vm431_vm11, %v3335_v11, %v7189_v12  ;;  %v7372_v18 = vld [vmem:[#allocation4_spill] sm:$0xff]  ;;  %v7374_v12 = vld [vmem:[#allocation10_spill] sm:$0xff] }
 0x1bc   : > { %3673 = vrot.lane.b32.xlu0 %v4754_v49, %s4166_s7  ;;  %1158 = vmatpush.msra.mxu2 %v883_v3  ;;  %v3005_v3 = vunpack.i.l.bf16 %v7369_v35  ;;  %v7197_v63 = vunpack.i.h.bf16 %v7372_v18  ;;  %v2995_v11 = vunpack.i.l.bf16 %v7372_v18  ;;  %v7198_v4 = vunpack.i.h.bf16 %v7374_v12 }
 0x1bd   : > { %1300 = vmatpush.msra.mxu1 %v404_v27  ;;  %1370 = vmatpush.msrb.mxu0 %v4097_v10  ;;  %v377_v27 = vsel %vm373_vm4, %v3010_v13, %v7187_v21  ;;  %v4098_v10 = vld [vmem:[%s4232_s24 + $0x28] sm:$0xff]  ;;  %v7373_v21 = vld [vmem:[#allocation9_spill] sm:$0xff] }
 0x1be   : > { %1159 = vmatpush.msra.mxu2 %v882_v61  ;;  %3683 = vrot.lane.b32.xlu2 %v4756_v5, %s4166_s7  ;;  %v7370_v61 = vld [vmem:[#allocation13_spill] sm:$0xff]  ;;  %v376_v13 = vsel %vm373_vm4, %v3005_v3, %v7188_v22 }
 0x1bf   : > { %1301 = vmatpush.msra.mxu1 %v403_v8  ;;  %1371 = vmatpush.msrb.mxu0 %v4098_v10  ;;  %v7191_v0 = vunpack.i.h.bf16 %v7370_v61  ;;  %v3000_v14 = vunpack.i.l.bf16 %v7370_v61  ;;  %v4099_v10 = vld [vmem:[%s4232_s24 + $0x18] sm:$0xff] }
 0x1c0   : > { %1160 = vmatpush.msra.mxu2 %v881_v50  ;;  %v5291_v8 = vld.sshfl [vmem:[#allocation1 + $0x10] sm:$0xff pattern:$0x75316420]  ;;  %v7195_v50 = vunpack.i.h.bf16 %v7373_v21 }
 0x1c1   : > { %1302 = vmatpush.msra.mxu1 %v377_v27  ;;  %1161 = vmatmul.f32.vlgmr.msra.gmra.mxu2 %v5291_v8  ;;  %v2990_v27 = vunpack.i.l.bf16 %v7373_v21  ;;  %v375_v3 = vsel %vm373_vm4, %v3000_v14, %v7191_v0  ;;  %v2985_v14 = vunpack.i.l.bf16 %v7374_v12  ;;  %v374_v0 = vsel %vm373_vm4, %v2995_v11, %v7197_v63 }
 0x1c2   : > { %1225 = vmatpush.msrb.mxu2 %v7371_v19  ;;  %1372 = vmatpush.msrb.mxu0 %v4099_v10  ;;  %v5303_v40 = vpop.permute.xlu1 %3483  ;;  %v7381_v63 = vunpack.i.h.bf16 %v4963_v42 }
 0x1c3   : > { %1303 = vmatpush.msra.mxu1 %v376_v13  ;;  %3693 = vrot.lane.b32.xlu1 %v4754_v49, %s4167_s8  ;;  %v7194_v19 = vunpack.i.h.bf16 %v5303_v40  ;;  %v3485_v48 = vunpack.i.l.bf16 %v5303_v40  ;;  %v5321_v22 = vpop.permute.xlu2 %3533  ;;  %v348_v11 = vsel %vm344_vm5, %v2990_v27, %v7195_v50  ;;  %v347_v27 = vsel %vm344_vm5, %v2985_v14, %v7198_v4 }
 0x1c4   : > { %1226 = vmatpush.msrb.mxu2 %v3406_v1  ;;  %3688 = vrot.lane.b32.xlu0 %v4782_v26, %s4166_s7  ;;  %v5315_v1 = vpop.permute.xlu0 %3478  ;;  %v3465_v4 = vunpack.i.l.bf16 %v5265_v16 }
 0x1c5   : > { %1304 = vmatpush.msra.mxu1 %v375_v3  ;;  %v7196_v13 = vunpack.i.h.bf16 %v5315_v1  ;;  %v3480_v10 = vunpack.i.l.bf16 %v5315_v1  ;;  %v1079_v3 = vsel %vm634_vm9, %v3485_v48, %v7194_v19  ;;  %1373 = vmatpush.msrb.mxu0 %v4100_v58  ;;  %v7201_v48 = vunpack.i.h.bf16 %v5108_v20 }
 0x1c6   : > { %1227 = vmatpush.msrb.mxu2 %v3401_v60  ;;  %3698 = vrot.lane.b32.xlu2 %v4748_v23, %s4167_s8  ;;  %v7375_v60 = vld [vmem:[#allocation3_spill] sm:$0xff]  ;;  %v3475_v19 = vunpack.i.l.bf16 %v5108_v20 }
 0x1c7   : > { %v7200_v6 = vunpack.i.h.bf16 %v7375_v60  ;;  %1305 = vmatpush.msra.mxu1 %v374_v0  ;;  %v2980_v45 = vunpack.i.l.bf16 %v7375_v60  ;;  %1166 = vmatpush.msra.mxu3 %v1079_v3  ;;  %v1078_v28 = vsel %vm634_vm9, %v3480_v10, %v7196_v13  ;;  %v7377_v3 = vld [vmem:[#allocation8_spill] sm:$0xff]  ;;  %v7379_v13 = vld [vmem:[#allocation2_spill] sm:$0xff] }
 0x1c8   : > { %1228 = vmatpush.msrb.mxu2 %v3396_v7  ;;  %v7376_v7 = vld [vmem:[#allocation7_spill] sm:$0xff]  ;;  %v2965_v0 = vunpack.i.l.bf16 %v7379_v13  ;;  %v1077_v50 = vsel %vm634_vm9, %v3475_v19, %v7201_v48  ;;  %v7384_v48 = vunpack.i.h.bf16 %v4973_v39  ;;  %v7388_v39 = vunpack.i.h.bf16 %v4822_v53 }
 0x1c9   : > { %1306 = vmatpush.msra.mxu1 %v348_v11  ;;  %v2975_v58 = vunpack.i.l.bf16 %v7376_v7  ;;  %1167 = vmatpush.msra.mxu3 %v1078_v28  ;;  %v2970_v11 = vunpack.i.l.bf16 %v7377_v3  ;;  %v346_v14 = vsel %vm344_vm5, %v2980_v45, %v7200_v6  ;;  %v7383_v45 = vunpack.i.h.bf16 %v7376_v7 }
 0x1ca   : > { %1229 = vmatpush.msrb.mxu2 %v3391_v37  ;;  %v3470_v37 = vunpack.i.l.bf16 %v5258_v15  ;;  %v5359_v10 = vpop.permute.xlu1 %3498  ;;  %v7391_v53 = vunpack.i.h.bf16 %v4912_v31 }
 0x1cb   : > { %1307 = vmatpush.msra.mxu1 %v347_v27  ;;  %7378 = vst [vmem:[#allocation45_spill] sm:$0xff] %v5359_v10  ;;  %3708 = vrot.lane.b32.xlu1 %v4782_v26, %s4167_s8  ;;  %v5380_v54 = vpop.permute.xlu2 %3548  ;;  %v1270_v10 = vld.sshfl [vmem:[#allocation1] sm:$0xff pattern:$0x75316420]  ;;  %v345_v6 = vsel %vm344_vm5, %v2975_v58, %v7383_v45  ;;  %v7386_v45 = vunpack.i.h.bf16 %v7377_v3 }
 0x1cc   : > { %1230 = vmatpush.msrb.mxu2 %v3386_v9  ;;  %3703 = vrot.lane.b32.xlu0 %v4756_v5, %s4167_s8  ;;  %v5370_v28 = vpop.permute.xlu0 %3493  ;;  %7382 = vst [vmem:[#allocation12_spill] sm:$0xff] %v5380_v54  ;;  %v3550_v42 = vunpack.i.l.bf16 %v5380_v54  ;;  %v3460_v9 = vunpack.i.l.bf16 %v5067_v33 }
 0x1cd   : > { %1308 = vmatpush.msra.mxu1 %v346_v14  ;;  %1168 = vmatpush.msra.mxu3 %v1077_v50  ;;  %v7202_v14 = vunpack.i.h.bf16 %v5380_v54  ;;  %v7385_v50 = vunpack.i.h.bf16 %v5258_v15  ;;  %v7429_v54 = vunpack.i.h.bf16 %v7372_v18 }
 0x1ce   : > { %1231 = vmatpush.msrb.mxu2 %v7381_v63  ;;  %3713 = vrot.lane.b32.xlu2 %v4754_v49, %s4168_s9  ;;  %v2960_v63 = vunpack.i.l.bf16 %v7380_v41  ;;  %v319_v49 = vsel %vm315_vm6, %v2970_v11, %v7386_v45  ;;  %v7390_v11 = vunpack.i.h.bf16 %v7379_v13  ;;  %v7206_v45 = vunpack.i.h.bf16 %v5196_v24 }
 0x1cf   : > { %1309 = vmatpush.msra.mxu1 %v345_v6  ;;  %v1052_v58 = vsel %vm605_vm12, %v3470_v37, %v7385_v50  ;;  %1294 = vmatmul.f32.vlgmr.msra.gmra.mxu0 %v1270_v10  ;;  %v1533_v19 = vsel %vm286_vm0, %v3550_v42, %v7202_v14  ;;  %v7387_v6 = vld [vmem:[#allocation6_spill] sm:$0xff]  ;;  %v3455_v42 = vunpack.i.l.bf16 %v5196_v24  ;;  %v7407_v14 = vunpack.i.h.bf16 %v4482_v51  ;;  %v7410_v51 = vld [vmem:[#allocation31_spill] sm:$0xff] }
 0x1d0   : > { %1232 = vmatpush.msrb.mxu2 %v7384_v48  ;;  %1169 = vmatpush.msra.mxu3 %v1052_v58  ;;  %v7205_v27 = vunpack.i.h.bf16 %v7387_v6  ;;  %v7389_v48 = vunpack.i.h.bf16 %v5265_v16  ;;  %v318_v50 = vsel %vm315_vm6, %v2965_v0, %v7390_v11  ;;  %v2955_v58 = vunpack.i.l.bf16 %v7387_v6 }
 0x1d1   : > { %1310 = vmatpush.msra.mxu1 %v319_v49  ;;  %1894 = vmatpush.msra.mxu0 %v1533_v19  ;;  %v7392_v0 = vunpack.i.h.bf16 %v5067_v33 }
 0x1d2   : > { %1233 = vmatpush.msrb.mxu2 %v7388_v39  ;;  %v1051_v37 = vsel %vm605_vm12, %v3465_v4, %v7389_v48  ;;  %v5417_v49 = vpop.permute.xlu1 %3513  ;;  %v7204_v4 = vunpack.i.h.bf16 %v5201_v57  ;;  %v3450_v39 = vunpack.i.l.bf16 %v5201_v57  ;;  %v7393_v48 = vunpack.i.h.bf16 %v7380_v41 }
 0x1d3   : > { %1170 = vmatpush.msra.mxu3 %v1051_v37  ;;  %1311 = vmatpush.msra.mxu1 %v318_v50  ;;  %v1050_v19 = vsel %vm605_vm12, %v3460_v9, %v7392_v0  ;;  %v7395_v50 = vunpack.i.h.bf16 %v4923_v44  ;;  %v1049_v9 = vsel %vm605_vm12, %v3455_v42, %v7206_v45  ;;  %v7397_v44 = vunpack.i.h.bf16 %v4496_v55  ;;  %v5467_v55 = vld [vmem:[%s4232_s24 + $0x80] sm:$0xff] }
 0x1d4   : > { %1234 = vmatpush.msrb.mxu2 %v7391_v53  ;;  %3723 = vrot.lane.b32.xlu1 %v4756_v5, %s4168_s9  ;;  %v317_v31 = vsel %vm315_vm6, %v2960_v63, %v7393_v48  ;;  %v5431_v37 = vpop.permute.xlu0 %3508  ;;  %v5433_v11 = vpop.permute.xlu2 %3563  ;;  %v7203_v5 = vunpack.i.h.bf16 %v5027_v34  ;;  %v316_v63 = vsel %vm315_vm6, %v2955_v58, %v7205_v27  ;;  %v7396_v53 = vunpack.i.h.bf16 %v4801_v59  ;;  %7400 = vst [vmem:[#allocation10_spill] sm:$0xff] %v5467_v55  ;;  %v5470_v48 = vld [vmem:[%s4232_s24 + $0x88] sm:$0xff] }
 0x1d5   : > { %3718 = vrot.lane.b32.xlu0 %v4748_v23, %s4168_s9  ;;  %1171 = vmatpush.msra.mxu3 %v1050_v19  ;;  %7394 = vst [vmem:[#allocation13_spill] sm:$0xff] %v5433_v11  ;;  %v3445_v23 = vunpack.i.l.bf16 %v5027_v34  ;;  %v1024_v42 = vsel %vm576_vm13, %v3450_v39, %v7204_v4  ;;  %v7209_v0 = vunpack.i.h.bf16 %v5143_v17  ;;  %v3440_v58 = vunpack.i.l.bf16 %v5143_v17  ;;  %v5460_v19 = vld [vmem:[%s4232_s24 + $0x98] sm:$0xff] }
 0x1d6   : > { %1312 = vmatpush.msra.mxu1 %v317_v31  ;;  %1235 = vmatpush.msrb.mxu2 %v7395_v50  ;;  %7399 = vst [vmem:[#allocation9_spill] sm:$0xff] %v5460_v19  ;;  %v5474_v39 = vpack.i.bf16 %v5470_v48, %v5467_v55  ;;  %v7402_v31 = vunpack.i.h.bf16 %v4870_v46  ;;  %v7403_v50 = vunpack.i.h.bf16 %v4422_v36  ;;  %v7405_v36 = vld [vmem:[#allocation30_spill] sm:$0xff]  ;;  %v3105_v45 = vunpack.i.l.bf16 %v7410_v51 }
 0x1d7   : > { %3728 = vrot.lane.b32.xlu2 %v4782_v26, %s4168_s9  ;;  %1172 = vmatpush.msra.mxu3 %v1049_v9  ;;  %v5457_v26 = vld [vmem:[%s4232_s24 + $0x90] sm:$0xff]  ;;  %7401 = vst [vmem:[#allocation3_spill] sm:$0xff] %v5470_v48  ;;  %v1023_v9 = vsel %vm576_vm13, %v3445_v23, %v7203_v5  ;;  %v7406_v23 = vunpack.i.h.bf16 %v4877_v38  ;;  %v1022_v38 = vsel %vm576_vm13, %v3440_v58, %v7209_v0  ;;  %v7411_v4 = vunpack.i.h.bf16 %v4779_v56 }
 0x1d8   : > { %1313 = vmatpush.msra.mxu1 %v316_v63  ;;  %1236 = vmatpush.msrb.mxu2 %v7396_v53  ;;  %7398 = vst [vmem:[#allocation4_spill] sm:$0xff] %v5457_v26  ;;  %v5464_v59 = vpack.i.bf16 %v5460_v19, %v5457_v26  ;;  %v3435_v53 = vunpack.i.l.bf16 %v5148_v43  ;;  %v7408_v5 = vld [vmem:[#allocation47_spill] sm:$0xff]  ;;  %v3425_v63 = vunpack.i.l.bf16 %v5095_v2  ;;  %v7412_v11 = vunpack.i.h.bf16 %v4484_v52  ;;  %v5550_v52 = vld [vmem:[%s4232_s24 + $0xb8] sm:$0xff] }
 0x1d9   : > { %1173 = vmatpush.msra.mxu3 %v1024_v42  ;;  %1374 = vmatmul.f32.vlgmr.msrb.gmra.mxu0 %v1270_v10  ;;  %v5488_v42 = vld [vmem:[%s4232_s24 + $0xa0] sm:$0xff]  ;;  %v5491_v10 = vld [vmem:[%s4232_s24 + $0xa8] sm:$0xff]  ;;  %v3430_v27 = vunpack.i.l.bf16 %v7408_v5  ;;  %v7413_v48 = vunpack.i.h.bf16 %v5148_v43  ;;  %v7414_v56 = vunpack.i.h.bf16 %v7368_v47  ;;  %v7416_v0 = vunpack.i.h.bf16 %v4398_v29  ;;  %7419 = vst [vmem:[#allocation2_spill] sm:$0xff] %v5550_v52  ;;  %v7426_v47 = vld [vmem:[#allocation28_spill] sm:$0xff] }
 0x1da   : > { %1378 = vmatpush.msrb.mxu1 %v7397_v44  ;;  %1237 = vmatpush.msrb.mxu2 %v7402_v31  ;;  %v5485_v44 = vpop.permute.xlu1 %3528  ;;  %7404 = vst [vmem:[#allocation7_spill] sm:$0xff] %v5491_v10  ;;  %v5495_v46 = vpack.i.bf16 %v5491_v10, %v5488_v42  ;;  %v7214_v31 = vunpack.i.h.bf16 %v5095_v2  ;;  %v7424_v10 = vunpack.i.h.bf16 %v7370_v61 }
 0x1db   : > { %1174 = vmatpush.msra.mxu3 %v1023_v9  ;;  %v1021_v58 = vsel %vm576_vm13, %v3435_v53, %v7413_v48  ;;  %v7417_v48 = vunpack.i.h.bf16 %v7408_v5 }
 0x1dc   : > { %1379 = vmatpush.msrb.mxu1 %v7403_v50  ;;  %v3110_v50 = vunpack.i.l.bf16 %v7405_v36  ;;  %1238 = vmatpush.msrb.mxu2 %v7406_v23  ;;  %v5503_v9 = vpop.permute.xlu0 %3523  ;;  %v5514_v23 = vpop.permute.xlu2 %3578 }
 0x1dd   : > { %3738 = vrot.lane.b32.xlu1 %v5464_v59, %s4169_s10  ;;  %3733 = vrot.lane.b32.xlu0 %v5474_v39, %s4169_s10  ;;  %7409 = vst [vmem:[#allocation8_spill] sm:$0xff] %v5514_v23  ;;  %v996_v53 = vsel %vm547_vm14, %v3430_v27, %v7417_v48  ;;  %v7420_v27 = vld [vmem:[#allocation46_spill] sm:$0xff]  ;;  %v7421_v48 = vunpack.i.h.bf16 %v7369_v35  ;;  %v7423_v35 = vld [vmem:[#allocation17_spill] sm:$0xff] }
 0x1de   : > { %1380 = vmatpush.msrb.mxu1 %v7407_v14  ;;  %v7210_v14 = vunpack.i.h.bf16 %v7410_v51  ;;  %1175 = vmatpush.msra.mxu3 %v1022_v38 }
 0x1df   : > { %1239 = vmatpush.msrb.mxu2 %v7411_v4  ;;  %3743 = vrot.lane.b32.xlu2 %v5495_v46, %s4169_s10  ;;  %v7415_v4 = vunpack.i.h.bf16 %v7405_v36 }
 0x1e0   : > { %1381 = vmatpush.msrb.mxu1 %v7412_v11  ;;  %1176 = vmatpush.msra.mxu3 %v1021_v58  ;;  %v3420_v11 = vunpack.i.l.bf16 %v5103_v32  ;;  %v7418_v58 = vld [vmem:[#allocation20_spill] sm:$0xff] }
 0x1e1   : > { %1240 = vmatpush.msrb.mxu2 %v7414_v56  ;;  %v522_v38 = vsel %vm518_vm7, %v3110_v50, %v7415_v4  ;;  %v3100_v56 = vunpack.i.l.bf16 %v7418_v58  ;;  %v521_v50 = vsel %vm518_vm7, %v3105_v45, %v7210_v14  ;;  %v5547_v4 = vld [vmem:[%s4232_s24 + $0xb0] sm:$0xff]  ;;  %v995_v45 = vsel %vm547_vm14, %v3425_v63, %v7214_v31 }
 0x1e2   : > { %1382 = vmatpush.msrb.mxu1 %v7416_v0  ;;  %1177 = vmatpush.msra.mxu3 %v996_v53  ;;  %v5554_v29 = vpack.i.bf16 %v5550_v52, %v5547_v4  ;;  %v5564_v53 = vpop.permute.xlu1 %3543  ;;  %v7422_v14 = vld [vmem:[#allocation27_spill] sm:$0xff]  ;;  %v7425_v63 = vunpack.i.h.bf16 %v5103_v32  ;;  %v3090_v52 = vunpack.i.l.bf16 %v7426_v47  ;;  %v7427_v61 = vunpack.i.h.bf16 %v7418_v58 }
 0x1e3   : > { %1318 = vmatpush.msra.mxu2 %v522_v38  ;;  %v3415_v38 = vunpack.i.l.bf16 %v7420_v27  ;;  %v3095_v23 = vunpack.i.l.bf16 %v7422_v14  ;;  %v3545_v0 = vunpack.i.l.bf16 %v5564_v53 }
 0x1e4   : > { %1241 = vmatmul.f32.vlgmr.msrb.gmra.mxu2 %v5291_v8  ;;  %1383 = vmatpush.msrb.mxu1 %v7421_v48  ;;  %v5570_v19 = vpop.permute.xlu0 %3538  ;;  %v7428_v48 = vunpack.i.h.bf16 %v5564_v53  ;;  %v3535_v8 = vunpack.i.l.bf16 %v5321_v22  ;;  %v5600_v26 = vpop.permute.xlu2 %3593 }
 0x1e5   : > { %1319 = vmatpush.msra.mxu2 %v521_v50  ;;  %1178 = vmatpush.msra.mxu3 %v995_v45  ;;  %v994_v50 = vsel %vm547_vm14, %v3420_v11, %v7425_v63  ;;  %v3540_v31 = vunpack.i.l.bf16 %v5570_v19  ;;  %v3085_v63 = vunpack.i.l.bf16 %v7423_v35  ;;  %v7219_v45 = vunpack.i.h.bf16 %v5321_v22 }
 0x1e6   : > { %1384 = vmatpush.msrb.mxu1 %v7424_v10  ;;  %3753 = vrot.lane.b32.xlu1 %v5474_v39, %s4170_s11  ;;  %v520_v10 = vsel %vm518_vm7, %v3100_v56, %v7427_v61  ;;  %v1532_v11 = vsel %vm286_vm0, %v3545_v0, %v7428_v48  ;;  %v7431_v56 = vunpack.i.h.bf16 %v7422_v14  ;;  %v7432_v48 = vunpack.i.h.bf16 %v5150_v30  ;;  %v648_v30 = vld [vmem:[%s7109_s1 + $0x8] sm:$0xff] }
 0x1e7   : > { %3748 = vrot.lane.b32.xlu0 %v5554_v29, %s4169_s10  ;;  %1179 = vmatpush.msra.mxu3 %v994_v50  ;;  %v7430_v50 = vunpack.i.h.bf16 %v7420_v27  ;;  %v7433_v61 = vunpack.i.h.bf16 %v5570_v19 }
 0x1e8   : > { %1320 = vmatpush.msra.mxu2 %v520_v10  ;;  %1385 = vmatpush.msrb.mxu1 %v7429_v54  ;;  %v519_v0 = vsel %vm518_vm7, %v3095_v23, %v7431_v56  ;;  %v7434_v54 = vld [vmem:[#allocation24_spill] sm:$0xff]  ;;  %v7438_v56 = vunpack.i.h.bf16 %v7423_v35 }
 0x1e9   : > { %v993_v55 = vsel %vm547_vm14, %v3415_v38, %v7430_v50  ;;  %1895 = vmatpush.msra.mxu0 %v1532_v11  ;;  %v1531_v18 = vsel %vm286_vm0, %v3540_v31, %v7433_v61  ;;  %v7220_v10 = vunpack.i.h.bf16 %v7434_v54  ;;  %v3080_v38 = vunpack.i.l.bf16 %v7434_v54  ;;  %v5620_v11 = vld.sshfl [vmem:[#allocation1 + $0x18] sm:$0xff pattern:$0x75316420]  ;;  %3758 = vrot.lane.b32.xlu2 %v5464_v59, %s4170_s11 }
 0x1ea   : > { %1180 = vmatpush.msra.mxu3 %v993_v55  ;;  %1321 = vmatpush.msra.mxu2 %v519_v0  ;;  %v7435_v50 = vunpack.i.h.bf16 %v7373_v21  ;;  %v7436_v55 = vunpack.i.h.bf16 %v7426_v47  ;;  %v7437_v31 = vunpack.i.h.bf16 %v5303_v40  ;;  %v492_v21 = vsel %vm489_vm8, %v3085_v63, %v7438_v56  ;;  %v5627_v0 = vpop.permute.xlu1 %3558  ;;  %1269 = vst [vmem:[#allocation1 + $0x10] ss:$2 sm:$0xff] %v648_v30  ;;  %v7443_v63 = vld [vmem:[#allocation15_spill] sm:$0xff] }
 0x1eb   : > { %1896 = vmatpush.msra.mxu0 %v1531_v18  ;;  %7439 = vst [vmem:[#allocation5_spill] sm:$0xff] %v5627_v0  ;;  %v3530_v40 = vunpack.i.l.bf16 %v5485_v44  ;;  %v3070_v30 = vunpack.i.l.bf16 %v7443_v63  ;;  %v7221_v56 = vunpack.i.h.bf16 %v5503_v9  ;;  %1181 = vmatmul.f32.vlgmr.msra.gmra.mxu3 %v5620_v11 }
 0x1ec   : > { %1245 = vmatpush.msrb.mxu3 %v7432_v48  ;;  %1386 = vmatpush.msrb.mxu1 %v7435_v50  ;;  %v493_v23 = vsel %vm489_vm8, %v3090_v52, %v7436_v55  ;;  %v1530_v52 = vsel %vm286_vm0, %v3535_v8, %v7219_v45  ;;  %v7440_v48 = vld [vmem:[#allocation25_spill] sm:$0xff]  ;;  %v7441_v55 = vunpack.i.h.bf16 %v7374_v12  ;;  %v7444_v8 = vunpack.i.h.bf16 %v5315_v1 }
 0x1ed   : > { %1322 = vmatpush.msra.mxu2 %v493_v23  ;;  %v7223_v61 = vunpack.i.h.bf16 %v7440_v48  ;;  %v3075_v18 = vunpack.i.l.bf16 %v7440_v48  ;;  %v5638_v23 = vpop.permute.xlu0 %3553  ;;  %1897 = vmatpush.msra.mxu0 %v1530_v52  ;;  %v3525_v45 = vunpack.i.l.bf16 %v5503_v9  ;;  %v7445_v50 = vunpack.i.h.bf16 %v7375_v60 }
 0x1ee   : > { %1246 = vmatpush.msrb.mxu3 %v7437_v31  ;;  %1387 = vmatpush.msrb.mxu1 %v7441_v55  ;;  %7442 = vst [vmem:[#allocation6_spill] sm:$0xff] %v5638_v23  ;;  %v7222_v31 = vunpack.i.h.bf16 %v7443_v63  ;;  %v491_v12 = vsel %vm489_vm8, %v3080_v38, %v7220_v10  ;;  %v3520_v60 = vunpack.i.l.bf16 %v5267_v62  ;;  %v7449_v10 = vunpack.i.h.bf16 %v5485_v44  ;;  %v7468_v23 = vld [vmem:[#allocation45_spill] sm:$0xff] }
 0x1ef   : > { %1323 = vmatpush.msra.mxu2 %v492_v21  ;;  %3768 = vrot.lane.b32.xlu1 %v5554_v29, %s4170_s11  ;;  %v7446_v21 = vld [vmem:[#allocation21_spill] sm:$0xff]  ;;  %v490_v38 = vsel %vm489_vm8, %v3075_v18, %v7223_v61  ;;  %v7450_v55 = vunpack.i.h.bf16 %v5258_v15  ;;  %v1504_v18 = vsel %vm257_vm1, %v3525_v45, %v7221_v56  ;;  %v7225_v15 = vunpack.i.h.bf16 %v5417_v49 }
 0x1f0   : > { %1247 = vmatpush.msrb.mxu3 %v7444_v8  ;;  %1388 = vmatpush.msrb.mxu1 %v7445_v50  ;;  %v3065_v1 = vunpack.i.l.bf16 %v7446_v21  ;;  %v7447_v50 = vunpack.i.h.bf16 %v5108_v20  ;;  %v7448_v8 = vunpack.i.h.bf16 %v7376_v7  ;;  %v1505_v52 = vsel %vm257_vm1, %v3530_v40, %v7449_v10 }
 0x1f1   : > { %3763 = vrot.lane.b32.xlu0 %v5495_v46, %s4170_s11  ;;  %1324 = vmatpush.msra.mxu2 %v491_v12  ;;  %v5669_v12 = vpop.permute.xlu2 %3608  ;;  %v7451_v20 = vunpack.i.h.bf16 %v7377_v3  ;;  %v464_v7 = vsel %vm460_vm10, %v3070_v30, %v7222_v31  ;;  %v3515_v3 = vunpack.i.l.bf16 %v5417_v49  ;;  %v7454_v30 = vunpack.i.h.bf16 %v7379_v13 }
 0x1f2   : > { %1248 = vmatpush.msrb.mxu3 %v7447_v50  ;;  %1389 = vmatpush.msrb.mxu1 %v7448_v8  ;;  %v7452_v50 = vld [vmem:[#allocation22_spill] sm:$0xff]  ;;  %v7455_v45 = vunpack.i.h.bf16 %v7446_v21  ;;  %v3505_v61 = vunpack.i.l.bf16 %v5203_v25  ;;  %v3501_v0 = vunpack.i.h.bf16 %v7468_v23 }
 0x1f3   : > { %1325 = vmatpush.msra.mxu2 %v490_v38  ;;  %1898 = vmatpush.msra.mxu0 %v1505_v52  ;;  %v7224_v10 = vunpack.i.h.bf16 %v7452_v50  ;;  %v3060_v40 = vunpack.i.l.bf16 %v7452_v50  ;;  %v5683_v52 = vpop.permute.xlu1 %3573  ;;  %v7456_v38 = vunpack.i.h.bf16 %v5267_v62 }
 0x1f4   : > { %1249 = vmatpush.msrb.mxu3 %v7450_v55  ;;  %1390 = vmatpush.msrb.mxu1 %v7451_v20  ;;  %v7453_v55 = vunpack.i.h.bf16 %v5265_v16  ;;  %v463_v8 = vsel %vm460_vm10, %v3065_v1, %v7455_v45  ;;  %v7458_v16 = vld [vmem:[#allocation18_spill] sm:$0xff]  ;;  %v7460_v45 = vunpack.i.h.bf16 %v7380_v41  ;;  %v1502_v41 = vsel %vm257_vm1, %v3515_v3, %v7225_v15  ;;  %v7462_v1 = vld [vmem:[#allocation19_spill] sm:$0xff] }
 0x1f5   : > { %1326 = vmatpush.msra.mxu2 %v464_v7  ;;  %1899 = vmatpush.msra.mxu0 %v1504_v18  ;;  %v1503_v20 = vsel %vm257_vm1, %v3520_v60, %v7456_v38  ;;  %v5697_v7 = vpop.permute.xlu0 %3568  ;;  %v7457_v18 = vld [vmem:[#allocation14_spill] sm:$0xff]  ;;  %v7459_v60 = vunpack.i.h.bf16 %v5067_v33  ;;  %v2823_v38 = vld [vmem:[%s4232_s24 + $0xd0] sm:$0xff]  ;;  %v7461_v33 = vunpack.i.h.bf16 %v5196_v24  ;;  %v7465_v3 = vunpack.i.h.bf16 %v5201_v57 }
 0x1f6   : > { %1250 = vmatpush.msrb.mxu3 %v7453_v55  ;;  %1391 = vmatpush.msrb.mxu1 %v7454_v30  ;;  %v7228_v56 = vunpack.i.h.bf16 %v7457_v18  ;;  %v3055_v31 = vunpack.i.l.bf16 %v7457_v18  ;;  %v3050_v55 = vunpack.i.l.bf16 %v7458_v16  ;;  %v3510_v30 = vunpack.i.l.bf16 %v5431_v37  ;;  %v7464_v24 = vld [vmem:[#allocation11_spill] sm:$0xff] }
 0x1f7   : > { %1327 = vmatpush.msra.mxu2 %v463_v8  ;;  %1900 = vmatpush.msra.mxu0 %v1503_v20  ;;  %v462_v8 = vsel %vm460_vm10, %v3060_v40, %v7224_v10  ;;  %v3045_v40 = vunpack.i.l.bf16 %v7462_v1  ;;  %v7463_v10 = vunpack.i.h.bf16 %v7387_v6  ;;  %v3040_v20 = vunpack.i.l.bf16 %v7464_v24 }
 0x1f8   : > { %1251 = vmatpush.msrb.mxu3 %v7459_v60  ;;  %1392 = vmatpush.msrb.mxu1 %v7460_v45  ;;  %v2821_v60 = vld [vmem:[%s4232_s24 + $0xc0] sm:$0xff]  ;;  %v2822_v45 = vld [vmem:[%s4232_s24 + $0xc8] sm:$0xff]  ;;  %v7466_v15 = vunpack.i.h.bf16 %v7458_v16  ;;  %v7467_v6 = vunpack.i.h.bf16 %v5431_v37 }
 0x1f9   : > { %3783 = vrot.lane.b32.xlu1 %v5495_v46, %s4171_s19  ;;  %3778 = vrot.lane.b32.xlu0 %v5464_v59, %s4171_s19  ;;  %v2824_v46 = vld [vmem:[%s4232_s24 + $0xd8] sm:$0xff]  ;;  %v5750_v57 = vpack.i.bf16 %v2822_v45, %v2821_v60  ;;  %v7472_v60 = vunpack.i.h.bf16 %v7462_v1 }
 0x1fa   : > { %1328 = vmatpush.msra.mxu2 %v462_v8  ;;  %1252 = vmatpush.msrb.mxu3 %v7461_v33  ;;  %v461_v8 = vsel %vm460_vm10, %v3055_v31, %v7228_v56  ;;  %v3041_v33 = vunpack.i.h.bf16 %v7464_v24  ;;  %v435_v13 = vsel %vm431_vm11, %v3050_v55, %v7466_v15  ;;  %v3500_v31 = vunpack.i.l.bf16 %v7468_v23  ;;  %v7469_v15 = vld [vmem:[#allocation16_spill] sm:$0xff]  ;;  %v7520_v24 = vld [vmem:[#allocation34_spill] sm:$0xff] }
 0x1fb   : > { %1393 = vmatpush.msrb.mxu1 %v7463_v10  ;;  %1901 = vmatpush.msra.mxu0 %v1502_v41  ;;  %v1477_v10 = vsel %vm228_vm2, %v3510_v30, %v7467_v6  ;;  %v5748_v41 = vpack.i.bf16 %v2824_v46, %v2823_v38  ;;  %v3036_v55 = vunpack.i.h.bf16 %v7469_v15  ;;  %v7470_v30 = vunpack.i.h.bf16 %v5027_v34 }
 0x1fc   : > { %1329 = vmatpush.msra.mxu2 %v461_v8  ;;  %1253 = vmatpush.msrb.mxu3 %v7465_v3  ;;  %v5752_v8 = vpop.permute.xlu1 %3588  ;;  %v5754_v3 = vpop.permute.xlu2 %3623  ;;  %v7471_v6 = vunpack.i.h.bf16 %v5203_v25  ;;  %v3035_v59 = vunpack.i.l.bf16 %v7469_v15  ;;  %v3496_v38 = vunpack.i.h.bf16 %v5370_v28  ;;  %v3495_v46 = vunpack.i.l.bf16 %v5370_v28  ;;  %v7521_v15 = vld [vmem:[#allocation23_spill] sm:$0xff] }
 0x1fd   : > { %1902 = vmatpush.msra.mxu0 %v1477_v10  ;;  %v5762_v56 = vpop.permute.xlu0 %3583  ;;  %v434_v45 = vsel %vm431_vm11, %v3045_v40, %v7472_v60  ;;  %v7473_v34 = vunpack.i.h.bf16 %v5143_v17  ;;  %v1271_v40 = vld.sshfl [vmem:[#allocation1 + $0x8] sm:$0xff pattern:$0x75316420]  ;;  %v2818_v17 = vld [vmem:[%s7109_s1 + $0x20] sm:$0xff]  ;;  %v7475_v60 = vunpack.i.h.bf16 %v7408_v5  ;;  %3773 = vrot.lane.b32.xlu2 %v5474_v39, %s4171_s19  ;;  %v7478_v5 = vunpack.i.h.bf16 %v5095_v2 }
 0x1fe   : > { %1330 = vmatpush.msra.mxu2 %v435_v13  ;;  %1254 = vmatpush.msrb.mxu3 %v7470_v30  ;;  %v1476_v10 = vsel %vm228_vm2, %v3505_v61, %v7471_v6  ;;  %v433_v61 = vsel %vm431_vm11, %v3040_v20, %v3041_v33  ;;  %v1475_v13 = vsel %vm228_vm2, %v3500_v31, %v3501_v0  ;;  %v7474_v30 = vunpack.i.h.bf16 %v5148_v43  ;;  %v2827_v31 = vld [vmem:[%s4232_s24 + $0xf0] sm:$0xff] }
 0x1ff   : > { %1903 = vmatpush.msra.mxu0 %v1476_v10  ;;  %1883 = vst [vmem:[#allocation1] ss:$2 sm:$0xff] %v2818_v17  ;;  %v432_v6 = vsel %vm431_vm11, %v3035_v59, %v3036_v55  ;;  %v1474_v20 = vsel %vm228_vm2, %v3495_v46, %v3496_v38  ;;  %v2828_v10 = vld [vmem:[%s4232_s24 + $0xf8] sm:$0xff]  ;;  %1314 = vmatmul.f32.vlgmr.msra.gmra.mxu1 %v1271_v40  ;;  %v7480_v39 = vunpack.i.h.bf16 %v5103_v32 }
 0x200   : > { %1331 = vmatpush.msra.mxu2 %v434_v45  ;;  %1255 = vmatpush.msrb.mxu3 %v7473_v34  ;;  %v7476_v45 = vunpack.i.h.bf16 %v7405_v36  ;;  %v5805_v59 = vpack.i.bf16 %v2828_v10, %v2827_v31  ;;  %v7477_v34 = vld [vmem:[#allocation38_spill] sm:$0xff]  ;;  %v7479_v36 = vunpack.i.h.bf16 %v7410_v51  ;;  %v7483_v51 = vld [vmem:[#allocation4_spill] sm:$0xff]  ;;  %v7486_v10 = vunpack.i.h.bf16 %v7422_v14 }
 0x201   : > { %3798 = vrot.lane.b32.xlu1 %v5748_v41, %s4157_s25  ;;  %3793 = vrot.lane.b32.xlu0 %v5750_v57, %s4157_s25 }
 0x202   : > { %1332 = vmatpush.msra.mxu2 %v433_v61  ;;  %1904 = vmatpush.msra.mxu0 %v1475_v13  ;;  %v3191_v61 = vunpack.i.h.bf16 %v7477_v34  ;;  %v3190_v13 = vunpack.i.l.bf16 %v7477_v34 }
 0x203   : > { %1256 = vmatpush.msrb.mxu3 %v7474_v30  ;;  %v7482_v30 = vld [vmem:[#allocation43_spill] sm:$0xff] }
 0x204   : > { %1333 = vmatpush.msra.mxu2 %v432_v6  ;;  %1905 = vmatpush.msra.mxu0 %v1474_v20  ;;  %v5800_v43 = vpop.permute.xlu1 %3603  ;;  %v5815_v17 = vpop.permute.xlu2 %3638  ;;  %v3186_v6 = vunpack.i.h.bf16 %v7482_v30  ;;  %v3185_v2 = vunpack.i.l.bf16 %v7482_v30  ;;  %v638_v32 = vsel %vm634_vm9, %v3190_v13, %v3191_v61 }
 0x205   : > { %1257 = vmatpush.msrb.mxu3 %v7475_v60  ;;  %v5807_v46 = vpop.permute.xlu0 %3598  ;;  %v2825_v60 = vld [vmem:[%s4232_s24 + $0xe0] sm:$0xff]  ;;  %3788 = vrot.lane.b32.xlu2 %v5554_v29, %s4171_s19  ;;  %v7495_v29 = vunpack.i.h.bf16 %v7434_v54  ;;  %v7498_v54 = vunpack.i.h.bf16 %v7440_v48 }
 0x206   : > { %1398 = vmatpush.msrb.mxu2 %v7476_v45  ;;  %1906 = vmatpush.msra.mxu0 %v5547_v4  ;;  %v7481_v4 = vunpack.i.h.bf16 %v7418_v58  ;;  %v7485_v58 = vld [vmem:[#allocation44_spill] sm:$0xff]  ;;  %v2826_v45 = vld [vmem:[%s4232_s24 + $0xe8] sm:$0xff]  ;;  %v637_v13 = vsel %vm634_vm9, %v3185_v2, %v3186_v6 }
 0x207   : > { %1258 = vmatpush.msrb.mxu3 %v7478_v5  ;;  %v3181_v20 = vunpack.i.h.bf16 %v7485_v58  ;;  %v3180_v31 = vunpack.i.l.bf16 %v7485_v58  ;;  %v7487_v5 = vld [vmem:[#allocation10_spill] sm:$0xff]  ;;  %1394 = vmatmul.f32.vlgmr.msrb.gmra.mxu1 %v1271_v40 }
 0x208   : > { %1399 = vmatpush.msrb.mxu2 %v7479_v36  ;;  %1907 = vmatpush.msra.mxu0 %v5488_v42  ;;  %v7484_v42 = vunpack.i.h.bf16 %v7420_v27  ;;  %v7488_v27 = vunpack.i.h.bf16 %v7426_v47  ;;  %v7489_v36 = vld [vmem:[#allocation12_spill] sm:$0xff]  ;;  %v5857_v47 = vpack.i.bf16 %v2826_v45, %v2825_v60 }
 0x209   : > { %1259 = vmatpush.msrb.mxu3 %v7480_v39  ;;  %3813 = vrot.lane.b32.xlu1 %v5750_v57, %s4158_s26  ;;  %v7490_v39 = vunpack.i.h.bf16 %v7489_v36  ;;  %v636_v2 = vsel %vm634_vm9, %v3180_v31, %v3181_v20 }
 0x20a   : > { %1400 = vmatpush.msrb.mxu2 %v7481_v4  ;;  %3808 = vrot.lane.b32.xlu0 %v5805_v59, %s4157_s25 }
 0x20b   : > { %1908 = vmatpush.msra.mxu0 %v7483_v51  ;;  %1260 = vmatpush.msrb.mxu3 %v7484_v42  ;;  %v7491_v51 = vld [vmem:[#allocation35_spill] sm:$0xff] }
 0x20c   : > { %1401 = vmatpush.msrb.mxu2 %v7486_v10  ;;  %1261 = vmatmul.f32.vlgmr.msrb.gmra.mxu3 %v5620_v11  ;;  %v5849_v4 = vpop.permute.xlu1 %3618  ;;  %v3176_v42 = vunpack.i.h.bf16 %v7491_v51  ;;  %v7492_v11 = vunpack.i.h.bf16 %v7423_v35  ;;  %v7493_v10 = vunpack.i.h.bf16 %v5564_v53  ;;  %v7496_v35 = vunpack.i.h.bf16 %v5570_v19  ;;  %v7497_v53 = vld [vmem:[#allocation42_spill] sm:$0xff]  ;;  %v7499_v19 = vld [vmem:[#allocation32_spill] sm:$0xff] }
 0x20d   : > { %1338 = vmatpush.msra.mxu3 %v638_v32  ;;  %1909 = vmatpush.msra.mxu0 %v7487_v5  ;;  %v5851_v14 = vpop.permute.xlu0 %3613  ;;  %v3175_v32 = vunpack.i.l.bf16 %v7491_v51  ;;  %v7494_v5 = vld [vmem:[#allocation41_spill] sm:$0xff]  ;;  %v7229_v60 = vunpack.i.h.bf16 %v7497_v53  ;;  %v3165_v45 = vunpack.i.l.bf16 %v7497_v53  ;;  %v7233_v31 = vunpack.i.h.bf16 %v7499_v19 }
 0x20e   : > { %1402 = vmatpush.msrb.mxu2 %v7488_v27  ;;  %v7230_v27 = vunpack.i.h.bf16 %v7494_v5  ;;  %v3170_v36 = vunpack.i.l.bf16 %v7494_v5  ;;  %3803 = vrot.lane.b32.xlu2 %v5857_v47, %s4157_s25 }
 0x20f   : > { %1974 = vmatpush.msrb.mxu0 %v7490_v39  ;;  %1339 = vmatpush.msra.mxu3 %v637_v13  ;;  %v5868_v39 = vpop.permute.xlu2 %3653  ;;  %v635_v40 = vsel %vm634_vm9, %v3175_v32, %v3176_v42  ;;  %v3160_v13 = vunpack.i.l.bf16 %v7499_v19  ;;  %v7502_v32 = vunpack.i.h.bf16 %v7443_v63  ;;  %v7504_v63 = vunpack.i.h.bf16 %v7446_v21 }
 0x210   : > { %1403 = vmatpush.msrb.mxu2 %v7492_v11  ;;  %v7500_v11 = vunpack.i.h.bf16 %v5321_v22  ;;  %v608_v22 = vsel %vm605_vm12, %v3165_v45, %v7229_v60  ;;  %v7507_v60 = vunpack.i.h.bf16 %v7452_v50 }
 0x211   : > { %1975 = vmatpush.msrb.mxu0 %v7493_v10  ;;  %1340 = vmatpush.msra.mxu3 %v636_v2  ;;  %v609_v10 = vsel %vm605_vm12, %v3170_v36, %v7230_v27  ;;  %v7501_v2 = vld [vmem:[#allocation39_spill] sm:$0xff]  ;;  %v607_v45 = vsel %vm605_vm12, %v3160_v13, %v7233_v31  ;;  %v7508_v27 = vld [vmem:[#allocation29_spill] sm:$0xff] }
 0x212   : > { %1404 = vmatpush.msrb.mxu2 %v7495_v29  ;;  %3828 = vrot.lane.b32.xlu1 %v5805_v59, %s4158_s26  ;;  %v7231_v29 = vunpack.i.h.bf16 %v7501_v2  ;;  %v3145_v21 = vunpack.i.l.bf16 %v7508_v27 }
 0x213   : > { %1976 = vmatpush.msrb.mxu0 %v7496_v35  ;;  %3823 = vrot.lane.b32.xlu0 %v5857_v47, %s4158_s26  ;;  %v3155_v35 = vunpack.i.l.bf16 %v7501_v2 }
 0x214   : > { %1341 = vmatpush.msra.mxu3 %v635_v40  ;;  %1405 = vmatpush.msrb.mxu2 %v7498_v54  ;;  %v5896_v48 = vpop.permute.xlu1 %3633  ;;  %v7503_v54 = vunpack.i.h.bf16 %v5485_v44 }
 0x215   : > { %1977 = vmatpush.msrb.mxu0 %v7500_v11  ;;  %v5898_v40 = vpop.permute.xlu0 %3628 }
 0x216   : > { %1342 = vmatpush.msra.mxu3 %v609_v10  ;;  %1406 = vmatpush.msrb.mxu2 %v7502_v32  ;;  %v7232_v36 = vunpack.i.h.bf16 %v5898_v40  ;;  %v3630_v11 = vunpack.i.l.bf16 %v5898_v40  ;;  %v7505_v10 = vld [vmem:[#allocation40_spill] sm:$0xff] }
 0x217   : > { %1978 = vmatpush.msrb.mxu0 %v7503_v54  ;;  %v7235_v32 = vunpack.i.h.bf16 %v7505_v10  ;;  %v3150_v44 = vunpack.i.l.bf16 %v7505_v10  ;;  %v7506_v54 = vunpack.i.h.bf16 %v5503_v9  ;;  %v606_v9 = vsel %vm605_vm12, %v3155_v35, %v7231_v29  ;;  %v5932_v50 = vpop.permute.xlu2 %3668  ;;  %3818 = vrot.lane.b32.xlu2 %v5748_v41, %s4158_s26 }
 0x218   : > { %1343 = vmatpush.msra.mxu3 %v608_v22  ;;  %1407 = vmatpush.msrb.mxu2 %v7504_v63  ;;  %v7234_v22 = vunpack.i.h.bf16 %v7508_v27  ;;  %v7509_v63 = vunpack.i.h.bf16 %v5267_v62  ;;  %v1645_v13 = vsel %vm402_vm3, %v3630_v11, %v7232_v36  ;;  %v7511_v35 = vunpack.i.h.bf16 %v7457_v18 }
 0x219   : > { %1979 = vmatpush.msrb.mxu0 %v7506_v54  ;;  %v7512_v29 = vunpack.i.h.bf16 %v5417_v49  ;;  %v580_v11 = vsel %vm576_vm13, %v3150_v44, %v7235_v32  ;;  %1914 = vmatpush.msra.mxu1 %v1645_v13  ;;  %v7514_v36 = vunpack.i.h.bf16 %v5431_v37  ;;  %v3620_v37 = vunpack.i.l.bf16 %v5849_v4  ;;  %v7519_v32 = vld [vmem:[#allocation33_spill] sm:$0xff] }
 0x21a   : > { %1344 = vmatpush.msra.mxu3 %v607_v45  ;;  %1408 = vmatpush.msrb.mxu2 %v7507_v60  ;;  %v7510_v60 = vld [vmem:[#allocation36_spill] sm:$0xff]  ;;  %v3626_v45 = vunpack.i.h.bf16 %v5754_v3  ;;  %v579_v18 = vsel %vm576_vm13, %v3145_v21, %v7234_v22  ;;  %v7517_v21 = vunpack.i.h.bf16 %v5203_v25  ;;  %v7237_v25 = vunpack.i.h.bf16 %v5851_v14 }
 0x21b   : > { %1980 = vmatpush.msrb.mxu0 %v7509_v63  ;;  %3843 = vrot.lane.b32.xlu1 %v5857_v47, %s4159_s27  ;;  %v3141_v54 = vunpack.i.h.bf16 %v7510_v60  ;;  %v3140_v62 = vunpack.i.l.bf16 %v7510_v60  ;;  %v3625_v63 = vunpack.i.l.bf16 %v5754_v3  ;;  %v7537_v3 = vunpack.i.h.bf16 %v5849_v4 }
 0x21c   : > { %3838 = vrot.lane.b32.xlu0 %v5748_v41, %s4159_s27  ;;  %1345 = vmatpush.msra.mxu3 %v606_v9  ;;  %v7513_v9 = vunpack.i.h.bf16 %v7458_v16  ;;  %v7236_v16 = vunpack.i.h.bf16 %v5849_v4 }
 0x21d   : > { %1409 = vmatpush.msrb.mxu2 %v7511_v35  ;;  %1981 = vmatpush.msrb.mxu0 %v7512_v29  ;;  %v5954_v35 = vpop.permute.xlu1 %3648  ;;  %v5956_v49 = vpop.permute.xlu0 %3643  ;;  %v7515_v29 = vld [vmem:[#allocation37_spill] sm:$0xff]  ;;  %v578_v13 = vsel %vm576_vm13, %v3140_v62, %v3141_v54 }
 0x21e   : > { %1346 = vmatpush.msra.mxu3 %v580_v11  ;;  %v3136_v31 = vunpack.i.h.bf16 %v7515_v29  ;;  %v3135_v44 = vunpack.i.l.bf16 %v7515_v29  ;;  %v1644_v11 = vsel %vm402_vm3, %v3625_v63, %v3626_v45  ;;  %v7240_v63 = vunpack.i.h.bf16 %v5669_v12 }
 0x21f   : > { %1410 = vmatpush.msrb.mxu2 %v7513_v9  ;;  %1982 = vmatpush.msrb.mxu0 %v7514_v36  ;;  %v7516_v36 = vunpack.i.h.bf16 %v7462_v1  ;;  %v7518_v9 = vld [vmem:[#allocation26_spill] sm:$0xff]  ;;  %v7238_v1 = vunpack.i.h.bf16 %v7519_v32  ;;  %v5998_v23 = vpop.permute.xlu2 %3683 }
 0x220   : > { %1347 = vmatpush.msra.mxu3 %v579_v18  ;;  %v3131_v18 = vunpack.i.h.bf16 %v7518_v9  ;;  %v3130_v22 = vunpack.i.l.bf16 %v7518_v9  ;;  %1915 = vmatpush.msra.mxu1 %v1644_v11  ;;  %v577_v62 = vsel %vm576_vm13, %v3135_v44, %v3136_v31  ;;  %v3120_v11 = vunpack.i.l.bf16 %v7520_v24 }
 0x221   : > { %1411 = vmatpush.msrb.mxu2 %v7516_v36  ;;  %1983 = vmatpush.msrb.mxu0 %v7517_v21  ;;  %v3125_v36 = vunpack.i.l.bf16 %v7519_v32  ;;  %v3615_v21 = vunpack.i.l.bf16 %v5851_v14 }
 0x222   : > { %1348 = vmatpush.msra.mxu3 %v578_v13  ;;  %v3610_v13 = vunpack.i.l.bf16 %v5669_v12  ;;  %v551_v44 = vsel %vm547_vm14, %v3130_v22, %v3131_v18  ;;  %v3605_v22 = vunpack.i.l.bf16 %v5800_v43  ;;  %3833 = vrot.lane.b32.xlu2 %v5750_v57, %s4159_s27 }
 0x223   : > { %1412 = vmatpush.msrb.mxu2 %v3041_v33  ;;  %1984 = vmatpush.msrb.mxu0 %v3501_v0  ;;  %v1643_v0 = vsel %vm402_vm3, %v3620_v37, %v7236_v16  ;;  %v7241_v33 = vunpack.i.h.bf16 %v7520_v24  ;;  %v550_v37 = vsel %vm547_vm14, %v3125_v36, %v7238_v1  ;;  %v1642_v16 = vsel %vm402_vm3, %v3615_v21, %v7237_v25  ;;  %v1272_v1 = vld.sshfl [vmem:[#allocation1 + $0x10] sm:$0xff pattern:$0x75316420] }
 0x224   : > { %3858 = vrot.lane.b32.xlu1 %v5748_v41, %s4160_s28  ;;  %3853 = vrot.lane.b32.xlu0 %v5750_v57, %s4160_s28  ;;  %v1617_v36 = vsel %vm373_vm4, %v3610_v13, %v7240_v63  ;;  %v3601_v21 = vunpack.i.h.bf16 %v5807_v46  ;;  %v3600_v25 = vunpack.i.l.bf16 %v5807_v46  ;;  %v3596_v13 = vunpack.i.h.bf16 %v5600_v26 }
 0x225   : > { %1349 = vmatpush.msra.mxu3 %v577_v62  ;;  %1413 = vmatpush.msrb.mxu2 %v3036_v55  ;;  %v7239_v55 = vunpack.i.h.bf16 %v7521_v15  ;;  %v3115_v62 = vunpack.i.l.bf16 %v7521_v15  ;;  %v6015_v28 = vpop.permute.xlu1 %3663 }
 0x226   : > { %1985 = vmatpush.msrb.mxu0 %v3496_v38  ;;  %1916 = vmatpush.msra.mxu1 %v1643_v0  ;;  %v3606_v38 = vunpack.i.h.bf16 %v5800_v43  ;;  %v6021_v0 = vpop.permute.xlu0 %3658  ;;  %v2819_v43 = vld [vmem:[%s7109_s1 + $0x28] sm:$0xff] }
 0x227   : > { %1350 = vmatpush.msra.mxu3 %v551_v44  ;;  %v7522_v44 = vld [vmem:[#allocation2_spill] sm:$0xff]  ;;  %1334 = vmatmul.f32.vlgmr.msra.gmra.mxu2 %v1272_v1 }
 0x228   : > { %1917 = vmatpush.msra.mxu1 %v1642_v16  ;;  %1986 = vmatpush.msrb.mxu0 %v7522_v44  ;;  %v549_v16 = vsel %vm547_vm14, %v3120_v11, %v7241_v33  ;;  %v3595_v44 = vunpack.i.l.bf16 %v5600_v26  ;;  %v1616_v11 = vsel %vm373_vm4, %v3605_v22, %v3606_v38  ;;  %v6054_v33 = vpop.permute.xlu2 %3698  ;;  %v7244_v22 = vunpack.i.h.bf16 %v5762_v56 }
 0x229   : > { %1351 = vmatpush.msra.mxu3 %v550_v37  ;;  %v548_v37 = vsel %vm547_vm14, %v3115_v62, %v7239_v55  ;;  %v3590_v62 = vunpack.i.l.bf16 %v5752_v8  ;;  %v7523_v55 = vld [vmem:[#allocation7_spill] sm:$0xff]  ;;  %v3671_v26 = vunpack.i.h.bf16 %v5932_v50 }
 0x22a   : > { %1918 = vmatpush.msra.mxu1 %v1617_v36  ;;  %v3591_v36 = vunpack.i.h.bf16 %v5752_v8  ;;  %1987 = vmatpush.msrb.mxu0 %v7523_v55  ;;  %v1614_v34 = vsel %vm373_vm4, %v3595_v44, %v3596_v13  ;;  %v7525_v55 = vld [vmem:[#allocation8_spill] sm:$0xff]  ;;  %v3575_v44 = vunpack.i.l.bf16 %v5683_v52 }
 0x22b   : > { %1352 = vmatpush.msra.mxu3 %v549_v16  ;;  %v1615_v16 = vsel %vm373_vm4, %v3600_v25, %v3601_v21  ;;  %3848 = vrot.lane.b32.xlu2 %v5805_v59, %s4159_s27  ;;  %v7524_v25 = vld [vmem:[#allocation9_spill] sm:$0xff] }
 0x22c   : > { %3873 = vrot.lane.b32.xlu1 %v5750_v57, %s4161_s29  ;;  %3868 = vrot.lane.b32.xlu0 %v5805_v59, %s4160_s28  ;;  %v1589_v30 = vsel %vm344_vm5, %v3590_v62, %v3591_v36  ;;  %v7526_v62 = vunpack.i.h.bf16 %v7494_v5 }
 0x22d   : > { %1353 = vmatpush.msra.mxu3 %v548_v37  ;;  %1919 = vmatpush.msra.mxu1 %v1616_v11  ;;  %v6052_v63 = vpop.permute.xlu1 %3678  ;;  %v3585_v37 = vunpack.i.l.bf16 %v5762_v56  ;;  %v7242_v11 = vunpack.i.h.bf16 %v7525_v55 }
 0x22e   : > { %1988 = vmatpush.msrb.mxu0 %v7524_v25 }
 0x22f   : > { %1418 = vmatpush.msrb.mxu3 %v3191_v61  ;;  %1920 = vmatpush.msra.mxu1 %v1615_v16  ;;  %v6065_v61 = vpop.permute.xlu0 %3673  ;;  %v3580_v16 = vunpack.i.l.bf16 %v7525_v55  ;;  %v1588_v58 = vsel %vm344_vm5, %v3585_v37, %v7244_v22 }
 0x230   : > { %1414 = vmatmul.f32.vlgmr.msrb.gmra.mxu2 %v1272_v1  ;;  %v3570_v1 = vunpack.i.l.bf16 %v5697_v7 }
 0x231   : > { %1419 = vmatpush.msrb.mxu3 %v3186_v6  ;;  %1921 = vmatpush.msra.mxu1 %v1614_v34  ;;  %v7243_v6 = vunpack.i.h.bf16 %v5683_v52  ;;  %v1587_v51 = vsel %vm344_vm5, %v3580_v16, %v7242_v11  ;;  %v7528_v34 = vld [vmem:[#allocation13_spill] sm:$0xff] }
 0x232   : > { %v3566_v37 = vunpack.i.h.bf16 %v7528_v34  ;;  %v3565_v25 = vunpack.i.l.bf16 %v7528_v34  ;;  %v3641_v34 = vunpack.i.h.bf16 %v5815_v17 }
 0x233   : > { %1420 = vmatpush.msrb.mxu3 %v3181_v20  ;;  %1922 = vmatpush.msra.mxu1 %v1589_v30  ;;  %v3571_v20 = vunpack.i.h.bf16 %v5697_v7  ;;  %v7529_v30 = vunpack.i.h.bf16 %v7497_v53  ;;  %v7531_v53 = vunpack.i.h.bf16 %v7499_v19  ;;  %v3645_v7 = vunpack.i.l.bf16 %v5956_v49 }
 0x234   : > { %3888 = vrot.lane.b32.xlu1 %v5805_v59, %s4161_s29  ;;  %3883 = vrot.lane.b32.xlu0 %v5857_v47, %s4161_s29  ;;  %v1560_v19 = vsel %vm315_vm6, %v3565_v25, %v3566_v37 }
 0x235   : > { %1421 = vmatpush.msrb.mxu3 %v3176_v42  ;;  %1923 = vmatpush.msra.mxu1 %v1588_v58  ;;  %v7527_v42 = vld [vmem:[#allocation3_spill] sm:$0xff]  ;;  %v1586_v58 = vsel %vm344_vm5, %v3575_v44, %v7243_v6  ;;  %v6101_v5 = vpop.permute.xlu1 %3693  ;;  %v1561_v44 = vsel %vm315_vm6, %v3570_v1, %v3571_v20  ;;  %v7534_v1 = vunpack.i.h.bf16 %v7505_v10 }
 0x236   : > { %1989 = vmatpush.msrb.mxu0 %v7527_v42  ;;  %3863 = vrot.lane.b32.xlu2 %v5857_v47, %s4160_s28  ;;  %v3696_v9 = vunpack.i.h.bf16 %v6101_v5  ;;  %v3695_v4 = vunpack.i.l.bf16 %v6101_v5  ;;  %v2829_v5 = vld [vmem:[%s7109_s1 + $0x30] sm:$0xff] }
 0x237   : > { %1422 = vmatpush.msrb.mxu3 %v7526_v62  ;;  %1924 = vmatpush.msra.mxu1 %v1587_v51  ;;  %v6105_v16 = vpop.permute.xlu0 %3688  ;;  %v6107_v62 = vpop.permute.xlu2 %3713  ;;  %v7530_v51 = vld [vmem:[#allocation5_spill] sm:$0xff] }
 0x238   : > { %v3561_v42 = vunpack.i.h.bf16 %v7530_v51  ;;  %v3560_v11 = vunpack.i.l.bf16 %v7530_v51  ;;  %v3635_v51 = vunpack.i.l.bf16 %v5896_v48 }
 0x239   : > { %1423 = vmatpush.msrb.mxu3 %v7529_v30  ;;  %1925 = vmatpush.msra.mxu1 %v1586_v58  ;;  %v7532_v30 = vld [vmem:[#allocation6_spill] sm:$0xff]  ;;  %v7533_v58 = vunpack.i.h.bf16 %v7501_v2  ;;  %v7535_v2 = vunpack.i.h.bf16 %v7508_v27  ;;  %v7536_v27 = vunpack.i.h.bf16 %v5898_v40  ;;  %v3701_v40 = vunpack.i.h.bf16 %v6054_v33 }
 0x23a   : > { %v3556_v6 = vunpack.i.h.bf16 %v7532_v30  ;;  %v3555_v22 = vunpack.i.l.bf16 %v7532_v30 }
 0x23b   : > { %1424 = vmatpush.msrb.mxu3 %v7531_v53  ;;  %1926 = vmatpush.msra.mxu1 %v1561_v44  ;;  %v1559_v53 = vsel %vm315_vm6, %v3560_v11, %v3561_v42 }
 0x23c   : > { %3903 = vrot.lane.b32.xlu1 %v5857_v47, %s4162_s30  ;;  %3898 = vrot.lane.b32.xlu0 %v5748_v41, %s4162_s30  ;;  %v1558_v44 = vsel %vm315_vm6, %v3555_v22, %v3556_v6 }
 0x23d   : > { %1425 = vmatpush.msrb.mxu3 %v7533_v58  ;;  %1927 = vmatpush.msra.mxu1 %v1560_v19  ;;  %v6137_v25 = vpop.permute.xlu1 %3708 }
 0x23e   : > { %3878 = vrot.lane.b32.xlu2 %v5748_v41, %s4161_s29  ;;  %v3711_v10 = vunpack.i.h.bf16 %v6137_v25  ;;  %v3710_v11 = vunpack.i.l.bf16 %v6137_v25 }
 0x23f   : > { %1426 = vmatpush.msrb.mxu3 %v7534_v1  ;;  %1928 = vmatpush.msra.mxu1 %v1559_v53  ;;  %v6141_v58 = vpop.permute.xlu0 %3703  ;;  %v6149_v19 = vpop.permute.xlu2 %3728 }
 0x240   : > { %v3706_v22 = vunpack.i.h.bf16 %v6141_v58  ;;  %v3705_v1 = vunpack.i.l.bf16 %v6141_v58  ;;  %v1757_v60 = vsel %vm518_vm7, %v3710_v11, %v3711_v10  ;;  %v3690_v11 = vunpack.i.l.bf16 %v6105_v16 }
 0x241   : > { %1427 = vmatpush.msrb.mxu3 %v7535_v2  ;;  %1929 = vmatpush.msra.mxu1 %v1558_v44  ;;  %v3691_v44 = vunpack.i.h.bf16 %v6105_v16 }
 0x242   : > { %1934 = vmatpush.msra.mxu2 %v1757_v60  ;;  %v1756_v29 = vsel %vm518_vm7, %v3705_v1, %v3706_v22  ;;  %v3685_v1 = vunpack.i.l.bf16 %v5998_v23  ;;  %v7542_v60 = vunpack.i.h.bf16 %v7521_v15  ;;  %v1273_v15 = vld.sshfl [vmem:[#allocation1 + $0x18] sm:$0xff pattern:$0x75316420] }
 0x243   : > { %1428 = vmatpush.msrb.mxu3 %v3141_v54  ;;  %1994 = vmatpush.msrb.mxu1 %v7536_v27  ;;  %v7538_v54 = vunpack.i.h.bf16 %v7519_v32  ;;  %v7540_v32 = vunpack.i.h.bf16 %v7520_v24  ;;  %v3686_v27 = vunpack.i.h.bf16 %v5998_v23  ;;  %1885 = vst [vmem:[#allocation1 + $0x10] ss:$2 sm:$0xff] %v2819_v43  ;;  %v7545_v43 = vunpack.i.h.bf16 %v5683_v52 }
 0x244   : > { %3918 = vrot.lane.b32.xlu1 %v5857_v47, %s4167_s8  ;;  %3913 = vrot.lane.b32.xlu0 %v5805_v59, %s4167_s8  ;;  %v3651_v52 = vunpack.i.h.bf16 %v5954_v35 }
 0x245   : > { %1429 = vmatpush.msrb.mxu3 %v3136_v31  ;;  %1995 = vmatpush.msrb.mxu1 %v3626_v45  ;;  %v3700_v31 = vunpack.i.l.bf16 %v6054_v33  ;;  %v7539_v45 = vunpack.i.h.bf16 %v5851_v14  ;;  %v7541_v14 = vunpack.i.h.bf16 %v5669_v12  ;;  %v1754_v12 = vsel %vm518_vm7, %v3695_v4, %v3696_v9 }
 0x246   : > { %v6177_v53 = vpop.permute.xlu1 %3723  ;;  %1935 = vmatpush.msra.mxu2 %v1756_v29  ;;  %3893 = vrot.lane.b32.xlu2 %v5750_v57, %s4162_s30  ;;  %v1728_v46 = vsel %vm489_vm8, %v3685_v1, %v3686_v27 }
 0x247   : > { %1430 = vmatpush.msrb.mxu3 %v3131_v18  ;;  %1996 = vmatpush.msrb.mxu1 %v7537_v3  ;;  %v6179_v2 = vpop.permute.xlu0 %3718  ;;  %v1755_v18 = vsel %vm518_vm7, %v3700_v31, %v3701_v40  ;;  %v6207_v24 = vpop.permute.xlu2 %3743  ;;  %v3680_v31 = vunpack.i.l.bf16 %v6052_v63  ;;  %v1729_v3 = vsel %vm489_vm8, %v3690_v11, %v3691_v44  ;;  %v3660_v11 = vunpack.i.l.bf16 %v6021_v0 }
 0x248   : > { %1936 = vmatpush.msra.mxu2 %v1755_v18  ;;  %1354 = vmatmul.f32.vlgmr.msra.gmra.mxu3 %v1273_v15  ;;  %v3665_v18 = vunpack.i.l.bf16 %v6015_v28 }
 0x249   : > { %1431 = vmatpush.msrb.mxu3 %v7538_v54  ;;  %1997 = vmatpush.msrb.mxu1 %v7539_v45  ;;  %v3675_v54 = vunpack.i.l.bf16 %v6065_v61 }
 0x24a   : > { %1937 = vmatpush.msra.mxu2 %v1754_v12  ;;  %v3656_v12 = vunpack.i.h.bf16 %v5868_v39 }
 0x24b   : > { %1432 = vmatpush.msrb.mxu3 %v7540_v32  ;;  %1998 = vmatpush.msrb.mxu1 %v7541_v14  ;;  %v7543_v32 = vunpack.i.h.bf16 %v5762_v56  ;;  %v3666_v14 = vunpack.i.h.bf16 %v6015_v28  ;;  %v3661_v56 = vunpack.i.h.bf16 %v6021_v0 }
 0x24c   : > { %3933 = vrot.lane.b32.xlu1 %v5748_v41, %s4167_s8  ;;  %3928 = vrot.lane.b32.xlu0 %v5805_v59, %s4163_s4 }
 0x24d   : > { %1433 = vmatpush.msrb.mxu3 %v7542_v60  ;;  %1999 = vmatpush.msrb.mxu1 %v3606_v38  ;;  %v3681_v38 = vunpack.i.h.bf16 %v6052_v63 }
 0x24e   : > { %1938 = vmatpush.msra.mxu2 %v1729_v3  ;;  %3908 = vrot.lane.b32.xlu2 %v5805_v59, %s4162_s30 }
 0x24f   : > { %2000 = vmatpush.msrb.mxu1 %v3601_v21  ;;  %v3676_v21 = vunpack.i.h.bf16 %v6065_v61  ;;  %v6226_v45 = vpop.permute.xlu1 %3738  ;;  %v6230_v29 = vpop.permute.xlu0 %3733  ;;  %v1727_v4 = vsel %vm489_vm8, %v3680_v31, %v3681_v38  ;;  %v1700_v31 = vsel %vm460_vm10, %v3665_v18, %v3666_v14 }
 0x250   : > { %1939 = vmatpush.msra.mxu2 %v1728_v46  ;;  %v6257_v60 = vpop.permute.xlu2 %3758  ;;  %1434 = vmatmul.f32.vlgmr.msrb.gmra.mxu3 %v1273_v15  ;;  %v3650_v46 = vunpack.i.l.bf16 %v5954_v35  ;;  %v3725_v35 = vunpack.i.l.bf16 %v6177_v53 }
 0x251   : > { %2001 = vmatpush.msrb.mxu1 %v3596_v13  ;;  %v3670_v13 = vunpack.i.l.bf16 %v5932_v50  ;;  %v1726_v8 = vsel %vm489_vm8, %v3675_v54, %v3676_v21  ;;  %v1699_v54 = vsel %vm460_vm10, %v3660_v11, %v3661_v56  ;;  %v3760_v23 = vunpack.i.l.bf16 %v6257_v60 }
 0x252   : > { %1940 = vmatpush.msra.mxu2 %v1727_v4  ;;  %v1673_v4 = vsel %vm431_vm11, %v3650_v46, %v3651_v52  ;;  %v3746_v50 = vunpack.i.h.bf16 %v6207_v24 }
 0x253   : > { %2002 = vmatpush.msrb.mxu1 %v3591_v36  ;;  %v7544_v36 = vunpack.i.h.bf16 %v7525_v55  ;;  %v1701_v1 = vsel %vm460_vm10, %v3670_v13, %v3671_v26  ;;  %v3655_v55 = vunpack.i.l.bf16 %v5868_v39  ;;  %v3646_v13 = vunpack.i.h.bf16 %v5956_v49 }
 0x254   : > { %3948 = vrot.lane.b32.xlu1 %v5750_v57, %s4167_s8  ;;  %3943 = vrot.lane.b32.xlu0 %v5857_v47, %s4163_s4  ;;  %v3721_v49 = vunpack.i.h.bf16 %v6179_v2 }
 0x255   : > { %2003 = vmatpush.msrb.mxu1 %v7543_v32  ;;  %1941 = vmatpush.msra.mxu2 %v1726_v8  ;;  %v3636_v32 = vunpack.i.h.bf16 %v5896_v48 }
 0x256   : > { %3923 = vrot.lane.b32.xlu2 %v5805_v59, %s4171_s19 }
 0x257   : > { %2004 = vmatpush.msrb.mxu1 %v7544_v36  ;;  %1942 = vmatpush.msra.mxu2 %v1701_v1  ;;  %v1670_v30 = vsel %vm431_vm11, %v3635_v51, %v3636_v32 }
 0x258   : > { %v6266_v3 = vpop.permute.xlu1 %3753  ;;  %v6300_v18 = vpop.permute.xlu2 %3773 }
 0x259   : > { %2005 = vmatpush.msrb.mxu1 %v7545_v43  ;;  %1943 = vmatpush.msra.mxu2 %v1700_v31  ;;  %v6272_v15 = vpop.permute.xlu0 %3748  ;;  %v3756_v63 = vunpack.i.h.bf16 %v6266_v3 }
 0x25b   : > { %2006 = vmatpush.msrb.mxu1 %v3571_v20  ;;  %1944 = vmatpush.msra.mxu2 %v1699_v54  ;;  %v1698_v20 = vsel %vm460_vm10, %v3655_v55, %v3656_v12  ;;  %v3776_v54 = vunpack.i.h.bf16 %v6300_v18 }
 0x25c   : > { %3963 = vrot.lane.b32.xlu1 %v5805_v59, %s4166_s7  ;;  %3958 = vrot.lane.b32.xlu0 %v5748_v41, %s4163_s4 }
 0x25d   : > { %2007 = vmatpush.msrb.mxu1 %v3566_v37  ;;  %1945 = vmatpush.msra.mxu2 %v1698_v20  ;;  %v3640_v37 = vunpack.i.l.bf16 %v5815_v17  ;;  %v6359_v20 = vld.sshfl [vmem:[#allocation1 + $0x18] sm:$0xff pattern:$0x75316420] }
 0x25e   : > { %3938 = vrot.lane.b32.xlu2 %v5857_v47, %s4171_s19 }
 0x25f   : > { %2008 = vmatpush.msrb.mxu1 %v3561_v42  ;;  %1946 = vmatpush.msra.mxu2 %v1673_v4  ;;  %v1672_v42 = vsel %vm431_vm11, %v3645_v7, %v3646_v13  ;;  %v3775_v7 = vunpack.i.l.bf16 %v6300_v18 }
 0x260   : > { %v6326_v11 = vpop.permute.xlu2 %3788 }
 0x261   : > { %2009 = vmatpush.msrb.mxu1 %v3556_v6  ;;  %1947 = vmatpush.msra.mxu2 %v1672_v42  ;;  %v6308_v8 = vpop.permute.xlu1 %3768  ;;  %v1671_v6 = vsel %vm431_vm11, %v3640_v37, %v3641_v34  ;;  %v3791_v1 = vunpack.i.h.bf16 %v6326_v11  ;;  %v3790_v43 = vunpack.i.l.bf16 %v6326_v11  ;;  %v2830_v37 = vld [vmem:[%s7109_s1 + $0x38] sm:$0xff] }
 0x262   : > { %v3771_v4 = vunpack.i.h.bf16 %v6308_v8  ;;  %v3770_v51 = vunpack.i.l.bf16 %v6308_v8 }
 0x263   : > { %v6310_v36 = vpop.permute.xlu0 %3763  ;;  %1948 = vmatpush.msra.mxu2 %v1671_v6  ;;  %v1869_v33 = vsel %vm634_vm9, %v3790_v43, %v3791_v1 }
 0x264   : > { %3978 = vrot.lane.b32.xlu1 %v5857_v47, %s4166_s7  ;;  %3973 = vrot.lane.b32.xlu0 %v5750_v57, %s4163_s4  ;;  %v3766_v16 = vunpack.i.h.bf16 %v6310_v36 }
 0x265   : > { %1949 = vmatpush.msra.mxu2 %v1670_v30  ;;  %1954 = vmatpush.msra.mxu3 %v1869_v33  ;;  %v1887_v30 = vld.sshfl [vmem:[#allocation1 + $0x8] sm:$0xff pattern:$0x75316420] }
 0x266   : > { %3953 = vrot.lane.b32.xlu2 %v5748_v41, %s4171_s19  ;;  %1930 = vmatmul.f32.vlgmr.msra.gmra.mxu1 %v1887_v30 }
 0x267   : > { %2014 = vmatpush.msrb.mxu2 %v3711_v10 }
 0x268   : > { %v6371_v42 = vpop.permute.xlu2 %3803 }
 0x269   : > { %2015 = vmatpush.msrb.mxu2 %v3706_v22 }
 0x26b   : > { %2016 = vmatpush.msrb.mxu2 %v3701_v40  ;;  %v6334_v55 = vpop.permute.xlu1 %3783  ;;  %v6336_v31 = vpop.permute.xlu0 %3778  ;;  %v6349_v40 = vld.sshfl [vmem:[#allocation1 + $0x10] sm:$0xff pattern:$0x75316420] }
 0x26c   : > { %v3786_v25 = vunpack.i.h.bf16 %v6334_v55  ;;  %v3785_v58 = vunpack.i.l.bf16 %v6334_v55  ;;  %3993 = vrot.lane.b32.xlu1 %v5857_v47, %s4170_s11  ;;  %3988 = vrot.lane.b32.xlu0 %v5748_v41, %s4166_s7  ;;  %v3781_v10 = vunpack.i.h.bf16 %v6336_v31  ;;  %v3780_v22 = vunpack.i.l.bf16 %v6336_v31  ;;  %2503 = vst [vmem:[#allocation1 + $0x10] ss:$2 sm:$0xff] %v2830_v37 }
 0x26d   : > { %2017 = vmatpush.msrb.mxu2 %v3696_v9  ;;  %v1886_v9 = vld.sshfl [vmem:[#allocation1] sm:$0xff pattern:$0x75316420] }
 0x26e   : > { %v1868_v46 = vsel %vm634_vm9, %v3785_v58, %v3786_v25  ;;  %1950 = vmatmul.f32.vlgmr.msra.gmra.mxu2 %v6349_v40  ;;  %v1867_v6 = vsel %vm634_vm9, %v3780_v22, %v3781_v10  ;;  %3968 = vrot.lane.b32.xlu2 %v5750_v57, %s4171_s19  ;;  %2501 = vst [vmem:[#allocation1] ss:$2 sm:$0xff] %v2829_v5  ;;  %v3761_v57 = vunpack.i.h.bf16 %v6257_v60  ;;  %v3740_v5 = vunpack.i.l.bf16 %v6226_v45 }
 0x26f   : > { %2018 = vmatpush.msrb.mxu2 %v3691_v44  ;;  %1955 = vmatpush.msra.mxu3 %v1868_v46  ;;  %v3765_v44 = vunpack.i.l.bf16 %v6310_v36  ;;  %v1866_v22 = vsel %vm634_vm9, %v3775_v7, %v3776_v54  ;;  %v3750_v46 = vunpack.i.l.bf16 %v6272_v15  ;;  %v3806_v36 = vunpack.i.h.bf16 %v6371_v42 }
 0x270   : > { %1910 = vmatmul.f32.vlgmr.msra.gmra.mxu0 %v1886_v9  ;;  %v1839_v61 = vsel %vm605_vm12, %v3760_v23, %v3761_v57  ;;  %2010 = vmatmul.f32.vlgmr.msrb.gmra.mxu1 %v1887_v30  ;;  %v3726_v23 = vunpack.i.h.bf16 %v6177_v53 }
 0x271   : > { %2019 = vmatpush.msrb.mxu2 %v3686_v27  ;;  %1956 = vmatpush.msra.mxu3 %v1867_v6  ;;  %v1841_v27 = vsel %vm605_vm12, %v3770_v51, %v3771_v4  ;;  %v1840_v33 = vsel %vm605_vm12, %v3765_v44, %v3766_v16  ;;  %v3735_v6 = vunpack.i.l.bf16 %v6230_v29  ;;  %v3731_v44 = vunpack.i.h.bf16 %v6149_v19 }
 0x273   : > { %v6382_v43 = vpop.permute.xlu1 %3798  ;;  %v6384_v58 = vpop.permute.xlu0 %3793  ;;  %2020 = vmatpush.msrb.mxu2 %v3681_v38  ;;  %1957 = vmatpush.msra.mxu3 %v1866_v22  ;;  %v3755_v38 = vunpack.i.l.bf16 %v6266_v3  ;;  %v3730_v22 = vunpack.i.l.bf16 %v6149_v19 }
 0x274   : > { %4008 = vrot.lane.b32.xlu1 %v5805_v59, %s4165_s6  ;;  %4003 = vrot.lane.b32.xlu0 %v5748_v41, %s4170_s11  ;;  %v3751_v41 = vunpack.i.h.bf16 %v6272_v15  ;;  %v3796_v3 = vunpack.i.h.bf16 %v6384_v58 }
 0x275   : > { %2021 = vmatpush.msrb.mxu2 %v3676_v21  ;;  %1958 = vmatpush.msra.mxu3 %v1841_v27  ;;  %v6418_v21 = vpop.permute.xlu2 %3818  ;;  %v1838_v7 = vsel %vm605_vm12, %v3755_v38, %v3756_v63  ;;  %v1785_v17 = vsel %vm547_vm14, %v3730_v22, %v3731_v44 }
 0x276   : > { %3983 = vrot.lane.b32.xlu2 %v5805_v59, %s4170_s11  ;;  %v1813_v0 = vsel %vm576_vm13, %v3750_v46, %v3751_v41  ;;  %v6499_v46 = vld [vmem:[%s4232_s24 + $0xf0] sm:$0xff] }
 0x277   : > { %2022 = vmatpush.msrb.mxu2 %v3671_v26  ;;  %1959 = vmatpush.msra.mxu3 %v1840_v33  ;;  %v3745_v26 = vunpack.i.l.bf16 %v6207_v24  ;;  %v3715_v33 = vunpack.i.l.bf16 %v6107_v62 }
 0x278   : > { %1990 = vmatmul.f32.vlgmr.msrb.gmra.mxu0 %v1886_v9  ;;  %v6444_v9 = vld [vmem:[%s4232_s24 + $0xc8] sm:$0xff] }
 0x279   : > { %2023 = vmatpush.msrb.mxu2 %v3666_v14  ;;  %1960 = vmatpush.msra.mxu3 %v1839_v61  ;;  %v3741_v14 = vunpack.i.h.bf16 %v6226_v45  ;;  %v1812_v30 = vsel %vm576_vm13, %v3745_v26, %v3746_v50  ;;  %v6502_v61 = vld [vmem:[%s4232_s24 + $0xf8] sm:$0xff] }
 0x27a   : > { %v4047_v48 = vpack.i.bf16 %v6502_v61, %v6499_v46 }
 0x27b   : > { %2024 = vmatpush.msrb.mxu2 %v3661_v56  ;;  %v6427_v37 = vpop.permute.xlu1 %3813  ;;  %1961 = vmatpush.msra.mxu3 %v1838_v7  ;;  %v6441_v56 = vld [vmem:[%s4232_s24 + $0xc0] sm:$0xff]  ;;  %v1811_v39 = vsel %vm576_vm13, %v3740_v5, %v3741_v14 }
 0x27c   : > { %v6429_v28 = vpop.permute.xlu0 %3808  ;;  %4023 = vrot.lane.b32.xlu1 %v5805_v59, %s4169_s10  ;;  %4018 = vrot.lane.b32.xlu0 %v5857_v47, %s4165_s6  ;;  %v6448_v51 = vpack.i.bf16 %v6444_v9, %v6441_v56  ;;  %v3736_v59 = vunpack.i.h.bf16 %v6230_v29  ;;  %v3816_v18 = vunpack.i.h.bf16 %v6427_v37 }
 0x27d   : > { %2025 = vmatpush.msrb.mxu2 %v3656_v12  ;;  %1962 = vmatpush.msra.mxu3 %v1813_v0  ;;  %v6468_v12 = vpop.permute.xlu2 %3833  ;;  %v3810_v8 = vunpack.i.l.bf16 %v6429_v28 }
 0x27e   : > { %3998 = vrot.lane.b32.xlu2 %v6448_v51, %s4166_s7 }
 0x27f   : > { %2026 = vmatpush.msrb.mxu2 %v3651_v52  ;;  %1963 = vmatpush.msra.mxu3 %v1812_v30  ;;  %v1810_v52 = vsel %vm576_vm13, %v3735_v6, %v3736_v59 }
 0x281   : > { %2027 = vmatpush.msrb.mxu2 %v3646_v13  ;;  %1964 = vmatpush.msra.mxu3 %v1811_v39  ;;  %v3720_v13 = vunpack.i.l.bf16 %v6179_v2 }
 0x283   : > { %2028 = vmatpush.msrb.mxu2 %v3641_v34  ;;  %1965 = vmatpush.msra.mxu3 %v1810_v52  ;;  %v3716_v34 = vunpack.i.h.bf16 %v6107_v62  ;;  %v6535_v52 = vld [vmem:[%s4232_s24 + $0xd8] sm:$0xff] }
 0x284   : > { %4038 = vrot.lane.b32.xlu1 %v6448_v51, %s4165_s6  ;;  %4033 = vrot.lane.b32.xlu0 %v5857_v47, %s4169_s10  ;;  %v6483_v27 = vpop.permute.xlu1 %3828  ;;  %v1784_v47 = vsel %vm547_vm14, %v3725_v35, %v3726_v23  ;;  %v6532_v35 = vld [vmem:[%s4232_s24 + $0xd0] sm:$0xff] }
 0x285   : > { %v6485_v38 = vpop.permute.xlu0 %3823  ;;  %2029 = vmatpush.msrb.mxu2 %v3636_v32  ;;  %1966 = vmatpush.msra.mxu3 %v1785_v17  ;;  %v1783_v32 = vsel %vm547_vm14, %v3720_v13, %v3721_v49  ;;  %v6511_v26 = vpop.permute.xlu2 %3848  ;;  %v1782_v5 = vsel %vm547_vm14, %v3715_v33, %v3716_v34  ;;  %v4027_v13 = vpack.i.bf16 %v6535_v52, %v6532_v35 }
 0x286   : > { %2030 = vmatmul.f32.vlgmr.msrb.gmra.mxu2 %v6349_v40  ;;  %4013 = vrot.lane.b32.xlu2 %v6448_v51, %s4170_s11  ;;  %v3851_v40 = vunpack.i.h.bf16 %v6511_v26  ;;  %v3850_v7 = vunpack.i.l.bf16 %v6511_v26  ;;  %v3826_v55 = vunpack.i.h.bf16 %v6485_v38 }
 0x287   : > { %1967 = vmatpush.msra.mxu3 %v1784_v47 }
 0x288   : > { %v2151_v6 = vsel %vm286_vm0, %v3850_v7, %v3851_v40  ;;  %v3835_v7 = vunpack.i.l.bf16 %v6468_v12 }
 0x289   : > { %1968 = vmatpush.msra.mxu3 %v1783_v32  ;;  %2512 = vmatpush.msra.mxu0 %v2151_v6  ;;  %v3836_v32 = vunpack.i.h.bf16 %v6468_v12  ;;  %v3830_v6 = vunpack.i.l.bf16 %v6483_v27 }
 0x28b   : > { %1969 = vmatpush.msra.mxu3 %v1782_v5 }
 0x28c   : > { %4053 = vrot.lane.b32.xlu1 %v6448_v51, %s4169_s10  ;;  %4048 = vrot.lane.b32.xlu0 %v4047_v48, %s4164_s5 }
 0x28d   : > { %v6521_v0 = vpop.permute.xlu1 %3843  ;;  %1970 = vmatmul.f32.vlgmr.msra.gmra.mxu3 %v6359_v20 }
 0x28e   : > { %v3846_v30 = vunpack.i.h.bf16 %v6521_v0  ;;  %v3845_v22 = vunpack.i.l.bf16 %v6521_v0  ;;  %v6528_v39 = vpop.permute.xlu0 %3838  ;;  %2034 = vmatpush.msrb.mxu3 %v3791_v1  ;;  %4028 = vrot.lane.b32.xlu2 %v4027_v13, %s4165_s6  ;;  %v3831_v1 = vunpack.i.h.bf16 %v6483_v27  ;;  %s2794_s6 = sshll.u32 %s7577_s12, 1 }
 0x28f   : > { %v3841_v17 = vunpack.i.h.bf16 %v6528_v39  ;;  %v3840_v33 = vunpack.i.l.bf16 %v6528_v39 }
 0x290   : > { %v2150_v47 = vsel %vm286_vm0, %v3845_v22, %v3846_v30  ;;  %2035 = vmatpush.msrb.mxu3 %v3786_v25  ;;  %v6554_v11 = vpop.permute.xlu2 %3863  ;;  %v3825_v25 = vunpack.i.l.bf16 %v6485_v38  ;;  %v2148_v22 = vsel %vm286_vm0, %v3835_v7, %v3836_v32 }
 0x291   : > { %2513 = vmatpush.msra.mxu0 %v2150_v47  ;;  %v2149_v5 = vsel %vm286_vm0, %v3840_v33, %v3841_v17  ;;  %v3820_v47 = vunpack.i.l.bf16 %v6418_v21  ;;  %vm2688_vm0 = vcmask 400388  }
 0x292   : > { %2036 = vmatpush.msrb.mxu3 %v3781_v10  ;;  %v3821_v10 = vunpack.i.h.bf16 %v6418_v21  ;;  %v2122_v7 = vsel %vm257_vm1, %v3825_v25, %v3826_v55 }
 0x293   : > { %2514 = vmatpush.msra.mxu0 %v2149_v5 }
 0x294   : > { %4068 = vrot.lane.b32.xlu1 %v4027_v13, %s4164_s5  ;;  %4063 = vrot.lane.b32.xlu0 %v4047_v48, %s4168_s9  ;;  %v2123_v48 = vsel %vm257_vm1, %v3830_v6, %v3831_v1  ;;  %v3811_v6 = vunpack.i.h.bf16 %v6429_v28 }
 0x295   : > { %2037 = vmatpush.msrb.mxu3 %v3776_v54  ;;  %2515 = vmatpush.msra.mxu0 %v2148_v22  ;;  %v3815_v54 = vunpack.i.l.bf16 %v6427_v37  ;;  %v3801_v22 = vunpack.i.h.bf16 %v6382_v43 }
 0x296   : > { %v6569_v33 = vpop.permute.xlu1 %3858  ;;  %v6571_v31 = vpop.permute.xlu0 %3853  ;;  %4043 = vrot.lane.b32.xlu2 %v4027_v13, %s4169_s10 }
 0x297   : > { %2038 = vmatpush.msrb.mxu3 %v3771_v4  ;;  %2516 = vmatpush.msra.mxu0 %v2123_v48  ;;  %v2121_v4 = vsel %vm257_vm1, %v3820_v47, %v3821_v10  ;;  %v2120_v25 = vsel %vm257_vm1, %v3815_v54, %v3816_v18  ;;  %v3800_v47 = vunpack.i.l.bf16 %v6382_v43  ;;  %v4115_v48 = vld [vmem:[%s4232_s24 + $0xe0] sm:$0xff]  ;;  %vm2689_vm1 = vmor %vm2688_vm0, %vm2685_vm15 }
 0x298   : > { %v6587_v5 = vpop.permute.xlu2 %3878 }
 0x299   : > { %2039 = vmatpush.msrb.mxu3 %v3766_v16  ;;  %2517 = vmatpush.msra.mxu0 %v2122_v7  ;;  %v3805_v16 = vunpack.i.l.bf16 %v6371_v42  ;;  %v6618_v7 = vld [vmem:[%s4232_s24 + $0xe8] sm:$0xff] }
 0x29a   : > { %v4057_v54 = vpack.i.bf16 %v6618_v7, %v4115_v48 }
 0x29b   : > { %2040 = vmatpush.msrb.mxu3 %v3761_v57  ;;  %2518 = vmatpush.msra.mxu0 %v2121_v4  ;;  %v2094_v4 = vsel %vm228_vm2, %v3805_v16, %v3806_v36 }
 0x29c   : > { %4083 = vrot.lane.b32.xlu1 %v4027_v13, %s4168_s9  ;;  %4078 = vrot.lane.b32.xlu0 %v6448_v51, %s4164_s5  ;;  %v2095_v13 = vsel %vm228_vm2, %v3810_v8, %v3811_v6  ;;  %v2093_v8 = vsel %vm228_vm2, %v3800_v47, %v3801_v22 }
 0x29d   : > { %2041 = vmatpush.msrb.mxu3 %v3756_v63  ;;  %2519 = vmatpush.msra.mxu0 %v2120_v25  ;;  %v3795_v63 = vunpack.i.l.bf16 %v6384_v58 }
 0x29e   : > { %v6607_v60 = vpop.permute.xlu1 %3873  ;;  %v6609_v57 = vpop.permute.xlu0 %3868  ;;  %4058 = vrot.lane.b32.xlu2 %v4057_v54, %s4164_s5  ;;  %s2835_s5 = smul.u32 24, %s7575_s13 }
 0x29f   : > { %2042 = vmatpush.msrb.mxu3 %v3751_v41  ;;  %2520 = vmatpush.msra.mxu0 %v2095_v13  ;;  %v2092_v41 = vsel %vm228_vm2, %v3795_v63, %v3796_v3 }
 0x2a0   : > { %v6634_v15 = vpop.permute.xlu2 %3893  ;;  %s190_s7 = sadd.s32 %s2835_s5, %s2794_s6 }
 0x2a1   : > { %2043 = vmatpush.msrb.mxu3 %v3746_v50  ;;  %2521 = vmatpush.msra.mxu0 %v2094_v4  ;;  %s2795_s8 = sshll.u32 %s190_s7, 2 }
 0x2a2   : > { %s192_s12 = scalar_lea.vmem %s7111_s3, %s2795_s8 }
 0x2a3   : > { %2044 = vmatpush.msrb.mxu3 %v3741_v14  ;;  %2522 = vmatpush.msra.mxu0 %v2093_v8 }
 0x2a5   : > { %2045 = vmatpush.msrb.mxu3 %v3736_v59  ;;  %2523 = vmatpush.msra.mxu0 %v2092_v41 }
 0x2a6   : > { %v6643_v24 = vpop.permute.xlu1 %3888  ;;  %v6645_v50 = vpop.permute.xlu0 %3883  ;;  %4073 = vrot.lane.b32.xlu2 %v4057_v54, %s4168_s9 }
 0x2a7   : > { %2046 = vmatpush.msrb.mxu3 %v3731_v44  ;;  %2524 = vmatpush.msra.mxu0 %v6499_v46 }
 0x2a8   : > { %v6653_v45 = vpop.permute.xlu2 %3908 }
 0x2a9   : > { %2047 = vmatpush.msrb.mxu3 %v3726_v23  ;;  %2525 = vmatpush.msra.mxu0 %v4115_v48 }
 0x2ab   : > { %2048 = vmatpush.msrb.mxu3 %v3721_v49  ;;  %2526 = vmatpush.msra.mxu0 %v6532_v35 }
 0x2ad   : > { %2049 = vmatpush.msrb.mxu3 %v3716_v34  ;;  %2527 = vmatpush.msra.mxu0 %v6441_v56 }
 0x2ae   : > { %v6660_v19 = vpop.permute.xlu1 %3903  ;;  %v6663_v29 = vpop.permute.xlu0 %3898  ;;  %2050 = vmatmul.f32.vlgmr.msrb.gmra.mxu3 %v6359_v20  ;;  %4088 = vrot.lane.b32.xlu2 %v6448_v51, %s4168_s9 }
 0x2af   : > { %2592 = vmatpush.msrb.mxu0 %v3851_v40 }
 0x2b0   : > { %v6674_v62 = vpop.permute.xlu2 %3923 }
 0x2b1   : > { %2593 = vmatpush.msrb.mxu0 %v3846_v30  ;;  %v7256_v53 = vunpack.i.h.bf16 %v6674_v62  ;;  %v3925_v2 = vunpack.i.l.bf16 %v6674_v62 }
 0x2b3   : > { %2594 = vmatpush.msrb.mxu0 %v3841_v17  ;;  %v2487_v20 = vsel %vm634_vm9, %v3925_v2, %v7256_v53  ;;  %v3911_v2 = vunpack.i.h.bf16 %v6653_v45  ;;  %v3860_v53 = vunpack.i.l.bf16 %v6569_v33 }
 0x2b4   : > { %2572 = vmatpush.msra.mxu3 %v2487_v20  ;;  %v3910_v20 = vunpack.i.l.bf16 %v6653_v45 }
 0x2b5   : > { %2595 = vmatpush.msrb.mxu0 %v3836_v32 }
 0x2b6   : > { %v6683_v14 = vpop.permute.xlu1 %3918  ;;  %v6685_v56 = vpop.permute.xlu0 %3913 }
 0x2b7   : > { %2596 = vmatpush.msrb.mxu0 %v3831_v1  ;;  %v7260_v51 = vunpack.i.h.bf16 %v6683_v14  ;;  %v3920_v59 = vunpack.i.l.bf16 %v6683_v14  ;;  %v7261_v44 = vunpack.i.h.bf16 %v6685_v56  ;;  %v3915_v12 = vunpack.i.l.bf16 %v6685_v56 }
 0x2b8   : > { %v6700_v49 = vpop.permute.xlu2 %3938 }
 0x2b9   : > { %2597 = vmatpush.msrb.mxu0 %v3826_v55  ;;  %v2375_v23 = vsel %vm518_vm7, %v3915_v12, %v7261_v44  ;;  %v2374_v27 = vsel %vm518_vm7, %v3920_v59, %v7260_v51  ;;  %v7254_v34 = vunpack.i.h.bf16 %v6700_v49  ;;  %v3940_v46 = vunpack.i.l.bf16 %v6700_v49 }
 0x2ba   : > { %2552 = vmatpush.msra.mxu2 %v2375_v23 }
 0x2bb   : > { %2598 = vmatpush.msrb.mxu0 %v3821_v10  ;;  %v2486_v38 = vsel %vm634_vm9, %v3940_v46, %v7254_v34 }
 0x2bc   : > { %2553 = vmatpush.msra.mxu2 %v2374_v27  ;;  %2573 = vmatpush.msra.mxu3 %v2486_v38 }
 0x2bd   : > { %2599 = vmatpush.msrb.mxu0 %v3816_v18 }
 0x2be   : > { %v6712_v21 = vpop.permute.xlu1 %3933  ;;  %v6714_v26 = vpop.permute.xlu0 %3928 }
 0x2bf   : > { %2600 = vmatpush.msrb.mxu0 %v3811_v6  ;;  %v7255_v40 = vunpack.i.h.bf16 %v6712_v21  ;;  %v3935_v0 = vunpack.i.l.bf16 %v6712_v21  ;;  %v3931_v30 = vunpack.i.h.bf16 %v6714_v26  ;;  %v3930_v37 = vunpack.i.l.bf16 %v6714_v26 }
 0x2c0   : > { %v6730_v35 = vpop.permute.xlu2 %3953 }
 0x2c1   : > { %2601 = vmatpush.msrb.mxu0 %v3806_v36  ;;  %v2263_v39 = vsel %vm402_vm3, %v3930_v37, %v3931_v30  ;;  %v2373_v28 = vsel %vm518_vm7, %v3935_v0, %v7255_v40  ;;  %v7252_v17 = vunpack.i.h.bf16 %v6730_v35  ;;  %v3955_v42 = vunpack.i.l.bf16 %v6730_v35 }
 0x2c2   : > { %2532 = vmatpush.msra.mxu1 %v2263_v39  ;;  %2554 = vmatpush.msra.mxu2 %v2373_v28  ;;  %v3906_v0 = vunpack.i.h.bf16 %v6660_v19  ;;  %v3905_v37 = vunpack.i.l.bf16 %v6660_v19  ;;  %v3861_v40 = vunpack.i.h.bf16 %v6569_v33  ;;  %v7547_v33 = vunpack.i.h.bf16 %v6683_v14 }
 0x2c3   : > { %2602 = vmatpush.msrb.mxu0 %v3801_v22  ;;  %v2485_v32 = vsel %vm634_vm9, %v3955_v42, %v7252_v17  ;;  %v3901_v42 = vunpack.i.h.bf16 %v6663_v29  ;;  %v3865_v17 = vunpack.i.l.bf16 %v6554_v11 }
 0x2c4   : > { %2574 = vmatpush.msra.mxu3 %v2485_v32  ;;  %v3900_v32 = vunpack.i.l.bf16 %v6663_v29 }
 0x2c5   : > { %2603 = vmatpush.msrb.mxu0 %v3796_v3 }
 0x2c6   : > { %v6741_v1 = vpop.permute.xlu1 %3948  ;;  %v6743_v55 = vpop.permute.xlu0 %3943 }
 0x2c7   : > { %v7253_v10 = vunpack.i.h.bf16 %v6741_v1  ;;  %v3950_v43 = vunpack.i.l.bf16 %v6741_v1  ;;  %v3946_v18 = vunpack.i.h.bf16 %v6743_v55  ;;  %v3945_v6 = vunpack.i.l.bf16 %v6743_v55  ;;  %2604 = vmatpush.msrb.mxu0 %v6502_v61 }
 0x2c8   : > { %v6757_v16 = vpop.permute.xlu2 %3968 }
 0x2c9   : > { %v2262_v58 = vsel %vm402_vm3, %v3945_v6, %v3946_v18  ;;  %v2372_v36 = vsel %vm518_vm7, %v3950_v43, %v7253_v10  ;;  %2605 = vmatpush.msrb.mxu0 %v6618_v7  ;;  %v7247_v25 = vunpack.i.h.bf16 %v6757_v16  ;;  %v3970_v22 = vunpack.i.l.bf16 %v6757_v16 }
 0x2ca   : > { %2533 = vmatpush.msra.mxu1 %v2262_v58  ;;  %2555 = vmatpush.msra.mxu2 %v2372_v36  ;;  %v2235_v6 = vsel %vm373_vm4, %v3910_v20, %v3911_v2  ;;  %v3896_v58 = vunpack.i.h.bf16 %v6634_v15  ;;  %v3895_v36 = vunpack.i.l.bf16 %v6634_v15  ;;  %v7554_v14 = vunpack.i.h.bf16 %v6757_v16 }
 0x2cb   : > { %2606 = vmatpush.msrb.mxu0 %v6535_v52  ;;  %v2484_v61 = vsel %vm634_vm9, %v3970_v22, %v7247_v25  ;;  %v2234_v22 = vsel %vm373_vm4, %v3905_v37, %v3906_v0 }
 0x2cc   : > { %2575 = vmatpush.msra.mxu3 %v2484_v61 }
 0x2cd   : > { %2607 = vmatpush.msrb.mxu0 %v6444_v9 }
 0x2ce   : > { %v6766_v47 = vpop.permute.xlu1 %3963  ;;  %v6768_v13 = vpop.permute.xlu0 %3958 }
 0x2cf   : > { %v7251_v48 = vunpack.i.h.bf16 %v6766_v47  ;;  %v3965_v7 = vunpack.i.l.bf16 %v6766_v47  ;;  %v3961_v54 = vunpack.i.h.bf16 %v6768_v13  ;;  %v3960_v3 = vunpack.i.l.bf16 %v6768_v13 }
 0x2d0   : > { %v6780_v63 = vpop.permute.xlu2 %3983 }
 0x2d1   : > { %v2261_v52 = vsel %vm402_vm3, %v3960_v3, %v3961_v54  ;;  %v2347_v9 = vsel %vm489_vm8, %v3965_v7, %v7251_v48  ;;  %v7245_v4 = vunpack.i.h.bf16 %v6780_v63  ;;  %v3985_v8 = vunpack.i.l.bf16 %v6780_v63 }
 0x2d2   : > { %2534 = vmatpush.msra.mxu1 %v2261_v52  ;;  %2556 = vmatpush.msra.mxu2 %v2347_v9  ;;  %v3891_v3 = vunpack.i.h.bf16 %v6643_v24  ;;  %v3890_v52 = vunpack.i.l.bf16 %v6643_v24  ;;  %v3866_v48 = vunpack.i.h.bf16 %v6554_v11 }
 0x2d3   : > { %v2459_v41 = vsel %vm605_vm12, %v3985_v8, %v7245_v4 }
 0x2d4   : > { %2576 = vmatpush.msra.mxu3 %v2459_v41  ;;  %v2233_v41 = vsel %vm373_vm4, %v3900_v32, %v3901_v42  ;;  %v3885_v32 = vunpack.i.l.bf16 %v6645_v50 }
 0x2d6   : > { %v6789_v59 = vpop.permute.xlu1 %3978  ;;  %v6791_v12 = vpop.permute.xlu0 %3973 }
 0x2d7   : > { %v7246_v23 = vunpack.i.h.bf16 %v6789_v59  ;;  %v3980_v27 = vunpack.i.l.bf16 %v6789_v59  ;;  %v3976_v46 = vunpack.i.h.bf16 %v6791_v12  ;;  %v3975_v38 = vunpack.i.l.bf16 %v6791_v12 }
 0x2d8   : > { %v6807_v43 = vpop.permute.xlu2 %3998 }
 0x2d9   : > { %v2260_v39 = vsel %vm402_vm3, %v3975_v38, %v3976_v46  ;;  %v2346_v28 = vsel %vm489_vm8, %v3980_v27, %v7246_v23  ;;  %v7249_v61 = vunpack.i.h.bf16 %v6807_v43  ;;  %v4000_v7 = vunpack.i.l.bf16 %v6807_v43 }
 0x2da   : > { %2535 = vmatpush.msra.mxu1 %v2260_v39  ;;  %2557 = vmatpush.msra.mxu2 %v2346_v28  ;;  %v3881_v39 = vunpack.i.h.bf16 %v6587_v5  ;;  %v3880_v28 = vunpack.i.l.bf16 %v6587_v5  ;;  %v2674_v5 = vld [vmem:[%s7110_s2] sm:$0xf] }
 0x2db   : > { %v2344_v25 = vsel %vm489_vm8, %v4000_v7, %v7249_v61  ;;  %v3870_v7 = vunpack.i.l.bf16 %v6609_v57 }
 0x2dc   : > { %2536 = vmatpush.msra.mxu1 %v2235_v6  ;;  %v3886_v6 = vunpack.i.h.bf16 %v6645_v50 }
 0x2de   : > { %v6821_v9 = vpop.permute.xlu1 %3993  ;;  %v6823_v8 = vpop.permute.xlu0 %3988  ;;  %2537 = vmatpush.msra.mxu1 %v2234_v22  ;;  %v2232_v22 = vsel %vm373_vm4, %v3895_v36, %v3896_v58  ;;  %v2207_v36 = vsel %vm344_vm5, %v3890_v52, %v3891_v3 }
 0x2df   : > { %v7250_v20 = vunpack.i.h.bf16 %v6821_v9  ;;  %v3995_v27 = vunpack.i.l.bf16 %v6821_v9  ;;  %v7248_v38 = vunpack.i.h.bf16 %v6823_v8  ;;  %v3990_v37 = vunpack.i.l.bf16 %v6823_v8 }
 0x2e0   : > { %2538 = vmatpush.msra.mxu1 %v2233_v41  ;;  %v6848_v41 = vpop.permute.xlu2 %4013 }
 0x2e1   : > { %v2345_v4 = vsel %vm489_vm8, %v3990_v37, %v7248_v38  ;;  %v2458_v23 = vsel %vm605_vm12, %v3995_v27, %v7250_v20  ;;  %v3876_v37 = vunpack.i.h.bf16 %v6607_v60  ;;  %v3875_v38 = vunpack.i.l.bf16 %v6607_v60 }
 0x2e2   : > { %2539 = vmatpush.msra.mxu1 %v2232_v22  ;;  %2558 = vmatpush.msra.mxu2 %v2345_v4  ;;  %v2206_v27 = vsel %vm344_vm5, %v3885_v32, %v3886_v6  ;;  %v2205_v4 = vsel %vm344_vm5, %v3880_v28, %v3881_v39 }
 0x2e3   : > { %2577 = vmatpush.msra.mxu3 %v2458_v23  ;;  %v3871_v23 = vunpack.i.h.bf16 %v6609_v57 }
 0x2e4   : > { %2540 = vmatpush.msra.mxu1 %v2207_v36  ;;  %2559 = vmatpush.msra.mxu2 %v2344_v25  ;;  %v7258_v25 = vunpack.i.h.bf16 %v6848_v41  ;;  %v4015_v36 = vunpack.i.l.bf16 %v6848_v41 }
 0x2e6   : > { %v6863_v22 = vpop.permute.xlu1 %4008  ;;  %v6865_v52 = vpop.permute.xlu0 %4003  ;;  %2541 = vmatpush.msra.mxu1 %v2206_v27  ;;  %v2204_v27 = vsel %vm344_vm5, %v3875_v38, %v3876_v37  ;;  %v2179_v38 = vsel %vm315_vm6, %v3870_v7, %v3871_v23  ;;  %v2177_v7 = vsel %vm315_vm6, %v3860_v53, %v3861_v40 }
 0x2e7   : > { %v7257_v61 = vunpack.i.h.bf16 %v6863_v22  ;;  %v4010_v32 = vunpack.i.l.bf16 %v6863_v22  ;;  %v7259_v20 = vunpack.i.h.bf16 %v6865_v52  ;;  %v4005_v28 = vunpack.i.l.bf16 %v6865_v52 }
 0x2e8   : > { %2542 = vmatpush.msra.mxu1 %v2205_v4  ;;  %v2456_v4 = vsel %vm605_vm12, %v4015_v36, %v7258_v25  ;;  %v7561_v16 = vunpack.i.h.bf16 %v6863_v22 }
 0x2e9   : > { %v2319_v10 = vsel %vm460_vm10, %v4010_v32, %v7257_v61  ;;  %v2457_v34 = vsel %vm605_vm12, %v4005_v28, %v7259_v20  ;;  %v6892_v32 = vpop.permute.xlu2 %4028  ;;  %v2178_v28 = vsel %vm315_vm6, %v3865_v17, %v3866_v48  ;;  %v3856_v61 = vunpack.i.h.bf16 %v6571_v31 }
 0x2ea   : > { %2543 = vmatpush.msra.mxu1 %v2204_v27  ;;  %2560 = vmatpush.msra.mxu2 %v2319_v10  ;;  %v3855_v10 = vunpack.i.l.bf16 %v6571_v31  ;;  %v4031_v27 = vunpack.i.h.bf16 %v6892_v32  ;;  %v7548_v31 = vunpack.i.h.bf16 %v6674_v62  ;;  %v7555_v62 = vunpack.i.h.bf16 %v6789_v59 }
 0x2eb   : > { %2578 = vmatpush.msra.mxu3 %v2457_v34  ;;  %v4030_v34 = vunpack.i.l.bf16 %v6892_v32  ;;  %v7562_v59 = vunpack.i.h.bf16 %v6848_v41 }
 0x2ec   : > { %2544 = vmatpush.msra.mxu1 %v2179_v38  ;;  %v2176_v51 = vsel %vm315_vm6, %v3855_v10, %v3856_v61 }
 0x2ed   : > { %2579 = vmatpush.msra.mxu3 %v2456_v4  ;;  %v2317_v44 = vsel %vm460_vm10, %v4030_v34, %v4031_v27  ;;  %v6936_v34 = vld.sshfl [vmem:[#allocation1 + $0x8] sm:$0xff pattern:$0x75316420] }
 0x2ee   : > { %v6901_v36 = vpop.permute.xlu1 %4023  ;;  %v6903_v25 = vpop.permute.xlu0 %4018  ;;  %2545 = vmatpush.msra.mxu1 %v2178_v28 }
 0x2ef   : > { %v7262_v17 = vunpack.i.h.bf16 %v6901_v36  ;;  %v4025_v38 = vunpack.i.l.bf16 %v6901_v36  ;;  %v4021_v20 = vunpack.i.h.bf16 %v6903_v25  ;;  %v4020_v4 = vunpack.i.l.bf16 %v6903_v25 }
 0x2f0   : > { %2546 = vmatpush.msra.mxu1 %v2177_v7 }
 0x2f1   : > { %v2318_v28 = vsel %vm460_vm10, %v4020_v4, %v4021_v20  ;;  %v2431_v53 = vsel %vm576_vm13, %v4025_v38, %v7262_v17  ;;  %v6926_v10 = vpop.permute.xlu2 %4043 }
 0x2f2   : > { %2547 = vmatpush.msra.mxu1 %v2176_v51  ;;  %2561 = vmatpush.msra.mxu2 %v2318_v28  ;;  %v4046_v7 = vunpack.i.h.bf16 %v6926_v10  ;;  %v4045_v38 = vunpack.i.l.bf16 %v6926_v10  ;;  %v2504_v51 = vld.sshfl [vmem:[#allocation1] sm:$0xff pattern:$0x75316420] }
 0x2f3   : > { %2580 = vmatpush.msra.mxu3 %v2431_v53  ;;  %2528 = vmatmul.f32.vlgmr.msra.gmra.mxu0 %v2504_v51 }
 0x2f4   : > { %2612 = vmatpush.msrb.mxu1 %v3931_v30  ;;  %2562 = vmatpush.msra.mxu2 %v2317_v44  ;;  %v2429_v53 = vsel %vm576_vm13, %v4045_v38, %v4046_v7 }
 0x2f5   : > { %2548 = vmatmul.f32.vlgmr.msra.gmra.mxu1 %v6936_v34 }
 0x2f6   : > { %2613 = vmatpush.msrb.mxu1 %v3946_v18  ;;  %v6932_v4 = vpop.permute.xlu1 %4038  ;;  %v6934_v17 = vpop.permute.xlu0 %4033 }
 0x2f7   : > { %v4041_v26 = vunpack.i.h.bf16 %v6932_v4  ;;  %v4040_v44 = vunpack.i.l.bf16 %v6932_v4  ;;  %v4036_v30 = vunpack.i.h.bf16 %v6934_v17  ;;  %v4035_v55 = vunpack.i.l.bf16 %v6934_v17 }
 0x2f8   : > { %2614 = vmatpush.msrb.mxu1 %v3961_v54 }
 0x2f9   : > { %v2316_v18 = vsel %vm460_vm10, %v4040_v44, %v4041_v26  ;;  %v2430_v28 = vsel %vm576_vm13, %v4035_v55, %v4036_v30  ;;  %v6958_v13 = vpop.permute.xlu2 %4058 }
 0x2fa   : > { %2615 = vmatpush.msrb.mxu1 %v3976_v46  ;;  %2563 = vmatpush.msra.mxu2 %v2316_v18  ;;  %v4061_v54 = vunpack.i.h.bf16 %v6958_v13  ;;  %v4060_v12 = vunpack.i.l.bf16 %v6958_v13 }
 0x2fb   : > { %2581 = vmatpush.msra.mxu3 %v2430_v28  ;;  %2608 = vmatmul.f32.vlgmr.msrb.gmra.mxu0 %v2504_v51 }
 0x2fc   : > { %2616 = vmatpush.msrb.mxu1 %v3911_v2  ;;  %v2290_v18 = vsel %vm431_vm11, %v4060_v12, %v4061_v54 }
 0x2fd   : > { %2582 = vmatpush.msra.mxu3 %v2429_v53 }
 0x2fe   : > { %2617 = vmatpush.msrb.mxu1 %v3906_v0  ;;  %v6964_v46 = vpop.permute.xlu1 %4053  ;;  %v6966_v44 = vpop.permute.xlu0 %4048 }
 0x2ff   : > { %v4056_v38 = vunpack.i.h.bf16 %v6964_v46  ;;  %v4055_v55 = vunpack.i.l.bf16 %v6964_v46  ;;  %v4051_v45 = vunpack.i.h.bf16 %v6966_v44  ;;  %v4050_v2 = vunpack.i.l.bf16 %v6966_v44 }
 0x300   : > { %2618 = vmatpush.msrb.mxu1 %v3901_v42 }
 0x301   : > { %v2291_v19 = vsel %vm431_vm11, %v4050_v2, %v4051_v45  ;;  %v2428_v0 = vsel %vm576_vm13, %v4055_v55, %v4056_v38  ;;  %v6987_v15 = vpop.permute.xlu2 %4073  ;;  %v4172_v55 = vmov 0  }
 0x302   : > { %2619 = vmatpush.msrb.mxu1 %v3896_v58  ;;  %2564 = vmatpush.msra.mxu2 %v2291_v19  ;;  %v4076_v29 = vunpack.i.h.bf16 %v6987_v15  ;;  %v4075_v42 = vunpack.i.l.bf16 %v6987_v15 }
 0x303   : > { %2583 = vmatpush.msra.mxu3 %v2428_v0  ;;  %4092 = vset.pattern.permute.xlu0 %v4172_v55 }
 0x304   : > { %2620 = vmatpush.msrb.mxu1 %v3891_v3  ;;  %2565 = vmatpush.msra.mxu2 %v2290_v18  ;;  %v2402_v12 = vsel %vm547_vm14, %v4075_v42, %v4076_v29 }
 0x305   : > { %2677 = vperm.xlu0 %4092, %v2674_v5  }
 0x306   : > { %2621 = vmatpush.msrb.mxu1 %v3886_v6  ;;  %v6993_v58 = vpop.permute.xlu1 %4068  ;;  %v6995_v51 = vpop.permute.xlu0 %4063 }
 0x307   : > { %v4071_v28 = vunpack.i.h.bf16 %v6993_v58  ;;  %v4070_v53 = vunpack.i.l.bf16 %v6993_v58  ;;  %v4066_v24 = vunpack.i.h.bf16 %v6995_v51  ;;  %v4065_v3 = vunpack.i.l.bf16 %v6995_v51 }
 0x308   : > { %2622 = vmatpush.msrb.mxu1 %v3881_v39 }
 0x309   : > { %v2289_v50 = vsel %vm431_vm11, %v4070_v53, %v4071_v28  ;;  %v2403_v6 = vsel %vm547_vm14, %v4065_v3, %v4066_v24  ;;  %v4089_v60 = vpop.permute.xlu2 %4088  ;;  %v2506_v3 = vld.sshfl [vmem:[#allocation1 + $0x10] sm:$0xff pattern:$0x75316420] }
 0x30a   : > { %2623 = vmatpush.msrb.mxu1 %v3876_v37  ;;  %2566 = vmatpush.msra.mxu2 %v2289_v50  ;;  %v4091_v39 = vunpack.i.h.bf16 %v4089_v60  ;;  %v4090_v37 = vunpack.i.l.bf16 %v4089_v60  ;;  %v7546_v50 = vunpack.i.h.bf16 %v6685_v56  ;;  %v7552_v56 = vunpack.i.h.bf16 %v6730_v35 }
 0x30b   : > { %2584 = vmatpush.msra.mxu3 %v2403_v6  ;;  %v7551_v6 = vunpack.i.h.bf16 %v6741_v1  ;;  %v7558_v1 = vunpack.i.h.bf16 %v6821_v9  ;;  %v7559_v35 = vunpack.i.h.bf16 %v6807_v43  ;;  %v1122_v43 = vpop.f32.mrf.mxu0  ;;  %v1142_v9 = vpop.f32.mrf.mxu1 }
 0x30c   : > { %2624 = vmatpush.msrb.mxu1 %v3871_v23  ;;  %v2507_v23 = vld.sshfl [vmem:[#allocation1 + $0x18] sm:$0xff pattern:$0x75316420]  ;;  %v1143_v46 = vadd.f32 %v1142_v9, %v1122_v43 }
 0x30d   : > { %2585 = vmatpush.msra.mxu3 %v2402_v12 }
 0x30e   : > { %2625 = vmatpush.msrb.mxu1 %v3866_v48  ;;  %v4084_v2 = vpop.permute.xlu1 %4083  ;;  %v4079_v19 = vpop.permute.xlu0 %4078  ;;  %v2400_v48 = vsel %vm547_vm14, %v4090_v37, %v4091_v39 }
 0x30f   : > { %v4086_v0 = vunpack.i.h.bf16 %v4084_v2  ;;  %v4085_v18 = vunpack.i.l.bf16 %v4084_v2  ;;  %v4081_v42 = vunpack.i.h.bf16 %v4079_v19  ;;  %v4080_v53 = vunpack.i.l.bf16 %v4079_v19 }
 0x310   : > { %2626 = vmatpush.msrb.mxu1 %v3861_v40  ;;  %v7549_v40 = vunpack.i.h.bf16 %v6712_v21  ;;  %v7556_v21 = vunpack.i.h.bf16 %v6780_v63  ;;  %v7563_v63 = vunpack.i.h.bf16 %v6901_v36 }
 0x311   : > { %v2288_v57 = vsel %vm431_vm11, %v4080_v53, %v4081_v42  ;;  %v2401_v11 = vsel %vm547_vm14, %v4085_v18, %v4086_v0 }
 0x312   : > { %2627 = vmatpush.msrb.mxu1 %v3856_v61  ;;  %2567 = vmatpush.msra.mxu2 %v2288_v57  ;;  %v7550_v61 = vunpack.i.h.bf16 %v6700_v49  ;;  %v7557_v49 = vunpack.i.h.bf16 %v6823_v8  ;;  %v1162_v8 = vpop.f32.mrf.mxu2 }
 0x313   : > { %2586 = vmatpush.msra.mxu3 %v2401_v11  ;;  %2568 = vmatmul.f32.vlgmr.msra.gmra.mxu2 %v2506_v3  ;;  %v1202_v41 = vpop.f32.mrf.mxu0  ;;  %v1222_v22 = vpop.f32.mrf.mxu1 }
 0x314   : > { %2628 = vmatmul.f32.vlgmr.msrb.gmra.mxu1 %v6936_v34  ;;  %2632 = vmatpush.msrb.mxu2 %v7546_v50  ;;  %v7553_v34 = vunpack.i.h.bf16 %v6766_v47  ;;  %v7560_v47 = vunpack.i.h.bf16 %v6865_v52  ;;  %v1223_v44 = vadd.f32 %v1222_v22, %v1202_v41 }
 0x315   : > { %2587 = vmatpush.msra.mxu3 %v2400_v48 }
 0x316   : > { %2588 = vmatmul.f32.vlgmr.msra.gmra.mxu3 %v2507_v23  ;;  %2633 = vmatpush.msrb.mxu2 %v7547_v33 }
 0x317   : > { %2652 = vmatpush.msrb.mxu3 %v7548_v31 }
 0x318   : > { %2634 = vmatpush.msrb.mxu2 %v7549_v40 }
 0x319   : > { %2653 = vmatpush.msrb.mxu3 %v7550_v61 }
 0x31a   : > { %2635 = vmatpush.msrb.mxu2 %v7551_v6  ;;  %v1242_v52 = vpop.f32.mrf.mxu2 }
 0x31b   : > { %2654 = vmatpush.msrb.mxu3 %v7552_v56  ;;  %v1295_v32 = vpop.f32.mrf.mxu0  ;;  %v1243_v58 = vadd.f32 %v1242_v52, %v1223_v44 }
 0x31c   : > { %2636 = vmatpush.msrb.mxu2 %v7553_v34 }
 0x31d   : > { %2655 = vmatpush.msrb.mxu3 %v7554_v14 }
 0x31e   : > { %2637 = vmatpush.msrb.mxu2 %v7555_v62 }
 0x31f   : > { %2656 = vmatpush.msrb.mxu3 %v7556_v21 }
 0x320   : > { %2638 = vmatpush.msrb.mxu2 %v7557_v49 }
 0x321   : > { %2657 = vmatpush.msrb.mxu3 %v7558_v1 }
 0x322   : > { %2639 = vmatpush.msrb.mxu2 %v7559_v35  ;;  %v1335_v36 = vpop.f32.mrf.mxu2 }
 0x323   : > { %2658 = vmatpush.msrb.mxu3 %v7560_v47  ;;  %v1375_v10 = vpop.f32.mrf.mxu0 }
 0x324   : > { %2640 = vmatpush.msrb.mxu2 %v7561_v16 }
 0x325   : > { %2659 = vmatpush.msrb.mxu3 %v7562_v59 }
 0x326   : > { %2641 = vmatpush.msrb.mxu2 %v4021_v20  ;;  %v1182_v20 = vpop.f32.mrf.mxu3 }
 0x327   : > { %2660 = vmatpush.msrb.mxu3 %v7563_v63 }
 0x328   : > { %2642 = vmatpush.msrb.mxu2 %v4031_v27  ;;  %v1315_v27 = vpop.f32.mrf.mxu1 }
 0x329   : > { %2661 = vmatpush.msrb.mxu3 %v4036_v30 }
 0x32a   : > { %2643 = vmatpush.msrb.mxu2 %v4041_v26  ;;  %v1415_v4 = vpop.f32.mrf.mxu2 }
 0x32b   : > { %2662 = vmatpush.msrb.mxu3 %v4046_v7  ;;  %v1911_v30 = vpop.f32.mrf.mxu0 }
 0x32c   : > { %2644 = vmatpush.msrb.mxu2 %v4051_v45 }
 0x32d   : > { %2663 = vmatpush.msrb.mxu3 %v4056_v38 }
 0x32e   : > { %2645 = vmatpush.msrb.mxu2 %v4061_v54  ;;  %v1262_v25 = vpop.f32.mrf.mxu3 }
 0x32f   : > { %2664 = vmatpush.msrb.mxu3 %v4066_v24  ;;  %v1263_v24 = vadd.f32 %v1262_v25, %v1243_v58 }
 0x330   : > { %2646 = vmatpush.msrb.mxu2 %v4071_v28  ;;  %v1395_v7 = vpop.f32.mrf.mxu1 }
 0x331   : > { %2665 = vmatpush.msrb.mxu3 %v4076_v29  ;;  %v1163_v29 = vadd.f32 %v1162_v8, %v1143_v46 }
 0x332   : > { %2647 = vmatpush.msrb.mxu2 %v4081_v42  ;;  %v1951_v54 = vpop.f32.mrf.mxu2 }
 0x333   : > { %2666 = vmatpush.msrb.mxu3 %v4086_v0  ;;  %2648 = vmatmul.f32.vlgmr.msrb.gmra.mxu2 %v2506_v3  ;;  %v1991_v38 = vpop.f32.mrf.mxu0  ;;  %v1183_v28 = vadd.f32 %v1182_v20, %v1163_v29 }
 0x335   : > { %2667 = vmatpush.msrb.mxu3 %v4091_v39  ;;  %v1296_v60 = vadd.f32 %v1295_v32, %v1183_v28  ;;  %v1376_v39 = vadd.f32 %v1375_v10, %v1263_v24 }
 0x336   : > { %2668 = vmatmul.f32.vlgmr.msrb.gmra.mxu3 %v2507_v23  ;;  %v1355_v17 = vpop.f32.mrf.mxu3 }
 0x337   : > { %v1316_v0 = vadd.f32 %v1315_v27, %v1296_v60  ;;  %v1396_v18 = vadd.f32 %v1395_v7, %v1376_v39 }
 0x338   : > { %v1931_v13 = vpop.f32.mrf.mxu1 }
 0x339   : > { %v1932_v37 = vadd.f32 %v1931_v13, %v1911_v30  ;;  %v1336_v23 = vadd.f32 %v1335_v36, %v1316_v0  ;;  %v1416_v50 = vadd.f32 %v1415_v4, %v1396_v18 }
 0x33a   : > { %v2031_v51 = vpop.f32.mrf.mxu2 }
 0x33b   : > { %v1952_v11 = vadd.f32 %v1951_v54, %v1932_v37  ;;  %v1356_v56 = vadd.f32 %v1355_v17, %v1336_v23 }
 0x33e   : > { %v1435_v26 = vpop.f32.mrf.mxu3 }
 0x33f   : > { %v1436_v34 = vadd.f32 %v1435_v26, %v1416_v50 }
 0x340   : > { %v2011_v15 = vpop.f32.mrf.mxu1 }
 0x341   : > { %v2012_v2 = vadd.f32 %v2011_v15, %v1991_v38 }
 0x343   : > { %v2032_v48 = vadd.f32 %v2031_v51, %v2012_v2 }
 0x346   : > { %v1971_v45 = vpop.f32.mrf.mxu3 }
 0x347   : > { %v1972_v40 = vadd.f32 %v1971_v45, %v1952_v11 }
 0x349   : > { %v2054_v49 = vadd.f32 %v1972_v40, %v1356_v56 }
 0x34e   : > { %v2051_v55 = vpop.f32.mrf.mxu3 }
 0x34f   : > { %v2052_v61 = vadd.f32 %v2051_v55, %v2032_v48 }
 0x351   : > { %v2055_v1 = vadd.f32 %v2052_v61, %v1436_v34 }
 0x370   : > { %v2529_v12 = vpop.f32.mrf.mxu0 }
 0x372   : > { %v2549_v5 = vpop.f32.mrf.mxu1 }
 0x373   : > { %v2550_v42 = vadd.f32 %v2549_v5, %v2529_v12 }
 0x377   : > { %v2678_v59 = vpop.permute.xlu0 %2677 }
 0x378   : > { %v2609_v53 = vpop.f32.mrf.mxu0 }
 0x391   : > { %v2629_v57 = vpop.f32.mrf.mxu1 }
 0x392   : > { %v2630_v31 = vadd.f32 %v2629_v57, %v2609_v53 }
 0x396   : > { %v2569_v19 = vpop.f32.mrf.mxu2 }
 0x397   : > { %v2570_v33 = vadd.f32 %v2569_v19, %v2550_v42 }
 0x399   : > { %v2589_v3 = vpop.f32.mrf.mxu3 }
 0x39a   : > { %v2590_v14 = vadd.f32 %v2589_v3, %v2570_v33 }
 0x39c   : > { %v2672_v47 = vadd.f32 %v2590_v14, %v2054_v49 }
 0x39e   : > { %v2680_v43 = vadd.f32 %v2678_v59, %v2672_v47 }
 0x3b6   : > { %v2649_v6 = vpop.f32.mrf.mxu2 }
 0x3b7   : > { %v2650_v62 = vadd.f32 %v2649_v6, %v2630_v31 }
 0x3b9   : > { %v2669_v21 = vpop.f32.mrf.mxu3 }
 0x3ba   : > { %v2670_v35 = vadd.f32 %v2669_v21, %v2650_v62 }
 0x3bc   : > { %v2673_v16 = vadd.f32 %v2670_v35, %v2055_v1 }
 0x3be   : > { %v2681_v63 = vadd.f32 %v2678_v59, %v2673_v16 }
 0x3c0   : > { %v2684_v9 = vrot.slane %v2681_v63, 4 }
 0x3c2   : > { %v2686_v8 = vsel %vm2685_vm15, %v2680_v43, %v2684_v9 }
 0x3c3   : > { %2690 = vst.msk [vmem:[%s192_s12] sm:$0xff] %vm2689_vm1, %v2686_v8 }
 0x3c4 PF: > { %s13_s16 = sadd.s32 1, %s4155_s16   ;;  %s7564_s12 = smov %s4147_s14 }
 0x3c5   : > { %p10_p7 = scmp.ge.s32.totalorder %s13_s16, 26   ;;  %s7565_s13 = smov %s4151_s15 }
 0x3c6   : > { %s7566_s14 = smov %s7569_s17  ;;  %s7567_s15 = smov %s7573_s18 }
 0x3c7   :  { %12 = sbr.rel (!%p10_p7) target bundleno = 3 (0x3), region = 73 }

// kernel: decoder_forward_pallas.12
= control target key start
LH: loop header
LB: loop body
LE: loop exit
PB: predicated region body
PF: predicated region fallthrough
CT: control target
= control target key end

     0   :  { %s995_s15 = smov 0   ;;  %s997_s16 = smov 0   ;;  %s1128_s0 = inlined_call_operand.vmem [shape: f32[2,14,8,196], index: 0, kind: input, shape index: {}]   ;;  %s1129_s1 = inlined_call_operand.vmem [shape: f32[1,3,8,72], index: 1, kind: input, shape index: {}]   ;;  %s1130_s2 = inlined_call_operand.vmem [shape: f32[8,1], index: 2, kind: input, shape index: {}]   ;;  %s1131_s3 = inlined_call_operand.vmem [shape: f32[2,12,8,168], index: 3, kind: input, shape index: {}]   ;;  %s1132_s4 = inlined_call_operand.vmem [shape: f32[2,12,8,168], index: 4, kind: output, shape index: {}]  }
   0x1   :  { %s999_s17 = smov 0   ;;  %s1001_s18 = smov 0  }
   0x2   :  { %s1003_s19 = smov 0  }
   0x3 LB: > { %s23_s20 = sadd.s32 1, %s951_s17  ;;  %s26_s21 = sadd.s32 1, %s955_s18  ;;  %s959_s19 = sphi %s1003_s19, %s14_s19   ;;  %s955_s18 = sphi %s1001_s18, %s1136_s18   ;;  %s951_s17 = sphi %s999_s17, %s1135_s17   ;;  %s947_s16 = sphi %s997_s16, %s1134_s16   ;;  %s943_s15 = sphi %s995_s15, %s1133_s15  }
   0x4   : > { %p24_p0 = scmp.ge.s32.totalorder %s23_s20, 12  ;;  %p724_p1 = scmp.ge.s32.totalorder %s959_s19, 1 }
   0x5   : > { %p192_p2 = scmp.lt.s32.totalorder %s959_s19, 25 }
   0x6   : > { %s1138_s20 = smov (%p24_p0, %s23_s20), 0  ;;  %s1140_s21 = smov (!%p24_p0, %s26_s21), %s955_s18 }
   0x7   : > { %p193_p3 = pnand %p724_p1, %p192_p2  ;;  %p28_p4 = scmp.ge.s32.totalorder %s1140_s21, 2 }
   0x8   : > { %p231_p5 = scmp.lt.s32.totalorder (!%p193_p3), %s947_s16, 1  ;;  %s748_s23 = sshll.u32 (!%p193_p3), %s943_s15, 4 }
   0x9   : > { %s1142_s21 = smov (%p28_p4, %s1140_s21), 0  ;;  %196 = sbr.rel (%p193_p3) target bundleno = 342 (0x156), region = 36 }
   0xa   : > { %s961_s28 = smov (!%p193_p3), 98   ;;  %s962_s29 = smov (!%p193_p3), 99  }
   0xb   : > { %s963_s30 = smov (!%p193_p3), 100   ;;  %s964_s5 = smov (!%p193_p3), 112  }
   0xc   : > { %s965_s6 = smov (!%p193_p3), 113   ;;  %s966_s7 = smov (!%p193_p3), 114  }
   0xd   : > { %s967_s8 = smov (!%p193_p3), 126   ;;  %s968_s9 = smov (!%p193_p3), 127  }
   0xe   : > { %s1144_s16 = smov (!%p231_p5, %s947_s16), 1  ;;  %vm321_vm0 = vcmask 801792   ;;  %vm313_vm1 = vcmask 809984   ;;  %vm305_vm2 = vcmask 818176   ;;  %vm289_vm3 = vcmask 924672   ;;  %v325_v62 = vld [vmem:[%s1129_s1] sm:$0xff] }
   0xf   : > { %s749_s22 = smul.u32 224, %s1144_s16  ;;  %vm297_vm4 = vcmask 916480   ;;  %vm281_vm5 = vcmask 932864   ;;  %vm273_vm6 = vcmask 1031168   ;;  %vm265_vm7 = vcmask 1039360   ;;  %p238_p6 = scmp.lt.s32.totalorder %s943_s15, 11 }
  0x10   : > { %vm392_vm8 = vcmask 588800   ;;  %s750_s25 = smul.u32 24, %s1144_s16  ;;  %vm603_vm9 = vcmask 310272  }
  0x11   : > { %s235_s26 = scalar_lea.vmem %s1128_s0, %s749_s22  ;;  %s1146_s15 = smov (!%p238_p6, %s943_s15), 11 }
  0x12   : > { %s256_s27 = scalar_lea.vmem %s235_s26, %s748_s23  ;;  %s726_s26 = sshll.u32 %s1146_s15, 1 }
  0x13   : > { %v1034_v0 = vld [vmem:[%s256_s27] sm:$0xff]  ;;  %v1036_v1 = vld [vmem:[%s256_s27 + $0x8] sm:$0xff]  ;;  %v1040_v3 = vld [vmem:[%s256_s27 + $0x10] sm:$0xff] }
  0x14   : > { %v800_v2 = vpack.i.bf16 %v1036_v1, %v1034_v0  ;;  %v1042_v4 = vld [vmem:[%s256_s27 + $0x18] sm:$0xff]  ;;  %v1046_v6 = vld [vmem:[%s256_s27 + $0x20] sm:$0xff]  ;;  %v1048_v7 = vld [vmem:[%s256_s27 + $0x28] sm:$0xff]  ;;  %s242_s27 = sadd.s32 %s750_s25, %s726_s26 }
  0x15   : > { %v805_v5 = vpack.i.bf16 %v1042_v4, %v1040_v3  ;;  %v850_v8 = vpack.i.bf16 %v1048_v7, %v1046_v6 }
  0x16   : > { %801 = vrot.lane.b32.xlu0 %v800_v2, %s961_s28  ;;  %811 = vrot.lane.b32.xlu1 %v800_v2, %s962_s29 }
  0x17   : > { %821 = vrot.lane.b32.xlu2 %v800_v2, %s963_s30 }
  0x1e   : > { %806 = vrot.lane.b32.xlu0 %v805_v5, %s961_s28  ;;  %816 = vrot.lane.b32.xlu1 %v805_v5, %s962_s29 }
  0x1f   : > { %826 = vrot.lane.b32.xlu2 %v805_v5, %s963_s30 }
  0x26   : > { %831 = vrot.lane.b32.xlu0 %v800_v2, %s964_s5  ;;  %836 = vrot.lane.b32.xlu1 %v805_v5, %s964_s5 }
  0x27   : > { %841 = vrot.lane.b32.xlu2 %v800_v2, %s965_s6 }
  0x2e   : > { %846 = vrot.lane.b32.xlu0 %v805_v5, %s965_s6  ;;  %851 = vrot.lane.b32.xlu1 %v850_v8, %s961_s28  ;;  %s727_s28 = sshll.u32 %s242_s27, 3 }
  0x2f   : > { %856 = vrot.lane.b32.xlu2 %v800_v2, %s966_s7 }
  0x36   : > { %861 = vrot.lane.b32.xlu0 %v805_v5, %s966_s7  ;;  %866 = vrot.lane.b32.xlu1 %v850_v8, %s962_s29 }
  0x37   : > { %871 = vrot.lane.b32.xlu2 %v800_v2, %s967_s8 }
  0x3e   : > { %876 = vrot.lane.b32.xlu0 %v805_v5, %s967_s8  ;;  %881 = vrot.lane.b32.xlu1 %v850_v8, %s963_s30 }
  0x3f   : > { %886 = vrot.lane.b32.xlu2 %v800_v2, %s968_s9 }
  0x46   : > { %891 = vrot.lane.b32.xlu0 %v805_v5, %s968_s9  ;;  %896 = vrot.lane.b32.xlu1 %v850_v8, %s964_s5  ;;  %s244_s5 = scalar_lea.vmem %s1131_s3, %s727_s28 }
  0x47   : > { %901 = vrot.lane.b32.xlu2 %v850_v8, %s965_s6  ;;  %s253_s6 = scalar_lea.vmem %s1132_s4, %s727_s28 }
  0x4e   : > { %906 = vrot.lane.b32.xlu0 %v850_v8, %s966_s7  ;;  %911 = vrot.lane.b32.xlu1 %v850_v8, %s967_s8 }
  0x4f   : > { %916 = vrot.lane.b32.xlu2 %v850_v8, %s968_s9 }
  0x71   : > { %v822_v9 = vpop.permute.xlu2 %821 }
  0x72   : > { %v823_v14 = vunpack.i.l.bf16 %v822_v9  ;;  %v824_v15 = vunpack.i.h.bf16 %v822_v9 }
  0x74   : > { %v306_v23 = vsel %vm305_vm2, %v823_v14, %v824_v15 }
  0x79   : > { %v827_v10 = vpop.permute.xlu2 %826 }
  0x7a   : > { %v828_v26 = vunpack.i.l.bf16 %v827_v10  ;;  %v829_v27 = vunpack.i.h.bf16 %v827_v10 }
  0x7c   : > { %v373_v35 = vsel %vm305_vm2, %v828_v26, %v829_v27 }
  0x81   : > { %v1052_v11 = vpop.permute.xlu2 %841 }
  0x82   : > { %v843_v36 = vunpack.i.l.bf16 %v1052_v11  ;;  %v844_v37 = vunpack.i.h.bf16 %v1052_v11 }
  0x84   : > { %v290_v46 = vsel %vm289_vm3, %v843_v36, %v844_v37 }
  0x88   : > { %v802_v12 = vpop.permute.xlu0 %801  ;;  %v812_v13 = vpop.permute.xlu1 %811 }
  0x89   : > { %v803_v16 = vunpack.i.l.bf16 %v802_v12  ;;  %v804_v17 = vunpack.i.h.bf16 %v802_v12  ;;  %v813_v18 = vunpack.i.l.bf16 %v812_v13  ;;  %v814_v19 = vunpack.i.h.bf16 %v812_v13  ;;  %v857_v20 = vpop.permute.xlu2 %856 }
  0x8a   : > { %v858_v40 = vunpack.i.l.bf16 %v857_v20  ;;  %v859_v41 = vunpack.i.h.bf16 %v857_v20  ;;  %v969_v13 = vmov 0  }
  0x8b   : > { %466 = vmatpush.msra.mxu3 %v804_v17  ;;  %v322_v21 = vsel %vm321_vm0, %v803_v16, %v804_v17  ;;  %v314_v22 = vsel %vm313_vm1, %v813_v18, %v814_v19  ;;  %920 = vset.pattern.permute.xlu0 %v969_v13 }
  0x8c   : > { %446 = vmatpush.msra.mxu2 %v322_v21  ;;  %v282_v52 = vsel %vm281_vm5, %v858_v40, %v859_v41 }
  0x8d   : > { %467 = vmatpush.msra.mxu3 %v814_v19 }
  0x8e   : > { %447 = vmatpush.msra.mxu2 %v314_v22 }
  0x8f   : > { %468 = vmatpush.msra.mxu3 %v824_v15 }
  0x90   : > { %v807_v24 = vpop.permute.xlu0 %806  ;;  %448 = vmatpush.msra.mxu2 %v306_v23  ;;  %v817_v25 = vpop.permute.xlu1 %816 }
  0x91   : > { %v808_v28 = vunpack.i.l.bf16 %v807_v24  ;;  %v809_v29 = vunpack.i.h.bf16 %v807_v24  ;;  %v818_v30 = vunpack.i.l.bf16 %v817_v25  ;;  %v819_v31 = vunpack.i.h.bf16 %v817_v25  ;;  %v872_v32 = vpop.permute.xlu2 %871  ;;  %v735_v25 = vld [vmem:[%s1129_s1 + $0x8] sm:$0xff] }
  0x92   : > { %v873_v50 = vunpack.i.l.bf16 %v872_v32  ;;  %v874_v51 = vunpack.i.h.bf16 %v872_v32 }
  0x93   : > { %423 = vmatpush.msra.mxu1 %v809_v29  ;;  %v387_v33 = vsel %vm321_vm0, %v808_v28, %v809_v29  ;;  %v380_v34 = vsel %vm313_vm1, %v818_v30, %v819_v31 }
  0x94   : > { %403 = vmatpush.msra.mxu0 %v387_v33  ;;  %v274_v55 = vsel %vm273_vm6, %v873_v50, %v874_v51 }
  0x95   : > { %424 = vmatpush.msra.mxu1 %v819_v31 }
  0x96   : > { %404 = vmatpush.msra.mxu0 %v380_v34 }
  0x97   : > { %425 = vmatpush.msra.mxu1 %v829_v27 }
  0x98   : > { %v832_v38 = vpop.permute.xlu0 %831  ;;  %405 = vmatpush.msra.mxu0 %v373_v35  ;;  %v837_v39 = vpop.permute.xlu1 %836 }
  0x99   : > { %v833_v42 = vunpack.i.l.bf16 %v832_v38  ;;  %v834_v43 = vunpack.i.h.bf16 %v832_v38  ;;  %v838_v44 = vunpack.i.l.bf16 %v837_v39  ;;  %v839_v45 = vunpack.i.h.bf16 %v837_v39  ;;  %v887_v47 = vpop.permute.xlu2 %886 }
  0x9a   : > { %v888_v53 = vunpack.i.l.bf16 %v887_v47  ;;  %v889_v54 = vunpack.i.h.bf16 %v887_v47  ;;  %v743_v47 = vld [vmem:[%s1129_s1 + $0x10] sm:$0xff] }
  0x9b   : > { %469 = vmatpush.msra.mxu3 %v834_v43  ;;  %v298_v48 = vsel %vm297_vm4, %v833_v42, %v834_v43  ;;  %426 = vmatpush.msra.mxu1 %v839_v45  ;;  %v366_v49 = vsel %vm297_vm4, %v838_v44, %v839_v45 }
  0x9c   : > { %449 = vmatpush.msra.mxu2 %v298_v48  ;;  %406 = vmatpush.msra.mxu0 %v366_v49  ;;  %v266_v60 = vsel %vm265_vm7, %v888_v53, %v889_v54 }
  0x9d   : > { %470 = vmatpush.msra.mxu3 %v844_v37 }
  0x9e   : > { %450 = vmatpush.msra.mxu2 %v290_v46 }
  0x9f   : > { %471 = vmatpush.msra.mxu3 %v859_v41 }
  0xa0   : > { %v847_v56 = vpop.permute.xlu0 %846  ;;  %v852_v57 = vpop.permute.xlu1 %851  ;;  %451 = vmatpush.msra.mxu2 %v282_v52 }
  0xa1   : > { %v848_v58 = vunpack.i.l.bf16 %v847_v56  ;;  %v849_v59 = vunpack.i.h.bf16 %v847_v56  ;;  %472 = vmatpush.msra.mxu3 %v874_v51  ;;  %v902_v19 = vpop.permute.xlu2 %901  ;;  %v853_v20 = vunpack.i.l.bf16 %v852_v57  ;;  %v854_v21 = vunpack.i.h.bf16 %v852_v57  ;;  %v599_v57 = vld [vmem:[%s244_s5 + $0x8] sm:$0xff] }
  0xa2   : > { %452 = vmatpush.msra.mxu2 %v274_v55  ;;  %v903_v33 = vunpack.i.l.bf16 %v902_v19  ;;  %v904_v35 = vunpack.i.h.bf16 %v902_v19 }
  0xa3   : > { %427 = vmatpush.msra.mxu1 %v849_v59  ;;  %v359_v61 = vsel %vm289_vm3, %v848_v58, %v849_v59  ;;  %473 = vmatpush.msra.mxu3 %v889_v54  ;;  %v540_v27 = vsel %vm321_vm0, %v853_v20, %v854_v21  ;;  %v598_v58 = vld [vmem:[%s244_s5] sm:$0xff] }
  0xa4   : > { %407 = vmatpush.msra.mxu0 %v359_v61  ;;  %453 = vmatpush.msra.mxu2 %v266_v60  ;;  %v512_v41 = vsel %vm289_vm3, %v903_v33, %v904_v35 }
  0xa5   : > { %474 = vmatpush.msra.mxu3 %v1036_v1  ;;  %v590_v1 = vld [vmem:[%s1130_s2] sm:$0xff] }
  0xa6   : > { %454 = vmatpush.msra.mxu2 %v1034_v0  ;;  %739 = vmatmul.msk.f32.vlgmr.msra.gmra.mxu3 %vm392_vm8, %v325_v62 }
  0xa7   : > { %738 = vmatmul.msk.f32.vlgmr.msra.gmra.mxu2 %vm392_vm8, %v325_v62  ;;  %593 = vperm.xlu0 %920, %v590_v1  }
  0xa8   : > { %v862_v63 = vpop.permute.xlu0 %861  ;;  %v867_v2 = vpop.permute.xlu1 %866 }
  0xa9   : > { %v863_v5 = vunpack.i.l.bf16 %v862_v63  ;;  %v864_v8 = vunpack.i.h.bf16 %v862_v63  ;;  %v868_v23 = vunpack.i.l.bf16 %v867_v2  ;;  %v869_v24 = vunpack.i.h.bf16 %v867_v2  ;;  %v917_v37 = vpop.permute.xlu2 %916 }
  0xaa   : > { %v919_v42 = vunpack.i.h.bf16 %v917_v37  ;;  %v918_v43 = vunpack.i.l.bf16 %v917_v37 }
  0xab   : > { %428 = vmatpush.msra.mxu1 %v864_v8  ;;  %v352_v9 = vsel %vm281_vm5, %v863_v5, %v864_v8  ;;  %v533_v30 = vsel %vm313_vm1, %v868_v23, %v869_v24 }
  0xac   : > { %408 = vmatpush.msra.mxu0 %v352_v9  ;;  %v491_v46 = vsel %vm265_vm7, %v918_v43, %v919_v42 }
  0xb0   : > { %v877_v10 = vpop.permute.xlu0 %876  ;;  %v882_v11 = vpop.permute.xlu1 %881 }
  0xb1   : > { %v878_v12 = vunpack.i.l.bf16 %v877_v10  ;;  %v879_v0 = vunpack.i.h.bf16 %v877_v10  ;;  %v883_v26 = vunpack.i.l.bf16 %v882_v11  ;;  %v884_v28 = vunpack.i.h.bf16 %v882_v11 }
  0xb3   : > { %429 = vmatpush.msra.mxu1 %v879_v0  ;;  %v345_v14 = vsel %vm273_vm6, %v878_v12, %v879_v0 }
  0xb4   : > { %409 = vmatpush.msra.mxu0 %v345_v14 }
  0xb8   : > { %v892_v15 = vpop.permute.xlu0 %891  ;;  %v897_v16 = vpop.permute.xlu1 %896 }
  0xb9   : > { %v893_v17 = vunpack.i.l.bf16 %v892_v15  ;;  %v894_v18 = vunpack.i.h.bf16 %v892_v15  ;;  %v898_v29 = vunpack.i.l.bf16 %v897_v16  ;;  %v899_v31 = vunpack.i.h.bf16 %v897_v16 }
  0xbb   : > { %430 = vmatpush.msra.mxu1 %v894_v18  ;;  %v338_v22 = vsel %vm265_vm7, %v893_v17, %v894_v18  ;;  %v519_v38 = vsel %vm297_vm4, %v898_v29, %v899_v31 }
  0xbc   : > { %410 = vmatpush.msra.mxu0 %v338_v22 }
  0xbd   : > { %431 = vmatpush.msra.mxu1 %v1042_v4 }
  0xbe   : > { %411 = vmatpush.msra.mxu0 %v1040_v3  ;;  %737 = vmatmul.msk.f32.vlgmr.msra.gmra.mxu1 %vm392_vm8, %v735_v25  ;;  %v526_v3 = vsel %vm305_vm2, %v883_v26, %v884_v28 }
  0xbf   : > { %575 = vmatpush.msrb.mxu1 %v854_v21  ;;  %736 = vmatmul.msk.f32.vlgmr.msra.gmra.mxu0 %vm392_vm8, %v735_v25 }
  0xc0   : > { %555 = vmatpush.msrb.mxu0 %v540_v27  ;;  %v907_v32 = vpop.permute.xlu0 %906  ;;  %v912_v4 = vpop.permute.xlu1 %911 }
  0xc1   : > { %576 = vmatpush.msrb.mxu1 %v869_v24  ;;  %v908_v34 = vunpack.i.l.bf16 %v907_v32  ;;  %v909_v36 = vunpack.i.h.bf16 %v907_v32  ;;  %v914_v39 = vunpack.i.h.bf16 %v912_v4  ;;  %v913_v40 = vunpack.i.l.bf16 %v912_v4 }
  0xc2   : > { %556 = vmatpush.msrb.mxu0 %v533_v30 }
  0xc3   : > { %577 = vmatpush.msrb.mxu1 %v884_v28  ;;  %v505_v44 = vsel %vm281_vm5, %v908_v34, %v909_v36  ;;  %v498_v45 = vsel %vm273_vm6, %v913_v40, %v914_v39 }
  0xc4   : > { %557 = vmatpush.msrb.mxu0 %v526_v3 }
  0xc5   : > { %578 = vmatpush.msrb.mxu1 %v899_v31 }
  0xc6   : > { %558 = vmatpush.msrb.mxu0 %v519_v38 }
  0xc7   : > { %579 = vmatpush.msrb.mxu1 %v904_v35 }
  0xc8   : > { %559 = vmatpush.msrb.mxu0 %v512_v41 }
  0xc9   : > { %580 = vmatpush.msrb.mxu1 %v909_v36 }
  0xca   : > { %560 = vmatpush.msrb.mxu0 %v505_v44 }
  0xcb   : > { %581 = vmatpush.msrb.mxu1 %v914_v39 }
  0xcc   : > { %561 = vmatpush.msrb.mxu0 %v498_v45 }
  0xcd   : > { %582 = vmatpush.msrb.mxu1 %v919_v42 }
  0xce   : > { %562 = vmatpush.msrb.mxu0 %v491_v46 }
  0xcf   : > { %583 = vmatpush.msrb.mxu1 %v1048_v7 }
  0xd0   : > { %563 = vmatpush.msrb.mxu0 %v1046_v6  ;;  %745 = vmatmul.msk.f32.vlgmr.msrb.gmra.mxu1 %vm392_vm8, %v743_v47 }
  0xd1   : > { %744 = vmatmul.msk.f32.vlgmr.msrb.gmra.mxu0 %vm392_vm8, %v743_v47 }
 0x119   : > { %v594_v53 = vpop.permute.xlu0 %593 }
 0x129   : > { %v476_v50 = vpop.f32.mrf.mxu3 }
 0x12a   : > { %v456_v51 = vpop.f32.mrf.mxu2 }
 0x13b   : > { %v433_v48 = vpop.f32.mrf.mxu1 }
 0x13c   : > { %v413_v49 = vpop.f32.mrf.mxu0  ;;  %v477_v52 = vadd.f32 %v476_v50, %v433_v48 }
 0x13d   : > { %v457_v6 = vadd.f32 %v456_v51, %v413_v49 }
 0x14d   : > { %v585_v7 = vpop.f32.mrf.mxu1 }
 0x14e   : > { %v589_v54 = vadd.f32 %v585_v7, %v477_v52  ;;  %v565_v55 = vpop.f32.mrf.mxu0 }
 0x14f   : > { %v588_v56 = vadd.f32 %v565_v55, %v457_v6 }
 0x150   : > { %v597_v59 = vadd.f32 %v594_v53, %v589_v54 }
 0x151   : > { %v596_v60 = vadd.f32 %v594_v53, %v588_v56 }
 0x152   : > { %v601_v61 = vadd.f32 %v599_v57, %v597_v59 }
 0x153   : > { %v600_v62 = vadd.f32 %v598_v58, %v596_v60 }
 0x154   : > { %604 = vst.msk [vmem:[%s253_s6 + $0x8] sm:$0xff] %vm603_vm9, %v601_v61 }
 0x155   : > { %602 = vst [vmem:[%s253_s6] sm:$0xff] %v600_v62 }
 0x156 PF: > { %s14_s19 = sadd.s32 1, %s959_s19   ;;  %s1133_s15 = smov %s951_s17 }
 0x157   : > { %p11_p7 = scmp.ge.s32.totalorder %s14_s19, 26   ;;  %s1134_s16 = smov %s955_s18 }
 0x158   : > { %s1135_s17 = smov %s1138_s20  ;;  %s1136_s18 = smov %s1142_s21 }
 0x159   :  { %13 = sbr.rel (!%p11_p7) target bundleno = 3 (0x3), region = 74 }

// kernel: decoder_forward_pallas.13
= control target key start
LH: loop header
LB: loop body
LE: loop exit
PB: predicated region body
PF: predicated region fallthrough
CT: control target
= control target key end

     0   :  { %s902_s12 = smov 0   ;;  %s904_s13 = smov 0   ;;  %s1032_s0 = inlined_call_operand.vmem [shape: f32[2,14,8,196], index: 0, kind: input, shape index: {}]   ;;  %s1033_s1 = inlined_call_operand.vmem [shape: f32[1,3,8,72], index: 1, kind: input, shape index: {}]   ;;  %s1034_s2 = inlined_call_operand.vmem [shape: f32[8,1], index: 2, kind: input, shape index: {}]   ;;  %s1035_s3 = inlined_call_operand.vmem [shape: f32[2,12,8,168], index: 3, kind: output, shape index: {}]  }
   0x1   :  { %s906_s14 = smov 0   ;;  %s908_s15 = smov 0  }
   0x2   :  { %s910_s16 = smov 0  }
   0x3 LB: > { %s22_s17 = sadd.s32 1, %s863_s14  ;;  %s25_s18 = sadd.s32 1, %s867_s15  ;;  %s871_s16 = sphi %s910_s16, %s13_s16   ;;  %s867_s15 = sphi %s908_s15, %s1039_s15   ;;  %s863_s14 = sphi %s906_s14, %s1038_s14   ;;  %s859_s13 = sphi %s904_s13, %s1037_s13   ;;  %s855_s12 = sphi %s902_s12, %s1036_s12  }
   0x4   : > { %p23_p0 = scmp.ge.s32.totalorder %s22_s17, 12  ;;  %p638_p1 = scmp.ge.s32.totalorder %s871_s16, 1 }
   0x5   : > { %p151_p2 = scmp.lt.s32.totalorder %s871_s16, 25 }
   0x6   : > { %s1041_s17 = smov (%p23_p0, %s22_s17), 0  ;;  %s1043_s18 = smov (!%p23_p0, %s25_s18), %s867_s15 }
   0x7   : > { %p152_p3 = pnand %p638_p1, %p151_p2  ;;  %p27_p4 = scmp.ge.s32.totalorder %s1043_s18, 2 }
   0x8   : > { %p179_p5 = scmp.lt.s32.totalorder (!%p152_p3), %s859_s13, 1  ;;  %s660_s20 = sshll.u32 (!%p152_p3), %s855_s12, 4 }
   0x9   : > { %s1045_s18 = smov (%p27_p4, %s1043_s18), 0  ;;  %155 = sbr.rel (%p152_p3) target bundleno = 340 (0x154), region = 32 }
   0xa   : > { %s873_s25 = smov (!%p152_p3), 98   ;;  %s874_s26 = smov (!%p152_p3), 99  }
   0xb   : > { %s875_s27 = smov (!%p152_p3), 100   ;;  %s876_s28 = smov (!%p152_p3), 112  }
   0xc   : > { %s877_s29 = smov (!%p152_p3), 113   ;;  %s878_s30 = smov (!%p152_p3), 114  }
   0xd   : > { %s879_s4 = smov (!%p152_p3), 126   ;;  %s880_s5 = smov (!%p152_p3), 127  }
   0xe   : > { %s1047_s13 = smov (!%p179_p5, %s859_s13), 1  ;;  %vm260_vm0 = vcmask 801792   ;;  %vm252_vm1 = vcmask 809984   ;;  %vm244_vm2 = vcmask 818176   ;;  %vm228_vm3 = vcmask 924672   ;;  %v264_v62 = vld [vmem:[%s1033_s1] sm:$0xff] }
   0xf   : > { %s661_s19 = smul.u32 224, %s1047_s13  ;;  %vm236_vm4 = vcmask 916480   ;;  %vm220_vm5 = vcmask 932864   ;;  %vm212_vm6 = vcmask 1031168   ;;  %vm204_vm7 = vcmask 1039360   ;;  %p186_p6 = scmp.lt.s32.totalorder %s855_s12, 11 }
  0x10   : > { %vm331_vm8 = vcmask 588800   ;;  %s662_s21 = smul.u32 24, %s1047_s13  ;;  %vm538_vm9 = vcmask 310272  }
  0x11   : > { %s183_s23 = scalar_lea.vmem %s1032_s0, %s661_s19  ;;  %s1049_s12 = smov (!%p186_p6, %s855_s12), 11 }
  0x12   : > { %s195_s24 = scalar_lea.vmem %s183_s23, %s660_s20  ;;  %s640_s22 = sshll.u32 %s1049_s12, 1 }
  0x13   : > { %v941_v0 = vld [vmem:[%s195_s24] sm:$0xff]  ;;  %v943_v1 = vld [vmem:[%s195_s24 + $0x8] sm:$0xff]  ;;  %v947_v3 = vld [vmem:[%s195_s24 + $0x10] sm:$0xff]  ;;  %s190_s23 = sadd.s32 %s662_s21, %s640_s22 }
  0x14   : > { %v712_v2 = vpack.i.bf16 %v943_v1, %v941_v0  ;;  %v949_v4 = vld [vmem:[%s195_s24 + $0x18] sm:$0xff]  ;;  %v953_v6 = vld [vmem:[%s195_s24 + $0x20] sm:$0xff]  ;;  %v955_v7 = vld [vmem:[%s195_s24 + $0x28] sm:$0xff]  ;;  %s641_s24 = sshll.u32 %s190_s23, 3 }
  0x15   : > { %v717_v5 = vpack.i.bf16 %v949_v4, %v947_v3  ;;  %v762_v8 = vpack.i.bf16 %v955_v7, %v953_v6 }
  0x16   : > { %713 = vrot.lane.b32.xlu0 %v712_v2, %s873_s25  ;;  %723 = vrot.lane.b32.xlu1 %v712_v2, %s874_s26 }
  0x17   : > { %733 = vrot.lane.b32.xlu2 %v712_v2, %s875_s27 }
  0x1e   : > { %718 = vrot.lane.b32.xlu0 %v717_v5, %s873_s25  ;;  %728 = vrot.lane.b32.xlu1 %v717_v5, %s874_s26 }
  0x1f   : > { %738 = vrot.lane.b32.xlu2 %v717_v5, %s875_s27 }
  0x26   : > { %743 = vrot.lane.b32.xlu0 %v712_v2, %s876_s28  ;;  %748 = vrot.lane.b32.xlu1 %v717_v5, %s876_s28 }
  0x27   : > { %753 = vrot.lane.b32.xlu2 %v712_v2, %s877_s29 }
  0x2e   : > { %758 = vrot.lane.b32.xlu0 %v717_v5, %s877_s29  ;;  %763 = vrot.lane.b32.xlu1 %v762_v8, %s873_s25 }
  0x2f   : > { %768 = vrot.lane.b32.xlu2 %v712_v2, %s878_s30 }
  0x36   : > { %773 = vrot.lane.b32.xlu0 %v717_v5, %s878_s30  ;;  %778 = vrot.lane.b32.xlu1 %v762_v8, %s874_s26 }
  0x37   : > { %783 = vrot.lane.b32.xlu2 %v712_v2, %s879_s4 }
  0x3e   : > { %788 = vrot.lane.b32.xlu0 %v717_v5, %s879_s4  ;;  %793 = vrot.lane.b32.xlu1 %v762_v8, %s875_s27  ;;  %s192_s27 = scalar_lea.vmem %s1035_s3, %s641_s24 }
  0x3f   : > { %798 = vrot.lane.b32.xlu2 %v712_v2, %s880_s5 }
  0x46   : > { %803 = vrot.lane.b32.xlu0 %v717_v5, %s880_s5  ;;  %808 = vrot.lane.b32.xlu1 %v762_v8, %s876_s28 }
  0x47   : > { %813 = vrot.lane.b32.xlu2 %v762_v8, %s877_s29 }
  0x4e   : > { %818 = vrot.lane.b32.xlu0 %v762_v8, %s878_s30  ;;  %823 = vrot.lane.b32.xlu1 %v762_v8, %s879_s4 }
  0x4f   : > { %828 = vrot.lane.b32.xlu2 %v762_v8, %s880_s5 }
  0x71   : > { %v734_v9 = vpop.permute.xlu2 %733 }
  0x72   : > { %v735_v14 = vunpack.i.l.bf16 %v734_v9  ;;  %v736_v15 = vunpack.i.h.bf16 %v734_v9 }
  0x74   : > { %v245_v23 = vsel %vm244_vm2, %v735_v14, %v736_v15 }
  0x79   : > { %v739_v10 = vpop.permute.xlu2 %738 }
  0x7a   : > { %v740_v26 = vunpack.i.l.bf16 %v739_v10  ;;  %v741_v27 = vunpack.i.h.bf16 %v739_v10 }
  0x7c   : > { %v312_v35 = vsel %vm244_vm2, %v740_v26, %v741_v27 }
  0x81   : > { %v959_v11 = vpop.permute.xlu2 %753 }
  0x82   : > { %v755_v36 = vunpack.i.l.bf16 %v959_v11  ;;  %v756_v37 = vunpack.i.h.bf16 %v959_v11 }
  0x84   : > { %v229_v46 = vsel %vm228_vm3, %v755_v36, %v756_v37 }
  0x88   : > { %v714_v12 = vpop.permute.xlu0 %713  ;;  %v724_v13 = vpop.permute.xlu1 %723 }
  0x89   : > { %v715_v16 = vunpack.i.l.bf16 %v714_v12  ;;  %v716_v17 = vunpack.i.h.bf16 %v714_v12  ;;  %v725_v18 = vunpack.i.l.bf16 %v724_v13  ;;  %v726_v19 = vunpack.i.h.bf16 %v724_v13  ;;  %v769_v20 = vpop.permute.xlu2 %768 }
  0x8a   : > { %v770_v40 = vunpack.i.l.bf16 %v769_v20  ;;  %v771_v41 = vunpack.i.h.bf16 %v769_v20  ;;  %v881_v13 = vmov 0  }
  0x8b   : > { %405 = vmatpush.msra.mxu3 %v716_v17  ;;  %v261_v21 = vsel %vm260_vm0, %v715_v16, %v716_v17  ;;  %v253_v22 = vsel %vm252_vm1, %v725_v18, %v726_v19  ;;  %832 = vset.pattern.permute.xlu0 %v881_v13 }
  0x8c   : > { %385 = vmatpush.msra.mxu2 %v261_v21  ;;  %v221_v52 = vsel %vm220_vm5, %v770_v40, %v771_v41 }
  0x8d   : > { %406 = vmatpush.msra.mxu3 %v726_v19 }
  0x8e   : > { %386 = vmatpush.msra.mxu2 %v253_v22 }
  0x8f   : > { %407 = vmatpush.msra.mxu3 %v736_v15 }
  0x90   : > { %v719_v24 = vpop.permute.xlu0 %718  ;;  %387 = vmatpush.msra.mxu2 %v245_v23  ;;  %v729_v25 = vpop.permute.xlu1 %728 }
  0x91   : > { %v720_v28 = vunpack.i.l.bf16 %v719_v24  ;;  %v721_v29 = vunpack.i.h.bf16 %v719_v24  ;;  %v730_v30 = vunpack.i.l.bf16 %v729_v25  ;;  %v731_v31 = vunpack.i.h.bf16 %v729_v25  ;;  %v784_v32 = vpop.permute.xlu2 %783  ;;  %v647_v25 = vld [vmem:[%s1033_s1 + $0x8] sm:$0xff] }
  0x92   : > { %v785_v50 = vunpack.i.l.bf16 %v784_v32  ;;  %v786_v51 = vunpack.i.h.bf16 %v784_v32 }
  0x93   : > { %362 = vmatpush.msra.mxu1 %v721_v29  ;;  %v326_v33 = vsel %vm260_vm0, %v720_v28, %v721_v29  ;;  %v319_v34 = vsel %vm252_vm1, %v730_v30, %v731_v31 }
  0x94   : > { %342 = vmatpush.msra.mxu0 %v326_v33  ;;  %v213_v55 = vsel %vm212_vm6, %v785_v50, %v786_v51 }
  0x95   : > { %363 = vmatpush.msra.mxu1 %v731_v31 }
  0x96   : > { %343 = vmatpush.msra.mxu0 %v319_v34 }
  0x97   : > { %364 = vmatpush.msra.mxu1 %v741_v27 }
  0x98   : > { %v744_v38 = vpop.permute.xlu0 %743  ;;  %344 = vmatpush.msra.mxu0 %v312_v35  ;;  %v749_v39 = vpop.permute.xlu1 %748 }
  0x99   : > { %v745_v42 = vunpack.i.l.bf16 %v744_v38  ;;  %v746_v43 = vunpack.i.h.bf16 %v744_v38  ;;  %v750_v44 = vunpack.i.l.bf16 %v749_v39  ;;  %v751_v45 = vunpack.i.h.bf16 %v749_v39  ;;  %v799_v47 = vpop.permute.xlu2 %798 }
  0x9a   : > { %v800_v53 = vunpack.i.l.bf16 %v799_v47  ;;  %v801_v54 = vunpack.i.h.bf16 %v799_v47  ;;  %v655_v47 = vld [vmem:[%s1033_s1 + $0x10] sm:$0xff] }
  0x9b   : > { %408 = vmatpush.msra.mxu3 %v746_v43  ;;  %v237_v48 = vsel %vm236_vm4, %v745_v42, %v746_v43  ;;  %365 = vmatpush.msra.mxu1 %v751_v45  ;;  %v305_v49 = vsel %vm236_vm4, %v750_v44, %v751_v45 }
  0x9c   : > { %388 = vmatpush.msra.mxu2 %v237_v48  ;;  %345 = vmatpush.msra.mxu0 %v305_v49  ;;  %v205_v60 = vsel %vm204_vm7, %v800_v53, %v801_v54 }
  0x9d   : > { %409 = vmatpush.msra.mxu3 %v756_v37 }
  0x9e   : > { %389 = vmatpush.msra.mxu2 %v229_v46 }
  0x9f   : > { %410 = vmatpush.msra.mxu3 %v771_v41 }
  0xa0   : > { %v759_v56 = vpop.permute.xlu0 %758  ;;  %v764_v57 = vpop.permute.xlu1 %763  ;;  %390 = vmatpush.msra.mxu2 %v221_v52 }
  0xa1   : > { %v760_v58 = vunpack.i.l.bf16 %v759_v56  ;;  %v761_v59 = vunpack.i.h.bf16 %v759_v56  ;;  %411 = vmatpush.msra.mxu3 %v786_v51  ;;  %v814_v19 = vpop.permute.xlu2 %813  ;;  %v765_v20 = vunpack.i.l.bf16 %v764_v57  ;;  %v766_v21 = vunpack.i.h.bf16 %v764_v57 }
  0xa2   : > { %391 = vmatpush.msra.mxu2 %v213_v55  ;;  %v815_v33 = vunpack.i.l.bf16 %v814_v19  ;;  %v816_v35 = vunpack.i.h.bf16 %v814_v19 }
  0xa3   : > { %366 = vmatpush.msra.mxu1 %v761_v59  ;;  %v298_v61 = vsel %vm228_vm3, %v760_v58, %v761_v59  ;;  %412 = vmatpush.msra.mxu3 %v801_v54  ;;  %v479_v27 = vsel %vm260_vm0, %v765_v20, %v766_v21 }
  0xa4   : > { %346 = vmatpush.msra.mxu0 %v298_v61  ;;  %392 = vmatpush.msra.mxu2 %v205_v60  ;;  %v451_v41 = vsel %vm228_vm3, %v815_v33, %v816_v35 }
  0xa5   : > { %413 = vmatpush.msra.mxu3 %v943_v1  ;;  %v529_v1 = vld [vmem:[%s1034_s2] sm:$0xff] }
  0xa6   : > { %393 = vmatpush.msra.mxu2 %v941_v0  ;;  %651 = vmatmul.msk.f32.vlgmr.msra.gmra.mxu3 %vm331_vm8, %v264_v62 }
  0xa7   : > { %650 = vmatmul.msk.f32.vlgmr.msra.gmra.mxu2 %vm331_vm8, %v264_v62  ;;  %532 = vperm.xlu0 %832, %v529_v1  }
  0xa8   : > { %v774_v63 = vpop.permute.xlu0 %773  ;;  %v779_v2 = vpop.permute.xlu1 %778 }
  0xa9   : > { %v775_v5 = vunpack.i.l.bf16 %v774_v63  ;;  %v776_v8 = vunpack.i.h.bf16 %v774_v63  ;;  %v780_v23 = vunpack.i.l.bf16 %v779_v2  ;;  %v781_v24 = vunpack.i.h.bf16 %v779_v2  ;;  %v829_v37 = vpop.permute.xlu2 %828 }
  0xaa   : > { %v831_v42 = vunpack.i.h.bf16 %v829_v37  ;;  %v830_v43 = vunpack.i.l.bf16 %v829_v37 }
  0xab   : > { %367 = vmatpush.msra.mxu1 %v776_v8  ;;  %v291_v9 = vsel %vm220_vm5, %v775_v5, %v776_v8  ;;  %v472_v30 = vsel %vm252_vm1, %v780_v23, %v781_v24 }
  0xac   : > { %347 = vmatpush.msra.mxu0 %v291_v9  ;;  %v430_v46 = vsel %vm204_vm7, %v830_v43, %v831_v42 }
  0xb0   : > { %v789_v10 = vpop.permute.xlu0 %788  ;;  %v794_v11 = vpop.permute.xlu1 %793 }
  0xb1   : > { %v790_v12 = vunpack.i.l.bf16 %v789_v10  ;;  %v791_v0 = vunpack.i.h.bf16 %v789_v10  ;;  %v795_v26 = vunpack.i.l.bf16 %v794_v11  ;;  %v796_v28 = vunpack.i.h.bf16 %v794_v11 }
  0xb3   : > { %368 = vmatpush.msra.mxu1 %v791_v0  ;;  %v284_v14 = vsel %vm212_vm6, %v790_v12, %v791_v0 }
  0xb4   : > { %348 = vmatpush.msra.mxu0 %v284_v14 }
  0xb8   : > { %v804_v15 = vpop.permute.xlu0 %803  ;;  %v809_v16 = vpop.permute.xlu1 %808 }
  0xb9   : > { %v805_v17 = vunpack.i.l.bf16 %v804_v15  ;;  %v806_v18 = vunpack.i.h.bf16 %v804_v15  ;;  %v810_v29 = vunpack.i.l.bf16 %v809_v16  ;;  %v811_v31 = vunpack.i.h.bf16 %v809_v16 }
  0xbb   : > { %369 = vmatpush.msra.mxu1 %v806_v18  ;;  %v277_v22 = vsel %vm204_vm7, %v805_v17, %v806_v18  ;;  %v458_v38 = vsel %vm236_vm4, %v810_v29, %v811_v31 }
  0xbc   : > { %349 = vmatpush.msra.mxu0 %v277_v22 }
  0xbd   : > { %370 = vmatpush.msra.mxu1 %v949_v4 }
  0xbe   : > { %350 = vmatpush.msra.mxu0 %v947_v3  ;;  %649 = vmatmul.msk.f32.vlgmr.msra.gmra.mxu1 %vm331_vm8, %v647_v25  ;;  %v465_v3 = vsel %vm244_vm2, %v795_v26, %v796_v28 }
  0xbf   : > { %514 = vmatpush.msrb.mxu1 %v766_v21  ;;  %648 = vmatmul.msk.f32.vlgmr.msra.gmra.mxu0 %vm331_vm8, %v647_v25 }
  0xc0   : > { %494 = vmatpush.msrb.mxu0 %v479_v27  ;;  %v819_v32 = vpop.permute.xlu0 %818  ;;  %v824_v4 = vpop.permute.xlu1 %823 }
  0xc1   : > { %515 = vmatpush.msrb.mxu1 %v781_v24  ;;  %v820_v34 = vunpack.i.l.bf16 %v819_v32  ;;  %v821_v36 = vunpack.i.h.bf16 %v819_v32  ;;  %v826_v39 = vunpack.i.h.bf16 %v824_v4  ;;  %v825_v40 = vunpack.i.l.bf16 %v824_v4 }
  0xc2   : > { %495 = vmatpush.msrb.mxu0 %v472_v30 }
  0xc3   : > { %516 = vmatpush.msrb.mxu1 %v796_v28  ;;  %v444_v44 = vsel %vm220_vm5, %v820_v34, %v821_v36  ;;  %v437_v45 = vsel %vm212_vm6, %v825_v40, %v826_v39 }
  0xc4   : > { %496 = vmatpush.msrb.mxu0 %v465_v3 }
  0xc5   : > { %517 = vmatpush.msrb.mxu1 %v811_v31 }
  0xc6   : > { %497 = vmatpush.msrb.mxu0 %v458_v38 }
  0xc7   : > { %518 = vmatpush.msrb.mxu1 %v816_v35 }
  0xc8   : > { %498 = vmatpush.msrb.mxu0 %v451_v41 }
  0xc9   : > { %519 = vmatpush.msrb.mxu1 %v821_v36 }
  0xca   : > { %499 = vmatpush.msrb.mxu0 %v444_v44 }
  0xcb   : > { %520 = vmatpush.msrb.mxu1 %v826_v39 }
  0xcc   : > { %500 = vmatpush.msrb.mxu0 %v437_v45 }
  0xcd   : > { %521 = vmatpush.msrb.mxu1 %v831_v42 }
  0xce   : > { %501 = vmatpush.msrb.mxu0 %v430_v46 }
  0xcf   : > { %522 = vmatpush.msrb.mxu1 %v955_v7 }
  0xd0   : > { %502 = vmatpush.msrb.mxu0 %v953_v6  ;;  %657 = vmatmul.msk.f32.vlgmr.msrb.gmra.mxu1 %vm331_vm8, %v655_v47 }
  0xd1   : > { %656 = vmatmul.msk.f32.vlgmr.msrb.gmra.mxu0 %vm331_vm8, %v655_v47 }
 0x119   : > { %v533_v7 = vpop.permute.xlu0 %532 }
 0x129   : > { %v415_v50 = vpop.f32.mrf.mxu3 }
 0x12a   : > { %v395_v51 = vpop.f32.mrf.mxu2 }
 0x13b   : > { %v372_v48 = vpop.f32.mrf.mxu1 }
 0x13c   : > { %v352_v49 = vpop.f32.mrf.mxu0  ;;  %v416_v52 = vadd.f32 %v415_v50, %v372_v48 }
 0x13d   : > { %v396_v53 = vadd.f32 %v395_v51, %v352_v49 }
 0x14d   : > { %v524_v54 = vpop.f32.mrf.mxu1 }
 0x14e   : > { %v528_v55 = vadd.f32 %v524_v54, %v416_v52  ;;  %v504_v6 = vpop.f32.mrf.mxu0 }
 0x14f   : > { %v527_v56 = vadd.f32 %v504_v6, %v396_v53 }
 0x150   : > { %v536_v57 = vadd.f32 %v533_v7, %v528_v55 }
 0x151   : > { %v535_v58 = vadd.f32 %v533_v7, %v527_v56 }
 0x152   : > { %539 = vst.msk [vmem:[%s192_s27 + $0x8] sm:$0xff] %vm538_vm9, %v536_v57 }
 0x153   : > { %537 = vst [vmem:[%s192_s27] sm:$0xff] %v535_v58 }
 0x154 PF: > { %s13_s16 = sadd.s32 1, %s871_s16   ;;  %s1036_s12 = smov %s863_s14 }
 0x155   : > { %p10_p7 = scmp.ge.s32.totalorder %s13_s16, 26   ;;  %s1037_s13 = smov %s867_s15 }
 0x156   : > { %s1038_s14 = smov %s1041_s17  ;;  %s1039_s15 = smov %s1045_s18 }
 0x157   :  { %12 = sbr.rel (!%p10_p7) target bundleno = 3 (0x3), region = 67 }

// kernel: decoder_forward_pallas.14
= control target key start
LH: loop header
LB: loop body
LE: loop exit
PB: predicated region body
PF: predicated region fallthrough
CT: control target
= control target key end

     0   :  { %s908_s12 = smov 0   ;;  %s910_s13 = smov 0   ;;  %s1038_s0 = inlined_call_operand.vmem [shape: f32[2,14,8,196], index: 0, kind: input, shape index: {}]   ;;  %s1039_s1 = inlined_call_operand.vmem [shape: f32[1,3,8,72], index: 1, kind: input, shape index: {}]   ;;  %s1040_s2 = inlined_call_operand.vmem [shape: f32[8,1], index: 2, kind: input, shape index: {}]   ;;  %s1041_s3 = inlined_call_operand.vmem [shape: f32[2,12,8,168], index: 3, kind: output, shape index: {}]  }
   0x1   :  { %s912_s14 = smov 0   ;;  %s914_s15 = smov 0  }
   0x2   :  { %s916_s16 = smov 0  }
   0x3 LB: > { %s22_s17 = sadd.s32 1, %s869_s14  ;;  %s25_s18 = sadd.s32 1, %s873_s15  ;;  %s877_s16 = sphi %s916_s16, %s13_s16   ;;  %s873_s15 = sphi %s914_s15, %s1045_s15   ;;  %s869_s14 = sphi %s912_s14, %s1044_s14   ;;  %s865_s13 = sphi %s910_s13, %s1043_s13   ;;  %s861_s12 = sphi %s908_s12, %s1042_s12  }
   0x4   : > { %p23_p0 = scmp.ge.s32.totalorder %s22_s17, 12  ;;  %p644_p1 = scmp.ge.s32.totalorder %s877_s16, 1 }
   0x5   : > { %p151_p2 = scmp.lt.s32.totalorder %s877_s16, 25 }
   0x6   : > { %s1047_s17 = smov (%p23_p0, %s22_s17), 0  ;;  %s1049_s18 = smov (!%p23_p0, %s25_s18), %s873_s15 }
   0x7   : > { %p152_p3 = pnand %p644_p1, %p151_p2  ;;  %p27_p4 = scmp.ge.s32.totalorder %s1049_s18, 2 }
   0x8   : > { %p179_p5 = scmp.lt.s32.totalorder (!%p152_p3), %s865_s13, 1  ;;  %s666_s20 = sshll.u32 (!%p152_p3), %s861_s12, 4 }
   0x9   : > { %s1051_s18 = smov (%p27_p4, %s1049_s18), 0  ;;  %155 = sbr.rel (%p152_p3) target bundleno = 343 (0x157), region = 32 }
   0xa   : > { %s879_s25 = smov (!%p152_p3), 98   ;;  %s880_s26 = smov (!%p152_p3), 99  }
   0xb   : > { %s881_s27 = smov (!%p152_p3), 100   ;;  %s882_s28 = smov (!%p152_p3), 112  }
   0xc   : > { %s883_s29 = smov (!%p152_p3), 113   ;;  %s884_s30 = smov (!%p152_p3), 114  }
   0xd   : > { %s885_s4 = smov (!%p152_p3), 126   ;;  %s886_s5 = smov (!%p152_p3), 127  }
   0xe   : > { %s1053_s13 = smov (!%p179_p5, %s865_s13), 1  ;;  %vm260_vm0 = vcmask 801792   ;;  %vm252_vm1 = vcmask 809984   ;;  %vm244_vm2 = vcmask 818176   ;;  %vm228_vm3 = vcmask 924672   ;;  %v264_v62 = vld [vmem:[%s1039_s1] sm:$0xff] }
   0xf   : > { %s667_s19 = smul.u32 224, %s1053_s13  ;;  %vm236_vm4 = vcmask 916480   ;;  %vm220_vm5 = vcmask 932864   ;;  %vm212_vm6 = vcmask 1031168   ;;  %vm204_vm7 = vcmask 1039360   ;;  %p186_p6 = scmp.lt.s32.totalorder %s861_s12, 11 }
  0x10   : > { %vm331_vm8 = vcmask 588800   ;;  %s668_s21 = smul.u32 24, %s1053_s13  ;;  %vm544_vm9 = vcmask 310272  }
  0x11   : > { %s183_s23 = scalar_lea.vmem %s1038_s0, %s667_s19  ;;  %s1055_s12 = smov (!%p186_p6, %s861_s12), 11 }
  0x12   : > { %s195_s24 = scalar_lea.vmem %s183_s23, %s666_s20  ;;  %s646_s22 = sshll.u32 %s1055_s12, 1 }
  0x13   : > { %v947_v0 = vld [vmem:[%s195_s24] sm:$0xff]  ;;  %v949_v1 = vld [vmem:[%s195_s24 + $0x8] sm:$0xff]  ;;  %v953_v3 = vld [vmem:[%s195_s24 + $0x10] sm:$0xff]  ;;  %s190_s23 = sadd.s32 %s668_s21, %s646_s22 }
  0x14   : > { %v718_v2 = vpack.i.bf16 %v949_v1, %v947_v0  ;;  %v955_v4 = vld [vmem:[%s195_s24 + $0x18] sm:$0xff]  ;;  %v959_v6 = vld [vmem:[%s195_s24 + $0x20] sm:$0xff]  ;;  %v961_v7 = vld [vmem:[%s195_s24 + $0x28] sm:$0xff]  ;;  %s647_s24 = sshll.u32 %s190_s23, 3 }
  0x15   : > { %v723_v5 = vpack.i.bf16 %v955_v4, %v953_v3  ;;  %v768_v8 = vpack.i.bf16 %v961_v7, %v959_v6 }
  0x16   : > { %719 = vrot.lane.b32.xlu0 %v718_v2, %s879_s25  ;;  %729 = vrot.lane.b32.xlu1 %v718_v2, %s880_s26 }
  0x17   : > { %739 = vrot.lane.b32.xlu2 %v718_v2, %s881_s27 }
  0x1e   : > { %724 = vrot.lane.b32.xlu0 %v723_v5, %s879_s25  ;;  %734 = vrot.lane.b32.xlu1 %v723_v5, %s880_s26 }
  0x1f   : > { %744 = vrot.lane.b32.xlu2 %v723_v5, %s881_s27 }
  0x26   : > { %749 = vrot.lane.b32.xlu0 %v718_v2, %s882_s28  ;;  %754 = vrot.lane.b32.xlu1 %v723_v5, %s882_s28 }
  0x27   : > { %759 = vrot.lane.b32.xlu2 %v718_v2, %s883_s29 }
  0x2e   : > { %764 = vrot.lane.b32.xlu0 %v723_v5, %s883_s29  ;;  %769 = vrot.lane.b32.xlu1 %v768_v8, %s879_s25 }
  0x2f   : > { %774 = vrot.lane.b32.xlu2 %v718_v2, %s884_s30 }
  0x36   : > { %779 = vrot.lane.b32.xlu0 %v723_v5, %s884_s30  ;;  %784 = vrot.lane.b32.xlu1 %v768_v8, %s880_s26 }
  0x37   : > { %789 = vrot.lane.b32.xlu2 %v718_v2, %s885_s4 }
  0x3e   : > { %794 = vrot.lane.b32.xlu0 %v723_v5, %s885_s4  ;;  %799 = vrot.lane.b32.xlu1 %v768_v8, %s881_s27  ;;  %s192_s27 = scalar_lea.vmem %s1041_s3, %s647_s24 }
  0x3f   : > { %804 = vrot.lane.b32.xlu2 %v718_v2, %s886_s5 }
  0x46   : > { %809 = vrot.lane.b32.xlu0 %v723_v5, %s886_s5  ;;  %814 = vrot.lane.b32.xlu1 %v768_v8, %s882_s28 }
  0x47   : > { %819 = vrot.lane.b32.xlu2 %v768_v8, %s883_s29 }
  0x4e   : > { %824 = vrot.lane.b32.xlu0 %v768_v8, %s884_s30  ;;  %829 = vrot.lane.b32.xlu1 %v768_v8, %s885_s4 }
  0x4f   : > { %834 = vrot.lane.b32.xlu2 %v768_v8, %s886_s5 }
  0x71   : > { %v740_v9 = vpop.permute.xlu2 %739 }
  0x72   : > { %v741_v14 = vunpack.i.l.bf16 %v740_v9  ;;  %v742_v15 = vunpack.i.h.bf16 %v740_v9 }
  0x74   : > { %v245_v23 = vsel %vm244_vm2, %v741_v14, %v742_v15 }
  0x79   : > { %v745_v10 = vpop.permute.xlu2 %744 }
  0x7a   : > { %v746_v26 = vunpack.i.l.bf16 %v745_v10  ;;  %v747_v27 = vunpack.i.h.bf16 %v745_v10 }
  0x7c   : > { %v312_v35 = vsel %vm244_vm2, %v746_v26, %v747_v27 }
  0x81   : > { %v965_v11 = vpop.permute.xlu2 %759 }
  0x82   : > { %v761_v36 = vunpack.i.l.bf16 %v965_v11  ;;  %v762_v37 = vunpack.i.h.bf16 %v965_v11 }
  0x84   : > { %v229_v46 = vsel %vm228_vm3, %v761_v36, %v762_v37 }
  0x88   : > { %v720_v12 = vpop.permute.xlu0 %719  ;;  %v730_v13 = vpop.permute.xlu1 %729 }
  0x89   : > { %v721_v16 = vunpack.i.l.bf16 %v720_v12  ;;  %v722_v17 = vunpack.i.h.bf16 %v720_v12  ;;  %v731_v18 = vunpack.i.l.bf16 %v730_v13  ;;  %v732_v19 = vunpack.i.h.bf16 %v730_v13  ;;  %v775_v20 = vpop.permute.xlu2 %774 }
  0x8a   : > { %v776_v40 = vunpack.i.l.bf16 %v775_v20  ;;  %v777_v41 = vunpack.i.h.bf16 %v775_v20  ;;  %v887_v13 = vmov 0  }
  0x8b   : > { %405 = vmatpush.msra.mxu3 %v722_v17  ;;  %v261_v21 = vsel %vm260_vm0, %v721_v16, %v722_v17  ;;  %v253_v22 = vsel %vm252_vm1, %v731_v18, %v732_v19  ;;  %838 = vset.pattern.permute.xlu0 %v887_v13 }
  0x8c   : > { %385 = vmatpush.msra.mxu2 %v261_v21  ;;  %v221_v52 = vsel %vm220_vm5, %v776_v40, %v777_v41 }
  0x8d   : > { %406 = vmatpush.msra.mxu3 %v732_v19 }
  0x8e   : > { %386 = vmatpush.msra.mxu2 %v253_v22 }
  0x8f   : > { %407 = vmatpush.msra.mxu3 %v742_v15 }
  0x90   : > { %v725_v24 = vpop.permute.xlu0 %724  ;;  %387 = vmatpush.msra.mxu2 %v245_v23  ;;  %v735_v25 = vpop.permute.xlu1 %734 }
  0x91   : > { %v726_v28 = vunpack.i.l.bf16 %v725_v24  ;;  %v727_v29 = vunpack.i.h.bf16 %v725_v24  ;;  %v736_v30 = vunpack.i.l.bf16 %v735_v25  ;;  %v737_v31 = vunpack.i.h.bf16 %v735_v25  ;;  %v790_v32 = vpop.permute.xlu2 %789  ;;  %v653_v25 = vld [vmem:[%s1039_s1 + $0x8] sm:$0xff] }
  0x92   : > { %v791_v50 = vunpack.i.l.bf16 %v790_v32  ;;  %v792_v51 = vunpack.i.h.bf16 %v790_v32 }
  0x93   : > { %362 = vmatpush.msra.mxu1 %v727_v29  ;;  %v326_v33 = vsel %vm260_vm0, %v726_v28, %v727_v29  ;;  %v319_v34 = vsel %vm252_vm1, %v736_v30, %v737_v31 }
  0x94   : > { %342 = vmatpush.msra.mxu0 %v326_v33  ;;  %v213_v55 = vsel %vm212_vm6, %v791_v50, %v792_v51 }
  0x95   : > { %363 = vmatpush.msra.mxu1 %v737_v31 }
  0x96   : > { %343 = vmatpush.msra.mxu0 %v319_v34 }
  0x97   : > { %364 = vmatpush.msra.mxu1 %v747_v27 }
  0x98   : > { %v750_v38 = vpop.permute.xlu0 %749  ;;  %344 = vmatpush.msra.mxu0 %v312_v35  ;;  %v755_v39 = vpop.permute.xlu1 %754 }
  0x99   : > { %v751_v42 = vunpack.i.l.bf16 %v750_v38  ;;  %v752_v43 = vunpack.i.h.bf16 %v750_v38  ;;  %v756_v44 = vunpack.i.l.bf16 %v755_v39  ;;  %v757_v45 = vunpack.i.h.bf16 %v755_v39  ;;  %v805_v47 = vpop.permute.xlu2 %804 }
  0x9a   : > { %v806_v53 = vunpack.i.l.bf16 %v805_v47  ;;  %v807_v54 = vunpack.i.h.bf16 %v805_v47  ;;  %v661_v47 = vld [vmem:[%s1039_s1 + $0x10] sm:$0xff] }
  0x9b   : > { %408 = vmatpush.msra.mxu3 %v752_v43  ;;  %v237_v48 = vsel %vm236_vm4, %v751_v42, %v752_v43  ;;  %365 = vmatpush.msra.mxu1 %v757_v45  ;;  %v305_v49 = vsel %vm236_vm4, %v756_v44, %v757_v45 }
  0x9c   : > { %388 = vmatpush.msra.mxu2 %v237_v48  ;;  %345 = vmatpush.msra.mxu0 %v305_v49  ;;  %v205_v60 = vsel %vm204_vm7, %v806_v53, %v807_v54 }
  0x9d   : > { %409 = vmatpush.msra.mxu3 %v762_v37 }
  0x9e   : > { %389 = vmatpush.msra.mxu2 %v229_v46 }
  0x9f   : > { %410 = vmatpush.msra.mxu3 %v777_v41 }
  0xa0   : > { %v765_v56 = vpop.permute.xlu0 %764  ;;  %v770_v57 = vpop.permute.xlu1 %769  ;;  %390 = vmatpush.msra.mxu2 %v221_v52 }
  0xa1   : > { %v766_v58 = vunpack.i.l.bf16 %v765_v56  ;;  %v767_v59 = vunpack.i.h.bf16 %v765_v56  ;;  %411 = vmatpush.msra.mxu3 %v792_v51  ;;  %v820_v19 = vpop.permute.xlu2 %819  ;;  %v771_v20 = vunpack.i.l.bf16 %v770_v57  ;;  %v772_v21 = vunpack.i.h.bf16 %v770_v57 }
  0xa2   : > { %391 = vmatpush.msra.mxu2 %v213_v55  ;;  %v821_v33 = vunpack.i.l.bf16 %v820_v19  ;;  %v822_v35 = vunpack.i.h.bf16 %v820_v19 }
  0xa3   : > { %366 = vmatpush.msra.mxu1 %v767_v59  ;;  %v298_v61 = vsel %vm228_vm3, %v766_v58, %v767_v59  ;;  %412 = vmatpush.msra.mxu3 %v807_v54  ;;  %v479_v27 = vsel %vm260_vm0, %v771_v20, %v772_v21 }
  0xa4   : > { %346 = vmatpush.msra.mxu0 %v298_v61  ;;  %392 = vmatpush.msra.mxu2 %v205_v60  ;;  %v451_v41 = vsel %vm228_vm3, %v821_v33, %v822_v35 }
  0xa5   : > { %413 = vmatpush.msra.mxu3 %v949_v1  ;;  %v529_v1 = vld [vmem:[%s1040_s2] sm:$0xff] }
  0xa6   : > { %393 = vmatpush.msra.mxu2 %v947_v0  ;;  %657 = vmatmul.msk.f32.vlgmr.msra.gmra.mxu3 %vm331_vm8, %v264_v62 }
  0xa7   : > { %656 = vmatmul.msk.f32.vlgmr.msra.gmra.mxu2 %vm331_vm8, %v264_v62  ;;  %532 = vperm.xlu0 %838, %v529_v1  }
  0xa8   : > { %v780_v63 = vpop.permute.xlu0 %779  ;;  %v785_v2 = vpop.permute.xlu1 %784 }
  0xa9   : > { %v781_v5 = vunpack.i.l.bf16 %v780_v63  ;;  %v782_v8 = vunpack.i.h.bf16 %v780_v63  ;;  %v786_v23 = vunpack.i.l.bf16 %v785_v2  ;;  %v787_v24 = vunpack.i.h.bf16 %v785_v2  ;;  %v835_v37 = vpop.permute.xlu2 %834 }
  0xaa   : > { %v837_v42 = vunpack.i.h.bf16 %v835_v37  ;;  %v836_v43 = vunpack.i.l.bf16 %v835_v37 }
  0xab   : > { %367 = vmatpush.msra.mxu1 %v782_v8  ;;  %v291_v9 = vsel %vm220_vm5, %v781_v5, %v782_v8  ;;  %v472_v30 = vsel %vm252_vm1, %v786_v23, %v787_v24 }
  0xac   : > { %347 = vmatpush.msra.mxu0 %v291_v9  ;;  %v430_v46 = vsel %vm204_vm7, %v836_v43, %v837_v42 }
  0xb0   : > { %v795_v10 = vpop.permute.xlu0 %794  ;;  %v800_v11 = vpop.permute.xlu1 %799 }
  0xb1   : > { %v796_v12 = vunpack.i.l.bf16 %v795_v10  ;;  %v797_v0 = vunpack.i.h.bf16 %v795_v10  ;;  %v801_v26 = vunpack.i.l.bf16 %v800_v11  ;;  %v802_v28 = vunpack.i.h.bf16 %v800_v11 }
  0xb3   : > { %368 = vmatpush.msra.mxu1 %v797_v0  ;;  %v284_v14 = vsel %vm212_vm6, %v796_v12, %v797_v0 }
  0xb4   : > { %348 = vmatpush.msra.mxu0 %v284_v14 }
  0xb8   : > { %v810_v15 = vpop.permute.xlu0 %809  ;;  %v815_v16 = vpop.permute.xlu1 %814 }
  0xb9   : > { %v811_v17 = vunpack.i.l.bf16 %v810_v15  ;;  %v812_v18 = vunpack.i.h.bf16 %v810_v15  ;;  %v816_v29 = vunpack.i.l.bf16 %v815_v16  ;;  %v817_v31 = vunpack.i.h.bf16 %v815_v16 }
  0xbb   : > { %369 = vmatpush.msra.mxu1 %v812_v18  ;;  %v277_v22 = vsel %vm204_vm7, %v811_v17, %v812_v18  ;;  %v458_v38 = vsel %vm236_vm4, %v816_v29, %v817_v31 }
  0xbc   : > { %349 = vmatpush.msra.mxu0 %v277_v22 }
  0xbd   : > { %370 = vmatpush.msra.mxu1 %v955_v4 }
  0xbe   : > { %350 = vmatpush.msra.mxu0 %v953_v3  ;;  %655 = vmatmul.msk.f32.vlgmr.msra.gmra.mxu1 %vm331_vm8, %v653_v25  ;;  %v465_v3 = vsel %vm244_vm2, %v801_v26, %v802_v28 }
  0xbf   : > { %514 = vmatpush.msrb.mxu1 %v772_v21  ;;  %654 = vmatmul.msk.f32.vlgmr.msra.gmra.mxu0 %vm331_vm8, %v653_v25 }
  0xc0   : > { %494 = vmatpush.msrb.mxu0 %v479_v27  ;;  %v825_v32 = vpop.permute.xlu0 %824  ;;  %v830_v4 = vpop.permute.xlu1 %829 }
  0xc1   : > { %515 = vmatpush.msrb.mxu1 %v787_v24  ;;  %v826_v34 = vunpack.i.l.bf16 %v825_v32  ;;  %v827_v36 = vunpack.i.h.bf16 %v825_v32  ;;  %v832_v39 = vunpack.i.h.bf16 %v830_v4  ;;  %v831_v40 = vunpack.i.l.bf16 %v830_v4 }
  0xc2   : > { %495 = vmatpush.msrb.mxu0 %v472_v30 }
  0xc3   : > { %516 = vmatpush.msrb.mxu1 %v802_v28  ;;  %v444_v44 = vsel %vm220_vm5, %v826_v34, %v827_v36  ;;  %v437_v45 = vsel %vm212_vm6, %v831_v40, %v832_v39 }
  0xc4   : > { %496 = vmatpush.msrb.mxu0 %v465_v3 }
  0xc5   : > { %517 = vmatpush.msrb.mxu1 %v817_v31 }
  0xc6   : > { %497 = vmatpush.msrb.mxu0 %v458_v38 }
  0xc7   : > { %518 = vmatpush.msrb.mxu1 %v822_v35 }
  0xc8   : > { %498 = vmatpush.msrb.mxu0 %v451_v41 }
  0xc9   : > { %519 = vmatpush.msrb.mxu1 %v827_v36 }
  0xca   : > { %499 = vmatpush.msrb.mxu0 %v444_v44 }
  0xcb   : > { %520 = vmatpush.msrb.mxu1 %v832_v39 }
  0xcc   : > { %500 = vmatpush.msrb.mxu0 %v437_v45 }
  0xcd   : > { %521 = vmatpush.msrb.mxu1 %v837_v42 }
  0xce   : > { %501 = vmatpush.msrb.mxu0 %v430_v46 }
  0xcf   : > { %522 = vmatpush.msrb.mxu1 %v961_v7 }
  0xd0   : > { %502 = vmatpush.msrb.mxu0 %v959_v6  ;;  %663 = vmatmul.msk.f32.vlgmr.msrb.gmra.mxu1 %vm331_vm8, %v661_v47 }
  0xd1   : > { %662 = vmatmul.msk.f32.vlgmr.msrb.gmra.mxu0 %vm331_vm8, %v661_v47 }
 0x119   : > { %v533_v55 = vpop.permute.xlu0 %532 }
 0x129   : > { %v415_v50 = vpop.f32.mrf.mxu3 }
 0x12a   : > { %v395_v51 = vpop.f32.mrf.mxu2 }
 0x13b   : > { %v372_v48 = vpop.f32.mrf.mxu1 }
 0x13c   : > { %v352_v49 = vpop.f32.mrf.mxu0  ;;  %v416_v52 = vadd.f32 %v415_v50, %v372_v48 }
 0x13d   : > { %v396_v53 = vadd.f32 %v395_v51, %v352_v49 }
 0x14d   : > { %v524_v54 = vpop.f32.mrf.mxu1 }
 0x14e   : > { %v528_v7 = vadd.f32 %v524_v54, %v416_v52  ;;  %v504_v56 = vpop.f32.mrf.mxu0 }
 0x14f   : > { %v527_v6 = vadd.f32 %v504_v56, %v396_v53 }
 0x150   : > { %v536_v57 = vadd.f32 %v533_v55, %v528_v7 }
 0x151   : > { %v535_v58 = vadd.f32 %v533_v55, %v527_v6 }
 0x152   : > { %vm538_vm10 = vcmp.ge.f32.partialorder %v536_v57, 0.0  ;;  %v540_v59 = vmul.f32 0.1, %v536_v57 }
 0x153   : > { %vm537_vm11 = vcmp.ge.f32.partialorder %v535_v58, 0.0  ;;  %v539_v60 = vmul.f32 0.1, %v535_v58 }
 0x154   : > { %v542_v61 = vsel %vm538_vm10, %v536_v57, %v540_v59 }
 0x155   : > { %v541_v62 = vsel %vm537_vm11, %v535_v58, %v539_v60  ;;  %545 = vst.msk [vmem:[%s192_s27 + $0x8] sm:$0xff] %vm544_vm9, %v542_v61 }
 0x156   : > { %543 = vst [vmem:[%s192_s27] sm:$0xff] %v541_v62 }
 0x157 PF: > { %s13_s16 = sadd.s32 1, %s877_s16   ;;  %s1042_s12 = smov %s869_s14 }
 0x158   : > { %p10_p7 = scmp.ge.s32.totalorder %s13_s16, 26   ;;  %s1043_s13 = smov %s873_s15 }
 0x159   : > { %s1044_s14 = smov %s1047_s17  ;;  %s1045_s15 = smov %s1051_s18 }
 0x15a   :  { %12 = sbr.rel (!%p10_p7) target bundleno = 3 (0x3), region = 67 }

// kernel: decoder_forward_pallas.15
= control target key start
LH: loop header
LB: loop body
LE: loop exit
PB: predicated region body
PF: predicated region fallthrough
CT: control target
= control target key end

     0   :  { %s909_s12 = smov 0   ;;  %s911_s13 = smov 0   ;;  %s1055_s0 = inlined_call_operand.vmem [shape: f32[2,14,8,196], index: 0, kind: input, shape index: {}]   ;;  %s1056_s1 = inlined_call_operand.vmem [shape: f32[1,3,3,72], index: 1, kind: input, shape index: {}]   ;;  %s1057_s2 = inlined_call_operand.vmem [shape: f32[3,1], index: 2, kind: input, shape index: {}]   ;;  %s1058_s3 = inlined_call_operand.vmem [shape: f32[2,12,3,168], index: 3, kind: output, shape index: {}]  }
   0x1   :  { %s913_s14 = smov 0   ;;  %s915_s15 = smov 0  }
   0x2   :  { %s917_s16 = smov 0  }
   0x3 LB: > { %s22_s17 = sadd.s32 1, %s870_s14  ;;  %s25_s18 = sadd.s32 1, %s874_s15  ;;  %s878_s16 = sphi %s917_s16, %s13_s16   ;;  %s874_s15 = sphi %s915_s15, %s1062_s15   ;;  %s870_s14 = sphi %s913_s14, %s1061_s14   ;;  %s866_s13 = sphi %s911_s13, %s1060_s13   ;;  %s862_s12 = sphi %s909_s12, %s1059_s12  }
   0x4   : > { %p23_p0 = scmp.ge.s32.totalorder %s22_s17, 12  ;;  %p645_p1 = scmp.ge.s32.totalorder %s878_s16, 1 }
   0x5   : > { %p151_p2 = scmp.lt.s32.totalorder %s878_s16, 25 }
   0x6   : > { %s1064_s17 = smov (%p23_p0, %s22_s17), 0  ;;  %s1066_s18 = smov (!%p23_p0, %s25_s18), %s874_s15 }
   0x7   : > { %p152_p3 = pnand %p645_p1, %p151_p2  ;;  %p27_p4 = scmp.ge.s32.totalorder %s1066_s18, 2 }
   0x8   : > { %p179_p5 = scmp.lt.s32.totalorder (!%p152_p3), %s866_s13, 1  ;;  %s667_s20 = sshll.u32 (!%p152_p3), %s862_s12, 4 }
   0x9   : > { %s1068_s18 = smov (%p27_p4, %s1066_s18), 0  ;;  %155 = sbr.rel (%p152_p3) target bundleno = 341 (0x155), region = 32 }
   0xa   : > { %s880_s25 = smov (!%p152_p3), 99   ;;  %s881_s26 = smov (!%p152_p3), 98  }
   0xb   : > { %s882_s27 = smov (!%p152_p3), 100   ;;  %s883_s28 = smov (!%p152_p3), 112  }
   0xc   : > { %s884_s29 = smov (!%p152_p3), 113   ;;  %s885_s30 = smov (!%p152_p3), 114  }
   0xd   : > { %s886_s4 = smov (!%p152_p3), 126   ;;  %s887_s5 = smov (!%p152_p3), 127  }
   0xe   : > { %s1070_s13 = smov (!%p179_p5, %s866_s13), 1  ;;  %vm260_vm0 = vcmask 801792   ;;  %vm252_vm1 = vcmask 809984   ;;  %vm244_vm2 = vcmask 818176   ;;  %vm236_vm3 = vcmask 916480   ;;  %p186_p6 = scmp.lt.s32.totalorder %s862_s12, 11 }
   0xf   : > { %s668_s19 = smul.u32 224, %s1070_s13  ;;  %vm228_vm4 = vcmask 924672   ;;  %v264_v60 = vld [vmem:[%s1056_s1] sm:$0x7]  ;;  %vm331_vm5 = vcmask 588800   ;;  %vm220_vm6 = vcmask 932864  }
  0x10   : > { %v654_v61 = vld [vmem:[%s1056_s1 + $0x4] sm:$0x7]  ;;  %vm212_vm7 = vcmask 1031168   ;;  %vm204_vm8 = vcmask 1039360   ;;  %s1072_s12 = smov (!%p186_p6, %s862_s12), 11  ;;  %s669_s21 = smul.u32 24, %s1070_s13 }
  0x11   : > { %s183_s23 = scalar_lea.vmem %s1055_s0, %s668_s19  ;;  %s647_s22 = sshll.u32 %s1072_s12, 1  ;;  %vm543_vm9 = vcmask 1042432   ;;  %vm544_vm10 = vcmask 309252   ;;  %vm540_vm11 = vcmask 1043456  }
  0x12   : > { %s195_s24 = scalar_lea.vmem %s183_s23, %s667_s20  ;;  %s190_s23 = sadd.s32 %s669_s21, %s647_s22  ;;  %vm545_vm12 = vmor %vm544_vm10, %vm543_vm9 }
  0x13   : > { %v948_v0 = vld [vmem:[%s195_s24 + $0x8] sm:$0xff]  ;;  %v950_v1 = vld [vmem:[%s195_s24 + $0x18] sm:$0xff]  ;;  %v954_v3 = vld [vmem:[%s195_s24] sm:$0xff] }
  0x14   : > { %v729_v2 = vpack.i.bf16 %v950_v1, %v948_v0  ;;  %v956_v4 = vld [vmem:[%s195_s24 + $0x10] sm:$0xff]  ;;  %v960_v6 = vld [vmem:[%s195_s24 + $0x20] sm:$0xff]  ;;  %v962_v7 = vld [vmem:[%s195_s24 + $0x28] sm:$0xff]  ;;  %s648_s24 = sshll.u32 %s190_s23, 2 }
  0x15   : > { %v734_v5 = vpack.i.bf16 %v956_v4, %v954_v3  ;;  %v764_v8 = vpack.i.bf16 %v960_v6, %v962_v7 }
  0x16   : > { %730 = vrot.lane.b32.xlu1 %v729_v2, %s880_s25  ;;  %720 = vrot.lane.b32.xlu0 %v729_v2, %s881_s26 }
  0x17   : > { %740 = vrot.lane.b32.xlu2 %v729_v2, %s882_s27 }
  0x1e   : > { %735 = vrot.lane.b32.xlu1 %v734_v5, %s880_s25  ;;  %725 = vrot.lane.b32.xlu0 %v734_v5, %s881_s26 }
  0x1f   : > { %745 = vrot.lane.b32.xlu2 %v734_v5, %s882_s27 }
  0x26   : > { %755 = vrot.lane.b32.xlu1 %v734_v5, %s883_s28  ;;  %750 = vrot.lane.b32.xlu0 %v729_v2, %s883_s28 }
  0x27   : > { %760 = vrot.lane.b32.xlu2 %v729_v2, %s884_s29 }
  0x2e   : > { %770 = vrot.lane.b32.xlu1 %v734_v5, %s884_s29  ;;  %765 = vrot.lane.b32.xlu0 %v764_v8, %s881_s26 }
  0x2f   : > { %775 = vrot.lane.b32.xlu2 %v729_v2, %s885_s30 }
  0x36   : > { %785 = vrot.lane.b32.xlu1 %v734_v5, %s885_s30  ;;  %780 = vrot.lane.b32.xlu0 %v764_v8, %s880_s25 }
  0x37   : > { %790 = vrot.lane.b32.xlu2 %v729_v2, %s886_s4 }
  0x3e   : > { %800 = vrot.lane.b32.xlu1 %v734_v5, %s886_s4  ;;  %795 = vrot.lane.b32.xlu0 %v764_v8, %s882_s27  ;;  %s192_s27 = scalar_lea.vmem %s1058_s3, %s648_s24 }
  0x3f   : > { %805 = vrot.lane.b32.xlu2 %v729_v2, %s887_s5 }
  0x46   : > { %815 = vrot.lane.b32.xlu1 %v734_v5, %s887_s5  ;;  %810 = vrot.lane.b32.xlu0 %v764_v8, %s883_s28 }
  0x47   : > { %820 = vrot.lane.b32.xlu2 %v764_v8, %s884_s29 }
  0x4e   : > { %825 = vrot.lane.b32.xlu0 %v764_v8, %s885_s30  ;;  %830 = vrot.lane.b32.xlu1 %v764_v8, %s886_s4 }
  0x4f   : > { %835 = vrot.lane.b32.xlu2 %v764_v8, %s887_s5 }
  0x71   : > { %v741_v9 = vpop.permute.xlu2 %740 }
  0x72   : > { %v743_v19 = vunpack.i.h.bf16 %v741_v9  ;;  %v742_v20 = vunpack.i.l.bf16 %v741_v9 }
  0x79   : > { %v746_v10 = vpop.permute.xlu2 %745 }
  0x7a   : > { %v748_v28 = vunpack.i.h.bf16 %v746_v10  ;;  %v747_v29 = vunpack.i.l.bf16 %v746_v10 }
  0x7c   : > { %v312_v34 = vsel %vm244_vm2, %v748_v28, %v743_v19  ;;  %v245_v35 = vsel %vm244_vm2, %v747_v29, %v742_v20 }
  0x81   : > { %v966_v11 = vpop.permute.xlu2 %760 }
  0x82   : > { %v763_v38 = vunpack.i.h.bf16 %v966_v11  ;;  %v762_v39 = vunpack.i.l.bf16 %v966_v11  ;;  %v529_v11 = vld [vmem:[%s1057_s2] sm:$0x7] }
  0x88   : > { %v731_v12 = vpop.permute.xlu1 %730  ;;  %v721_v13 = vpop.permute.xlu0 %720 }
  0x89   : > { %v723_v14 = vunpack.i.h.bf16 %v721_v13  ;;  %v722_v15 = vunpack.i.l.bf16 %v721_v13  ;;  %v968_v16 = vpop.permute.xlu2 %775  ;;  %v733_v17 = vunpack.i.h.bf16 %v731_v12  ;;  %v732_v18 = vunpack.i.l.bf16 %v731_v12 }
  0x8a   : > { %v778_v46 = vunpack.i.h.bf16 %v968_v16  ;;  %v777_v47 = vunpack.i.l.bf16 %v968_v16 }
  0x8b   : > { %362 = vmatpush.msra.mxu1 %v723_v14  ;;  %405 = vmatpush.msra.mxu3 %v722_v15 }
  0x8d   : > { %363 = vmatpush.msra.mxu1 %v733_v17  ;;  %406 = vmatpush.msra.mxu3 %v732_v18 }
  0x8f   : > { %364 = vmatpush.msra.mxu1 %v743_v19  ;;  %407 = vmatpush.msra.mxu3 %v742_v20 }
  0x90   : > { %v736_v21 = vpop.permute.xlu1 %735  ;;  %v726_v22 = vpop.permute.xlu0 %725 }
  0x91   : > { %v738_v23 = vunpack.i.h.bf16 %v736_v21  ;;  %v737_v24 = vunpack.i.l.bf16 %v736_v21  ;;  %v728_v25 = vunpack.i.h.bf16 %v726_v22  ;;  %v727_v26 = vunpack.i.l.bf16 %v726_v22  ;;  %v970_v27 = vpop.permute.xlu2 %790 }
  0x92   : > { %v793_v49 = vunpack.i.h.bf16 %v970_v27  ;;  %v792_v50 = vunpack.i.l.bf16 %v970_v27 }
  0x93   : > { %v326_v30 = vsel %vm260_vm0, %v728_v25, %v723_v14  ;;  %v261_v31 = vsel %vm260_vm0, %v727_v26, %v722_v15  ;;  %v319_v32 = vsel %vm252_vm1, %v738_v23, %v733_v17  ;;  %v253_v33 = vsel %vm252_vm1, %v737_v24, %v732_v18 }
  0x94   : > { %342 = vmatpush.msra.mxu0 %v326_v30  ;;  %385 = vmatpush.msra.mxu2 %v261_v31  ;;  %v888_v15 = vmov 0  }
  0x95   : > { %839 = vset.pattern.permute.xlu0 %v888_v15 }
  0x96   : > { %343 = vmatpush.msra.mxu0 %v319_v32  ;;  %386 = vmatpush.msra.mxu2 %v253_v33 }
  0x97   : > { %532 = vperm.xlu0 %839, %v529_v11  }
  0x98   : > { %v756_v36 = vpop.permute.xlu1 %755  ;;  %v751_v37 = vpop.permute.xlu0 %750  ;;  %344 = vmatpush.msra.mxu0 %v312_v34  ;;  %387 = vmatpush.msra.mxu2 %v245_v35 }
  0x99   : > { %v758_v40 = vunpack.i.h.bf16 %v756_v36  ;;  %v757_v41 = vunpack.i.l.bf16 %v756_v36  ;;  %v753_v42 = vunpack.i.h.bf16 %v751_v37  ;;  %v752_v43 = vunpack.i.l.bf16 %v751_v37  ;;  %v984_v48 = vpop.permute.xlu2 %805 }
  0x9a   : > { %v808_v51 = vunpack.i.h.bf16 %v984_v48  ;;  %v807_v52 = vunpack.i.l.bf16 %v984_v48 }
  0x9b   : > { %v305_v44 = vsel %vm236_vm3, %v758_v40, %v753_v42  ;;  %365 = vmatpush.msra.mxu1 %v753_v42  ;;  %v237_v45 = vsel %vm236_vm3, %v757_v41, %v752_v43  ;;  %408 = vmatpush.msra.mxu3 %v752_v43 }
  0x9c   : > { %345 = vmatpush.msra.mxu0 %v305_v44  ;;  %388 = vmatpush.msra.mxu2 %v237_v45  ;;  %v662_v45 = vld [vmem:[%s1056_s1 + $0x8] sm:$0x7] }
  0x9d   : > { %366 = vmatpush.msra.mxu1 %v763_v38  ;;  %409 = vmatpush.msra.mxu3 %v762_v39 }
  0x9f   : > { %367 = vmatpush.msra.mxu1 %v778_v46  ;;  %410 = vmatpush.msra.mxu3 %v777_v47 }
  0xa0   : > { %v771_v53 = vpop.permute.xlu1 %770  ;;  %v990_v54 = vpop.permute.xlu0 %765 }
  0xa1   : > { %v773_v55 = vunpack.i.h.bf16 %v771_v53  ;;  %v772_v56 = vunpack.i.l.bf16 %v771_v53  ;;  %368 = vmatpush.msra.mxu1 %v793_v49  ;;  %411 = vmatpush.msra.mxu3 %v792_v50  ;;  %v767_v57 = vunpack.i.l.bf16 %v990_v54  ;;  %v821_v18 = vpop.permute.xlu2 %820  ;;  %v768_v25 = vunpack.i.h.bf16 %v990_v54 }
  0xa2   : > { %v822_v24 = vunpack.i.l.bf16 %v821_v18 }
  0xa3   : > { %v298_v58 = vsel %vm228_vm4, %v773_v55, %v763_v38  ;;  %369 = vmatpush.msra.mxu1 %v808_v51  ;;  %v229_v59 = vsel %vm228_vm4, %v772_v56, %v762_v39  ;;  %412 = vmatpush.msra.mxu3 %v807_v52  ;;  %v479_v30 = vsel %vm260_vm0, %v768_v25, %v767_v57  ;;  %v823_v38 = vunpack.i.h.bf16 %v821_v18 }
  0xa4   : > { %346 = vmatpush.msra.mxu0 %v298_v58  ;;  %389 = vmatpush.msra.mxu2 %v229_v59 }
  0xa5   : > { %370 = vmatpush.msra.mxu1 %v950_v1  ;;  %413 = vmatpush.msra.mxu3 %v948_v0  ;;  %v451_v43 = vsel %vm228_vm4, %v823_v38, %v822_v24 }
  0xa6   : > { %658 = vmatmul.msk.f32.vlgmr.msra.gmra.mxu3 %vm331_vm5, %v264_v60  ;;  %656 = vmatmul.msk.f32.vlgmr.msra.gmra.mxu1 %vm331_vm5, %v654_v61 }
  0xa7   : > { %514 = vmatpush.msrb.mxu1 %v767_v57 }
  0xa8   : > { %v786_v62 = vpop.permute.xlu1 %785  ;;  %v781_v63 = vpop.permute.xlu0 %780 }
  0xa9   : > { %v788_v2 = vunpack.i.h.bf16 %v786_v62  ;;  %v787_v5 = vunpack.i.l.bf16 %v786_v62  ;;  %v782_v8 = vunpack.i.l.bf16 %v781_v63  ;;  %v783_v28 = vunpack.i.h.bf16 %v781_v63  ;;  %v836_v31 = vpop.permute.xlu2 %835 }
  0xaa   : > { %v838_v42 = vunpack.i.h.bf16 %v836_v31 }
  0xab   : > { %v291_v9 = vsel %vm220_vm6, %v788_v2, %v778_v46  ;;  %v221_v10 = vsel %vm220_vm6, %v787_v5, %v777_v47  ;;  %515 = vmatpush.msrb.mxu1 %v782_v8  ;;  %v472_v34 = vsel %vm252_vm1, %v783_v28, %v782_v8 }
  0xac   : > { %347 = vmatpush.msra.mxu0 %v291_v9  ;;  %390 = vmatpush.msra.mxu2 %v221_v10 }
  0xb0   : > { %v801_v1 = vpop.permute.xlu1 %800  ;;  %v796_v0 = vpop.permute.xlu0 %795 }
  0xb1   : > { %v803_v12 = vunpack.i.h.bf16 %v801_v1  ;;  %v802_v13 = vunpack.i.l.bf16 %v801_v1  ;;  %v797_v14 = vunpack.i.l.bf16 %v796_v0  ;;  %v798_v29 = vunpack.i.h.bf16 %v796_v0 }
  0xb3   : > { %v284_v16 = vsel %vm212_vm7, %v803_v12, %v793_v49  ;;  %v213_v17 = vsel %vm212_vm7, %v802_v13, %v792_v50  ;;  %516 = vmatpush.msrb.mxu1 %v797_v14  ;;  %v465_v39 = vsel %vm244_vm2, %v798_v29, %v797_v14 }
  0xb4   : > { %348 = vmatpush.msra.mxu0 %v284_v16  ;;  %391 = vmatpush.msra.mxu2 %v213_v17 }
  0xb8   : > { %v816_v19 = vpop.permute.xlu1 %815  ;;  %v811_v20 = vpop.permute.xlu0 %810 }
  0xb9   : > { %v818_v21 = vunpack.i.h.bf16 %v816_v19  ;;  %v817_v22 = vunpack.i.l.bf16 %v816_v19  ;;  %v812_v23 = vunpack.i.l.bf16 %v811_v20  ;;  %v813_v32 = vunpack.i.h.bf16 %v811_v20 }
  0xbb   : > { %v277_v26 = vsel %vm204_vm8, %v818_v21, %v808_v51  ;;  %v205_v27 = vsel %vm204_vm8, %v817_v22, %v807_v52  ;;  %517 = vmatpush.msrb.mxu1 %v812_v23  ;;  %v458_v41 = vsel %vm236_vm3, %v813_v32, %v812_v23 }
  0xbc   : > { %349 = vmatpush.msra.mxu0 %v277_v26  ;;  %392 = vmatpush.msra.mxu2 %v205_v27 }
  0xbd   : > { %518 = vmatpush.msrb.mxu1 %v822_v24 }
  0xbe   : > { %350 = vmatpush.msra.mxu0 %v956_v4  ;;  %393 = vmatpush.msra.mxu2 %v954_v3  ;;  %v837_v3 = vunpack.i.l.bf16 %v836_v31 }
  0xbf   : > { %657 = vmatmul.msk.f32.vlgmr.msra.gmra.mxu2 %vm331_vm5, %v264_v60  ;;  %655 = vmatmul.msk.f32.vlgmr.msra.gmra.mxu0 %vm331_vm5, %v654_v61 }
  0xc0   : > { %494 = vmatpush.msrb.mxu0 %v479_v30  ;;  %v826_v33 = vpop.permute.xlu0 %825  ;;  %v831_v35 = vpop.permute.xlu1 %830  ;;  %v430_v47 = vsel %vm204_vm8, %v838_v42, %v837_v3 }
  0xc1   : > { %v832_v36 = vunpack.i.l.bf16 %v831_v35  ;;  %v827_v37 = vunpack.i.l.bf16 %v826_v33  ;;  %v828_v4 = vunpack.i.h.bf16 %v826_v33  ;;  %v833_v40 = vunpack.i.h.bf16 %v831_v35 }
  0xc2   : > { %495 = vmatpush.msrb.mxu0 %v472_v34 }
  0xc3   : > { %519 = vmatpush.msrb.mxu1 %v827_v37  ;;  %v444_v44 = vsel %vm220_vm6, %v828_v4, %v827_v37  ;;  %v437_v46 = vsel %vm212_vm7, %v833_v40, %v832_v36 }
  0xc4   : > { %496 = vmatpush.msrb.mxu0 %v465_v39 }
  0xc5   : > { %520 = vmatpush.msrb.mxu1 %v832_v36 }
  0xc6   : > { %497 = vmatpush.msrb.mxu0 %v458_v41 }
  0xc7   : > { %521 = vmatpush.msrb.mxu1 %v837_v3 }
  0xc8   : > { %498 = vmatpush.msrb.mxu0 %v451_v43 }
  0xc9   : > { %522 = vmatpush.msrb.mxu1 %v962_v7 }
  0xca   : > { %499 = vmatpush.msrb.mxu0 %v444_v44  ;;  %664 = vmatmul.msk.f32.vlgmr.msrb.gmra.mxu1 %vm331_vm5, %v662_v45 }
  0xcc   : > { %500 = vmatpush.msrb.mxu0 %v437_v46 }
  0xce   : > { %501 = vmatpush.msrb.mxu0 %v430_v47 }
  0xd0   : > { %502 = vmatpush.msrb.mxu0 %v960_v6 }
  0xd1   : > { %663 = vmatmul.msk.f32.vlgmr.msrb.gmra.mxu0 %vm331_vm5, %v662_v45 }
 0x109   : > { %v533_v54 = vpop.permute.xlu0 %532 }
 0x123   : > { %v372_v48 = vpop.f32.mrf.mxu1 }
 0x129   : > { %v415_v49 = vpop.f32.mrf.mxu3 }
 0x12a   : > { %v416_v51 = vadd.f32 %v415_v49, %v372_v48 }
 0x13c   : > { %v352_v50 = vpop.f32.mrf.mxu0 }
 0x142   : > { %v395_v53 = vpop.f32.mrf.mxu2 }
 0x143   : > { %v396_v55 = vadd.f32 %v395_v53, %v352_v50 }
 0x147   : > { %v524_v52 = vpop.f32.mrf.mxu1 }
 0x148   : > { %v528_v7 = vadd.f32 %v524_v52, %v416_v51 }
 0x14a   : > { %v536_v56 = vadd.f32 %v533_v54, %v528_v7 }
 0x14c   : > { %v539_v58 = vrot.slane %v536_v56, 4 }
 0x14e   : > { %v504_v57 = vpop.f32.mrf.mxu0 }
 0x14f   : > { %v527_v6 = vadd.f32 %v504_v57, %v396_v55 }
 0x151   : > { %v535_v59 = vadd.f32 %v533_v54, %v527_v6 }
 0x153   : > { %v541_v60 = vsel %vm540_vm11, %v535_v59, %v539_v58 }
 0x154   : > { %546 = vst.msk [vmem:[%s192_s27] sm:$0x77] %vm545_vm12, %v541_v60 }
 0x155 PF: > { %s13_s16 = sadd.s32 1, %s878_s16   ;;  %s1059_s12 = smov %s870_s14 }
 0x156   : > { %p10_p7 = scmp.ge.s32.totalorder %s13_s16, 26   ;;  %s1060_s13 = smov %s874_s15 }
 0x157   : > { %s1061_s14 = smov %s1064_s17  ;;  %s1062_s15 = smov %s1068_s18 }
 0x158   :  { %12 = sbr.rel (!%p10_p7) target bundleno = 3 (0x3), region = 67 }

</bundles_post_ra>
